<compile_context>
chip_gen: v7x
topology: tpu7x:2x2x1
jax: 0.10.0
libtpu: 0.0.40
codegen_flags: <defaults>
</compile_context>

<pallas_src>
from functools import partial

import jax
import jax.numpy as jnp
import numpy as np
from jax import lax
from jax.experimental import pallas as pl
from jax.experimental.pallas import tpu as pltpu

# PyTorch gate order is [i, f, g, o]; kernel uses [i, f, o, g] so the three
# sigmoid gates are contiguous (one sigmoid over 3*Hp lanes, one tanh).
_GATE_ORDER = (0, 1, 3, 2)


# ----------------------------- fused kernel ---------------------------------
def _make_fused_kernel(B, T, D, Hp):
    """Fused encoder+decoder LSTM. B is the (sublane-padded) batch, T the
    sequence length (statically unrolled), D the raw input dim, Hp the
    per-gate lane padding (multiple of 128)."""

    def kernel(x_ref,                           # (B, T, D)        f32
               wih_e_ref, whh_e_ref, be_ref,    # (D,4Hp) (Hp,4Hp) (1,4Hp)
               wih_d_ref, whh_d_ref, bd_ref,    # (Hp,4Hp) (Hp,4Hp) (1,4Hp)
               enc_ref,                         # (B, T, Hp) out (lane-dense)
               dec_ref,                         # (B, T, Hp) out (lane-dense)
               pre_ref):                        # (B, T, 4Hp) VMEM scratch
        f32 = jnp.float32

        def recurrence(whh_ref, out_ref):
            """T-step LSTM recurrence consuming precomputed input
            pre-activations from pre_ref; hidden state stored per step."""
            h = jnp.zeros((B, Hp), f32)
            c = jnp.zeros((B, Hp), f32)
            for t in range(T):                       # statically unrolled
                # Only the recurrent matmul remains on the serial chain;
                # Whh is indexed at the point of use.
                gates = pre_ref[:, t, :] + jnp.dot(
                    h, whh_ref[...], preferred_element_type=f32)
                sig = jax.nn.sigmoid(gates[:, :3 * Hp])   # i | f | o contiguous
                i_g = sig[:, 0 * Hp:1 * Hp]
                f_g = sig[:, 1 * Hp:2 * Hp]
                o_g = sig[:, 2 * Hp:3 * Hp]
                g_g = jnp.tanh(gates[:, 3 * Hp:4 * Hp])
                c = f_g * c + i_g * g_g
                h = o_g * jnp.tanh(c)
                out_ref[:, t, :] = h                 # full-Hp unmasked store

        # ---- encoder: hoisted input projection (one big matmul, bias folded) ----
        x2d = x_ref[...].reshape(B * T, D)
        pre_e = jnp.dot(x2d, wih_e_ref[...],
                        preferred_element_type=f32) + be_ref[...]
        pre_ref[...] = pre_e.reshape(B, T, 4 * Hp)

        # ---- encoder recurrence ----
        recurrence(whh_e_ref, enc_ref)

        # ---- decoder: hoisted input projection over all encoder hidden states ----
        # Padded lanes [He, Hp) of enc_ref are exactly zero, and the padded rows
        # of wih_d are zero, so this is exact.
        h_enc2d = enc_ref[...].reshape(B * T, Hp)
        pre_d = jnp.dot(h_enc2d, wih_d_ref[...],
                        preferred_element_type=f32) + bd_ref[...]
        pre_ref[...] = pre_d.reshape(B, T, 4 * Hp)

        # ---- decoder recurrence ----
        recurrence(whh_d_ref, dec_ref)

    return kernel


# -------------------------- parameter preparation ---------------------------
def _pad_gate_weights(w_ih, w_hh, b_ih, b_hh, in_pad, Hp):
    """Re-lay PyTorch LSTM weights into lane-aligned per-gate tiles in the
    kernel gate order [i, f, o, g].

    w_ih : (4H, Din), w_hh : (4H, H), b_* : (4H,)  (PyTorch order i, f, g, o)
    Returns wih_pad (in_pad, 4Hp), whh_pad (Hp, 4Hp), b_pad (1, 4Hp).
    Zero padding keeps padded lanes of h/c exactly zero.
    """
    H = w_hh.shape[1]
    Din = w_ih.shape[1]
    wih_t = jnp.transpose(w_ih).astype(jnp.float32)   # (Din, 4H)
    whh_t = jnp.transpose(w_hh).astype(jnp.float32)   # (H,   4H)
    bias = (b_ih + b_hh).astype(jnp.float32)          # (4H,)

    wih_pad = jnp.zeros((in_pad, 4 * Hp), jnp.float32)
    whh_pad = jnp.zeros((Hp, 4 * Hp), jnp.float32)
    b_pad = jnp.zeros((1, 4 * Hp), jnp.float32)
    for new_g, old_g in enumerate(_GATE_ORDER):
        src = slice(old_g * H, (old_g + 1) * H)
        dst = slice(new_g * Hp, new_g * Hp + H)
        wih_pad = wih_pad.at[:Din, dst].set(wih_t[:, src])
        whh_pad = whh_pad.at[:H, dst].set(whh_t[:, src])
        b_pad = b_pad.at[0, dst].set(bias[src])
    return wih_pad, whh_pad, b_pad


def prepare_params(params, *, input_dim, latent_dim, hidden_pad=128):
    """One-time weight re-layout (outside the hot path)."""
    assert hidden_pad % 128 == 0 and latent_dim <= hidden_pad and input_dim <= hidden_pad
    wih_e, whh_e, b_e = _pad_gate_weights(
        params["enc_w_ih"], params["enc_w_hh"], params["enc_b_ih"], params["enc_b_hh"],
        in_pad=input_dim, Hp=hidden_pad)
    wih_d, whh_d, b_d = _pad_gate_weights(
        params["dec_w_ih"], params["dec_w_hh"], params["dec_b_ih"], params["dec_b_hh"],
        in_pad=hidden_pad, Hp=hidden_pad)
    return (wih_e, whh_e, b_e, wih_d, whh_d, b_d)


# ------------------------------ forward pass ---------------------------------
@partial(jax.jit, static_argnames=("latent_dim", "hidden_pad"))
def seq2seq_autoencoder_forward(x, prepped, *, latent_dim, hidden_pad=128):
    """Equivalent of Seq2SeqAutoencoder.forward: returns (encoded, decoded)."""
    B, T, D = x.shape
    Hp = hidden_pad

    # Pad batch to a full sublane group (>= 8 rows): identical VPU cost,
    # better MXU row fill for the hoisted projections. Padded rows are dropped.
    B8 = ((B + 7) // 8) * 8
    x_p = x.astype(jnp.float32)
    if B8 != B:
        x_p = jnp.pad(x_p, ((0, B8 - B), (0, 0), (0, 0)))

    kernel = _make_fused_kernel(B=B8, T=T, D=D, Hp=Hp)
    vmem = pl.BlockSpec(memory_space=pltpu.MemorySpace.VMEM)

    enc_p, dec_p = pl.pallas_call(
        kernel,
        out_shape=(
            jax.ShapeDtypeStruct((B8, T, Hp), jnp.float32),   # lane-dense enc
            jax.ShapeDtypeStruct((B8, T, Hp), jnp.float32),   # lane-dense dec
        ),
        in_specs=[vmem] * 7,
        out_specs=(vmem, vmem),
        scratch_shapes=[pltpu.VMEM((B8, T, 4 * Hp), jnp.float32)],
    )(x_p, *prepped)

    # Wrapper-side slicing: outputs stay lane-dense inside the kernel.
    encoded = enc_p[:B, :, :latent_dim]
    decoded = dec_p[:B, :, :D]
    return encoded, decoded


# ---------------- pure-JAX reference (for correctness check) ----------------
def _lstm_ref(x_btd, w_ih, w_hh, b_ih, b_hh):
    B, T, D = x_btd.shape
    H = w_hh.shape[1]
    wih_t = jnp.transpose(w_ih)
    whh_t = jnp.transpose(w_hh)
    bias = b_ih + b_hh

    def step(carry, x_t):
        h, c = carry
        gates = x_t @ wih_t + h @ whh_t + bias
        i = jax.nn.sigmoid(gates[:, :H])
        f = jax.nn.sigmoid(gates[:, H:2 * H])
        g = jnp.tanh(gates[:, 2 * H:3 * H])
        o = jax.nn.sigmoid(gates[:, 3 * H:])
        c = f * c + i * g
        h = o * jnp.tanh(c)
        return (h, c), h

    init = (jnp.zeros((B, H), jnp.float32), jnp.zeros((B, H), jnp.float32))
    _, hs = lax.scan(step, init, jnp.transpose(x_btd, (1, 0, 2)))
    return jnp.transpose(hs, (1, 0, 2))


def _init_params(key, input_dim, latent_dim):
    """Deterministic init mimicking PyTorch LSTM default U(-1/sqrt(H), 1/sqrt(H))."""
    keys = jax.random.split(key, 8)

    def u(k, shape, hidden):
        bound = 1.0 / np.sqrt(hidden)
        return jax.random.uniform(k, shape, jnp.float32, -bound, bound)

    H, D = latent_dim, input_dim
    return {
        # encoder: LSTM(D -> H)
        "enc_w_ih": u(keys[0], (4 * H, D), H),
        "enc_w_hh": u(keys[1], (4 * H, H), H),
        "enc_b_ih": u(keys[2], (4 * H,), H),
        "enc_b_hh": u(keys[3], (4 * H,), H),
        # decoder: LSTM(H -> D)
        "dec_w_ih": u(keys[4], (4 * D, H), D),
        "dec_w_hh": u(keys[5], (4 * D, D), D),
        "dec_b_ih": u(keys[6], (4 * D,), D),
        "dec_b_hh": u(keys[7], (4 * D,), D),
    }


if __name__ == "__main__":
    B, T = 2, 8          # batch, sequence length
    input_dim = 6        # X_train.shape[2] stand-in
    latent_dim = 20      # as in the script

    key = jax.random.PRNGKey(0)
    k_x, k_p = jax.random.split(key)
    x = jax.random.normal(k_x, (B, T, input_dim), dtype=jnp.float32)
    params = _init_params(k_p, input_dim, latent_dim)

    # One-time weight re-layout (lane-aligned per-gate tiles, gate order i,f,o,g).
    prepped = prepare_params(params, input_dim=input_dim, latent_dim=latent_dim,
                             hidden_pad=128)

    encoded, decoded = seq2seq_autoencoder_forward(
        x, prepped, latent_dim=latent_dim, hidden_pad=128)
    encoded = jax.block_until_ready(encoded)
    decoded = jax.block_until_ready(decoded)

    # reference check
    enc_ref = _lstm_ref(x, params["enc_w_ih"], params["enc_w_hh"],
                        params["enc_b_ih"], params["enc_b_hh"])
    dec_ref = _lstm_ref(enc_ref, params["dec_w_ih"], params["dec_w_hh"],
                        params["dec_b_ih"], params["dec_b_hh"])
    assert encoded.shape == (B, T, latent_dim)
    assert decoded.shape == (B, T, input_dim)
    np.testing.assert_allclose(np.asarray(encoded), np.asarray(enc_ref),
                               atol=5e-5, rtol=5e-5)
    np.testing.assert_allclose(np.asarray(decoded), np.asarray(dec_ref),
                               atol=5e-5, rtol=5e-5)

    print("KERNEL_OK")
</pallas_src>

<mosaic_0001>
module attributes {stable_mosaic.version = 11 : i64} {
  func.func @kernel(%arg0: memref<8x8x6xf32, #tpu.memory_space<vmem>>, %arg1: memref<6x512xf32, #tpu.memory_space<vmem>>, %arg2: memref<128x512xf32, #tpu.memory_space<vmem>>, %arg3: memref<1x512xf32, #tpu.memory_space<vmem>>, %arg4: memref<128x512xf32, #tpu.memory_space<vmem>>, %arg5: memref<128x512xf32, #tpu.memory_space<vmem>>, %arg6: memref<1x512xf32, #tpu.memory_space<vmem>>, %arg7: memref<8x8x128xf32, #tpu.memory_space<vmem>>, %arg8: memref<8x8x128xf32, #tpu.memory_space<vmem>>, %arg9: memref<8x8x512xf32, #tpu.memory_space<vmem>>) attributes {dimension_semantics = [], scalar_prefetch = 0 : i64, scratch_operands = 1 : i64, tpu.core_type = #tpu.core_type<tc>} {
    %c0 = arith.constant 0 : index
    %c0_0 = arith.constant 0 : index
    %c0_1 = arith.constant 0 : index
    %0 = vector.load %arg0[%c0, %c0_0, %c0_1] : memref<8x8x6xf32, #tpu.memory_space<vmem>>, vector<8x8x6xf32>
    %1 = vector.shape_cast %0 : vector<8x8x6xf32> to vector<64x6xf32>
    %c0_2 = arith.constant 0 : index
    %c0_3 = arith.constant 0 : index
    %2 = vector.load %arg1[%c0_2, %c0_3] : memref<6x512xf32, #tpu.memory_space<vmem>>, vector<6x512xf32>
    %cst = arith.constant dense<0.000000e+00> : vector<64x512xf32>
    %3 = tpu.matmul %1, %2, %cst {dimension_numbers = #tpu.dot_dimension_numbers<[1], [0], [0], [1], [0, 0, 1, 1], [], []>} : vector<64x6xf32>, vector<6x512xf32>, vector<64x512xf32> -> vector<64x512xf32>
    %c0_4 = arith.constant 0 : index
    %c0_5 = arith.constant 0 : index
    %4 = vector.load %arg3[%c0_4, %c0_5] : memref<1x512xf32, #tpu.memory_space<vmem>>, vector<1x512xf32>
    %5 = vector.broadcast %4 : vector<1x512xf32> to vector<64x512xf32>
    %6 = arith.addf %3, %5 : vector<64x512xf32>
    %7 = vector.shape_cast %6 : vector<64x512xf32> to vector<8x8x512xf32>
    %c0_6 = arith.constant 0 : index
    %c0_7 = arith.constant 0 : index
    %c0_8 = arith.constant 0 : index
    %8 = vector.load %arg9[%c0_6, %c0_7, %c0_8] : memref<8x8x512xf32, #tpu.memory_space<vmem>>, vector<8x8x512xf32>
    tpu.vector_store %arg9[%c0_6, %c0_7, %c0_8], %7 {strides = array<i32>} : memref<8x8x512xf32, #tpu.memory_space<vmem>>, vector<8x8x512xf32>,
    %cst_9 = arith.constant 0.000000e+00 : f32
    %9 = vector.broadcast %cst_9 : f32 to vector<8x128xf32>
    %cst_10 = arith.constant 0.000000e+00 : f32
    %10 = vector.broadcast %cst_10 : f32 to vector<8x128xf32>
    %c0_11 = arith.constant 0 : index
    %c0_12 = arith.constant 0 : index
    %c0_13 = arith.constant 0 : index
    %11 = vector.load %arg9[%c0_11, %c0_12, %c0_13] : memref<8x8x512xf32, #tpu.memory_space<vmem>>, vector<8x1x512xf32>
    %12 = vector.shape_cast %11 : vector<8x1x512xf32> to vector<8x512xf32>
    %c0_14 = arith.constant 0 : index
    %c0_15 = arith.constant 0 : index
    %13 = vector.load %arg2[%c0_14, %c0_15] : memref<128x512xf32, #tpu.memory_space<vmem>>, vector<128x512xf32>
    %cst_16 = arith.constant dense<0.000000e+00> : vector<8x512xf32>
    %14 = tpu.matmul %9, %13, %cst_16 {dimension_numbers = #tpu.dot_dimension_numbers<[1], [0], [0], [1], [0, 0, 1, 1], [], []>} : vector<8x128xf32>, vector<128x512xf32>, vector<8x512xf32> -> vector<8x512xf32>
    %15 = arith.addf %12, %14 : vector<8x512xf32>
    %16 = vector.extract_strided_slice %15 {offsets = [0, 0], sizes = [8, 384], strides = [1, 1]} : vector<8x512xf32> to vector<8x384xf32>
    %17 = arith.negf %16 : vector<8x384xf32>
    %18 = math.exp %17 : vector<8x384xf32>
    %cst_17 = arith.constant 1.000000e+00 : f32
    %19 = vector.broadcast %cst_17 : f32 to vector<8x384xf32>
    %20 = arith.addf %19, %18 : vector<8x384xf32>
    %21 = arith.divf %19, %20 : vector<8x384xf32>
    %22 = vector.extract_strided_slice %21 {offsets = [0, 0], sizes = [8, 128], strides = [1, 1]} : vector<8x384xf32> to vector<8x128xf32>
    %23 = vector.extract_strided_slice %21 {offsets = [0, 128], sizes = [8, 128], strides = [1, 1]} : vector<8x384xf32> to vector<8x128xf32>
    %24 = vector.extract_strided_slice %21 {offsets = [0, 256], sizes = [8, 128], strides = [1, 1]} : vector<8x384xf32> to vector<8x128xf32>
    %25 = vector.extract_strided_slice %15 {offsets = [0, 384], sizes = [8, 128], strides = [1, 1]} : vector<8x512xf32> to vector<8x128xf32>
    %26 = math.tanh %25 : vector<8x128xf32>
    %27 = arith.mulf %23, %10 : vector<8x128xf32>
    %28 = arith.mulf %22, %26 : vector<8x128xf32>
    %29 = arith.addf %27, %28 : vector<8x128xf32>
    %30 = math.tanh %29 : vector<8x128xf32>
    %31 = arith.mulf %24, %30 : vector<8x128xf32>
    %c0_18 = arith.constant 0 : index
    %c0_19 = arith.constant 0 : index
    %c0_20 = arith.constant 0 : index
    %32 = vector.load %arg7[%c0_18, %c0_19, %c0_20] : memref<8x8x128xf32, #tpu.memory_space<vmem>>, vector<8x1x128xf32>
    %33 = vector.shape_cast %32 : vector<8x1x128xf32> to vector<8x128xf32>
    %34 = vector.shape_cast %31 : vector<8x128xf32> to vector<8x1x128xf32>
    tpu.vector_store %arg7[%c0_18, %c0_19, %c0_20], %34 {strides = array<i32>} : memref<8x8x128xf32, #tpu.memory_space<vmem>>, vector<8x1x128xf32>,
    %c0_21 = arith.constant 0 : index
    %c1 = arith.constant 1 : index
    %c0_22 = arith.constant 0 : index
    %35 = vector.load %arg9[%c0_21, %c1, %c0_22] : memref<8x8x512xf32, #tpu.memory_space<vmem>>, vector<8x1x512xf32>
    %36 = vector.shape_cast %35 : vector<8x1x512xf32> to vector<8x512xf32>
    %c0_23 = arith.constant 0 : index
    %c0_24 = arith.constant 0 : index
    %37 = vector.load %arg2[%c0_23, %c0_24] : memref<128x512xf32, #tpu.memory_space<vmem>>, vector<128x512xf32>
    %cst_25 = arith.constant dense<0.000000e+00> : vector<8x512xf32>
    %38 = tpu.matmul %31, %37, %cst_25 {dimension_numbers = #tpu.dot_dimension_numbers<[1], [0], [0], [1], [0, 0, 1, 1], [], []>} : vector<8x128xf32>, vector<128x512xf32>, vector<8x512xf32> -> vector<8x512xf32>
    %39 = arith.addf %36, %38 : vector<8x512xf32>
    %40 = vector.extract_strided_slice %39 {offsets = [0, 0], sizes = [8, 384], strides = [1, 1]} : vector<8x512xf32> to vector<8x384xf32>
    %41 = arith.negf %40 : vector<8x384xf32>
    %42 = math.exp %41 : vector<8x384xf32>
    %cst_26 = arith.constant 1.000000e+00 : f32
    %43 = vector.broadcast %cst_26 : f32 to vector<8x384xf32>
    %44 = arith.addf %43, %42 : vector<8x384xf32>
    %45 = arith.divf %43, %44 : vector<8x384xf32>
    %46 = vector.extract_strided_slice %45 {offsets = [0, 0], sizes = [8, 128], strides = [1, 1]} : vector<8x384xf32> to vector<8x128xf32>
    %47 = vector.extract_strided_slice %45 {offsets = [0, 128], sizes = [8, 128], strides = [1, 1]} : vector<8x384xf32> to vector<8x128xf32>
    %48 = vector.extract_strided_slice %45 {offsets = [0, 256], sizes = [8, 128], strides = [1, 1]} : vector<8x384xf32> to vector<8x128xf32>
    %49 = vector.extract_strided_slice %39 {offsets = [0, 384], sizes = [8, 128], strides = [1, 1]} : vector<8x512xf32> to vector<8x128xf32>
    %50 = math.tanh %49 : vector<8x128xf32>
    %51 = arith.mulf %47, %29 : vector<8x128xf32>
    %52 = arith.mulf %46, %50 : vector<8x128xf32>
    %53 = arith.addf %51, %52 : vector<8x128xf32>
    %54 = math.tanh %53 : vector<8x128xf32>
    %55 = arith.mulf %48, %54 : vector<8x128xf32>
    %c0_27 = arith.constant 0 : index
    %c1_28 = arith.constant 1 : index
    %c0_29 = arith.constant 0 : index
    %56 = vector.load %arg7[%c0_27, %c1_28, %c0_29] : memref<8x8x128xf32, #tpu.memory_space<vmem>>, vector<8x1x128xf32>
    %57 = vector.shape_cast %56 : vector<8x1x128xf32> to vector<8x128xf32>
    %58 = vector.shape_cast %55 : vector<8x128xf32> to vector<8x1x128xf32>
    tpu.vector_store %arg7[%c0_27, %c1_28, %c0_29], %58 {strides = array<i32>} : memref<8x8x128xf32, #tpu.memory_space<vmem>>, vector<8x1x128xf32>,
    %c0_30 = arith.constant 0 : index
    %c2 = arith.constant 2 : index
    %c0_31 = arith.constant 0 : index
    %59 = vector.load %arg9[%c0_30, %c2, %c0_31] : memref<8x8x512xf32, #tpu.memory_space<vmem>>, vector<8x1x512xf32>
    %60 = vector.shape_cast %59 : vector<8x1x512xf32> to vector<8x512xf32>
    %c0_32 = arith.constant 0 : index
    %c0_33 = arith.constant 0 : index
    %61 = vector.load %arg2[%c0_32, %c0_33] : memref<128x512xf32, #tpu.memory_space<vmem>>, vector<128x512xf32>
    %cst_34 = arith.constant dense<0.000000e+00> : vector<8x512xf32>
    %62 = tpu.matmul %55, %61, %cst_34 {dimension_numbers = #tpu.dot_dimension_numbers<[1], [0], [0], [1], [0, 0, 1, 1], [], []>} : vector<8x128xf32>, vector<128x512xf32>, vector<8x512xf32> -> vector<8x512xf32>
    %63 = arith.addf %60, %62 : vector<8x512xf32>
    %64 = vector.extract_strided_slice %63 {offsets = [0, 0], sizes = [8, 384], strides = [1, 1]} : vector<8x512xf32> to vector<8x384xf32>
    %65 = arith.negf %64 : vector<8x384xf32>
    %66 = math.exp %65 : vector<8x384xf32>
    %cst_35 = arith.constant 1.000000e+00 : f32
    %67 = vector.broadcast %cst_35 : f32 to vector<8x384xf32>
    %68 = arith.addf %67, %66 : vector<8x384xf32>
    %69 = arith.divf %67, %68 : vector<8x384xf32>
    %70 = vector.extract_strided_slice %69 {offsets = [0, 0], sizes = [8, 128], strides = [1, 1]} : vector<8x384xf32> to vector<8x128xf32>
    %71 = vector.extract_strided_slice %69 {offsets = [0, 128], sizes = [8, 128], strides = [1, 1]} : vector<8x384xf32> to vector<8x128xf32>
    %72 = vector.extract_strided_slice %69 {offsets = [0, 256], sizes = [8, 128], strides = [1, 1]} : vector<8x384xf32> to vector<8x128xf32>
    %73 = vector.extract_strided_slice %63 {offsets = [0, 384], sizes = [8, 128], strides = [1, 1]} : vector<8x512xf32> to vector<8x128xf32>
    %74 = math.tanh %73 : vector<8x128xf32>
    %75 = arith.mulf %71, %53 : vector<8x128xf32>
    %76 = arith.mulf %70, %74 : vector<8x128xf32>
    %77 = arith.addf %75, %76 : vector<8x128xf32>
    %78 = math.tanh %77 : vector<8x128xf32>
    %79 = arith.mulf %72, %78 : vector<8x128xf32>
    %c0_36 = arith.constant 0 : index
    %c2_37 = arith.constant 2 : index
    %c0_38 = arith.constant 0 : index
    %80 = vector.load %arg7[%c0_36, %c2_37, %c0_38] : memref<8x8x128xf32, #tpu.memory_space<vmem>>, vector<8x1x128xf32>
    %81 = vector.shape_cast %80 : vector<8x1x128xf32> to vector<8x128xf32>
    %82 = vector.shape_cast %79 : vector<8x128xf32> to vector<8x1x128xf32>
    tpu.vector_store %arg7[%c0_36, %c2_37, %c0_38], %82 {strides = array<i32>} : memref<8x8x128xf32, #tpu.memory_space<vmem>>, vector<8x1x128xf32>,
    %c0_39 = arith.constant 0 : index
    %c3 = arith.constant 3 : index
    %c0_40 = arith.constant 0 : index
    %83 = vector.load %arg9[%c0_39, %c3, %c0_40] : memref<8x8x512xf32, #tpu.memory_space<vmem>>, vector<8x1x512xf32>
    %84 = vector.shape_cast %83 : vector<8x1x512xf32> to vector<8x512xf32>
    %c0_41 = arith.constant 0 : index
    %c0_42 = arith.constant 0 : index
    %85 = vector.load %arg2[%c0_41, %c0_42] : memref<128x512xf32, #tpu.memory_space<vmem>>, vector<128x512xf32>
    %cst_43 = arith.constant dense<0.000000e+00> : vector<8x512xf32>
    %86 = tpu.matmul %79, %85, %cst_43 {dimension_numbers = #tpu.dot_dimension_numbers<[1], [0], [0], [1], [0, 0, 1, 1], [], []>} : vector<8x128xf32>, vector<128x512xf32>, vector<8x512xf32> -> vector<8x512xf32>
    %87 = arith.addf %84, %86 : vector<8x512xf32>
    %88 = vector.extract_strided_slice %87 {offsets = [0, 0], sizes = [8, 384], strides = [1, 1]} : vector<8x512xf32> to vector<8x384xf32>
    %89 = arith.negf %88 : vector<8x384xf32>
    %90 = math.exp %89 : vector<8x384xf32>
    %cst_44 = arith.constant 1.000000e+00 : f32
    %91 = vector.broadcast %cst_44 : f32 to vector<8x384xf32>
    %92 = arith.addf %91, %90 : vector<8x384xf32>
    %93 = arith.divf %91, %92 : vector<8x384xf32>
    %94 = vector.extract_strided_slice %93 {offsets = [0, 0], sizes = [8, 128], strides = [1, 1]} : vector<8x384xf32> to vector<8x128xf32>
    %95 = vector.extract_strided_slice %93 {offsets = [0, 128], sizes = [8, 128], strides = [1, 1]} : vector<8x384xf32> to vector<8x128xf32>
    %96 = vector.extract_strided_slice %93 {offsets = [0, 256], sizes = [8, 128], strides = [1, 1]} : vector<8x384xf32> to vector<8x128xf32>
    %97 = vector.extract_strided_slice %87 {offsets = [0, 384], sizes = [8, 128], strides = [1, 1]} : vector<8x512xf32> to vector<8x128xf32>
    %98 = math.tanh %97 : vector<8x128xf32>
    %99 = arith.mulf %95, %77 : vector<8x128xf32>
    %100 = arith.mulf %94, %98 : vector<8x128xf32>
    %101 = arith.addf %99, %100 : vector<8x128xf32>
    %102 = math.tanh %101 : vector<8x128xf32>
    %103 = arith.mulf %96, %102 : vector<8x128xf32>
    %c0_45 = arith.constant 0 : index
    %c3_46 = arith.constant 3 : index
    %c0_47 = arith.constant 0 : index
    %104 = vector.load %arg7[%c0_45, %c3_46, %c0_47] : memref<8x8x128xf32, #tpu.memory_space<vmem>>, vector<8x1x128xf32>
    %105 = vector.shape_cast %104 : vector<8x1x128xf32> to vector<8x128xf32>
    %106 = vector.shape_cast %103 : vector<8x128xf32> to vector<8x1x128xf32>
    tpu.vector_store %arg7[%c0_45, %c3_46, %c0_47], %106 {strides = array<i32>} : memref<8x8x128xf32, #tpu.memory_space<vmem>>, vector<8x1x128xf32>,
    %c0_48 = arith.constant 0 : index
    %c4 = arith.constant 4 : index
    %c0_49 = arith.constant 0 : index
    %107 = vector.load %arg9[%c0_48, %c4, %c0_49] : memref<8x8x512xf32, #tpu.memory_space<vmem>>, vector<8x1x512xf32>
    %108 = vector.shape_cast %107 : vector<8x1x512xf32> to vector<8x512xf32>
    %c0_50 = arith.constant 0 : index
    %c0_51 = arith.constant 0 : index
    %109 = vector.load %arg2[%c0_50, %c0_51] : memref<128x512xf32, #tpu.memory_space<vmem>>, vector<128x512xf32>
    %cst_52 = arith.constant dense<0.000000e+00> : vector<8x512xf32>
    %110 = tpu.matmul %103, %109, %cst_52 {dimension_numbers = #tpu.dot_dimension_numbers<[1], [0], [0], [1], [0, 0, 1, 1], [], []>} : vector<8x128xf32>, vector<128x512xf32>, vector<8x512xf32> -> vector<8x512xf32>
    %111 = arith.addf %108, %110 : vector<8x512xf32>
    %112 = vector.extract_strided_slice %111 {offsets = [0, 0], sizes = [8, 384], strides = [1, 1]} : vector<8x512xf32> to vector<8x384xf32>
    %113 = arith.negf %112 : vector<8x384xf32>
    %114 = math.exp %113 : vector<8x384xf32>
    %cst_53 = arith.constant 1.000000e+00 : f32
    %115 = vector.broadcast %cst_53 : f32 to vector<8x384xf32>
    %116 = arith.addf %115, %114 : vector<8x384xf32>
    %117 = arith.divf %115, %116 : vector<8x384xf32>
    %118 = vector.extract_strided_slice %117 {offsets = [0, 0], sizes = [8, 128], strides = [1, 1]} : vector<8x384xf32> to vector<8x128xf32>
    %119 = vector.extract_strided_slice %117 {offsets = [0, 128], sizes = [8, 128], strides = [1, 1]} : vector<8x384xf32> to vector<8x128xf32>
    %120 = vector.extract_strided_slice %117 {offsets = [0, 256], sizes = [8, 128], strides = [1, 1]} : vector<8x384xf32> to vector<8x128xf32>
    %121 = vector.extract_strided_slice %111 {offsets = [0, 384], sizes = [8, 128], strides = [1, 1]} : vector<8x512xf32> to vector<8x128xf32>
    %122 = math.tanh %121 : vector<8x128xf32>
    %123 = arith.mulf %119, %101 : vector<8x128xf32>
    %124 = arith.mulf %118, %122 : vector<8x128xf32>
    %125 = arith.addf %123, %124 : vector<8x128xf32>
    %126 = math.tanh %125 : vector<8x128xf32>
    %127 = arith.mulf %120, %126 : vector<8x128xf32>
    %c0_54 = arith.constant 0 : index
    %c4_55 = arith.constant 4 : index
    %c0_56 = arith.constant 0 : index
    %128 = vector.load %arg7[%c0_54, %c4_55, %c0_56] : memref<8x8x128xf32, #tpu.memory_space<vmem>>, vector<8x1x128xf32>
    %129 = vector.shape_cast %128 : vector<8x1x128xf32> to vector<8x128xf32>
    %130 = vector.shape_cast %127 : vector<8x128xf32> to vector<8x1x128xf32>
    tpu.vector_store %arg7[%c0_54, %c4_55, %c0_56], %130 {strides = array<i32>} : memref<8x8x128xf32, #tpu.memory_space<vmem>>, vector<8x1x128xf32>,
    %c0_57 = arith.constant 0 : index
    %c5 = arith.constant 5 : index
    %c0_58 = arith.constant 0 : index
    %131 = vector.load %arg9[%c0_57, %c5, %c0_58] : memref<8x8x512xf32, #tpu.memory_space<vmem>>, vector<8x1x512xf32>
    %132 = vector.shape_cast %131 : vector<8x1x512xf32> to vector<8x512xf32>
    %c0_59 = arith.constant 0 : index
    %c0_60 = arith.constant 0 : index
    %133 = vector.load %arg2[%c0_59, %c0_60] : memref<128x512xf32, #tpu.memory_space<vmem>>, vector<128x512xf32>
    %cst_61 = arith.constant dense<0.000000e+00> : vector<8x512xf32>
    %134 = tpu.matmul %127, %133, %cst_61 {dimension_numbers = #tpu.dot_dimension_numbers<[1], [0], [0], [1], [0, 0, 1, 1], [], []>} : vector<8x128xf32>, vector<128x512xf32>, vector<8x512xf32> -> vector<8x512xf32>
    %135 = arith.addf %132, %134 : vector<8x512xf32>
    %136 = vector.extract_strided_slice %135 {offsets = [0, 0], sizes = [8, 384], strides = [1, 1]} : vector<8x512xf32> to vector<8x384xf32>
    %137 = arith.negf %136 : vector<8x384xf32>
    %138 = math.exp %137 : vector<8x384xf32>
    %cst_62 = arith.constant 1.000000e+00 : f32
    %139 = vector.broadcast %cst_62 : f32 to vector<8x384xf32>
    %140 = arith.addf %139, %138 : vector<8x384xf32>
    %141 = arith.divf %139, %140 : vector<8x384xf32>
    %142 = vector.extract_strided_slice %141 {offsets = [0, 0], sizes = [8, 128], strides = [1, 1]} : vector<8x384xf32> to vector<8x128xf32>
    %143 = vector.extract_strided_slice %141 {offsets = [0, 128], sizes = [8, 128], strides = [1, 1]} : vector<8x384xf32> to vector<8x128xf32>
    %144 = vector.extract_strided_slice %141 {offsets = [0, 256], sizes = [8, 128], strides = [1, 1]} : vector<8x384xf32> to vector<8x128xf32>
    %145 = vector.extract_strided_slice %135 {offsets = [0, 384], sizes = [8, 128], strides = [1, 1]} : vector<8x512xf32> to vector<8x128xf32>
    %146 = math.tanh %145 : vector<8x128xf32>
    %147 = arith.mulf %143, %125 : vector<8x128xf32>
    %148 = arith.mulf %142, %146 : vector<8x128xf32>
    %149 = arith.addf %147, %148 : vector<8x128xf32>
    %150 = math.tanh %149 : vector<8x128xf32>
    %151 = arith.mulf %144, %150 : vector<8x128xf32>
    %c0_63 = arith.constant 0 : index
    %c5_64 = arith.constant 5 : index
    %c0_65 = arith.constant 0 : index
    %152 = vector.load %arg7[%c0_63, %c5_64, %c0_65] : memref<8x8x128xf32, #tpu.memory_space<vmem>>, vector<8x1x128xf32>
    %153 = vector.shape_cast %152 : vector<8x1x128xf32> to vector<8x128xf32>
    %154 = vector.shape_cast %151 : vector<8x128xf32> to vector<8x1x128xf32>
    tpu.vector_store %arg7[%c0_63, %c5_64, %c0_65], %154 {strides = array<i32>} : memref<8x8x128xf32, #tpu.memory_space<vmem>>, vector<8x1x128xf32>,
    %c0_66 = arith.constant 0 : index
    %c6 = arith.constant 6 : index
    %c0_67 = arith.constant 0 : index
    %155 = vector.load %arg9[%c0_66, %c6, %c0_67] : memref<8x8x512xf32, #tpu.memory_space<vmem>>, vector<8x1x512xf32>
    %156 = vector.shape_cast %155 : vector<8x1x512xf32> to vector<8x512xf32>
    %c0_68 = arith.constant 0 : index
    %c0_69 = arith.constant 0 : index
    %157 = vector.load %arg2[%c0_68, %c0_69] : memref<128x512xf32, #tpu.memory_space<vmem>>, vector<128x512xf32>
    %cst_70 = arith.constant dense<0.000000e+00> : vector<8x512xf32>
    %158 = tpu.matmul %151, %157, %cst_70 {dimension_numbers = #tpu.dot_dimension_numbers<[1], [0], [0], [1], [0, 0, 1, 1], [], []>} : vector<8x128xf32>, vector<128x512xf32>, vector<8x512xf32> -> vector<8x512xf32>
    %159 = arith.addf %156, %158 : vector<8x512xf32>
    %160 = vector.extract_strided_slice %159 {offsets = [0, 0], sizes = [8, 384], strides = [1, 1]} : vector<8x512xf32> to vector<8x384xf32>
    %161 = arith.negf %160 : vector<8x384xf32>
    %162 = math.exp %161 : vector<8x384xf32>
    %cst_71 = arith.constant 1.000000e+00 : f32
    %163 = vector.broadcast %cst_71 : f32 to vector<8x384xf32>
    %164 = arith.addf %163, %162 : vector<8x384xf32>
    %165 = arith.divf %163, %164 : vector<8x384xf32>
    %166 = vector.extract_strided_slice %165 {offsets = [0, 0], sizes = [8, 128], strides = [1, 1]} : vector<8x384xf32> to vector<8x128xf32>
    %167 = vector.extract_strided_slice %165 {offsets = [0, 128], sizes = [8, 128], strides = [1, 1]} : vector<8x384xf32> to vector<8x128xf32>
    %168 = vector.extract_strided_slice %165 {offsets = [0, 256], sizes = [8, 128], strides = [1, 1]} : vector<8x384xf32> to vector<8x128xf32>
    %169 = vector.extract_strided_slice %159 {offsets = [0, 384], sizes = [8, 128], strides = [1, 1]} : vector<8x512xf32> to vector<8x128xf32>
    %170 = math.tanh %169 : vector<8x128xf32>
    %171 = arith.mulf %167, %149 : vector<8x128xf32>
    %172 = arith.mulf %166, %170 : vector<8x128xf32>
    %173 = arith.addf %171, %172 : vector<8x128xf32>
    %174 = math.tanh %173 : vector<8x128xf32>
    %175 = arith.mulf %168, %174 : vector<8x128xf32>
    %c0_72 = arith.constant 0 : index
    %c6_73 = arith.constant 6 : index
    %c0_74 = arith.constant 0 : index
    %176 = vector.load %arg7[%c0_72, %c6_73, %c0_74] : memref<8x8x128xf32, #tpu.memory_space<vmem>>, vector<8x1x128xf32>
    %177 = vector.shape_cast %176 : vector<8x1x128xf32> to vector<8x128xf32>
    %178 = vector.shape_cast %175 : vector<8x128xf32> to vector<8x1x128xf32>
    tpu.vector_store %arg7[%c0_72, %c6_73, %c0_74], %178 {strides = array<i32>} : memref<8x8x128xf32, #tpu.memory_space<vmem>>, vector<8x1x128xf32>,
    %c0_75 = arith.constant 0 : index
    %c7 = arith.constant 7 : index
    %c0_76 = arith.constant 0 : index
    %179 = vector.load %arg9[%c0_75, %c7, %c0_76] : memref<8x8x512xf32, #tpu.memory_space<vmem>>, vector<8x1x512xf32>
    %180 = vector.shape_cast %179 : vector<8x1x512xf32> to vector<8x512xf32>
    %c0_77 = arith.constant 0 : index
    %c0_78 = arith.constant 0 : index
    %181 = vector.load %arg2[%c0_77, %c0_78] : memref<128x512xf32, #tpu.memory_space<vmem>>, vector<128x512xf32>
    %cst_79 = arith.constant dense<0.000000e+00> : vector<8x512xf32>
    %182 = tpu.matmul %175, %181, %cst_79 {dimension_numbers = #tpu.dot_dimension_numbers<[1], [0], [0], [1], [0, 0, 1, 1], [], []>} : vector<8x128xf32>, vector<128x512xf32>, vector<8x512xf32> -> vector<8x512xf32>
    %183 = arith.addf %180, %182 : vector<8x512xf32>
    %184 = vector.extract_strided_slice %183 {offsets = [0, 0], sizes = [8, 384], strides = [1, 1]} : vector<8x512xf32> to vector<8x384xf32>
    %185 = arith.negf %184 : vector<8x384xf32>
    %186 = math.exp %185 : vector<8x384xf32>
    %cst_80 = arith.constant 1.000000e+00 : f32
    %187 = vector.broadcast %cst_80 : f32 to vector<8x384xf32>
    %188 = arith.addf %187, %186 : vector<8x384xf32>
    %189 = arith.divf %187, %188 : vector<8x384xf32>
    %190 = vector.extract_strided_slice %189 {offsets = [0, 0], sizes = [8, 128], strides = [1, 1]} : vector<8x384xf32> to vector<8x128xf32>
    %191 = vector.extract_strided_slice %189 {offsets = [0, 128], sizes = [8, 128], strides = [1, 1]} : vector<8x384xf32> to vector<8x128xf32>
    %192 = vector.extract_strided_slice %189 {offsets = [0, 256], sizes = [8, 128], strides = [1, 1]} : vector<8x384xf32> to vector<8x128xf32>
    %193 = vector.extract_strided_slice %183 {offsets = [0, 384], sizes = [8, 128], strides = [1, 1]} : vector<8x512xf32> to vector<8x128xf32>
    %194 = math.tanh %193 : vector<8x128xf32>
    %195 = arith.mulf %191, %173 : vector<8x128xf32>
    %196 = arith.mulf %190, %194 : vector<8x128xf32>
    %197 = arith.addf %195, %196 : vector<8x128xf32>
    %198 = math.tanh %197 : vector<8x128xf32>
    %199 = arith.mulf %192, %198 : vector<8x128xf32>
    %c0_81 = arith.constant 0 : index
    %c7_82 = arith.constant 7 : index
    %c0_83 = arith.constant 0 : index
    %200 = vector.load %arg7[%c0_81, %c7_82, %c0_83] : memref<8x8x128xf32, #tpu.memory_space<vmem>>, vector<8x1x128xf32>
    %201 = vector.shape_cast %200 : vector<8x1x128xf32> to vector<8x128xf32>
    %202 = vector.shape_cast %199 : vector<8x128xf32> to vector<8x1x128xf32>
    tpu.vector_store %arg7[%c0_81, %c7_82, %c0_83], %202 {strides = array<i32>} : memref<8x8x128xf32, #tpu.memory_space<vmem>>, vector<8x1x128xf32>,
    %c0_84 = arith.constant 0 : index
    %c0_85 = arith.constant 0 : index
    %c0_86 = arith.constant 0 : index
    %203 = vector.load %arg7[%c0_84, %c0_85, %c0_86] : memref<8x8x128xf32, #tpu.memory_space<vmem>>, vector<8x8x128xf32>
    %204 = vector.shape_cast %203 : vector<8x8x128xf32> to vector<64x128xf32>
    %c0_87 = arith.constant 0 : index
    %c0_88 = arith.constant 0 : index
    %205 = vector.load %arg4[%c0_87, %c0_88] : memref<128x512xf32, #tpu.memory_space<vmem>>, vector<128x512xf32>
    %cst_89 = arith.constant dense<0.000000e+00> : vector<64x512xf32>
    %206 = tpu.matmul %204, %205, %cst_89 {dimension_numbers = #tpu.dot_dimension_numbers<[1], [0], [0], [1], [0, 0, 1, 1], [], []>} : vector<64x128xf32>, vector<128x512xf32>, vector<64x512xf32> -> vector<64x512xf32>
    %c0_90 = arith.constant 0 : index
    %c0_91 = arith.constant 0 : index
    %207 = vector.load %arg6[%c0_90, %c0_91] : memref<1x512xf32, #tpu.memory_space<vmem>>, vector<1x512xf32>
    %208 = vector.broadcast %207 : vector<1x512xf32> to vector<64x512xf32>
    %209 = arith.addf %206, %208 : vector<64x512xf32>
    %210 = vector.shape_cast %209 : vector<64x512xf32> to vector<8x8x512xf32>
    %c0_92 = arith.constant 0 : index
    %c0_93 = arith.constant 0 : index
    %c0_94 = arith.constant 0 : index
    %211 = vector.load %arg9[%c0_92, %c0_93, %c0_94] : memref<8x8x512xf32, #tpu.memory_space<vmem>>, vector<8x8x512xf32>
    tpu.vector_store %arg9[%c0_92, %c0_93, %c0_94], %210 {strides = array<i32>} : memref<8x8x512xf32, #tpu.memory_space<vmem>>, vector<8x8x512xf32>,
    %cst_95 = arith.constant 0.000000e+00 : f32
    %212 = vector.broadcast %cst_95 : f32 to vector<8x128xf32>
    %cst_96 = arith.constant 0.000000e+00 : f32
    %213 = vector.broadcast %cst_96 : f32 to vector<8x128xf32>
    %c0_97 = arith.constant 0 : index
    %c0_98 = arith.constant 0 : index
    %c0_99 = arith.constant 0 : index
    %214 = vector.load %arg9[%c0_97, %c0_98, %c0_99] : memref<8x8x512xf32, #tpu.memory_space<vmem>>, vector<8x1x512xf32>
    %215 = vector.shape_cast %214 : vector<8x1x512xf32> to vector<8x512xf32>
    %c0_100 = arith.constant 0 : index
    %c0_101 = arith.constant 0 : index
    %216 = vector.load %arg5[%c0_100, %c0_101] : memref<128x512xf32, #tpu.memory_space<vmem>>, vector<128x512xf32>
    %cst_102 = arith.constant dense<0.000000e+00> : vector<8x512xf32>
    %217 = tpu.matmul %212, %216, %cst_102 {dimension_numbers = #tpu.dot_dimension_numbers<[1], [0], [0], [1], [0, 0, 1, 1], [], []>} : vector<8x128xf32>, vector<128x512xf32>, vector<8x512xf32> -> vector<8x512xf32>
    %218 = arith.addf %215, %217 : vector<8x512xf32>
    %219 = vector.extract_strided_slice %218 {offsets = [0, 0], sizes = [8, 384], strides = [1, 1]} : vector<8x512xf32> to vector<8x384xf32>
    %220 = arith.negf %219 : vector<8x384xf32>
    %221 = math.exp %220 : vector<8x384xf32>
    %cst_103 = arith.constant 1.000000e+00 : f32
    %222 = vector.broadcast %cst_103 : f32 to vector<8x384xf32>
    %223 = arith.addf %222, %221 : vector<8x384xf32>
    %224 = arith.divf %222, %223 : vector<8x384xf32>
    %225 = vector.extract_strided_slice %224 {offsets = [0, 0], sizes = [8, 128], strides = [1, 1]} : vector<8x384xf32> to vector<8x128xf32>
    %226 = vector.extract_strided_slice %224 {offsets = [0, 128], sizes = [8, 128], strides = [1, 1]} : vector<8x384xf32> to vector<8x128xf32>
    %227 = vector.extract_strided_slice %224 {offsets = [0, 256], sizes = [8, 128], strides = [1, 1]} : vector<8x384xf32> to vector<8x128xf32>
    %228 = vector.extract_strided_slice %218 {offsets = [0, 384], sizes = [8, 128], strides = [1, 1]} : vector<8x512xf32> to vector<8x128xf32>
    %229 = math.tanh %228 : vector<8x128xf32>
    %230 = arith.mulf %226, %213 : vector<8x128xf32>
    %231 = arith.mulf %225, %229 : vector<8x128xf32>
    %232 = arith.addf %230, %231 : vector<8x128xf32>
    %233 = math.tanh %232 : vector<8x128xf32>
    %234 = arith.mulf %227, %233 : vector<8x128xf32>
    %c0_104 = arith.constant 0 : index
    %c0_105 = arith.constant 0 : index
    %c0_106 = arith.constant 0 : index
    %235 = vector.load %arg8[%c0_104, %c0_105, %c0_106] : memref<8x8x128xf32, #tpu.memory_space<vmem>>, vector<8x1x128xf32>
    %236 = vector.shape_cast %235 : vector<8x1x128xf32> to vector<8x128xf32>
    %237 = vector.shape_cast %234 : vector<8x128xf32> to vector<8x1x128xf32>
    tpu.vector_store %arg8[%c0_104, %c0_105, %c0_106], %237 {strides = array<i32>} : memref<8x8x128xf32, #tpu.memory_space<vmem>>, vector<8x1x128xf32>,
    %c0_107 = arith.constant 0 : index
    %c1_108 = arith.constant 1 : index
    %c0_109 = arith.constant 0 : index
    %238 = vector.load %arg9[%c0_107, %c1_108, %c0_109] : memref<8x8x512xf32, #tpu.memory_space<vmem>>, vector<8x1x512xf32>
    %239 = vector.shape_cast %238 : vector<8x1x512xf32> to vector<8x512xf32>
    %c0_110 = arith.constant 0 : index
    %c0_111 = arith.constant 0 : index
    %240 = vector.load %arg5[%c0_110, %c0_111] : memref<128x512xf32, #tpu.memory_space<vmem>>, vector<128x512xf32>
    %cst_112 = arith.constant dense<0.000000e+00> : vector<8x512xf32>
    %241 = tpu.matmul %234, %240, %cst_112 {dimension_numbers = #tpu.dot_dimension_numbers<[1], [0], [0], [1], [0, 0, 1, 1], [], []>} : vector<8x128xf32>, vector<128x512xf32>, vector<8x512xf32> -> vector<8x512xf32>
    %242 = arith.addf %239, %241 : vector<8x512xf32>
    %243 = vector.extract_strided_slice %242 {offsets = [0, 0], sizes = [8, 384], strides = [1, 1]} : vector<8x512xf32> to vector<8x384xf32>
    %244 = arith.negf %243 : vector<8x384xf32>
    %245 = math.exp %244 : vector<8x384xf32>
    %cst_113 = arith.constant 1.000000e+00 : f32
    %246 = vector.broadcast %cst_113 : f32 to vector<8x384xf32>
    %247 = arith.addf %246, %245 : vector<8x384xf32>
    %248 = arith.divf %246, %247 : vector<8x384xf32>
    %249 = vector.extract_strided_slice %248 {offsets = [0, 0], sizes = [8, 128], strides = [1, 1]} : vector<8x384xf32> to vector<8x128xf32>
    %250 = vector.extract_strided_slice %248 {offsets = [0, 128], sizes = [8, 128], strides = [1, 1]} : vector<8x384xf32> to vector<8x128xf32>
    %251 = vector.extract_strided_slice %248 {offsets = [0, 256], sizes = [8, 128], strides = [1, 1]} : vector<8x384xf32> to vector<8x128xf32>
    %252 = vector.extract_strided_slice %242 {offsets = [0, 384], sizes = [8, 128], strides = [1, 1]} : vector<8x512xf32> to vector<8x128xf32>
    %253 = math.tanh %252 : vector<8x128xf32>
    %254 = arith.mulf %250, %232 : vector<8x128xf32>
    %255 = arith.mulf %249, %253 : vector<8x128xf32>
    %256 = arith.addf %254, %255 : vector<8x128xf32>
    %257 = math.tanh %256 : vector<8x128xf32>
    %258 = arith.mulf %251, %257 : vector<8x128xf32>
    %c0_114 = arith.constant 0 : index
    %c1_115 = arith.constant 1 : index
    %c0_116 = arith.constant 0 : index
    %259 = vector.load %arg8[%c0_114, %c1_115, %c0_116] : memref<8x8x128xf32, #tpu.memory_space<vmem>>, vector<8x1x128xf32>
    %260 = vector.shape_cast %259 : vector<8x1x128xf32> to vector<8x128xf32>
    %261 = vector.shape_cast %258 : vector<8x128xf32> to vector<8x1x128xf32>
    tpu.vector_store %arg8[%c0_114, %c1_115, %c0_116], %261 {strides = array<i32>} : memref<8x8x128xf32, #tpu.memory_space<vmem>>, vector<8x1x128xf32>,
    %c0_117 = arith.constant 0 : index
    %c2_118 = arith.constant 2 : index
    %c0_119 = arith.constant 0 : index
    %262 = vector.load %arg9[%c0_117, %c2_118, %c0_119] : memref<8x8x512xf32, #tpu.memory_space<vmem>>, vector<8x1x512xf32>
    %263 = vector.shape_cast %262 : vector<8x1x512xf32> to vector<8x512xf32>
    %c0_120 = arith.constant 0 : index
    %c0_121 = arith.constant 0 : index
    %264 = vector.load %arg5[%c0_120, %c0_121] : memref<128x512xf32, #tpu.memory_space<vmem>>, vector<128x512xf32>
    %cst_122 = arith.constant dense<0.000000e+00> : vector<8x512xf32>
    %265 = tpu.matmul %258, %264, %cst_122 {dimension_numbers = #tpu.dot_dimension_numbers<[1], [0], [0], [1], [0, 0, 1, 1], [], []>} : vector<8x128xf32>, vector<128x512xf32>, vector<8x512xf32> -> vector<8x512xf32>
    %266 = arith.addf %263, %265 : vector<8x512xf32>
    %267 = vector.extract_strided_slice %266 {offsets = [0, 0], sizes = [8, 384], strides = [1, 1]} : vector<8x512xf32> to vector<8x384xf32>
    %268 = arith.negf %267 : vector<8x384xf32>
    %269 = math.exp %268 : vector<8x384xf32>
    %cst_123 = arith.constant 1.000000e+00 : f32
    %270 = vector.broadcast %cst_123 : f32 to vector<8x384xf32>
    %271 = arith.addf %270, %269 : vector<8x384xf32>
    %272 = arith.divf %270, %271 : vector<8x384xf32>
    %273 = vector.extract_strided_slice %272 {offsets = [0, 0], sizes = [8, 128], strides = [1, 1]} : vector<8x384xf32> to vector<8x128xf32>
    %274 = vector.extract_strided_slice %272 {offsets = [0, 128], sizes = [8, 128], strides = [1, 1]} : vector<8x384xf32> to vector<8x128xf32>
    %275 = vector.extract_strided_slice %272 {offsets = [0, 256], sizes = [8, 128], strides = [1, 1]} : vector<8x384xf32> to vector<8x128xf32>
    %276 = vector.extract_strided_slice %266 {offsets = [0, 384], sizes = [8, 128], strides = [1, 1]} : vector<8x512xf32> to vector<8x128xf32>
    %277 = math.tanh %276 : vector<8x128xf32>
    %278 = arith.mulf %274, %256 : vector<8x128xf32>
    %279 = arith.mulf %273, %277 : vector<8x128xf32>
    %280 = arith.addf %278, %279 : vector<8x128xf32>
    %281 = math.tanh %280 : vector<8x128xf32>
    %282 = arith.mulf %275, %281 : vector<8x128xf32>
    %c0_124 = arith.constant 0 : index
    %c2_125 = arith.constant 2 : index
    %c0_126 = arith.constant 0 : index
    %283 = vector.load %arg8[%c0_124, %c2_125, %c0_126] : memref<8x8x128xf32, #tpu.memory_space<vmem>>, vector<8x1x128xf32>
    %284 = vector.shape_cast %283 : vector<8x1x128xf32> to vector<8x128xf32>
    %285 = vector.shape_cast %282 : vector<8x128xf32> to vector<8x1x128xf32>
    tpu.vector_store %arg8[%c0_124, %c2_125, %c0_126], %285 {strides = array<i32>} : memref<8x8x128xf32, #tpu.memory_space<vmem>>, vector<8x1x128xf32>,
    %c0_127 = arith.constant 0 : index
    %c3_128 = arith.constant 3 : index
    %c0_129 = arith.constant 0 : index
    %286 = vector.load %arg9[%c0_127, %c3_128, %c0_129] : memref<8x8x512xf32, #tpu.memory_space<vmem>>, vector<8x1x512xf32>
    %287 = vector.shape_cast %286 : vector<8x1x512xf32> to vector<8x512xf32>
    %c0_130 = arith.constant 0 : index
    %c0_131 = arith.constant 0 : index
    %288 = vector.load %arg5[%c0_130, %c0_131] : memref<128x512xf32, #tpu.memory_space<vmem>>, vector<128x512xf32>
    %cst_132 = arith.constant dense<0.000000e+00> : vector<8x512xf32>
    %289 = tpu.matmul %282, %288, %cst_132 {dimension_numbers = #tpu.dot_dimension_numbers<[1], [0], [0], [1], [0, 0, 1, 1], [], []>} : vector<8x128xf32>, vector<128x512xf32>, vector<8x512xf32> -> vector<8x512xf32>
    %290 = arith.addf %287, %289 : vector<8x512xf32>
    %291 = vector.extract_strided_slice %290 {offsets = [0, 0], sizes = [8, 384], strides = [1, 1]} : vector<8x512xf32> to vector<8x384xf32>
    %292 = arith.negf %291 : vector<8x384xf32>
    %293 = math.exp %292 : vector<8x384xf32>
    %cst_133 = arith.constant 1.000000e+00 : f32
    %294 = vector.broadcast %cst_133 : f32 to vector<8x384xf32>
    %295 = arith.addf %294, %293 : vector<8x384xf32>
    %296 = arith.divf %294, %295 : vector<8x384xf32>
    %297 = vector.extract_strided_slice %296 {offsets = [0, 0], sizes = [8, 128], strides = [1, 1]} : vector<8x384xf32> to vector<8x128xf32>
    %298 = vector.extract_strided_slice %296 {offsets = [0, 128], sizes = [8, 128], strides = [1, 1]} : vector<8x384xf32> to vector<8x128xf32>
    %299 = vector.extract_strided_slice %296 {offsets = [0, 256], sizes = [8, 128], strides = [1, 1]} : vector<8x384xf32> to vector<8x128xf32>
    %300 = vector.extract_strided_slice %290 {offsets = [0, 384], sizes = [8, 128], strides = [1, 1]} : vector<8x512xf32> to vector<8x128xf32>
    %301 = math.tanh %300 : vector<8x128xf32>
    %302 = arith.mulf %298, %280 : vector<8x128xf32>
    %303 = arith.mulf %297, %301 : vector<8x128xf32>
    %304 = arith.addf %302, %303 : vector<8x128xf32>
    %305 = math.tanh %304 : vector<8x128xf32>
    %306 = arith.mulf %299, %305 : vector<8x128xf32>
    %c0_134 = arith.constant 0 : index
    %c3_135 = arith.constant 3 : index
    %c0_136 = arith.constant 0 : index
    %307 = vector.load %arg8[%c0_134, %c3_135, %c0_136] : memref<8x8x128xf32, #tpu.memory_space<vmem>>, vector<8x1x128xf32>
    %308 = vector.shape_cast %307 : vector<8x1x128xf32> to vector<8x128xf32>
    %309 = vector.shape_cast %306 : vector<8x128xf32> to vector<8x1x128xf32>
    tpu.vector_store %arg8[%c0_134, %c3_135, %c0_136], %309 {strides = array<i32>} : memref<8x8x128xf32, #tpu.memory_space<vmem>>, vector<8x1x128xf32>,
    %c0_137 = arith.constant 0 : index
    %c4_138 = arith.constant 4 : index
    %c0_139 = arith.constant 0 : index
    %310 = vector.load %arg9[%c0_137, %c4_138, %c0_139] : memref<8x8x512xf32, #tpu.memory_space<vmem>>, vector<8x1x512xf32>
    %311 = vector.shape_cast %310 : vector<8x1x512xf32> to vector<8x512xf32>
    %c0_140 = arith.constant 0 : index
    %c0_141 = arith.constant 0 : index
    %312 = vector.load %arg5[%c0_140, %c0_141] : memref<128x512xf32, #tpu.memory_space<vmem>>, vector<128x512xf32>
    %cst_142 = arith.constant dense<0.000000e+00> : vector<8x512xf32>
    %313 = tpu.matmul %306, %312, %cst_142 {dimension_numbers = #tpu.dot_dimension_numbers<[1], [0], [0], [1], [0, 0, 1, 1], [], []>} : vector<8x128xf32>, vector<128x512xf32>, vector<8x512xf32> -> vector<8x512xf32>
    %314 = arith.addf %311, %313 : vector<8x512xf32>
    %315 = vector.extract_strided_slice %314 {offsets = [0, 0], sizes = [8, 384], strides = [1, 1]} : vector<8x512xf32> to vector<8x384xf32>
    %316 = arith.negf %315 : vector<8x384xf32>
    %317 = math.exp %316 : vector<8x384xf32>
    %cst_143 = arith.constant 1.000000e+00 : f32
    %318 = vector.broadcast %cst_143 : f32 to vector<8x384xf32>
    %319 = arith.addf %318, %317 : vector<8x384xf32>
    %320 = arith.divf %318, %319 : vector<8x384xf32>
    %321 = vector.extract_strided_slice %320 {offsets = [0, 0], sizes = [8, 128], strides = [1, 1]} : vector<8x384xf32> to vector<8x128xf32>
    %322 = vector.extract_strided_slice %320 {offsets = [0, 128], sizes = [8, 128], strides = [1, 1]} : vector<8x384xf32> to vector<8x128xf32>
    %323 = vector.extract_strided_slice %320 {offsets = [0, 256], sizes = [8, 128], strides = [1, 1]} : vector<8x384xf32> to vector<8x128xf32>
    %324 = vector.extract_strided_slice %314 {offsets = [0, 384], sizes = [8, 128], strides = [1, 1]} : vector<8x512xf32> to vector<8x128xf32>
    %325 = math.tanh %324 : vector<8x128xf32>
    %326 = arith.mulf %322, %304 : vector<8x128xf32>
    %327 = arith.mulf %321, %325 : vector<8x128xf32>
    %328 = arith.addf %326, %327 : vector<8x128xf32>
    %329 = math.tanh %328 : vector<8x128xf32>
    %330 = arith.mulf %323, %329 : vector<8x128xf32>
    %c0_144 = arith.constant 0 : index
    %c4_145 = arith.constant 4 : index
    %c0_146 = arith.constant 0 : index
    %331 = vector.load %arg8[%c0_144, %c4_145, %c0_146] : memref<8x8x128xf32, #tpu.memory_space<vmem>>, vector<8x1x128xf32>
    %332 = vector.shape_cast %331 : vector<8x1x128xf32> to vector<8x128xf32>
    %333 = vector.shape_cast %330 : vector<8x128xf32> to vector<8x1x128xf32>
    tpu.vector_store %arg8[%c0_144, %c4_145, %c0_146], %333 {strides = array<i32>} : memref<8x8x128xf32, #tpu.memory_space<vmem>>, vector<8x1x128xf32>,
    %c0_147 = arith.constant 0 : index
    %c5_148 = arith.constant 5 : index
    %c0_149 = arith.constant 0 : index
    %334 = vector.load %arg9[%c0_147, %c5_148, %c0_149] : memref<8x8x512xf32, #tpu.memory_space<vmem>>, vector<8x1x512xf32>
    %335 = vector.shape_cast %334 : vector<8x1x512xf32> to vector<8x512xf32>
    %c0_150 = arith.constant 0 : index
    %c0_151 = arith.constant 0 : index
    %336 = vector.load %arg5[%c0_150, %c0_151] : memref<128x512xf32, #tpu.memory_space<vmem>>, vector<128x512xf32>
    %cst_152 = arith.constant dense<0.000000e+00> : vector<8x512xf32>
    %337 = tpu.matmul %330, %336, %cst_152 {dimension_numbers = #tpu.dot_dimension_numbers<[1], [0], [0], [1], [0, 0, 1, 1], [], []>} : vector<8x128xf32>, vector<128x512xf32>, vector<8x512xf32> -> vector<8x512xf32>
    %338 = arith.addf %335, %337 : vector<8x512xf32>
    %339 = vector.extract_strided_slice %338 {offsets = [0, 0], sizes = [8, 384], strides = [1, 1]} : vector<8x512xf32> to vector<8x384xf32>
    %340 = arith.negf %339 : vector<8x384xf32>
    %341 = math.exp %340 : vector<8x384xf32>
    %cst_153 = arith.constant 1.000000e+00 : f32
    %342 = vector.broadcast %cst_153 : f32 to vector<8x384xf32>
    %343 = arith.addf %342, %341 : vector<8x384xf32>
    %344 = arith.divf %342, %343 : vector<8x384xf32>
    %345 = vector.extract_strided_slice %344 {offsets = [0, 0], sizes = [8, 128], strides = [1, 1]} : vector<8x384xf32> to vector<8x128xf32>
    %346 = vector.extract_strided_slice %344 {offsets = [0, 128], sizes = [8, 128], strides = [1, 1]} : vector<8x384xf32> to vector<8x128xf32>
    %347 = vector.extract_strided_slice %344 {offsets = [0, 256], sizes = [8, 128], strides = [1, 1]} : vector<8x384xf32> to vector<8x128xf32>
    %348 = vector.extract_strided_slice %338 {offsets = [0, 384], sizes = [8, 128], strides = [1, 1]} : vector<8x512xf32> to vector<8x128xf32>
    %349 = math.tanh %348 : vector<8x128xf32>
    %350 = arith.mulf %346, %328 : vector<8x128xf32>
    %351 = arith.mulf %345, %349 : vector<8x128xf32>
    %352 = arith.addf %350, %351 : vector<8x128xf32>
    %353 = math.tanh %352 : vector<8x128xf32>
    %354 = arith.mulf %347, %353 : vector<8x128xf32>
    %c0_154 = arith.constant 0 : index
    %c5_155 = arith.constant 5 : index
    %c0_156 = arith.constant 0 : index
    %355 = vector.load %arg8[%c0_154, %c5_155, %c0_156] : memref<8x8x128xf32, #tpu.memory_space<vmem>>, vector<8x1x128xf32>
    %356 = vector.shape_cast %355 : vector<8x1x128xf32> to vector<8x128xf32>
    %357 = vector.shape_cast %354 : vector<8x128xf32> to vector<8x1x128xf32>
    tpu.vector_store %arg8[%c0_154, %c5_155, %c0_156], %357 {strides = array<i32>} : memref<8x8x128xf32, #tpu.memory_space<vmem>>, vector<8x1x128xf32>,
    %c0_157 = arith.constant 0 : index
    %c6_158 = arith.constant 6 : index
    %c0_159 = arith.constant 0 : index
    %358 = vector.load %arg9[%c0_157, %c6_158, %c0_159] : memref<8x8x512xf32, #tpu.memory_space<vmem>>, vector<8x1x512xf32>
    %359 = vector.shape_cast %358 : vector<8x1x512xf32> to vector<8x512xf32>
    %c0_160 = arith.constant 0 : index
    %c0_161 = arith.constant 0 : index
    %360 = vector.load %arg5[%c0_160, %c0_161] : memref<128x512xf32, #tpu.memory_space<vmem>>, vector<128x512xf32>
    %cst_162 = arith.constant dense<0.000000e+00> : vector<8x512xf32>
    %361 = tpu.matmul %354, %360, %cst_162 {dimension_numbers = #tpu.dot_dimension_numbers<[1], [0], [0], [1], [0, 0, 1, 1], [], []>} : vector<8x128xf32>, vector<128x512xf32>, vector<8x512xf32> -> vector<8x512xf32>
    %362 = arith.addf %359, %361 : vector<8x512xf32>
    %363 = vector.extract_strided_slice %362 {offsets = [0, 0], sizes = [8, 384], strides = [1, 1]} : vector<8x512xf32> to vector<8x384xf32>
    %364 = arith.negf %363 : vector<8x384xf32>
    %365 = math.exp %364 : vector<8x384xf32>
    %cst_163 = arith.constant 1.000000e+00 : f32
    %366 = vector.broadcast %cst_163 : f32 to vector<8x384xf32>
    %367 = arith.addf %366, %365 : vector<8x384xf32>
    %368 = arith.divf %366, %367 : vector<8x384xf32>
    %369 = vector.extract_strided_slice %368 {offsets = [0, 0], sizes = [8, 128], strides = [1, 1]} : vector<8x384xf32> to vector<8x128xf32>
    %370 = vector.extract_strided_slice %368 {offsets = [0, 128], sizes = [8, 128], strides = [1, 1]} : vector<8x384xf32> to vector<8x128xf32>
    %371 = vector.extract_strided_slice %368 {offsets = [0, 256], sizes = [8, 128], strides = [1, 1]} : vector<8x384xf32> to vector<8x128xf32>
    %372 = vector.extract_strided_slice %362 {offsets = [0, 384], sizes = [8, 128], strides = [1, 1]} : vector<8x512xf32> to vector<8x128xf32>
    %373 = math.tanh %372 : vector<8x128xf32>
    %374 = arith.mulf %370, %352 : vector<8x128xf32>
    %375 = arith.mulf %369, %373 : vector<8x128xf32>
    %376 = arith.addf %374, %375 : vector<8x128xf32>
    %377 = math.tanh %376 : vector<8x128xf32>
    %378 = arith.mulf %371, %377 : vector<8x128xf32>
    %c0_164 = arith.constant 0 : index
    %c6_165 = arith.constant 6 : index
    %c0_166 = arith.constant 0 : index
    %379 = vector.load %arg8[%c0_164, %c6_165, %c0_166] : memref<8x8x128xf32, #tpu.memory_space<vmem>>, vector<8x1x128xf32>
    %380 = vector.shape_cast %379 : vector<8x1x128xf32> to vector<8x128xf32>
    %381 = vector.shape_cast %378 : vector<8x128xf32> to vector<8x1x128xf32>
    tpu.vector_store %arg8[%c0_164, %c6_165, %c0_166], %381 {strides = array<i32>} : memref<8x8x128xf32, #tpu.memory_space<vmem>>, vector<8x1x128xf32>,
    %c0_167 = arith.constant 0 : index
    %c7_168 = arith.constant 7 : index
    %c0_169 = arith.constant 0 : index
    %382 = vector.load %arg9[%c0_167, %c7_168, %c0_169] : memref<8x8x512xf32, #tpu.memory_space<vmem>>, vector<8x1x512xf32>
    %383 = vector.shape_cast %382 : vector<8x1x512xf32> to vector<8x512xf32>
    %c0_170 = arith.constant 0 : index
    %c0_171 = arith.constant 0 : index
    %384 = vector.load %arg5[%c0_170, %c0_171] : memref<128x512xf32, #tpu.memory_space<vmem>>, vector<128x512xf32>
    %cst_172 = arith.constant dense<0.000000e+00> : vector<8x512xf32>
    %385 = tpu.matmul %378, %384, %cst_172 {dimension_numbers = #tpu.dot_dimension_numbers<[1], [0], [0], [1], [0, 0, 1, 1], [], []>} : vector<8x128xf32>, vector<128x512xf32>, vector<8x512xf32> -> vector<8x512xf32>
    %386 = arith.addf %383, %385 : vector<8x512xf32>
    %387 = vector.extract_strided_slice %386 {offsets = [0, 0], sizes = [8, 384], strides = [1, 1]} : vector<8x512xf32> to vector<8x384xf32>
    %388 = arith.negf %387 : vector<8x384xf32>
    %389 = math.exp %388 : vector<8x384xf32>
    %cst_173 = arith.constant 1.000000e+00 : f32
    %390 = vector.broadcast %cst_173 : f32 to vector<8x384xf32>
    %391 = arith.addf %390, %389 : vector<8x384xf32>
    %392 = arith.divf %390, %391 : vector<8x384xf32>
    %393 = vector.extract_strided_slice %392 {offsets = [0, 0], sizes = [8, 128], strides = [1, 1]} : vector<8x384xf32> to vector<8x128xf32>
    %394 = vector.extract_strided_slice %392 {offsets = [0, 128], sizes = [8, 128], strides = [1, 1]} : vector<8x384xf32> to vector<8x128xf32>
    %395 = vector.extract_strided_slice %392 {offsets = [0, 256], sizes = [8, 128], strides = [1, 1]} : vector<8x384xf32> to vector<8x128xf32>
    %396 = vector.extract_strided_slice %386 {offsets = [0, 384], sizes = [8, 128], strides = [1, 1]} : vector<8x512xf32> to vector<8x128xf32>
    %397 = math.tanh %396 : vector<8x128xf32>
    %398 = arith.mulf %394, %376 : vector<8x128xf32>
    %399 = arith.mulf %393, %397 : vector<8x128xf32>
    %400 = arith.addf %398, %399 : vector<8x128xf32>
    %401 = math.tanh %400 : vector<8x128xf32>
    %402 = arith.mulf %395, %401 : vector<8x128xf32>
    %c0_174 = arith.constant 0 : index
    %c7_175 = arith.constant 7 : index
    %c0_176 = arith.constant 0 : index
    %403 = vector.load %arg8[%c0_174, %c7_175, %c0_176] : memref<8x8x128xf32, #tpu.memory_space<vmem>>, vector<8x1x128xf32>
    %404 = vector.shape_cast %403 : vector<8x1x128xf32> to vector<8x128xf32>
    %405 = vector.shape_cast %402 : vector<8x128xf32> to vector<8x1x128xf32>
    tpu.vector_store %arg8[%c0_174, %c7_175, %c0_176], %405 {strides = array<i32>} : memref<8x8x128xf32, #tpu.memory_space<vmem>>, vector<8x1x128xf32>,
    return
  }
}

</mosaic_0001>

<bundles_post_ra>
// kernel: seq2seq_autoencoder_forward.1
= control target key start
LH: loop header
LB: loop body
LE: loop exit
PB: predicated region body
PF: predicated region fallthrough
CT: control target
= control target key end

     0   :  { %14 = vsyncpa [#allocation4], 0  ;;  %s13967_s0 = inlined_call_operand.vmem [shape: f32[8,8,6], index: 0, kind: input, shape index: {}]   ;;  %s13968_s1 = inlined_call_operand.vmem [shape: f32[6,512], index: 1, kind: input, shape index: {}]   ;;  %s13969_s2 = inlined_call_operand.hbm [shape: f32[128,512], index: 2, kind: input, shape index: {}]   ;;  %s13970_s3 = inlined_call_operand.vmem [shape: f32[1,512], index: 3, kind: input, shape index: {}]   ;;  %s13971_s4 = inlined_call_operand.hbm [shape: f32[128,512], index: 4, kind: input, shape index: {}]   ;;  %s13972_s5 = inlined_call_operand.hbm [shape: f32[128,512], index: 5, kind: input, shape index: {}]   ;;  %s13973_s6 = inlined_call_operand.vmem [shape: f32[1,512], index: 6, kind: input, shape index: {}]   ;;  %s13974_s7 = inlined_call_operand.vmem [shape: f32[8,8,128], index: 7, kind: output, shape index: {0}]   ;;  %s13975_s8 = inlined_call_operand.vmem [shape: f32[8,8,128], index: 8, kind: output, shape index: {1}]  }
   0x1   :  { %15 = vsyncpa [#allocation6], 0  ;;  %s11493_s27 = smov [#allocation5]   ;;  %s11494_s29 = smov [#allocation3]  }
   0x2   :  { %s39_s28 = sshll.u32 %s11493_s27, 4  ;;  %s25_s30 = sshll.u32 %s11494_s29, 4  ;;  %s40_s28 = int_to_ptr.vmem [resolvable:$true] %s39_s28  ;;  %s11545_s30 = int_to_ptr.vmem [resolvable:$true] %s25_s30 }
   0x3   :  { %s11423_s11 = scalar_lea.hbm %s13971_s4, 8192 }
   0x4   :  { %p11424_p0 = scmp.ne.s32.totalorder %s13971_s4, %s11423_s11  ;;  %p11427_p1 = scmp.lt.u32.totalorder %s11423_s11, %s13971_s4 }
   0x6   :  { %p11429_p2 = pnand %p11427_p1, %p11424_p0 }
   0x8   :  { %11432 = shalt.err (!%p11429_p2)
}
   0x9   :  { %s11433_s16 = scalar_lea.vmem %s40_s28, 8192  ;;  %p11438_p4 = scmp.lt.s32.totalorder %s40_s28, %s40_s28 }
   0xa   :  { %p11434_p3 = scmp.ne.s32.totalorder %s40_s28, %s11433_s16  ;;  %p11439_p5 = scmp.lt.s32.totalorder %s11433_s16, %s11433_s16 }
   0xc   :  { %p11440_p6 = por %p11439_p5, %p11438_p4 }
   0xe   :  { %p11441_p7 = pnand %p11440_p6, %p11434_p3 }
  0x10   :  { %11444 = shalt.err (!%p11441_p7)
}
  0x11   :  { %s11495_s17 = smov 512   ;;  %s11496_s18 = smov 32  }
  0x12   :  { %45 = dma.hbm_to_vmem [thread:$0]  %s13971_s4, 8192, %s40_s28, [#allocation6], %s11495_s17, %s11495_s17, %s11496_s18  }
  0x13   :  { %s11445_s23 = scalar_lea.hbm %s13969_s2, 8192 }
  0x14   :  { %p11446_p8 = scmp.ne.s32.totalorder %s13969_s2, %s11445_s23  ;;  %p11449_p9 = scmp.lt.u32.totalorder %s11445_s23, %s13969_s2 }
  0x16   :  { %p11451_p10 = pnand %p11449_p9, %p11446_p8 }
  0x18   :  { %11454 = shalt.err (!%p11451_p10)
}
  0x19   :  { %s11455_s29 = scalar_lea.vmem %s11545_s30, 8192  ;;  %p11460_p12 = scmp.lt.s32.totalorder %s11545_s30, %s11545_s30 }
  0x1a   :  { %p11456_p11 = scmp.ne.s32.totalorder %s11545_s30, %s11455_s29  ;;  %p11461_p13 = scmp.lt.s32.totalorder %s11455_s29, %s11455_s29 }
  0x1c   :  { %p11462_p0 = por %p11461_p13, %p11460_p12 }
  0x1e   :  { %p11463_p1 = pnand %p11462_p0, %p11456_p11 }
  0x20   :  { %11466 = shalt.err (!%p11463_p1)
}
  0x21   :  { %31 = dma.hbm_to_vmem [thread:$0]  %s13969_s2, 8192, %s11545_s30, [#allocation4], %s11495_s17, %s11495_s17, %s11496_s18  }
  0x22   :  { %s11497_s9 = smov [#allocation7]   ;;  %s11467_s13 = scalar_lea.hbm %s13972_s5, 8192 }
  0x23   :  { %s51_s10 = sshll.u32 %s11497_s9, 4  ;;  %p11468_p2 = scmp.ne.s32.totalorder %s13972_s5, %s11467_s13  ;;  %s52_s10 = int_to_ptr.vmem [resolvable:$true] %s51_s10 }
  0x24   :  { %p11471_p3 = scmp.lt.u32.totalorder %s11467_s13, %s13972_s5 }
  0x26   :  { %p11473_p4 = pnand %p11471_p3, %p11468_p2 }
  0x28   :  { %11476 = shalt.err (!%p11473_p4)
}
  0x29   :  { %s11477_s20 = scalar_lea.vmem %s52_s10, 8192  ;;  %p11482_p6 = scmp.lt.s32.totalorder %s52_s10, %s52_s10 }
  0x2a   :  { %p11478_p5 = scmp.ne.s32.totalorder %s52_s10, %s11477_s20  ;;  %p11483_p7 = scmp.lt.s32.totalorder %s11477_s20, %s11477_s20 }
  0x2c   :  { %p11484_p8 = por %p11483_p7, %p11482_p6 }
  0x2e   :  { %p11485_p9 = pnand %p11484_p8, %p11478_p5 }
  0x30   :  { %11488 = shalt.err (!%p11485_p9)
}
  0x31   :  { %57 = dma.hbm_to_vmem [thread:$0]  %s13972_s5, 8192, %s52_s10, [#allocation6], %s11495_s17, %s11495_s17, %s11496_s18  }
  0x32   :  { %11489 = dma.done.wait [#allocation4], 8192  }
  0x33   :  { %11490 = vsyncadd [#allocation4], 4294959104 }
  0x34   :  { %11491 = dma.done.wait [#allocation6], 16384  }
  0x35   :  { %11492 = vsyncadd [#allocation6], 4294950912  ;;  %v13980_v0 = vmov 0.0   ;;  %vm128_vm0 = vcmask 1045504   ;;  %vm103_vm1 = vcmask 48128   ;;  %v69_v5 = vld [vmem:[%s13967_s0] sm:$0xff] }
  0x36   :  { %205 = vmatprep.mubr.f32.mxu0 %v13980_v0  ;;  %318 = vmatprep.mubr.f32.mxu1 %v13980_v0  ;;  %v78_v1 = vld [vmem:[%s13968_s1 + $0x8] sm:$0x3f]  ;;  %v80_v2 = vld [vmem:[%s13968_s1 + $0x18] sm:$0x3f]  ;;  %v77_v3 = vld [vmem:[%s13968_s1] sm:$0x3f] }
  0x37   :  { %9156 = vmatprep.subr.msk.mxu0 %vm128_vm0, %v78_v1  ;;  %9166 = vmatprep.subr.msk.mxu1 %vm128_vm0, %v80_v2  ;;  %v79_v4 = vld [vmem:[%s13968_s1 + $0x10] sm:$0x3f]  ;;  %v415_v6 = vld [vmem:[#allocation3 + $0x8] sm:$0xff]  ;;  %v417_v8 = vld [vmem:[#allocation3 + $0x18] sm:$0xff] }
  0x38   :  { %9157 = vmatpush1.msk.msra.mxu0 %vm128_vm0, %v77_v3  ;;  %9167 = vmatpush1.msk.msra.mxu1 %vm128_vm0, %v79_v4  ;;  %v419_v7 = vld [vmem:[#allocation3 + $0x28] sm:$0xff]  ;;  %v421_v9 = vld [vmem:[#allocation3 + $0x38] sm:$0xff]  ;;  %v414_v12 = vld [vmem:[#allocation3] sm:$0xff] }
  0x39   :  { %9158 = vmatmul.mubr.msk.f32.vlgmr.msra.gmra.mrb[0].mxu0 %vm103_vm1, %v69_v5  ;;  %9168 = vmatmul.mubr.msk.f32.vlgmr.msra.gmra.mrb[0].mxu1 %vm103_vm1, %v69_v5  ;;  %v11616_v10 = vpack.c.bf16 %v419_v7, %v415_v6  ;;  %v11618_v11 = vpack.c.bf16 %v421_v9, %v417_v8  ;;  %v418_v13 = vld [vmem:[#allocation3 + $0x20] sm:$0xff]  ;;  %v416_v14 = vld [vmem:[#allocation3 + $0x10] sm:$0xff]  ;;  %v70_v17 = vld [vmem:[%s13967_s0 + $0x8] sm:$0xff] }
  0x3a   :  { %v11620_v15 = vpack.c.bf16 %v418_v13, %v414_v12  ;;  %v420_v16 = vld [vmem:[#allocation3 + $0x30] sm:$0xff]  ;;  %211 = vmatprep.mubr.f32.mxu0 %v13980_v0  ;;  %324 = vmatprep.mubr.f32.mxu1 %v13980_v0  ;;  %v423_v18 = vld [vmem:[#allocation3 + $0x48] sm:$0xff]  ;;  %v425_v21 = vld [vmem:[#allocation3 + $0x58] sm:$0xff] }
  0x3b   :  { %9305 = vmatprep.subr.bf16.mxu0 %v11616_v10  ;;  %9337 = vmatprep.subr.bf16.mxu1 %v11618_v11  ;;  %v11629_v19 = vpack.c.bf16 %v420_v16, %v416_v14  ;;  %v427_v20 = vld [vmem:[#allocation3 + $0x68] sm:$0xff]  ;;  %v429_v22 = vld [vmem:[#allocation3 + $0x78] sm:$0xff]  ;;  %v422_v25 = vld [vmem:[#allocation3 + $0x40] sm:$0xff] }
  0x3c   :  { %9307 = vmatpush1.bf16.msra.mxu0 %v11620_v15  ;;  %v11632_v23 = vpack.c.bf16 %v427_v20, %v423_v18  ;;  %v11634_v24 = vpack.c.bf16 %v429_v22, %v425_v21  ;;  %v426_v26 = vld [vmem:[#allocation3 + $0x60] sm:$0xff]  ;;  %v424_v27 = vld [vmem:[#allocation3 + $0x50] sm:$0xff]  ;;  %v431_v31 = vld [vmem:[#allocation3 + $0x88] sm:$0xff] }
  0x3d   :  { %9339 = vmatpush1.bf16.msra.mxu1 %v11629_v19  ;;  %9159 = vmatmul.mubr.msk.f32.gmra.mrb[2].mxu0 %vm103_vm1, %v70_v17  ;;  %v11638_v28 = vpack.c.bf16 %v426_v26, %v422_v25  ;;  %v428_v29 = vld [vmem:[#allocation3 + $0x70] sm:$0xff]  ;;  %v435_v33 = vld [vmem:[#allocation3 + $0xa8] sm:$0xff]  ;;  %v433_v34 = vld [vmem:[#allocation3 + $0x98] sm:$0xff] }
  0x3e   :  { %v71_v30 = vld [vmem:[%s13967_s0 + $0x10] sm:$0xff]  ;;  %9169 = vmatmul.mubr.msk.f32.gmra.mrb[2].mxu1 %vm103_vm1, %v70_v17  ;;  %9309 = vmatprep.subr.bf16.mxu0 %v11632_v23  ;;  %v11645_v32 = vpack.c.bf16 %v428_v29, %v424_v27  ;;  %v437_v35 = vld [vmem:[#allocation3 + $0xb8] sm:$0xff]  ;;  %v11649_v36 = vpack.c.bf16 %v435_v33, %v431_v31  ;;  %v430_v38 = vld [vmem:[#allocation3 + $0x80] sm:$0xff] }
  0x3f   :  { %9341 = vmatprep.subr.bf16.mxu1 %v11634_v24  ;;  %217 = vmatprep.mubr.f32.mxu0 %v13980_v0  ;;  %v11651_v37 = vpack.c.bf16 %v437_v35, %v433_v34  ;;  %v434_v39 = vld [vmem:[#allocation3 + $0xa0] sm:$0xff]  ;;  %v432_v40 = vld [vmem:[#allocation3 + $0x90] sm:$0xff]  ;;  %v72_v43 = vld [vmem:[%s13967_s0 + $0x18] sm:$0xff] }
  0x40   :  { %9311 = vmatpush1.bf16.msra.mxu0 %v11638_v28  ;;  %330 = vmatprep.mubr.f32.mxu1 %v13980_v0  ;;  %v11655_v41 = vpack.c.bf16 %v434_v39, %v430_v38  ;;  %v436_v42 = vld [vmem:[#allocation3 + $0xb0] sm:$0xff]  ;;  %v439_v44 = vld [vmem:[#allocation3 + $0xc8] sm:$0xff]  ;;  %v441_v47 = vld [vmem:[#allocation3 + $0xd8] sm:$0xff] }
  0x41   :  { %9343 = vmatpush1.bf16.msra.mxu1 %v11645_v32  ;;  %9160 = vmatmul.mubr.msk.f32.gmra.mrb[4].mxu0 %vm103_vm1, %v71_v30  ;;  %v11662_v45 = vpack.c.bf16 %v436_v42, %v432_v40  ;;  %v443_v46 = vld [vmem:[#allocation3 + $0xe8] sm:$0xff]  ;;  %v445_v48 = vld [vmem:[#allocation3 + $0xf8] sm:$0xff]  ;;  %v438_v50 = vld [vmem:[#allocation3 + $0xc0] sm:$0xff] }
  0x42   :  { %9170 = vmatmul.mubr.msk.f32.gmra.mrb[4].mxu1 %vm103_vm1, %v71_v30  ;;  %9313 = vmatprep.subr.bf16.mxu0 %v11649_v36  ;;  %v11666_v49 = vpack.c.bf16 %v443_v46, %v439_v44  ;;  %v442_v51 = vld [vmem:[#allocation3 + $0xe0] sm:$0xff]  ;;  %v440_v52 = vld [vmem:[#allocation3 + $0xd0] sm:$0xff]  ;;  %v11670_v53 = vpack.c.bf16 %v445_v48, %v441_v47  ;;  %v447_v55 = vld [vmem:[#allocation3 + $0x108] sm:$0xff] }
  0x43   :  { %9345 = vmatprep.subr.bf16.mxu1 %v11651_v37  ;;  %223 = vmatprep.mubr.f32.mxu0 %v13980_v0  ;;  %v444_v54 = vld [vmem:[#allocation3 + $0xf0] sm:$0xff]  ;;  %v11674_v56 = vpack.c.bf16 %v442_v51, %v438_v50  ;;  %v451_v57 = vld [vmem:[#allocation3 + $0x128] sm:$0xff]  ;;  %v449_v58 = vld [vmem:[#allocation3 + $0x118] sm:$0xff] }
  0x44   :  { %9315 = vmatpush1.bf16.msra.mxu0 %v11655_v41  ;;  %336 = vmatprep.mubr.f32.mxu1 %v13980_v0  ;;  %v453_v59 = vld [vmem:[#allocation3 + $0x138] sm:$0xff]  ;;  %v11678_v60 = vpack.c.bf16 %v444_v54, %v440_v52  ;;  %v446_v61 = vld [vmem:[#allocation3 + $0x100] sm:$0xff]  ;;  %v11685_v1 = vpack.c.bf16 %v451_v57, %v447_v55  ;;  %v448_v2 = vld [vmem:[#allocation3 + $0x110] sm:$0xff] }
  0x45   :  { %9347 = vmatpush1.bf16.msra.mxu1 %v11662_v45  ;;  %9161 = vmatmul.mubr.msk.f32.gmra.mrb[6].mxu0 %vm103_vm1, %v72_v43  ;;  %v450_v62 = vld [vmem:[#allocation3 + $0x120] sm:$0xff]  ;;  %v452_v3 = vld [vmem:[#allocation3 + $0x130] sm:$0xff]  ;;  %v11689_v4 = vpack.c.bf16 %v453_v59, %v449_v58  ;;  %v455_v5 = vld [vmem:[#allocation3 + $0x148] sm:$0xff] }
  0x46   :  { %9171 = vmatmul.mubr.msk.f32.gmra.mrb[6].mxu1 %vm103_vm1, %v72_v43  ;;  %9317 = vmatprep.subr.bf16.mxu0 %v11666_v49  ;;  %v73_v63 = vld [vmem:[%s13967_s0 + $0x20] sm:$0xff]  ;;  %v459_v6 = vld [vmem:[#allocation3 + $0x168] sm:$0xff]  ;;  %v11693_v7 = vpack.c.bf16 %v450_v62, %v446_v61  ;;  %v457_v8 = vld [vmem:[#allocation3 + $0x158] sm:$0xff]  ;;  %v11697_v12 = vpack.c.bf16 %v452_v3, %v448_v2 }
  0x47   :  { %9349 = vmatprep.subr.bf16.mxu1 %v11670_v53  ;;  %229 = vmatprep.mubr.f32.mxu0 %v13980_v0  ;;  %v461_v9 = vld [vmem:[#allocation3 + $0x178] sm:$0xff]  ;;  %v454_v13 = vld [vmem:[#allocation3 + $0x140] sm:$0xff]  ;;  %v74_v16 = vld [vmem:[%s13967_s0 + $0x28] sm:$0xff]  ;;  %v11704_v17 = vpack.c.bf16 %v459_v6, %v455_v5 }
  0x48   :  { %9319 = vmatpush1.bf16.msra.mxu0 %v11674_v56  ;;  %342 = vmatprep.mubr.f32.mxu1 %v13980_v0  ;;  %v458_v14 = vld [vmem:[#allocation3 + $0x160] sm:$0xff]  ;;  %v456_v18 = vld [vmem:[#allocation3 + $0x150] sm:$0xff]  ;;  %v11708_v21 = vpack.c.bf16 %v461_v9, %v457_v8  ;;  %v463_v22 = vld [vmem:[#allocation3 + $0x188] sm:$0xff] }
  0x49   :  { %9351 = vmatpush1.bf16.msra.mxu1 %v11678_v60  ;;  %9162 = vmatmul.mubr.msk.f32.gmra.mrb[8].mxu0 %vm103_vm1, %v73_v63  ;;  %v460_v20 = vld [vmem:[#allocation3 + $0x170] sm:$0xff]  ;;  %v467_v25 = vld [vmem:[#allocation3 + $0x1a8] sm:$0xff]  ;;  %v11712_v26 = vpack.c.bf16 %v458_v14, %v454_v13  ;;  %v465_v27 = vld [vmem:[#allocation3 + $0x198] sm:$0xff] }
  0x4a   :  { %9172 = vmatmul.mubr.msk.f32.gmra.mrb[8].mxu1 %vm103_vm1, %v73_v63  ;;  %9321 = vmatprep.subr.bf16.mxu0 %v11685_v1  ;;  %v469_v29 = vld [vmem:[#allocation3 + $0x1b8] sm:$0xff]  ;;  %v11716_v30 = vpack.c.bf16 %v460_v20, %v456_v18  ;;  %v462_v31 = vld [vmem:[#allocation3 + $0x180] sm:$0xff]  ;;  %v75_v34 = vld [vmem:[%s13967_s0 + $0x30] sm:$0xff]  ;;  %v11723_v35 = vpack.c.bf16 %v467_v25, %v463_v22 }
  0x4b   :  { %9353 = vmatprep.subr.bf16.mxu1 %v11689_v4  ;;  %235 = vmatprep.mubr.f32.mxu0 %v13980_v0  ;;  %v466_v33 = vld [vmem:[#allocation3 + $0x1a0] sm:$0xff]  ;;  %v464_v38 = vld [vmem:[#allocation3 + $0x190] sm:$0xff]  ;;  %v11727_v40 = vpack.c.bf16 %v469_v29, %v465_v27  ;;  %v471_v42 = vld [vmem:[#allocation3 + $0x1c8] sm:$0xff] }
  0x4c   :  { %9323 = vmatpush1.bf16.msra.mxu0 %v11693_v7  ;;  %348 = vmatprep.mubr.f32.mxu1 %v13980_v0  ;;  %v468_v39 = vld [vmem:[#allocation3 + $0x1b0] sm:$0xff]  ;;  %v475_v43 = vld [vmem:[#allocation3 + $0x1e8] sm:$0xff]  ;;  %v9330_v44 = vpack.c.bf16 %v466_v33, %v462_v31  ;;  %v473_v46 = vld [vmem:[#allocation3 + $0x1d8] sm:$0xff] }
  0x4d   :  { %9355 = vmatpush1.bf16.msra.mxu1 %v11697_v12  ;;  %9163 = vmatmul.mubr.msk.f32.gmra.mrb[10].mxu0 %vm103_vm1, %v74_v16  ;;  %v477_v47 = vld [vmem:[#allocation3 + $0x1f8] sm:$0xff]  ;;  %v9362_v48 = vpack.c.bf16 %v468_v39, %v464_v38  ;;  %v470_v50 = vld [vmem:[#allocation3 + $0x1c0] sm:$0xff]  ;;  %v9332_v54 = vpack.c.bf16 %v475_v43, %v471_v42  ;;  %v472_v55 = vld [vmem:[#allocation3 + $0x1d0] sm:$0xff] }
  0x4e   :  { %9173 = vmatmul.mubr.msk.f32.gmra.mrb[10].mxu1 %vm103_vm1, %v74_v16  ;;  %9325 = vmatprep.subr.bf16.mxu0 %v11704_v17  ;;  %v474_v51 = vld [vmem:[#allocation3 + $0x1e0] sm:$0xff]  ;;  %v76_v52 = vld [vmem:[%s13967_s0 + $0x38] sm:$0xff]  ;;  %v476_v57 = vld [vmem:[#allocation3 + $0x1f0] sm:$0xff]  ;;  %v9364_v58 = vpack.c.bf16 %v477_v47, %v473_v46 }
  0x4f   :  { %9357 = vmatprep.subr.bf16.mxu1 %v11708_v21  ;;  %241 = vmatprep.mubr.f32.mxu0 %v13980_v0  ;;  %v9334_v59 = vpack.c.bf16 %v474_v51, %v470_v50  ;;  %v9366_v61 = vpack.c.bf16 %v476_v57, %v472_v55 }
  0x50   :  { %9327 = vmatpush1.bf16.msra.mxu0 %v11712_v26  ;;  %354 = vmatprep.mubr.f32.mxu1 %v13980_v0 }
  0x51   :  { %9359 = vmatpush1.bf16.msra.mxu1 %v11716_v30  ;;  %9164 = vmatmul.mubr.msk.f32.gmra.mrb[12].mxu0 %vm103_vm1, %v75_v34 }
  0x52   :  { %9174 = vmatmul.mubr.msk.f32.gmra.mrb[12].mxu1 %vm103_vm1, %v75_v34  ;;  %9329 = vmatprep.subr.bf16.mxu0 %v11723_v35 }
  0x53   :  { %9361 = vmatprep.subr.bf16.mxu1 %v11727_v40  ;;  %247 = vmatprep.mubr.f32.mxu0 %v13980_v0 }
  0x54   :  { %9331 = vmatpush1.bf16.msra.mxu0 %v9330_v44  ;;  %360 = vmatprep.mubr.f32.mxu1 %v13980_v0 }
  0x55   :  { %9363 = vmatpush1.bf16.msra.mxu1 %v9362_v48  ;;  %9165 = vmatmul.mubr.msk.f32.gmra.mrb[14].mxu0 %vm103_vm1, %v76_v52 }
  0x56   :  { %9175 = vmatmul.mubr.msk.f32.gmra.mrb[14].mxu1 %vm103_vm1, %v76_v52  ;;  %9333 = vmatprep.subr.bf16.mxu0 %v9332_v54 }
  0x57   :  { %9365 = vmatprep.subr.bf16.mxu1 %v9364_v58  ;;  %542 = vmatprep.mubr.f32.mxu0 %v13980_v0 }
  0x58   :  { %9335 = vmatpush1.bf16.msra.mxu0 %v9334_v59  ;;  %613 = vmatprep.mubr.f32.mxu1 %v13980_v0 }
  0x59   :  { %9367 = vmatpush1.bf16.msra.mxu1 %v9366_v61  ;;  %9369 = vmatprep.subr.bf16.mxu0 %v11616_v10  ;;  %v83_v10 = vlaneseq }
  0x5a   :  { %9401 = vmatprep.subr.bf16.mxu1 %v11618_v11 }
  0x5b   :  { %543 = vmatmul.mubr.f32.vlgmr.msra.gmra.mrb[16].mxu0 %v13980_v0  ;;  %v11775_v11 = vshrl.u32 %v83_v10, 7 }
  0x5c   :  { %614 = vmatmul.mubr.f32.vlgmr.msra.gmra.mrb[16].mxu1 %v13980_v0  ;;  %9371 = vmatpush1.bf16.msra.mxu0 %v11620_v15 }
  0x5d   :  { %9403 = vmatpush1.bf16.msra.mxu1 %v11629_v19  ;;  %9373 = vmatprep.subr.bf16.mxu0 %v11632_v23  ;;  %14025 = vst [vmem:[#allocation10_spill] sm:$0xff] %v11775_v11  ;;  %v13979_v15 = vsub.s32 0, %v11775_v11  ;;  %v13978_v19 = vsub.s32 2, %v11775_v11  ;;  %v81_v23 = vld [vmem:[%s13970_s3] sm:$0xf] }
  0x5e   :  { %9405 = vmatprep.subr.bf16.mxu1 %v11634_v24  ;;  %1078 = vmatprep.mubr.f32.mxu0 %v13980_v0  ;;  %v13977_v24 = vsub.s32 1, %v11775_v11 }
  0x5f   :  { %1149 = vmatprep.mubr.f32.mxu1 %v13980_v0 }
  0x60   :  { %9375 = vmatpush1.bf16.msra.mxu0 %v11638_v28  ;;  %v13976_v28 = vsub.s32 3, %v11775_v11 }
  0x61   :  { %9407 = vmatpush1.bf16.msra.mxu1 %v11645_v32  ;;  %9377 = vmatprep.subr.bf16.mxu0 %v11649_v36  ;;  %v11786_v32 = vrot.slane %v81_v23, %v13979_v15  ;;  %v11790_v36 = vrot.slane %v81_v23, %v13978_v19 }
  0x62   :  { %9409 = vmatprep.subr.bf16.mxu1 %v11651_v37  ;;  %v11794_v37 = vrot.slane %v81_v23, %v13977_v24 }
  0x64   :  { %9379 = vmatpush1.bf16.msra.mxu0 %v11655_v41  ;;  %v11798_v41 = vrot.slane %v81_v23, %v13976_v28 }
  0x65   :  { %9411 = vmatpush1.bf16.msra.mxu1 %v11662_v45  ;;  %9381 = vmatprep.subr.bf16.mxu0 %v11666_v49 }
  0x66   :  { %9413 = vmatprep.subr.bf16.mxu1 %v11670_v53 }
  0x68   :  { %9383 = vmatpush1.bf16.msra.mxu0 %v11674_v56 }
  0x69   :  { %9415 = vmatpush1.bf16.msra.mxu1 %v11678_v60  ;;  %9385 = vmatprep.subr.bf16.mxu0 %v11685_v1 }
  0x6a   :  { %9417 = vmatprep.subr.bf16.mxu1 %v11689_v4 }
  0x6c   :  { %9387 = vmatpush1.bf16.msra.mxu0 %v11693_v7 }
  0x6d   :  { %9419 = vmatpush1.bf16.msra.mxu1 %v11697_v12  ;;  %9389 = vmatprep.subr.bf16.mxu0 %v11704_v17 }
  0x6e   :  { %9421 = vmatprep.subr.bf16.mxu1 %v11708_v21 }
  0x70   :  { %9391 = vmatpush1.bf16.msra.mxu0 %v11712_v26 }
  0x71   :  { %9423 = vmatpush1.bf16.msra.mxu1 %v11716_v30  ;;  %9393 = vmatprep.subr.bf16.mxu0 %v11723_v35 }
  0x72   :  { %9425 = vmatprep.subr.bf16.mxu1 %v11727_v40 }
  0x74   :  { %9395 = vmatpush1.bf16.msra.mxu0 %v9330_v44 }
  0x75   :  { %9427 = vmatpush1.bf16.msra.mxu1 %v9362_v48  ;;  %9397 = vmatprep.subr.bf16.mxu0 %v9332_v54 }
  0x76   :  { %9429 = vmatprep.subr.bf16.mxu1 %v9364_v58 }
  0x78   :  { %9399 = vmatpush1.bf16.msra.mxu0 %v9334_v59 }
  0x79   :  { %9431 = vmatpush1.bf16.msra.mxu1 %v9366_v61 }
 0x10c   :  { %v207_v45 = vpop.f32.mrb[0].mxu0  ;;  %v320_v49 = vpop.f32.mrb[0].mxu1 }
 0x10d   :  { %v208_v53 = vadd.f32 %v207_v45, %v11786_v32  ;;  %v321_v56 = vadd.f32 %v320_v49, %v11790_v36  ;;  %v209_v60 = vpop.f32.mrb[1].mxu0  ;;  %v322_v62 = vpop.f32.mrb[1].mxu1  ;;  %v11499_v49 = vmov 1966171168  }
 0x10e   :  { %v210_v63 = vadd.f32 %v209_v60, %v11794_v37  ;;  %v323_v1 = vadd.f32 %v322_v62, %v11798_v41 }
 0x10f   :  { %367 = vst [vmem:[#allocation2] sm:$0xff] %v208_v53  ;;  %369 = vst [vmem:[#allocation2 + $0x10] sm:$0xff] %v321_v56  ;;  %v629_v53 = vunpack.c.l.s4 %v11499_v49 }
 0x110   :  { %368 = vst [vmem:[#allocation2 + $0x8] sm:$0xff] %v210_v63  ;;  %370 = vst [vmem:[#allocation2 + $0x18] sm:$0xff] %v323_v1  ;;  %v213_v2 = vpop.f32.mrb[2].mxu0 }
 0x111   :  { %v214_v3 = vadd.f32 %v213_v2, %v11786_v32  ;;  %v326_v4 = vpop.f32.mrb[2].mxu1  ;;  %v215_v5 = vpop.f32.mrb[3].mxu0 }
 0x112   :  { %v327_v6 = vadd.f32 %v326_v4, %v11790_v36  ;;  %v216_v7 = vadd.f32 %v215_v5, %v11794_v37  ;;  %v328_v8 = vpop.f32.mrb[3].mxu1  ;;  %v630_v5 = vunpack.c.0.s8 %v629_v53 }
 0x113   :  { %371 = vst [vmem:[#allocation2 + $0x20] sm:$0xff] %v214_v3  ;;  %v329_v9 = vadd.f32 %v328_v8, %v11798_v41 }
 0x114   :  { %373 = vst [vmem:[#allocation2 + $0x30] sm:$0xff] %v327_v6  ;;  %372 = vst [vmem:[#allocation2 + $0x28] sm:$0xff] %v216_v7  ;;  %v219_v12 = vpop.f32.mrb[4].mxu0  ;;  %v11833_v8 = vsub.s32 %v630_v5, %v11775_v11 }
 0x115   :  { %374 = vst [vmem:[#allocation2 + $0x38] sm:$0xff] %v329_v9  ;;  %v220_v13 = vadd.f32 %v219_v12, %v11786_v32  ;;  %v332_v14 = vpop.f32.mrb[4].mxu1  ;;  %v221_v16 = vpop.f32.mrb[5].mxu0 }
 0x116   :  { %v333_v17 = vadd.f32 %v332_v14, %v11790_v36  ;;  %v222_v18 = vadd.f32 %v221_v16, %v11794_v37  ;;  %v334_v20 = vpop.f32.mrb[5].mxu1 }
 0x117   :  { %375 = vst [vmem:[#allocation2 + $0x40] sm:$0xff] %v220_v13  ;;  %v335_v21 = vadd.f32 %v334_v20, %v11798_v41 }
 0x118   :  { %377 = vst [vmem:[#allocation2 + $0x50] sm:$0xff] %v333_v17  ;;  %376 = vst [vmem:[#allocation2 + $0x48] sm:$0xff] %v222_v18  ;;  %v225_v22 = vpop.f32.mrb[6].mxu0 }
 0x119   :  { %378 = vst [vmem:[#allocation2 + $0x58] sm:$0xff] %v335_v21  ;;  %v226_v25 = vadd.f32 %v225_v22, %v11786_v32  ;;  %v338_v26 = vpop.f32.mrb[6].mxu1  ;;  %v227_v27 = vpop.f32.mrb[7].mxu0 }
 0x11a   :  { %v339_v29 = vadd.f32 %v338_v26, %v11790_v36  ;;  %v228_v30 = vadd.f32 %v227_v27, %v11794_v37  ;;  %v340_v31 = vpop.f32.mrb[7].mxu1 }
 0x11b   :  { %379 = vst [vmem:[#allocation2 + $0x60] sm:$0xff] %v226_v25  ;;  %v341_v33 = vadd.f32 %v340_v31, %v11798_v41  ;;  %v399_v31 = vld [vmem:[#allocation2] ss:$8 sm:$0xf] }
 0x11c   :  { %381 = vst [vmem:[#allocation2 + $0x70] sm:$0xff] %v339_v29  ;;  %380 = vst [vmem:[#allocation2 + $0x68] sm:$0xff] %v228_v30  ;;  %v231_v34 = vpop.f32.mrb[8].mxu0 }
 0x11d   :  { %382 = vst [vmem:[#allocation2 + $0x78] sm:$0xff] %v341_v33  ;;  %v232_v35 = vadd.f32 %v231_v34, %v11786_v32  ;;  %v344_v38 = vpop.f32.mrb[8].mxu1  ;;  %v233_v39 = vpop.f32.mrb[9].mxu0  ;;  %v401_v33 = vld [vmem:[#allocation2 + $0x20] ss:$8 sm:$0xf] }
 0x11e   :  { %v345_v40 = vadd.f32 %v344_v38, %v11790_v36  ;;  %v234_v42 = vadd.f32 %v233_v39, %v11794_v37  ;;  %v346_v43 = vpop.f32.mrb[9].mxu1 }
 0x11f   :  { %383 = vst [vmem:[#allocation2 + $0x80] sm:$0xff] %v232_v35  ;;  %v347_v44 = vadd.f32 %v346_v43, %v11798_v41 }
 0x120   :  { %385 = vst [vmem:[#allocation2 + $0x90] sm:$0xff] %v345_v40  ;;  %384 = vst [vmem:[#allocation2 + $0x88] sm:$0xff] %v234_v42  ;;  %v237_v46 = vpop.f32.mrb[10].mxu0  ;;  %v403_v34 = vld [vmem:[#allocation2 + $0x40] ss:$8 sm:$0xf] }
 0x121   :  { %386 = vst [vmem:[#allocation2 + $0x98] sm:$0xff] %v347_v44  ;;  %v238_v47 = vadd.f32 %v237_v46, %v11786_v32  ;;  %v350_v48 = vpop.f32.mrb[10].mxu1  ;;  %v239_v50 = vpop.f32.mrb[11].mxu0 }
 0x122   :  { %v351_v51 = vadd.f32 %v350_v48, %v11790_v36  ;;  %v240_v52 = vadd.f32 %v239_v50, %v11794_v37  ;;  %v352_v54 = vpop.f32.mrb[11].mxu1 }
 0x123   :  { %387 = vst [vmem:[#allocation2 + $0xa0] sm:$0xff] %v238_v47  ;;  %v353_v55 = vadd.f32 %v352_v54, %v11798_v41 }
 0x124   :  { %389 = vst [vmem:[#allocation2 + $0xb0] sm:$0xff] %v351_v51  ;;  %388 = vst [vmem:[#allocation2 + $0xa8] sm:$0xff] %v240_v52  ;;  %v243_v57 = vpop.f32.mrb[12].mxu0  ;;  %v405_v43 = vld [vmem:[#allocation2 + $0x60] ss:$8 sm:$0xf] }
 0x125   :  { %390 = vst [vmem:[#allocation2 + $0xb8] sm:$0xff] %v353_v55  ;;  %v244_v58 = vadd.f32 %v243_v57, %v11786_v32  ;;  %v356_v59 = vpop.f32.mrb[12].mxu1  ;;  %v245_v61 = vpop.f32.mrb[13].mxu0  ;;  %v883_v24 = vld [vmem:[#allocation2 + $0x61] ss:$8 sm:$0xf] }
 0x126   :  { %v357_v10 = vadd.f32 %v356_v59, %v11790_v36  ;;  %v246_v23 = vadd.f32 %v245_v61, %v11794_v37  ;;  %v358_v45 = vpop.f32.mrb[13].mxu1 }
 0x127   :  { %391 = vst [vmem:[#allocation2 + $0xc0] sm:$0xff] %v244_v58  ;;  %v359_v56 = vadd.f32 %v358_v45, %v11798_v41 }
 0x128   :  { %393 = vst [vmem:[#allocation2 + $0xd0] sm:$0xff] %v357_v10  ;;  %392 = vst [vmem:[#allocation2 + $0xc8] sm:$0xff] %v246_v23  ;;  %v249_v60 = vpop.f32.mrb[14].mxu0  ;;  %v407_v35 = vld [vmem:[#allocation2 + $0x80] ss:$8 sm:$0xf] }
 0x129   :  { %394 = vst [vmem:[#allocation2 + $0xd8] sm:$0xff] %v359_v56  ;;  %v250_v62 = vadd.f32 %v249_v60, %v11786_v32  ;;  %v362_v63 = vpop.f32.mrb[14].mxu1  ;;  %v251_v1 = vpop.f32.mrb[15].mxu0 }
 0x12a   :  { %v363_v2 = vadd.f32 %v362_v63, %v11790_v36  ;;  %v252_v3 = vadd.f32 %v251_v1, %v11794_v37  ;;  %v364_v4 = vpop.f32.mrb[15].mxu1 }
 0x12b   :  { %395 = vst [vmem:[#allocation2 + $0xe0] sm:$0xff] %v250_v62  ;;  %v365_v6 = vadd.f32 %v364_v4, %v11798_v41 }
 0x12c   :  { %397 = vst [vmem:[#allocation2 + $0xf0] sm:$0xff] %v363_v2  ;;  %396 = vst [vmem:[#allocation2 + $0xe8] sm:$0xff] %v252_v3  ;;  %v409_v44 = vld [vmem:[#allocation2 + $0xa0] ss:$8 sm:$0xf] }
 0x12d   :  { %398 = vst [vmem:[#allocation2 + $0xf8] sm:$0xff] %v365_v6 }
 0x12e   :  { %v544_v7 = vpop.f32.mrb[16].mxu0 }
 0x12f   :  { %v615_v9 = vpop.f32.mrb[16].mxu1  ;;  %v546_v32 = vpop.f32.mrb[17].mxu0 }
 0x130   :  { %v624_v12 = vcombine.low %v544_v7, %v546_v32  ;;  %v625_v13 = vcombine.high %v544_v7, %v546_v32  ;;  %v617_v14 = vpop.f32.mrb[17].mxu1  ;;  %v411_v50 = vld [vmem:[#allocation2 + $0xc0] ss:$8 sm:$0xf] }
 0x131   :  { %v626_v36 = vcombine.low %v615_v9, %v617_v14  ;;  %v627_v16 = vcombine.high %v615_v9, %v617_v14 }
 0x132   :  { %v634_v37 = vrot.slane %v624_v12, %v11833_v8  ;;  %v641_v17 = vrot.slane %v625_v13, %v11833_v8 }
 0x133   :  { %v648_v41 = vrot.slane %v626_v36, %v11833_v8  ;;  %v655_v18 = vrot.slane %v627_v16, %v11833_v8 }
 0x134   :  { %v413_v51 = vld [vmem:[#allocation2 + $0xe0] ss:$8 sm:$0xf]  ;;  %v891_v19 = vld [vmem:[#allocation2 + $0xe1] ss:$8 sm:$0xf] }
 0x135   :  { %v656_v20 = vcombine.low %v634_v37, %v648_v41  ;;  %v657_v21 = vcombine.high %v634_v37, %v648_v41  ;;  %v658_v22 = vcombine.low %v641_v17, %v655_v18  ;;  %v659_v25 = vcombine.high %v641_v17, %v655_v18 }
 0x137   :  { %v666_v26 = vrot.slane %v656_v20, %v11833_v8  ;;  %v673_v27 = vrot.slane %v658_v22, %v11833_v8  ;;  %v680_v29 = vrot.slane %v657_v21, %v11833_v8  ;;  %v687_v30 = vrot.slane %v659_v25, %v11833_v8 }
 0x139   :  { %v688_v38 = vcombine.high %v666_v26, %v666_v26  ;;  %v689_v39 = vcombine.high %v673_v27, %v673_v27  ;;  %v690_v40 = vcombine.high %v680_v29, %v680_v29  ;;  %v691_v42 = vcombine.high %v687_v30, %v687_v30 }
 0x13a   :  { %v700_v46 = vadd.f32 %v666_v26, %v399_v31  ;;  %v701_v47 = vadd.f32 %v680_v29, %v401_v33  ;;  %v704_v48 = vadd.f32 %v673_v27, %v407_v35  ;;  %v705_v55 = vadd.f32 %v687_v30, %v409_v44 }
 0x13b   :  { %v702_v52 = vadd.f32 %v688_v38, %v403_v34  ;;  %v703_v54 = vadd.f32 %v690_v40, %v405_v43  ;;  %v706_v57 = vadd.f32 %v689_v39, %v411_v50  ;;  %v707_v61 = vadd.f32 %v691_v42, %v413_v51 }
 0x13c   :  { %v9176_v58 = vmul.f32 -1.442695, %v700_v46  ;;  %v9177_v59 = vmul.f32 -1.442695, %v701_v47  ;;  %v9180_v45 = vmul.f32 -1.442695, %v704_v48 }
 0x13d   :  { %v9178_v10 = vmul.f32 -1.442695, %v702_v52  ;;  %v9179_v23 = vmul.f32 -1.442695, %v703_v54  ;;  %v9181_v49 = vmul.f32 -1.442695, %v705_v55 }
 0x13e   :  { %10399 = vpow2.f32 %v9176_v58  ;;  %v9182_v53 = vmul.f32 -1.442695, %v706_v57  ;;  %v9183_v56 = vmul.f32 -1.442695, %v707_v61  ;;  %v764_v60 = vrot.slane %v700_v46, 3 }
 0x13f   :  { %10401 = vpow2.f32 %v9177_v59  ;;  %v765_v62 = vrot.slane %v701_v47, 3  ;;  %v766_v63 = vrot.slane %v702_v52, 3  ;;  %v767_v1 = vrot.slane %v703_v54, 3 }
 0x140   :  { %10403 = vpow2.f32 %v9178_v10  ;;  %v768_v2 = vrot.slane %v704_v48, 3  ;;  %v769_v18 = vrot.slane %v705_v55, 3  ;;  %v770_v22 = vrot.slane %v706_v57, 3 }
 0x141   :  { %10405 = vpow2.f32 %v9179_v23  ;;  %v771_v26 = vrot.slane %v707_v61, 3 }
 0x142   :  { %10407 = vpow2.f32 %v9180_v45 }
 0x143   :  { %10409 = vpow2.f32 %v9181_v49 }
 0x144   :  { %10411 = vpow2.f32 %v9182_v53 }
 0x145   :  { %10413 = vpow2.f32 %v9183_v56 }
 0x146   :  { %10415 = vtanh.f32 %v764_v60 }
 0x147   :  { %10417 = vtanh.f32 %v765_v62 }
 0x148   :  { %v10400_v3 = vpop.eup %10399  ;;  %10419 = vtanh.f32 %v766_v63 }
 0x149   :  { %v10402_v4 = vpop.eup %10401  ;;  %v732_v5 = vadd.f32 1.0, %v10400_v3  ;;  %10421 = vtanh.f32 %v767_v1 }
 0x14a   :  { %v10404_v6 = vpop.eup %10403  ;;  %v733_v7 = vadd.f32 1.0, %v10402_v4  ;;  %10423 = vtanh.f32 %v768_v2 }
 0x14b   :  { %v10406_v9 = vpop.eup %10405  ;;  %v734_v32 = vadd.f32 1.0, %v10404_v6  ;;  %10425 = vrcp.f32 %v732_v5 }
 0x14c   :  { %v10408_v12 = vpop.eup %10407  ;;  %v735_v13 = vadd.f32 1.0, %v10406_v9  ;;  %10427 = vrcp.f32 %v733_v7 }
 0x14d   :  { %v10410_v14 = vpop.eup %10409  ;;  %v736_v36 = vadd.f32 1.0, %v10408_v12  ;;  %10429 = vrcp.f32 %v734_v32 }
 0x14e   :  { %v10412_v16 = vpop.eup %10411  ;;  %v737_v37 = vadd.f32 1.0, %v10410_v14  ;;  %10431 = vrcp.f32 %v735_v13 }
 0x14f   :  { %v10414_v17 = vpop.eup %10413  ;;  %v738_v41 = vadd.f32 1.0, %v10412_v16  ;;  %10433 = vrcp.f32 %v736_v36 }
 0x150   :  { %v10416_v20 = vpop.eup %10415  ;;  %v739_v21 = vadd.f32 1.0, %v10414_v17  ;;  %10435 = vrcp.f32 %v737_v37 }
 0x151   :  { %v10418_v25 = vpop.eup %10417  ;;  %10437 = vrcp.f32 %v738_v41 }
 0x152   :  { %v10420_v27 = vpop.eup %10419  ;;  %10439 = vrcp.f32 %v739_v21 }
 0x153   :  { %v10422_v29 = vpop.eup %10421  ;;  %10441 = vtanh.f32 %v769_v18 }
 0x154   :  { %v10424_v30 = vpop.eup %10423  ;;  %10443 = vtanh.f32 %v770_v22 }
 0x155   :  { %v10426_v31 = vpop.eup %10425  ;;  %10445 = vtanh.f32 %v771_v26 }
 0x156   :  { %v10428_v33 = vpop.eup %10427  ;;  %v796_v34 = vrot.slane %v10426_v31, 1  ;;  %v820_v43 = vmul.f32 %v10426_v31, %v10416_v20  ;;  %v844_v36 = vrot.slane %v10426_v31, 2 }
 0x157   :  { %v10430_v35 = vpop.eup %10429  ;;  %v797_v38 = vrot.slane %v10428_v33, 1  ;;  %v821_v48 = vmul.f32 %v10428_v33, %v10418_v25  ;;  %v845_v37 = vrot.slane %v10428_v33, 2 }
 0x158   :  { %v10432_v39 = vpop.eup %10431  ;;  %v798_v40 = vrot.slane %v10430_v35, 1  ;;  %v812_v42 = vmul.f32 0.0, %v796_v34  ;;  %v822_v50 = vmul.f32 %v10430_v35, %v10420_v27  ;;  %v846_v41 = vrot.slane %v10430_v35, 2 }
 0x159   :  { %v10434_v44 = vpop.eup %10433  ;;  %v799_v46 = vrot.slane %v10432_v39, 1  ;;  %v813_v47 = vmul.f32 0.0, %v797_v38  ;;  %v823_v55 = vmul.f32 %v10432_v39, %v10422_v29  ;;  %v847_v21 = vrot.slane %v10432_v39, 2 }
 0x15a   :  { %v11843_v51 = vpop.eup %10435  ;;  %v800_v52 = vrot.slane %v10434_v44, 1  ;;  %v814_v54 = vmul.f32 0.0, %v798_v40  ;;  %v11845_v57 = vadd.f32 %v820_v43, %v812_v42  ;;  %v824_v10 = vmul.f32 %v10434_v44, %v10424_v30 }
 0x15b   :  { %v10438_v58 = vpop.eup %10437  ;;  %v801_v59 = vrot.slane %v11843_v51, 1  ;;  %v815_v61 = vmul.f32 0.0, %v799_v46  ;;  %v11848_v23 = vadd.f32 %v821_v48, %v813_v47  ;;  %v848_v26 = vrot.slane %v10434_v44, 2 }
 0x15c   :  { %v10440_v45 = vpop.eup %10439  ;;  %v802_v49 = vrot.slane %v10438_v58, 1  ;;  %v816_v53 = vmul.f32 0.0, %v800_v52  ;;  %v11850_v56 = vadd.f32 %v822_v50, %v814_v54  ;;  %10447 = vtanh.f32 %v11845_v57 }
 0x15d   :  { %v10442_v60 = vpop.eup %10441  ;;  %v803_v62 = vrot.slane %v10440_v45, 1  ;;  %v817_v63 = vmul.f32 0.0, %v801_v59  ;;  %v11853_v1 = vadd.f32 %v823_v55, %v815_v61  ;;  %10449 = vtanh.f32 %v11848_v23 }
 0x15e   :  { %v10444_v2 = vpop.eup %10443  ;;  %v818_v3 = vmul.f32 0.0, %v802_v49  ;;  %v825_v4 = vmul.f32 %v10442_v60, %v11843_v51  ;;  %v11857_v5 = vadd.f32 %v824_v10, %v816_v53  ;;  %10451 = vtanh.f32 %v11850_v56  ;;  %v1429_v49 = vld [vmem:[#allocation3 + $0x8] sm:$0xff]  ;;  %v1431_v60 = vld [vmem:[#allocation3 + $0x18] sm:$0xff] }
 0x15f   :  { %v10446_v6 = vpop.eup %10445  ;;  %v819_v7 = vmul.f32 0.0, %v803_v62  ;;  %v826_v9 = vmul.f32 %v10444_v2, %v10438_v58  ;;  %10453 = vtanh.f32 %v11853_v1  ;;  %v849_v33 = vrot.slane %v11843_v51, 2  ;;  %v1433_v53 = vld [vmem:[#allocation3 + $0x28] sm:$0xff]  ;;  %v1428_v2 = vld [vmem:[#allocation3] sm:$0xff] }
 0x160   :  { %v827_v32 = vmul.f32 %v10446_v6, %v10440_v45  ;;  %v11861_v12 = vadd.f32 %v825_v4, %v817_v63  ;;  %10455 = vtanh.f32 %v11857_v5  ;;  %v850_v38 = vrot.slane %v10438_v58, 2  ;;  %v1435_v63 = vld [vmem:[#allocation3 + $0x38] sm:$0xff] }
 0x161   :  { %v11864_v13 = vadd.f32 %v826_v9, %v818_v3  ;;  %v851_v42 = vrot.slane %v10440_v45, 2  ;;  %v11904_v62 = vpack.c.bf16 %v1433_v53, %v1429_v49  ;;  %v1432_v3 = vld [vmem:[#allocation3 + $0x20] sm:$0xff]  ;;  %v11906_v4 = vpack.c.bf16 %v1435_v63, %v1431_v60  ;;  %v1434_v9 = vld [vmem:[#allocation3 + $0x30] sm:$0xff]  ;;  %v1467_v49 = vld [vmem:[#allocation3 + $0x138] sm:$0xff] }
 0x162   :  { %v11866_v14 = vadd.f32 %v827_v32, %v819_v7  ;;  %10457 = vtanh.f32 %v11861_v12  ;;  %v11908_v6 = vpack.c.bf16 %v1432_v3, %v1428_v2  ;;  %v1430_v7 = vld [vmem:[#allocation3 + $0x10] sm:$0xff]  ;;  %v1437_v32 = vld [vmem:[#allocation3 + $0x48] sm:$0xff]  ;;  %v1460_v2 = vld [vmem:[#allocation3 + $0x100] sm:$0xff] }
 0x163   :  { %10459 = vtanh.f32 %v11864_v13  ;;  %9433 = vmatprep.subr.bf16.mxu0 %v11904_v62  ;;  %9465 = vmatprep.subr.bf16.mxu1 %v11906_v4  ;;  %v1464_v3 = vld [vmem:[#allocation3 + $0x120] sm:$0xff] }
 0x164   :  { %10461 = vtanh.f32 %v11866_v14 }
 0x166   :  { %v10448_v16 = vpop.eup %10447 }
 0x167   :  { %v10450_v17 = vpop.eup %10449  ;;  %v860_v18 = vmul.f32 %v10448_v16, %v844_v36  ;;  %v11911_v36 = vpack.c.bf16 %v1434_v9, %v1430_v7  ;;  %v1441_v16 = vld [vmem:[#allocation3 + $0x68] sm:$0xff]  ;;  %v1462_v7 = vld [vmem:[#allocation3 + $0x110] sm:$0xff] }
 0x168   :  { %v10452_v20 = vpop.eup %10451  ;;  %v861_v22 = vmul.f32 %v10450_v17, %v845_v37  ;;  %v1439_v37 = vld [vmem:[#allocation3 + $0x58] sm:$0xff] }
 0x169   :  { %v10454_v25 = vpop.eup %10453  ;;  %v862_v27 = vmul.f32 %v10452_v20, %v846_v41  ;;  %868 = vst [vmem:[%s13974_s7] sm:$0x1] %v860_v18  ;;  %v1443_v17 = vld [vmem:[#allocation3 + $0x78] sm:$0xff]  ;;  %v11915_v41 = vpack.c.bf16 %v1441_v16, %v1437_v32  ;;  %v1436_v20 = vld [vmem:[#allocation3 + $0x40] sm:$0xff]  ;;  %v1466_v32 = vld [vmem:[#allocation3 + $0x130] sm:$0xff] }
 0x16a   :  { %v10456_v29 = vpop.eup %10455  ;;  %v863_v30 = vmul.f32 %v10454_v25, %v847_v21  ;;  %869 = vst [vmem:[%s13974_s7 + $0x8] sm:$0x1] %v861_v22  ;;  %v964_v31 = vcombine.low %v860_v18, %v861_v22  ;;  %v11917_v18 = vpack.c.bf16 %v1443_v17, %v1439_v37  ;;  %v1440_v21 = vld [vmem:[#allocation3 + $0x60] sm:$0xff]  ;;  %v1438_v22 = vld [vmem:[#allocation3 + $0x50] sm:$0xff]  ;;  %v1469_v16 = vld [vmem:[#allocation3 + $0x148] sm:$0xff] }
 0x16b   :  { %v864_v34 = vmul.f32 %v10456_v29, %v848_v26  ;;  %870 = vst [vmem:[%s13974_s7 + $0x10] sm:$0x1] %v862_v27  ;;  %v11920_v25 = vpack.c.bf16 %v1440_v21, %v1436_v20  ;;  %v1442_v26 = vld [vmem:[#allocation3 + $0x70] sm:$0xff]  ;;  %v1449_v29 = vld [vmem:[#allocation3 + $0xa8] sm:$0xff]  ;;  %v1471_v17 = vld [vmem:[#allocation3 + $0x158] sm:$0xff]  ;;  %v11955_v21 = vpack.c.bf16 %v1464_v3, %v1460_v2 }
 0x16c   :  { %v10458_v35 = vpop.eup %10457  ;;  %871 = vst [vmem:[%s13974_s7 + $0x18] sm:$0x1] %v863_v30  ;;  %v965_v39 = vcombine.low %v862_v27, %v863_v30  ;;  %v974_v47 = vrot.slane %v964_v31, %v11833_v8  ;;  %v1445_v27 = vld [vmem:[#allocation3 + $0x88] sm:$0xff]  ;;  %v11924_v30 = vpack.c.bf16 %v1442_v26, %v1438_v22  ;;  %v1475_v20 = vld [vmem:[#allocation3 + $0x178] sm:$0xff]  ;;  %v11959_v22 = vpack.c.bf16 %v1466_v32, %v1462_v7 }
 0x16d   :  { %v10460_v40 = vpop.eup %10459  ;;  %v865_v43 = vmul.f32 %v10458_v35, %v849_v33  ;;  %872 = vst [vmem:[%s13974_s7 + $0x20] sm:$0x1] %v864_v34  ;;  %v11926_v31 = vpack.c.bf16 %v1449_v29, %v1445_v27  ;;  %v1447_v33 = vld [vmem:[#allocation3 + $0x98] sm:$0xff]  ;;  %v1444_v35 = vld [vmem:[#allocation3 + $0x80] sm:$0xff]  ;;  %v1473_v37 = vld [vmem:[#allocation3 + $0x168] sm:$0xff] }
 0x16e   :  { %v10462_v44 = vpop.eup %10461  ;;  %v866_v46 = vmul.f32 %v10460_v40, %v850_v38  ;;  %v981_v48 = vrot.slane %v965_v39, %v11833_v8  ;;  %v1448_v39 = vld [vmem:[#allocation3 + $0xa0] sm:$0xff]  ;;  %v1446_v40 = vld [vmem:[#allocation3 + $0x90] sm:$0xff]  ;;  %v11961_v26 = vpack.c.bf16 %v1473_v37, %v1469_v16  ;;  %v1491_v2 = vld [vmem:[#allocation3 + $0x1f8] sm:$0xff] }
 0x16f   :  { %v867_v50 = vmul.f32 %v10462_v44, %v851_v42  ;;  %873 = vst [vmem:[%s13974_s7 + $0x28] sm:$0x1] %v865_v43  ;;  %v966_v51 = vcombine.low %v864_v34, %v865_v43  ;;  %v1451_v34 = vld [vmem:[#allocation3 + $0xb8] sm:$0xff]  ;;  %v1450_v42 = vld [vmem:[#allocation3 + $0xb0] sm:$0xff]  ;;  %v11931_v43 = vpack.c.bf16 %v1448_v39, %v1444_v35  ;;  %v1453_v44 = vld [vmem:[#allocation3 + $0xc8] sm:$0xff] }
 0x170   :  { %874 = vst [vmem:[%s13974_s7 + $0x30] sm:$0x1] %v866_v46  ;;  %v996_v52 = vcombine.low %v974_v47, %v981_v48  ;;  %v11928_v38 = vpack.c.bf16 %v1451_v34, %v1447_v33  ;;  %v1455_v47 = vld [vmem:[#allocation3 + $0xd8] sm:$0xff]  ;;  %v11935_v48 = vpack.c.bf16 %v1450_v42, %v1446_v40  ;;  %v1468_v27 = vld [vmem:[#allocation3 + $0x140] sm:$0xff]  ;;  %v1470_v33 = vld [vmem:[#allocation3 + $0x150] sm:$0xff]  ;;  %v11964_v34 = vpack.c.bf16 %v1475_v20, %v1471_v17 }
 0x171   :  { %875 = vst [vmem:[%s13974_s7 + $0x38] sm:$0x1] %v867_v50  ;;  %v967_v54 = vcombine.low %v866_v46, %v867_v50  ;;  %v988_v55 = vrot.slane %v966_v51, %v11833_v8  ;;  %v1457_v46 = vld [vmem:[#allocation3 + $0xe8] sm:$0xff]  ;;  %v1459_v51 = vld [vmem:[#allocation3 + $0xf8] sm:$0xff]  ;;  %v1472_v29 = vld [vmem:[#allocation3 + $0x160] sm:$0xff] }
 0x172   :  { %v1004_v61 = vrot.slane %v996_v52, %v11833_v8  ;;  %v11937_v50 = vpack.c.bf16 %v1457_v46, %v1453_v44  ;;  %v1452_v52 = vld [vmem:[#allocation3 + $0xc0] sm:$0xff]  ;;  %v1474_v35 = vld [vmem:[#allocation3 + $0x170] sm:$0xff]  ;;  %v1477_v39 = vld [vmem:[#allocation3 + $0x188] sm:$0xff]  ;;  %v11967_v46 = vpack.c.bf16 %v1472_v29, %v1468_v27 }
 0x173   :  { %v995_v58 = vrot.slane %v967_v54, %v11833_v8  ;;  %v1456_v54 = vld [vmem:[#allocation3 + $0xe0] sm:$0xff]  ;;  %v1481_v40 = vld [vmem:[#allocation3 + $0x1a8] sm:$0xff]  ;;  %v1479_v42 = vld [vmem:[#allocation3 + $0x198] sm:$0xff] }
 0x174   :  { %v11943_v53 = vpack.c.bf16 %v1456_v54, %v1452_v52  ;;  %v1483_v44 = vld [vmem:[#allocation3 + $0x1b8] sm:$0xff]  ;;  %v1476_v52 = vld [vmem:[#allocation3 + $0x180] sm:$0xff]  ;;  %v1486_v20 = vld [vmem:[#allocation3 + $0x1d0] sm:$0xff] }
 0x175   :  { %v997_v59 = vcombine.low %v988_v55, %v995_v58  ;;  %v11940_v55 = vpack.c.bf16 %v1459_v51, %v1455_v47  ;;  %v1454_v58 = vld [vmem:[#allocation3 + $0xd0] sm:$0xff]  ;;  %v11971_v47 = vpack.c.bf16 %v1474_v35, %v1470_v33  ;;  %v11973_v51 = vpack.c.bf16 %v1481_v40, %v1477_v39  ;;  %v1480_v54 = vld [vmem:[#allocation3 + $0x1a0] sm:$0xff] }
 0x176   :  { %v11979_v3 = vpack.c.bf16 %v1480_v54, %v1476_v52  ;;  %v1484_v16 = vld [vmem:[#allocation3 + $0x1c0] sm:$0xff]  ;;  %v1490_v27 = vld [vmem:[#allocation3 + $0x1f0] sm:$0xff] }
 0x177   :  { %v1011_v10 = vrot.slane %v997_v59, %v11833_v8  ;;  %v1458_v59 = vld [vmem:[#allocation3 + $0xf0] sm:$0xff]  ;;  %v1488_v37 = vld [vmem:[#allocation3 + $0x1e0] sm:$0xff]  ;;  %v11995_v33 = vpack.c.bf16 %v1490_v27, %v1486_v20 }
 0x178   :  { %v11947_v60 = vpack.c.bf16 %v1458_v59, %v1454_v58  ;;  %v1478_v58 = vld [vmem:[#allocation3 + $0x190] sm:$0xff]  ;;  %v11976_v59 = vpack.c.bf16 %v1483_v44, %v1479_v42  ;;  %14026 = vst [vmem:[#allocation11_spill] sm:$0xff] %v11979_v3  ;;  %v11991_v29 = vpack.c.bf16 %v1488_v37, %v1484_v16 }
 0x179   :  { %v1012_v45 = vcombine.low %v1004_v61, %v1011_v10  ;;  %v1461_v61 = vld [vmem:[#allocation3 + $0x108] sm:$0xff]  ;;  %14031 = vst [vmem:[#allocation16_spill] sm:$0xff] %v11995_v33 }
 0x17a   :  { %v1465_v10 = vld [vmem:[#allocation3 + $0x128] sm:$0xff]  ;;  %14030 = vst [vmem:[#allocation15_spill] sm:$0xff] %v11991_v29 }
 0x17b   :  { %1079 = vmatmul.mubr.f32.vlgmr.msra.gmra.mrb[18].mxu0 %v1012_v45  ;;  %1150 = vmatmul.mubr.f32.vlgmr.msra.gmra.mrb[18].mxu1 %v1012_v45  ;;  %v1463_v45 = vld [vmem:[#allocation3 + $0x118] sm:$0xff]  ;;  %v11949_v63 = vpack.c.bf16 %v1465_v10, %v1461_v61  ;;  %v1482_v61 = vld [vmem:[#allocation3 + $0x1b0] sm:$0xff]  ;;  %v1485_v10 = vld [vmem:[#allocation3 + $0x1c8] sm:$0xff] }
 0x17c   :  { %1614 = vmatprep.mubr.f32.mxu0 %v13980_v0  ;;  %1685 = vmatprep.mubr.f32.mxu1 %v13980_v0  ;;  %v11952_v9 = vpack.c.bf16 %v1467_v49, %v1463_v45  ;;  %v1489_v45 = vld [vmem:[#allocation3 + $0x1e8] sm:$0xff]  ;;  %v1487_v49 = vld [vmem:[#allocation3 + $0x1d8] sm:$0xff]  ;;  %v11983_v7 = vpack.c.bf16 %v1482_v61, %v1478_v58 }
 0x17d   :  { %9435 = vmatpush1.bf16.msra.mxu0 %v11908_v6  ;;  %9467 = vmatpush1.bf16.msra.mxu1 %v11911_v36  ;;  %v11985_v32 = vpack.c.bf16 %v1489_v45, %v1485_v10  ;;  %v11988_v17 = vpack.c.bf16 %v1491_v2, %v1487_v49 }
 0x17e   :  { %9437 = vmatprep.subr.bf16.mxu0 %v11915_v41  ;;  %9469 = vmatprep.subr.bf16.mxu1 %v11917_v18  ;;  %14027 = vst [vmem:[#allocation12_spill] sm:$0xff] %v11983_v7 }
 0x17f   :  { %14028 = vst [vmem:[#allocation13_spill] sm:$0xff] %v11985_v32  ;;  %14029 = vst [vmem:[#allocation14_spill] sm:$0xff] %v11988_v17 }
 0x181   :  { %9439 = vmatpush1.bf16.msra.mxu0 %v11920_v25  ;;  %9471 = vmatpush1.bf16.msra.mxu1 %v11924_v30 }
 0x182   :  { %9441 = vmatprep.subr.bf16.mxu0 %v11926_v31  ;;  %9473 = vmatprep.subr.bf16.mxu1 %v11928_v38 }
 0x185   :  { %9443 = vmatpush1.bf16.msra.mxu0 %v11931_v43  ;;  %9475 = vmatpush1.bf16.msra.mxu1 %v11935_v48 }
 0x186   :  { %9445 = vmatprep.subr.bf16.mxu0 %v11937_v50  ;;  %9477 = vmatprep.subr.bf16.mxu1 %v11940_v55 }
 0x189   :  { %9447 = vmatpush1.bf16.msra.mxu0 %v11943_v53  ;;  %9479 = vmatpush1.bf16.msra.mxu1 %v11947_v60 }
 0x18a   :  { %9449 = vmatprep.subr.bf16.mxu0 %v11949_v63  ;;  %9481 = vmatprep.subr.bf16.mxu1 %v11952_v9 }
 0x18d   :  { %9451 = vmatpush1.bf16.msra.mxu0 %v11955_v21  ;;  %9483 = vmatpush1.bf16.msra.mxu1 %v11959_v22 }
 0x18e   :  { %9453 = vmatprep.subr.bf16.mxu0 %v11961_v26  ;;  %9485 = vmatprep.subr.bf16.mxu1 %v11964_v34 }
 0x191   :  { %9455 = vmatpush1.bf16.msra.mxu0 %v11967_v46  ;;  %9487 = vmatpush1.bf16.msra.mxu1 %v11971_v47 }
 0x192   :  { %9457 = vmatprep.subr.bf16.mxu0 %v11973_v51  ;;  %9489 = vmatprep.subr.bf16.mxu1 %v11976_v59 }
 0x195   :  { %9459 = vmatpush1.bf16.msra.mxu0 %v11979_v3  ;;  %9491 = vmatpush1.bf16.msra.mxu1 %v11983_v7 }
 0x196   :  { %9461 = vmatprep.subr.bf16.mxu0 %v11985_v32  ;;  %9493 = vmatprep.subr.bf16.mxu1 %v11988_v17 }
 0x199   :  { %9463 = vmatpush1.bf16.msra.mxu0 %v11991_v29  ;;  %9495 = vmatpush1.bf16.msra.mxu1 %v11995_v33 }
 0x19a   :  { %9497 = vmatprep.subr.bf16.mxu0 %v11904_v62  ;;  %9529 = vmatprep.subr.bf16.mxu1 %v11906_v4 }
 0x24e   :  { %v1080_v35 = vpop.f32.mrb[18].mxu0  ;;  %v1151_v39 = vpop.f32.mrb[18].mxu1 }
 0x24f   :  { %v1082_v40 = vpop.f32.mrb[19].mxu0  ;;  %v1153_v42 = vpop.f32.mrb[19].mxu1 }
 0x250   :  { %v1160_v44 = vcombine.low %v1080_v35, %v1082_v40  ;;  %v1161_v52 = vcombine.high %v1080_v35, %v1082_v40  ;;  %v1162_v54 = vcombine.low %v1151_v39, %v1153_v42  ;;  %v1163_v58 = vcombine.high %v1151_v39, %v1153_v42  ;;  %v877_v39 = vld [vmem:[#allocation2 + $0x1] ss:$8 sm:$0xf] }
 0x251   :  { %v879_v40 = vld [vmem:[#allocation2 + $0x21] ss:$8 sm:$0xf] }
 0x252   :  { %v1170_v61 = vrot.slane %v1160_v44, %v11833_v8  ;;  %v1177_v10 = vrot.slane %v1161_v52, %v11833_v8  ;;  %v1184_v45 = vrot.slane %v1162_v54, %v11833_v8  ;;  %v1191_v49 = vrot.slane %v1163_v58, %v11833_v8  ;;  %v881_v42 = vld [vmem:[#allocation2 + $0x41] ss:$8 sm:$0xf] }
 0x253   :  { %v885_v44 = vld [vmem:[#allocation2 + $0x81] ss:$8 sm:$0xf] }
 0x254   :  { %v1192_v2 = vcombine.low %v1170_v61, %v1184_v45  ;;  %v1193_v62 = vcombine.high %v1170_v61, %v1184_v45  ;;  %v1194_v16 = vcombine.low %v1177_v10, %v1191_v49  ;;  %v1195_v4 = vcombine.high %v1177_v10, %v1191_v49  ;;  %v887_v61 = vld [vmem:[#allocation2 + $0xa1] ss:$8 sm:$0xf] }
 0x256   :  { %v1202_v37 = vrot.slane %v1192_v2, %v11833_v8  ;;  %v1209_v20 = vrot.slane %v1194_v16, %v11833_v8  ;;  %v1216_v27 = vrot.slane %v1193_v62, %v11833_v8  ;;  %v1223_v35 = vrot.slane %v1195_v4, %v11833_v8  ;;  %v889_v2 = vld [vmem:[#allocation2 + $0xc1] ss:$8 sm:$0xf] }
 0x258   :  { %v1224_v52 = vcombine.high %v1202_v37, %v1202_v37  ;;  %v1225_v54 = vcombine.high %v1209_v20, %v1209_v20  ;;  %v1226_v28 = vcombine.high %v1216_v27, %v1216_v27  ;;  %v1227_v58 = vcombine.high %v1223_v35, %v1223_v35 }
 0x259   :  { %v1236_v45 = vadd.f32 %v1202_v37, %v877_v39  ;;  %v1237_v10 = vadd.f32 %v1216_v27, %v879_v40  ;;  %v1240_v49 = vadd.f32 %v1209_v20, %v885_v44  ;;  %v1241_v62 = vadd.f32 %v1223_v35, %v887_v61 }
 0x25a   :  { %v1238_v16 = vadd.f32 %v1224_v52, %v881_v42  ;;  %v1239_v15 = vadd.f32 %v1226_v28, %v883_v24  ;;  %v1242_v0 = vadd.f32 %v1225_v54, %v889_v2  ;;  %v1243_v33 = vadd.f32 %v1227_v58, %v891_v19 }
 0x25b   :  { %v9184_v4 = vmul.f32 -1.442695, %v1236_v45  ;;  %v9185_v11 = vmul.f32 -1.442695, %v1237_v10  ;;  %v9188_v32 = vmul.f32 -1.442695, %v1240_v49 }
 0x25c   :  { %v9186_v29 = vmul.f32 -1.442695, %v1238_v16  ;;  %v9187_v17 = vmul.f32 -1.442695, %v1239_v15  ;;  %v9189_v7 = vmul.f32 -1.442695, %v1241_v62 }
 0x25d   :  { %10463 = vpow2.f32 %v9184_v4  ;;  %v9190_v3 = vmul.f32 -1.442695, %v1242_v0  ;;  %v9191_v37 = vmul.f32 -1.442695, %v1243_v33  ;;  %v1300_v20 = vrot.slane %v1236_v45, 3 }
 0x25e   :  { %10465 = vpow2.f32 %v9185_v11  ;;  %v1301_v27 = vrot.slane %v1237_v10, 3  ;;  %v1302_v24 = vrot.slane %v1238_v16, 3  ;;  %v1303_v28 = vrot.slane %v1239_v15, 3 }
 0x25f   :  { %10467 = vpow2.f32 %v9186_v29  ;;  %v1304_v35 = vrot.slane %v1240_v49, 3  ;;  %v1305_v61 = vrot.slane %v1241_v62, 3  ;;  %v1306_v49 = vrot.slane %v1242_v0, 3 }
 0x260   :  { %10469 = vpow2.f32 %v9187_v17  ;;  %v1307_v16 = vrot.slane %v1243_v33, 3 }
 0x261   :  { %10471 = vpow2.f32 %v9188_v32 }
 0x262   :  { %10473 = vpow2.f32 %v9189_v7 }
 0x263   :  { %10475 = vpow2.f32 %v9190_v3 }
 0x264   :  { %10477 = vpow2.f32 %v9191_v37 }
 0x265   :  { %10479 = vtanh.f32 %v1300_v20 }
 0x266   :  { %10481 = vtanh.f32 %v1301_v27 }
 0x267   :  { %v10464_v19 = vpop.eup %10463  ;;  %10483 = vtanh.f32 %v1302_v24 }
 0x268   :  { %v10466_v39 = vpop.eup %10465  ;;  %v1268_v11 = vadd.f32 1.0, %v10464_v19  ;;  %10485 = vtanh.f32 %v1303_v28 }
 0x269   :  { %v10468_v29 = vpop.eup %10467  ;;  %v1269_v40 = vadd.f32 1.0, %v10466_v39  ;;  %10487 = vtanh.f32 %v1304_v35 }
 0x26a   :  { %v10470_v17 = vpop.eup %10469  ;;  %v1270_v32 = vadd.f32 1.0, %v10468_v29  ;;  %10489 = vrcp.f32 %v1268_v11 }
 0x26b   :  { %v10472_v7 = vpop.eup %10471  ;;  %v1271_v42 = vadd.f32 1.0, %v10470_v17  ;;  %10491 = vrcp.f32 %v1269_v40 }
 0x26c   :  { %v10474_v3 = vpop.eup %10473  ;;  %v1272_v44 = vadd.f32 1.0, %v10472_v7  ;;  %10493 = vrcp.f32 %v1270_v32 }
 0x26d   :  { %v10476_v15 = vpop.eup %10475  ;;  %v1273_v52 = vadd.f32 1.0, %v10474_v3  ;;  %10495 = vrcp.f32 %v1271_v42 }
 0x26e   :  { %v10478_v54 = vpop.eup %10477  ;;  %v1274_v58 = vadd.f32 1.0, %v10476_v15  ;;  %10497 = vrcp.f32 %v1272_v44 }
 0x26f   :  { %v10480_v45 = vpop.eup %10479  ;;  %v1275_v10 = vadd.f32 1.0, %v10478_v54  ;;  %10499 = vrcp.f32 %v1273_v52 }
 0x270   :  { %v10482_v2 = vpop.eup %10481  ;;  %10501 = vrcp.f32 %v1274_v58 }
 0x271   :  { %v10484_v4 = vpop.eup %10483  ;;  %10503 = vrcp.f32 %v1275_v10 }
 0x272   :  { %v10486_v37 = vpop.eup %10485  ;;  %10505 = vtanh.f32 %v1305_v61 }
 0x273   :  { %v10488_v20 = vpop.eup %10487  ;;  %10507 = vtanh.f32 %v1306_v49 }
 0x274   :  { %v10490_v27 = vpop.eup %10489  ;;  %10509 = vtanh.f32 %v1307_v16 }
 0x275   :  { %v10492_v24 = vpop.eup %10491  ;;  %v1332_v28 = vrot.slane %v10490_v27, 1  ;;  %v1356_v0 = vmul.f32 %v10490_v27, %v10480_v45 }
 0x276   :  { %v10494_v35 = vpop.eup %10493  ;;  %v1333_v19 = vrot.slane %v10492_v24, 1  ;;  %v1357_v17 = vmul.f32 %v10492_v24, %v10482_v2 }
 0x277   :  { %v10496_v62 = vpop.eup %10495  ;;  %v1334_v39 = vrot.slane %v10494_v35, 1  ;;  %v1348_v11 = vmul.f32 %v1332_v28, %v11845_v57  ;;  %v1358_v32 = vmul.f32 %v10494_v35, %v10484_v4 }
 0x278   :  { %v10498_v29 = vpop.eup %10497  ;;  %v1335_v40 = vrot.slane %v10496_v62, 1  ;;  %v1349_v33 = vmul.f32 %v1333_v19, %v11848_v23  ;;  %v1359_v44 = vmul.f32 %v10496_v62, %v10486_v37 }
 0x279   :  { %v12012_v7 = vpop.eup %10499  ;;  %v1336_v42 = vrot.slane %v10498_v29, 1  ;;  %v1350_v3 = vmul.f32 %v1334_v39, %v11850_v56  ;;  %v12015_v15 = vadd.f32 %v1356_v0, %v1348_v11  ;;  %v1360_v58 = vmul.f32 %v10498_v29, %v10488_v20 }
 0x27a   :  { %v10502_v52 = vpop.eup %10501  ;;  %v1337_v54 = vrot.slane %v12012_v7, 1  ;;  %v1351_v57 = vmul.f32 %v1335_v40, %v11853_v1  ;;  %v12019_v61 = vadd.f32 %v1357_v17, %v1349_v33  ;;  %v1380_v40 = vrot.slane %v10490_v27, 2 }
 0x27b   :  { %v10504_v45 = vpop.eup %10503  ;;  %v1338_v23 = vrot.slane %v10502_v52, 1  ;;  %v1352_v10 = vmul.f32 %v1336_v42, %v11857_v5  ;;  %v12022_v49 = vadd.f32 %v1358_v32, %v1350_v3  ;;  %10511 = vtanh.f32 %v12015_v15 }
 0x27c   :  { %v10506_v56 = vpop.eup %10505  ;;  %v1339_v2 = vrot.slane %v10504_v45, 1  ;;  %v1353_v16 = vmul.f32 %v1337_v54, %v11861_v12  ;;  %v12026_v4 = vadd.f32 %v1359_v44, %v1351_v57  ;;  %10513 = vtanh.f32 %v12019_v61 }
 0x27d   :  { %v10508_v1 = vpop.eup %10507  ;;  %v1354_v37 = vmul.f32 %v1338_v23, %v11864_v13  ;;  %v1361_v20 = vmul.f32 %v10506_v56, %v12012_v7  ;;  %v12031_v28 = vadd.f32 %v1360_v58, %v1352_v10  ;;  %10515 = vtanh.f32 %v12022_v49 }
 0x27e   :  { %v10510_v5 = vpop.eup %10509  ;;  %v1355_v19 = vmul.f32 %v1339_v2, %v11866_v14  ;;  %v1362_v39 = vmul.f32 %v10508_v1, %v10502_v52  ;;  %10517 = vtanh.f32 %v12026_v4  ;;  %v1381_v33 = vrot.slane %v10492_v24, 2 }
 0x27f   :  { %v1363_v12 = vmul.f32 %v10510_v5, %v10504_v45  ;;  %v12036_v11 = vadd.f32 %v1361_v20, %v1353_v16  ;;  %10519 = vtanh.f32 %v12031_v28  ;;  %v1382_v32 = vrot.slane %v10494_v35, 2 }
 0x280   :  { %v12039_v0 = vadd.f32 %v1362_v39, %v1354_v37  ;;  %v1383_v44 = vrot.slane %v10496_v62, 2  ;;  %v1384_v58 = vrot.slane %v10498_v29, 2  ;;  %v1385_v24 = vrot.slane %v12012_v7, 2 }
 0x281   :  { %v12041_v13 = vadd.f32 %v1363_v12, %v1355_v19  ;;  %10521 = vtanh.f32 %v12036_v11  ;;  %v1386_v29 = vrot.slane %v10502_v52, 2  ;;  %v1387_v1 = vrot.slane %v10504_v45, 2 }
 0x282   :  { %10523 = vtanh.f32 %v12039_v0 }
 0x283   :  { %10525 = vtanh.f32 %v12041_v13 }
 0x285   :  { %v10512_v14 = vpop.eup %10511 }
 0x286   :  { %v10514_v17 = vpop.eup %10513  ;;  %v1396_v42 = vmul.f32 %v10512_v14, %v1380_v40 }
 0x287   :  { %v10516_v3 = vpop.eup %10515  ;;  %v1397_v54 = vmul.f32 %v10514_v17, %v1381_v33 }
 0x288   :  { %v10518_v57 = vpop.eup %10517  ;;  %v1398_v23 = vmul.f32 %v10516_v3, %v1382_v32  ;;  %1404 = vst [vmem:[%s13974_s7 + $0x1] sm:$0x1] %v1396_v42  ;;  %v14032_v3 = vmov 0.0  }
 0x289   :  { %v10520_v10 = vpop.eup %10519  ;;  %v1399_v56 = vmul.f32 %v10518_v57, %v1383_v44  ;;  %1405 = vst [vmem:[%s13974_s7 + $0x9] sm:$0x1] %v1397_v54  ;;  %v1500_v27 = vcombine.low %v1396_v42, %v1397_v54  ;;  %v1413_v57 = vld [vmem:[#allocation2 + $0x2] ss:$8 sm:$0xf] }
 0x28a   :  { %v1400_v35 = vmul.f32 %v10520_v10, %v1384_v58  ;;  %1406 = vst [vmem:[%s13974_s7 + $0x11] sm:$0x1] %v1398_v23  ;;  %v1415_v58 = vld [vmem:[#allocation2 + $0x22] ss:$8 sm:$0xf] }
 0x28b   :  { %v10522_v62 = vpop.eup %10521  ;;  %1407 = vst [vmem:[%s13974_s7 + $0x19] sm:$0x1] %v1399_v56  ;;  %v1501_v2 = vcombine.low %v1398_v23, %v1399_v56  ;;  %v1510_v5 = vrot.slane %v1500_v27, %v11833_v8  ;;  %v1417_v23 = vld [vmem:[#allocation2 + $0x42] ss:$8 sm:$0xf] }
 0x28c   :  { %v10524_v16 = vpop.eup %10523  ;;  %v1401_v37 = vmul.f32 %v10522_v62, %v1385_v24  ;;  %1408 = vst [vmem:[%s13974_s7 + $0x21] sm:$0x1] %v1400_v35  ;;  %v1421_v10 = vld [vmem:[#allocation2 + $0x82] ss:$8 sm:$0xf] }
 0x28d   :  { %v10526_v7 = vpop.eup %10525  ;;  %v1402_v20 = vmul.f32 %v10524_v16, %v1386_v29  ;;  %v1517_v19 = vrot.slane %v1501_v2, %v11833_v8  ;;  %v1419_v62 = vld [vmem:[#allocation2 + $0x62] ss:$8 sm:$0xf] }
 0x28e   :  { %v1403_v39 = vmul.f32 %v10526_v7, %v1387_v1  ;;  %1409 = vst [vmem:[%s13974_s7 + $0x29] sm:$0x1] %v1401_v37  ;;  %v1502_v52 = vcombine.low %v1400_v35, %v1401_v37  ;;  %v1423_v29 = vld [vmem:[#allocation2 + $0xa2] ss:$8 sm:$0xf] }
 0x28f   :  { %1410 = vst [vmem:[%s13974_s7 + $0x31] sm:$0x1] %v1402_v20  ;;  %v1532_v45 = vcombine.low %v1510_v5, %v1517_v19  ;;  %v1425_v37 = vld [vmem:[#allocation2 + $0xc2] ss:$8 sm:$0xf] }
 0x290   :  { %1411 = vst [vmem:[%s13974_s7 + $0x39] sm:$0x1] %v1403_v39  ;;  %v1503_v12 = vcombine.low %v1402_v20, %v1403_v39  ;;  %v1524_v40 = vrot.slane %v1502_v52, %v11833_v8  ;;  %v1427_v7 = vld [vmem:[#allocation2 + $0xe2] ss:$8 sm:$0xf] }
 0x291   :  { %v1540_v17 = vrot.slane %v1532_v45, %v11833_v8 }
 0x292   :  { %v1531_v14 = vrot.slane %v1503_v12, %v11833_v8 }
 0x294   :  { %v1533_v33 = vcombine.low %v1524_v40, %v1531_v14 }
 0x296   :  { %v1547_v32 = vrot.slane %v1533_v33, %v11833_v8 }
 0x298   :  { %v1548_v42 = vcombine.low %v1540_v17, %v1547_v32 }
 0x29a   :  { %1615 = vmatmul.mubr.f32.vlgmr.msra.gmra.mrb[20].mxu0 %v1548_v42  ;;  %1686 = vmatmul.mubr.f32.vlgmr.msra.gmra.mrb[20].mxu1 %v1548_v42 }
 0x29b   :  { %9499 = vmatpush1.bf16.msra.mxu0 %v11908_v6  ;;  %9531 = vmatpush1.bf16.msra.mxu1 %v11911_v36  ;;  %v14033_v6 = vld [vmem:[#allocation11_spill] sm:$0xff]  ;;  %v14034_v36 = vld [vmem:[#allocation12_spill] sm:$0xff] }
 0x29c   :  { %9501 = vmatprep.subr.bf16.mxu0 %v11915_v41  ;;  %9533 = vmatprep.subr.bf16.mxu1 %v11917_v18  ;;  %v14035_v41 = vld [vmem:[#allocation13_spill] sm:$0xff]  ;;  %v14036_v18 = vld [vmem:[#allocation14_spill] sm:$0xff] }
 0x29d   :  { %2150 = vmatprep.mubr.f32.mxu0 %v14032_v3  ;;  %2221 = vmatprep.mubr.f32.mxu1 %v14032_v3 }
 0x29f   :  { %9503 = vmatpush1.bf16.msra.mxu0 %v11920_v25  ;;  %9535 = vmatpush1.bf16.msra.mxu1 %v11924_v30  ;;  %v14037_v25 = vld [vmem:[#allocation15_spill] sm:$0xff]  ;;  %v14038_v30 = vld [vmem:[#allocation16_spill] sm:$0xff] }
 0x2a0   :  { %9505 = vmatprep.subr.bf16.mxu0 %v11926_v31  ;;  %9537 = vmatprep.subr.bf16.mxu1 %v11928_v38 }
 0x2a3   :  { %9507 = vmatpush1.bf16.msra.mxu0 %v11931_v43  ;;  %9539 = vmatpush1.bf16.msra.mxu1 %v11935_v48 }
 0x2a4   :  { %9509 = vmatprep.subr.bf16.mxu0 %v11937_v50  ;;  %9541 = vmatprep.subr.bf16.mxu1 %v11940_v55 }
 0x2a7   :  { %9511 = vmatpush1.bf16.msra.mxu0 %v11943_v53  ;;  %9543 = vmatpush1.bf16.msra.mxu1 %v11947_v60 }
 0x2a8   :  { %9513 = vmatprep.subr.bf16.mxu0 %v11949_v63  ;;  %9545 = vmatprep.subr.bf16.mxu1 %v11952_v9 }
 0x2ab   :  { %9515 = vmatpush1.bf16.msra.mxu0 %v11955_v21  ;;  %9547 = vmatpush1.bf16.msra.mxu1 %v11959_v22 }
 0x2ac   :  { %9517 = vmatprep.subr.bf16.mxu0 %v11961_v26  ;;  %9549 = vmatprep.subr.bf16.mxu1 %v11964_v34 }
 0x2af   :  { %9519 = vmatpush1.bf16.msra.mxu0 %v11967_v46  ;;  %9551 = vmatpush1.bf16.msra.mxu1 %v11971_v47 }
 0x2b0   :  { %9521 = vmatprep.subr.bf16.mxu0 %v11973_v51  ;;  %9553 = vmatprep.subr.bf16.mxu1 %v11976_v59 }
 0x2b3   :  { %9523 = vmatpush1.bf16.msra.mxu0 %v14033_v6  ;;  %9555 = vmatpush1.bf16.msra.mxu1 %v14034_v36 }
 0x2b4   :  { %9525 = vmatprep.subr.bf16.mxu0 %v14035_v41  ;;  %9557 = vmatprep.subr.bf16.mxu1 %v14036_v18 }
 0x2b7   :  { %9527 = vmatpush1.bf16.msra.mxu0 %v14037_v25  ;;  %9559 = vmatpush1.bf16.msra.mxu1 %v14038_v30 }
 0x36d   :  { %v1616_v31 = vpop.f32.mrb[20].mxu0  ;;  %v1687_v38 = vpop.f32.mrb[20].mxu1 }
 0x36e   :  { %v1618_v43 = vpop.f32.mrb[21].mxu0  ;;  %v1689_v48 = vpop.f32.mrb[21].mxu1 }
 0x36f   :  { %v1696_v50 = vcombine.low %v1616_v31, %v1618_v43  ;;  %v1697_v55 = vcombine.high %v1616_v31, %v1618_v43  ;;  %v1698_v53 = vcombine.low %v1687_v38, %v1689_v48  ;;  %v1699_v60 = vcombine.high %v1687_v38, %v1689_v48 }
 0x371   :  { %v1706_v63 = vrot.slane %v1696_v50, %v11833_v8  ;;  %v1713_v9 = vrot.slane %v1697_v55, %v11833_v8  ;;  %v1720_v21 = vrot.slane %v1698_v53, %v11833_v8  ;;  %v1727_v22 = vrot.slane %v1699_v60, %v11833_v8 }
 0x373   :  { %v1728_v26 = vcombine.low %v1706_v63, %v1720_v21  ;;  %v1729_v34 = vcombine.high %v1706_v63, %v1720_v21  ;;  %v1730_v46 = vcombine.low %v1713_v9, %v1727_v22  ;;  %v1731_v47 = vcombine.high %v1713_v9, %v1727_v22 }
 0x375   :  { %v1738_v51 = vrot.slane %v1728_v26, %v11833_v8  ;;  %v1745_v59 = vrot.slane %v1730_v46, %v11833_v8  ;;  %v1752_v44 = vrot.slane %v1729_v34, %v11833_v8  ;;  %v1759_v54 = vrot.slane %v1731_v47, %v11833_v8 }
 0x377   :  { %v1760_v56 = vcombine.high %v1738_v51, %v1738_v51  ;;  %v1761_v27 = vcombine.high %v1745_v59, %v1745_v59  ;;  %v1762_v24 = vcombine.high %v1752_v44, %v1752_v44  ;;  %v1763_v35 = vcombine.high %v1759_v54, %v1759_v54 }
 0x378   :  { %v1772_v2 = vadd.f32 %v1738_v51, %v1413_v57  ;;  %v1773_v16 = vadd.f32 %v1752_v44, %v1415_v58  ;;  %v1776_v1 = vadd.f32 %v1745_v59, %v1421_v10  ;;  %v1777_v19 = vadd.f32 %v1759_v54, %v1423_v29 }
 0x379   :  { %v1774_v20 = vadd.f32 %v1760_v56, %v1417_v23  ;;  %v1775_v5 = vadd.f32 %v1762_v24, %v1419_v62  ;;  %v1778_v39 = vadd.f32 %v1761_v27, %v1425_v37  ;;  %v1779_v12 = vadd.f32 %v1763_v35, %v1427_v7 }
 0x37a   :  { %v9192_v52 = vmul.f32 -1.442695, %v1772_v2  ;;  %v9193_v45 = vmul.f32 -1.442695, %v1773_v16  ;;  %v9196_v33 = vmul.f32 -1.442695, %v1776_v1 }
 0x37b   :  { %v9194_v40 = vmul.f32 -1.442695, %v1774_v20  ;;  %v9195_v14 = vmul.f32 -1.442695, %v1775_v5  ;;  %v9197_v17 = vmul.f32 -1.442695, %v1777_v19 }
 0x37c   :  { %10527 = vpow2.f32 %v9192_v52  ;;  %v9198_v32 = vmul.f32 -1.442695, %v1778_v39  ;;  %v9199_v42 = vmul.f32 -1.442695, %v1779_v12  ;;  %v1836_v6 = vrot.slane %v1772_v2, 3 }
 0x37d   :  { %10529 = vpow2.f32 %v9193_v45  ;;  %v1837_v36 = vrot.slane %v1773_v16, 3  ;;  %v1838_v41 = vrot.slane %v1774_v20, 3  ;;  %v1839_v18 = vrot.slane %v1775_v5, 3 }
 0x37e   :  { %10531 = vpow2.f32 %v9194_v40  ;;  %v1840_v25 = vrot.slane %v1776_v1, 3  ;;  %v1841_v46 = vrot.slane %v1777_v19, 3  ;;  %v1842_v59 = vrot.slane %v1778_v39, 3 }
 0x37f   :  { %10533 = vpow2.f32 %v9195_v14  ;;  %v1843_v54 = vrot.slane %v1779_v12, 3 }
 0x380   :  { %10535 = vpow2.f32 %v9196_v33 }
 0x381   :  { %10537 = vpow2.f32 %v9197_v17 }
 0x382   :  { %10539 = vpow2.f32 %v9198_v32 }
 0x383   :  { %10541 = vpow2.f32 %v9199_v42 }
 0x384   :  { %10543 = vtanh.f32 %v1836_v6 }
 0x385   :  { %10545 = vtanh.f32 %v1837_v36 }
 0x386   :  { %v10528_v30 = vpop.eup %10527  ;;  %10547 = vtanh.f32 %v1838_v41 }
 0x387   :  { %v10530_v31 = vpop.eup %10529  ;;  %v1804_v38 = vadd.f32 1.0, %v10528_v30  ;;  %10549 = vtanh.f32 %v1839_v18 }
 0x388   :  { %v10532_v43 = vpop.eup %10531  ;;  %v1805_v48 = vadd.f32 1.0, %v10530_v31  ;;  %10551 = vtanh.f32 %v1840_v25 }
 0x389   :  { %v10534_v50 = vpop.eup %10533  ;;  %v1806_v55 = vadd.f32 1.0, %v10532_v43  ;;  %10553 = vrcp.f32 %v1804_v38 }
 0x38a   :  { %v10536_v53 = vpop.eup %10535  ;;  %v1807_v60 = vadd.f32 1.0, %v10534_v50  ;;  %10555 = vrcp.f32 %v1805_v48 }
 0x38b   :  { %v10538_v63 = vpop.eup %10537  ;;  %v1808_v9 = vadd.f32 1.0, %v10536_v53  ;;  %10557 = vrcp.f32 %v1806_v55 }
 0x38c   :  { %v10540_v21 = vpop.eup %10539  ;;  %v1809_v22 = vadd.f32 1.0, %v10538_v63  ;;  %10559 = vrcp.f32 %v1807_v60 }
 0x38d   :  { %v10542_v26 = vpop.eup %10541  ;;  %v1810_v34 = vadd.f32 1.0, %v10540_v21  ;;  %10561 = vrcp.f32 %v1808_v9 }
 0x38e   :  { %v10544_v47 = vpop.eup %10543  ;;  %v1811_v51 = vadd.f32 1.0, %v10542_v26  ;;  %10563 = vrcp.f32 %v1809_v22 }
 0x38f   :  { %v10546_v44 = vpop.eup %10545  ;;  %10565 = vrcp.f32 %v1810_v34 }
 0x390   :  { %v10548_v57 = vpop.eup %10547  ;;  %10567 = vrcp.f32 %v1811_v51 }
 0x391   :  { %v10550_v58 = vpop.eup %10549  ;;  %10569 = vtanh.f32 %v1841_v46 }
 0x392   :  { %v10552_v23 = vpop.eup %10551  ;;  %10571 = vtanh.f32 %v1842_v59 }
 0x393   :  { %v10554_v10 = vpop.eup %10553  ;;  %10573 = vtanh.f32 %v1843_v54 }
 0x394   :  { %v10556_v56 = vpop.eup %10555  ;;  %v1868_v27 = vrot.slane %v10554_v10, 1  ;;  %v1892_v16 = vmul.f32 %v10554_v10, %v10544_v47  ;;  %v1916_v55 = vrot.slane %v10554_v10, 2 }
 0x395   :  { %v10558_v24 = vpop.eup %10557  ;;  %v1869_v35 = vrot.slane %v10556_v56, 1  ;;  %v1893_v20 = vmul.f32 %v10556_v56, %v10546_v44  ;;  %v1917_v53 = vrot.slane %v10556_v56, 2 }
 0x396   :  { %v10560_v62 = vpop.eup %10559  ;;  %v1870_v29 = vrot.slane %v10558_v24, 1  ;;  %v1884_v2 = vmul.f32 %v1868_v27, %v12015_v15  ;;  %v1894_v5 = vmul.f32 %v10558_v24, %v10548_v57  ;;  %v1918_v63 = vrot.slane %v10558_v24, 2 }
 0x397   :  { %v10562_v1 = vpop.eup %10561  ;;  %v1871_v37 = vrot.slane %v10560_v62, 1  ;;  %v1885_v7 = vmul.f32 %v1869_v35, %v12019_v61  ;;  %v1895_v45 = vmul.f32 %v10560_v62, %v10550_v58  ;;  %v1919_v22 = vrot.slane %v10560_v62, 2 }
 0x398   :  { %v12119_v19 = vpop.eup %10563  ;;  %v1872_v39 = vrot.slane %v10562_v1, 1  ;;  %v1886_v52 = vmul.f32 %v1870_v29, %v12022_v49  ;;  %v12122_v12 = vadd.f32 %v1892_v16, %v1884_v2  ;;  %v1896_v33 = vmul.f32 %v10562_v1, %v10552_v23 }
 0x399   :  { %v10566_v40 = vpop.eup %10565  ;;  %v1873_v14 = vrot.slane %v12119_v19, 1  ;;  %v1887_v15 = vmul.f32 %v1871_v37, %v12026_v4  ;;  %v12126_v17 = vadd.f32 %v1893_v20, %v1885_v7  ;;  %v1920_v46 = vrot.slane %v10562_v1, 2 }
 0x39a   :  { %v10568_v32 = vpop.eup %10567  ;;  %v1874_v61 = vrot.slane %v10566_v40, 1  ;;  %v1888_v42 = vmul.f32 %v1872_v39, %v12031_v28  ;;  %v12129_v6 = vadd.f32 %v1894_v5, %v1886_v52  ;;  %10575 = vtanh.f32 %v12122_v12 }
 0x39b   :  { %v10570_v49 = vpop.eup %10569  ;;  %v1875_v36 = vrot.slane %v10568_v32, 1  ;;  %v1889_v41 = vmul.f32 %v1873_v14, %v12036_v11  ;;  %v12133_v18 = vadd.f32 %v1895_v45, %v1887_v15  ;;  %10577 = vtanh.f32 %v12126_v17  ;;  %v2505_v14 = vld [vmem:[#allocation3 + $0x28] sm:$0xff]  ;;  %v2503_v15 = vld [vmem:[#allocation3 + $0x18] sm:$0xff] }
 0x39c   :  { %v10572_v4 = vpop.eup %10571  ;;  %v1890_v25 = vmul.f32 %v1874_v61, %v12039_v0  ;;  %v1897_v30 = vmul.f32 %v10570_v49, %v12119_v19  ;;  %v12138_v31 = vadd.f32 %v1896_v33, %v1888_v42  ;;  %10579 = vtanh.f32 %v12129_v6  ;;  %v2500_v61 = vld [vmem:[#allocation3] sm:$0xff] }
 0x39d   :  { %v10574_v28 = vpop.eup %10573  ;;  %v1891_v38 = vmul.f32 %v1875_v36, %v12041_v13  ;;  %v1898_v43 = vmul.f32 %v10572_v4, %v10566_v40  ;;  %10581 = vtanh.f32 %v12133_v18  ;;  %v1921_v54 = vrot.slane %v12119_v19, 2  ;;  %v2504_v42 = vld [vmem:[#allocation3 + $0x20] sm:$0xff]  ;;  %v2506_v4 = vld [vmem:[#allocation3 + $0x30] sm:$0xff] }
 0x39e   :  { %v1899_v11 = vmul.f32 %v10574_v28, %v10568_v32  ;;  %v12143_v48 = vadd.f32 %v1897_v30, %v1889_v41  ;;  %10583 = vtanh.f32 %v12138_v31  ;;  %v1922_v23 = vrot.slane %v10566_v40, 2  ;;  %v2501_v40 = vld [vmem:[#allocation3 + $0x8] sm:$0xff]  ;;  %v2502_v41 = vld [vmem:[#allocation3 + $0x10] sm:$0xff] }
 0x39f   :  { %v12146_v50 = vadd.f32 %v1898_v43, %v1890_v25  ;;  %v1923_v27 = vrot.slane %v10568_v32, 2  ;;  %v12186_v33 = vpack.c.bf16 %v2505_v14, %v2501_v40  ;;  %v2507_v32 = vld [vmem:[#allocation3 + $0x38] sm:$0xff]  ;;  %v12190_v36 = vpack.c.bf16 %v2504_v42, %v2500_v61  ;;  %v2509_v25 = vld [vmem:[#allocation3 + $0x48] sm:$0xff]  ;;  %v2536_v40 = vld [vmem:[#allocation3 + $0x120] sm:$0xff] }
 0x3a0   :  { %v12148_v0 = vadd.f32 %v1899_v11, %v1891_v38  ;;  %10585 = vtanh.f32 %v12143_v48  ;;  %v12188_v49 = vpack.c.bf16 %v2507_v32, %v2503_v15  ;;  %v12193_v30 = vpack.c.bf16 %v2506_v4, %v2502_v41  ;;  %v2513_v28 = vld [vmem:[#allocation3 + $0x68] sm:$0xff]  ;;  %v2511_v38 = vld [vmem:[#allocation3 + $0x58] sm:$0xff]  ;;  %v2534_v14 = vld [vmem:[#allocation3 + $0x110] sm:$0xff] }
 0x3a1   :  { %10587 = vtanh.f32 %v12146_v50  ;;  %9561 = vmatprep.subr.bf16.mxu0 %v12186_v33  ;;  %v2515_v43 = vld [vmem:[#allocation3 + $0x78] sm:$0xff]  ;;  %v12197_v11 = vpack.c.bf16 %v2513_v28, %v2509_v25  ;;  %v2538_v32 = vld [vmem:[#allocation3 + $0x130] sm:$0xff]  ;;  %v2541_v61 = vld [vmem:[#allocation3 + $0x148] sm:$0xff] }
 0x3a2   :  { %10589 = vtanh.f32 %v12148_v0  ;;  %9593 = vmatprep.subr.bf16.mxu1 %v12188_v49  ;;  %v2545_v42 = vld [vmem:[#allocation3 + $0x168] sm:$0xff]  ;;  %v2543_v41 = vld [vmem:[#allocation3 + $0x158] sm:$0xff]  ;;  %v12241_v28 = vpack.c.bf16 %v2538_v32, %v2534_v14  ;;  %v2558_v14 = vld [vmem:[#allocation3 + $0x1d0] sm:$0xff] }
 0x3a3   :  { %v2547_v4 = vld [vmem:[#allocation3 + $0x178] sm:$0xff]  ;;  %v2562_v32 = vld [vmem:[#allocation3 + $0x1f0] sm:$0xff] }
 0x3a4   :  { %v10576_v13 = vpop.eup %10575 }
 0x3a5   :  { %v10578_v60 = vpop.eup %10577  ;;  %v1932_v9 = vmul.f32 %v10576_v13, %v1916_v55  ;;  %v12199_v55 = vpack.c.bf16 %v2515_v43, %v2511_v38  ;;  %v2508_v13 = vld [vmem:[#allocation3 + $0x40] sm:$0xff]  ;;  %v12243_v38 = vpack.c.bf16 %v2545_v42, %v2541_v61  ;;  %v12277_v42 = vpack.c.bf16 %v2562_v32, %v2558_v14 }
 0x3a6   :  { %v10580_v21 = vpop.eup %10579  ;;  %v1933_v26 = vmul.f32 %v10578_v60, %v1917_v53  ;;  %v2512_v53 = vld [vmem:[#allocation3 + $0x60] sm:$0xff]  ;;  %v2510_v60 = vld [vmem:[#allocation3 + $0x50] sm:$0xff] }
 0x3a7   :  { %v10582_v34 = vpop.eup %10581  ;;  %v1934_v47 = vmul.f32 %v10580_v21, %v1918_v63  ;;  %1940 = vst [vmem:[%s13974_s7 + $0x2] sm:$0x1] %v1932_v9  ;;  %v12202_v63 = vpack.c.bf16 %v2512_v53, %v2508_v13  ;;  %v2517_v21 = vld [vmem:[#allocation3 + $0x88] sm:$0xff]  ;;  %v2540_v43 = vld [vmem:[#allocation3 + $0x140] sm:$0xff]  ;;  %v2542_v53 = vld [vmem:[#allocation3 + $0x150] sm:$0xff] }
 0x3a8   :  { %v10584_v51 = vpop.eup %10583  ;;  %v1935_v59 = vmul.f32 %v10582_v34, %v1919_v22  ;;  %1941 = vst [vmem:[%s13974_s7 + $0xa] sm:$0x1] %v1933_v26  ;;  %v2036_v44 = vcombine.low %v1932_v9, %v1933_v26  ;;  %v2514_v9 = vld [vmem:[#allocation3 + $0x70] sm:$0xff]  ;;  %v2521_v22 = vld [vmem:[#allocation3 + $0xa8] sm:$0xff]  ;;  %v2544_v13 = vld [vmem:[#allocation3 + $0x160] sm:$0xff] }
 0x3a9   :  { %v1936_v57 = vmul.f32 %v10584_v51, %v1920_v46  ;;  %1942 = vst [vmem:[%s13974_s7 + $0x12] sm:$0x1] %v1934_v47  ;;  %v12206_v26 = vpack.c.bf16 %v2514_v9, %v2510_v60  ;;  %v12208_v34 = vpack.c.bf16 %v2521_v22, %v2517_v21  ;;  %v2519_v46 = vld [vmem:[#allocation3 + $0x98] sm:$0xff]  ;;  %v2516_v51 = vld [vmem:[#allocation3 + $0x80] sm:$0xff]  ;;  %v12246_v60 = vpack.c.bf16 %v2547_v4, %v2543_v41  ;;  %v2546_v9 = vld [vmem:[#allocation3 + $0x170] sm:$0xff] }
 0x3aa   :  { %v10586_v58 = vpop.eup %10585  ;;  %1943 = vst [vmem:[%s13974_s7 + $0x1a] sm:$0x1] %v1935_v59  ;;  %v2037_v10 = vcombine.low %v1934_v47, %v1935_v59  ;;  %v2046_v29 = vrot.slane %v2036_v44, %v11833_v8  ;;  %v2523_v47 = vld [vmem:[#allocation3 + $0xb8] sm:$0xff]  ;;  %v2520_v44 = vld [vmem:[#allocation3 + $0xa0] sm:$0xff]  ;;  %v2549_v21 = vld [vmem:[#allocation3 + $0x188] sm:$0xff] }
 0x3ab   :  { %v10588_v56 = vpop.eup %10587  ;;  %v1937_v24 = vmul.f32 %v10586_v58, %v1921_v54  ;;  %1944 = vst [vmem:[%s13974_s7 + $0x22] sm:$0x1] %v1936_v57  ;;  %v12210_v59 = vpack.c.bf16 %v2523_v47, %v2519_v46  ;;  %v2518_v54 = vld [vmem:[#allocation3 + $0x90] sm:$0xff]  ;;  %v12213_v58 = vpack.c.bf16 %v2520_v44, %v2516_v51  ;;  %v2553_v22 = vld [vmem:[#allocation3 + $0x1a8] sm:$0xff]  ;;  %v2551_v46 = vld [vmem:[#allocation3 + $0x198] sm:$0xff]  ;;  %v12249_v51 = vpack.c.bf16 %v2544_v13, %v2540_v43 }
 0x3ac   :  { %v10590_v35 = vpop.eup %10589  ;;  %v1938_v62 = vmul.f32 %v10588_v56, %v1922_v23  ;;  %v2053_v2 = vrot.slane %v2037_v10, %v11833_v8  ;;  %v2525_v23 = vld [vmem:[#allocation3 + $0xc8] sm:$0xff]  ;;  %v2527_v56 = vld [vmem:[#allocation3 + $0xd8] sm:$0xff]  ;;  %v12253_v44 = vpack.c.bf16 %v2546_v9, %v2542_v53  ;;  %14045 = vst [vmem:[#allocation17_spill] sm:$0xff] %v12277_v42 }
 0x3ad   :  { %v1939_v16 = vmul.f32 %v10590_v35, %v1923_v27  ;;  %1945 = vst [vmem:[%s13974_s7 + $0x2a] sm:$0x1] %v1937_v24  ;;  %v2038_v1 = vcombine.low %v1936_v57, %v1937_v24  ;;  %v2522_v57 = vld [vmem:[#allocation3 + $0xb0] sm:$0xff]  ;;  %v2529_v10 = vld [vmem:[#allocation3 + $0xe8] sm:$0xff]  ;;  %v2531_v35 = vld [vmem:[#allocation3 + $0xf8] sm:$0xff] }
 0x3ae   :  { %1946 = vst [vmem:[%s13974_s7 + $0x32] sm:$0x1] %v1938_v62  ;;  %v2068_v37 = vcombine.low %v2046_v29, %v2053_v2  ;;  %v12217_v27 = vpack.c.bf16 %v2522_v57, %v2518_v54  ;;  %v12219_v24 = vpack.c.bf16 %v2529_v10, %v2525_v23  ;;  %v2528_v29 = vld [vmem:[#allocation3 + $0xe0] sm:$0xff]  ;;  %v12222_v2 = vpack.c.bf16 %v2531_v35, %v2527_v56  ;;  %v2555_v47 = vld [vmem:[#allocation3 + $0x1b8] sm:$0xff]  ;;  %v2550_v10 = vld [vmem:[#allocation3 + $0x190] sm:$0xff] }
 0x3af   :  { %1947 = vst [vmem:[%s13974_s7 + $0x3a] sm:$0x1] %v1939_v16  ;;  %v2039_v7 = vcombine.low %v1938_v62, %v1939_v16  ;;  %v2060_v20 = vrot.slane %v2038_v1, %v11833_v8  ;;  %v2524_v62 = vld [vmem:[#allocation3 + $0xc0] sm:$0xff]  ;;  %v2526_v16 = vld [vmem:[#allocation3 + $0xd0] sm:$0xff]  ;;  %v12255_v54 = vpack.c.bf16 %v2553_v22, %v2549_v21  ;;  %v12258_v56 = vpack.c.bf16 %v2555_v47, %v2551_v46 }
 0x3b0   :  { %v2076_v39 = vrot.slane %v2068_v37, %v11833_v8  ;;  %v2530_v1 = vld [vmem:[#allocation3 + $0xf0] sm:$0xff]  ;;  %v2533_v37 = vld [vmem:[#allocation3 + $0x108] sm:$0xff]  ;;  %v2548_v57 = vld [vmem:[#allocation3 + $0x180] sm:$0xff] }
 0x3b1   :  { %v2067_v5 = vrot.slane %v2039_v7, %v11833_v8  ;;  %v2537_v7 = vld [vmem:[#allocation3 + $0x128] sm:$0xff]  ;;  %v2552_v23 = vld [vmem:[#allocation3 + $0x1a0] sm:$0xff]  ;;  %14039 = vst [vmem:[#allocation11_spill] sm:$0xff] %v12258_v56  ;;  %v2554_v35 = vld [vmem:[#allocation3 + $0x1b0] sm:$0xff] }
 0x3b2   :  { %v1953_v14 = vld [vmem:[#allocation2 + $0x43] ss:$8 sm:$0xf] }
 0x3b3   :  { %v2069_v19 = vcombine.low %v2060_v20, %v2067_v5  ;;  %v2535_v20 = vld [vmem:[#allocation3 + $0x118] sm:$0xff] }
 0x3b4   :  { %v2539_v5 = vld [vmem:[#allocation3 + $0x138] sm:$0xff] }
 0x3b5   :  { %v2083_v52 = vrot.slane %v2069_v19, %v11833_v8  ;;  %v12225_v19 = vpack.c.bf16 %v2528_v29, %v2524_v62  ;;  %v12234_v15 = vpack.c.bf16 %v2539_v5, %v2535_v20  ;;  %v2557_v62 = vld [vmem:[#allocation3 + $0x1c8] sm:$0xff]  ;;  %v2556_v5 = vld [vmem:[#allocation3 + $0x1c0] sm:$0xff] }
 0x3b6   :  { %v2561_v29 = vld [vmem:[#allocation3 + $0x1e8] sm:$0xff] }
 0x3b7   :  { %v2084_v45 = vcombine.low %v2076_v39, %v2083_v52  ;;  %v12229_v39 = vpack.c.bf16 %v2530_v1, %v2526_v16  ;;  %v12231_v52 = vpack.c.bf16 %v2537_v7, %v2533_v37  ;;  %v2559_v16 = vld [vmem:[#allocation3 + $0x1d8] sm:$0xff]  ;;  %v12261_v37 = vpack.c.bf16 %v2552_v23, %v2548_v57 }
 0x3b8   :  { %v2563_v1 = vld [vmem:[#allocation3 + $0x1f8] sm:$0xff]  ;;  %v12265_v7 = vpack.c.bf16 %v2554_v35, %v2550_v10  ;;  %v12267_v20 = vpack.c.bf16 %v2561_v29, %v2557_v62 }
 0x3b9   :  { %2151 = vmatmul.mubr.f32.vlgmr.msra.gmra.mrb[22].mxu0 %v2084_v45  ;;  %2222 = vmatmul.mubr.f32.vlgmr.msra.gmra.mrb[22].mxu1 %v2084_v45  ;;  %v2532_v45 = vld [vmem:[#allocation3 + $0x100] sm:$0xff]  ;;  %14040 = vst [vmem:[#allocation12_spill] sm:$0xff] %v12261_v37 }
 0x3ba   :  { %2686 = vmatprep.mubr.f32.mxu0 %v14032_v3  ;;  %2757 = vmatprep.mubr.f32.mxu1 %v14032_v3  ;;  %v12237_v25 = vpack.c.bf16 %v2536_v40, %v2532_v45  ;;  %14041 = vst [vmem:[#allocation13_spill] sm:$0xff] %v12265_v7  ;;  %14042 = vst [vmem:[#allocation14_spill] sm:$0xff] %v12267_v20  ;;  %v2560_v45 = vld [vmem:[#allocation3 + $0x1e0] sm:$0xff]  ;;  %v12270_v40 = vpack.c.bf16 %v2563_v1, %v2559_v16 }
 0x3bb   :  { %9563 = vmatpush1.bf16.msra.mxu0 %v12190_v36  ;;  %9595 = vmatpush1.bf16.msra.mxu1 %v12193_v30  ;;  %v12273_v61 = vpack.c.bf16 %v2560_v45, %v2556_v5  ;;  %v1949_v5 = vld [vmem:[#allocation2 + $0x3] ss:$8 sm:$0xf] }
 0x3bc   :  { %9565 = vmatprep.subr.bf16.mxu0 %v12197_v11  ;;  %9597 = vmatprep.subr.bf16.mxu1 %v12199_v55  ;;  %14043 = vst [vmem:[#allocation15_spill] sm:$0xff] %v12270_v40  ;;  %v1951_v45 = vld [vmem:[#allocation2 + $0x23] ss:$8 sm:$0xf] }
 0x3bd   :  { %14044 = vst [vmem:[#allocation16_spill] sm:$0xff] %v12273_v61  ;;  %v1957_v32 = vld [vmem:[#allocation2 + $0x83] ss:$8 sm:$0xf] }
 0x3bf   :  { %9567 = vmatpush1.bf16.msra.mxu0 %v12202_v63  ;;  %9599 = vmatpush1.bf16.msra.mxu1 %v12206_v26 }
 0x3c0   :  { %9569 = vmatprep.subr.bf16.mxu0 %v12208_v34  ;;  %9601 = vmatprep.subr.bf16.mxu1 %v12210_v59 }
 0x3c3   :  { %9571 = vmatpush1.bf16.msra.mxu0 %v12213_v58  ;;  %9603 = vmatpush1.bf16.msra.mxu1 %v12217_v27 }
 0x3c4   :  { %9573 = vmatprep.subr.bf16.mxu0 %v12219_v24  ;;  %9605 = vmatprep.subr.bf16.mxu1 %v12222_v2 }
 0x3c7   :  { %9575 = vmatpush1.bf16.msra.mxu0 %v12225_v19  ;;  %9607 = vmatpush1.bf16.msra.mxu1 %v12229_v39 }
 0x3c8   :  { %9577 = vmatprep.subr.bf16.mxu0 %v12231_v52  ;;  %9609 = vmatprep.subr.bf16.mxu1 %v12234_v15 }
 0x3cb   :  { %9579 = vmatpush1.bf16.msra.mxu0 %v12237_v25  ;;  %9611 = vmatpush1.bf16.msra.mxu1 %v12241_v28 }
 0x3cc   :  { %9581 = vmatprep.subr.bf16.mxu0 %v12243_v38  ;;  %9613 = vmatprep.subr.bf16.mxu1 %v12246_v60 }
 0x3cf   :  { %9583 = vmatpush1.bf16.msra.mxu0 %v12249_v51  ;;  %9615 = vmatpush1.bf16.msra.mxu1 %v12253_v44 }
 0x3d0   :  { %9585 = vmatprep.subr.bf16.mxu0 %v12255_v54  ;;  %9617 = vmatprep.subr.bf16.mxu1 %v12258_v56 }
 0x3d3   :  { %9587 = vmatpush1.bf16.msra.mxu0 %v12261_v37  ;;  %9619 = vmatpush1.bf16.msra.mxu1 %v12265_v7 }
 0x3d4   :  { %9589 = vmatprep.subr.bf16.mxu0 %v12267_v20  ;;  %9621 = vmatprep.subr.bf16.mxu1 %v12270_v40 }
 0x3d7   :  { %9591 = vmatpush1.bf16.msra.mxu0 %v12273_v61  ;;  %9623 = vmatpush1.bf16.msra.mxu1 %v12277_v42 }
 0x3d8   :  { %9625 = vmatprep.subr.bf16.mxu0 %v12186_v33  ;;  %9657 = vmatprep.subr.bf16.mxu1 %v12188_v49 }
 0x48c   :  { %v2152_v41 = vpop.f32.mrb[22].mxu0  ;;  %v2223_v4 = vpop.f32.mrb[22].mxu1 }
 0x48d   :  { %v2154_v43 = vpop.f32.mrb[23].mxu0  ;;  %v2225_v13 = vpop.f32.mrb[23].mxu1 }
 0x48e   :  { %v2232_v53 = vcombine.low %v2152_v41, %v2154_v43  ;;  %v2233_v9 = vcombine.high %v2152_v41, %v2154_v43  ;;  %v2234_v21 = vcombine.low %v2223_v4, %v2225_v13  ;;  %v2235_v22 = vcombine.high %v2223_v4, %v2225_v13 }
 0x490   :  { %v2242_v46 = vrot.slane %v2232_v53, %v11833_v8  ;;  %v2249_v47 = vrot.slane %v2233_v9, %v11833_v8  ;;  %v2256_v57 = vrot.slane %v2234_v21, %v11833_v8  ;;  %v2263_v23 = vrot.slane %v2235_v22, %v11833_v8  ;;  %v1955_v53 = vld [vmem:[#allocation2 + $0x63] ss:$8 sm:$0xf] }
 0x491   :  { %v1959_v9 = vld [vmem:[#allocation2 + $0xa3] ss:$8 sm:$0xf] }
 0x492   :  { %v2264_v10 = vcombine.low %v2242_v46, %v2256_v57  ;;  %v2265_v33 = vcombine.high %v2242_v46, %v2256_v57  ;;  %v2266_v35 = vcombine.low %v2249_v47, %v2263_v23  ;;  %v2267_v49 = vcombine.high %v2249_v47, %v2263_v23  ;;  %v1961_v47 = vld [vmem:[#allocation2 + $0xc3] ss:$8 sm:$0xf] }
 0x493   :  { %v1963_v57 = vld [vmem:[#allocation2 + $0xe3] ss:$8 sm:$0xf] }
 0x494   :  { %v2274_v62 = vrot.slane %v2264_v10, %v11833_v8  ;;  %v2281_v29 = vrot.slane %v2266_v35, %v11833_v8  ;;  %v2288_v16 = vrot.slane %v2265_v33, %v11833_v8  ;;  %v2295_v1 = vrot.slane %v2267_v49, %v11833_v8 }
 0x496   :  { %v2296_v41 = vcombine.high %v2274_v62, %v2274_v62  ;;  %v2297_v4 = vcombine.high %v2281_v29, %v2281_v29  ;;  %v2298_v43 = vcombine.high %v2288_v16, %v2288_v16  ;;  %v2299_v13 = vcombine.high %v2295_v1, %v2295_v1 }
 0x497   :  { %v2308_v21 = vadd.f32 %v2274_v62, %v1949_v5  ;;  %v2309_v22 = vadd.f32 %v2288_v16, %v1951_v45  ;;  %v2312_v46 = vadd.f32 %v2281_v29, %v1957_v32  ;;  %v2313_v33 = vadd.f32 %v2295_v1, %v1959_v9 }
 0x498   :  { %v2310_v23 = vadd.f32 %v2296_v41, %v1953_v14  ;;  %v2311_v10 = vadd.f32 %v2298_v43, %v1955_v53  ;;  %v2314_v35 = vadd.f32 %v2297_v4, %v1961_v47  ;;  %v2315_v61 = vadd.f32 %v2299_v13, %v1963_v57 }
 0x499   :  { %v9200_v49 = vmul.f32 -1.442695, %v2308_v21  ;;  %v9201_v42 = vmul.f32 -1.442695, %v2309_v22  ;;  %v9204_v7 = vmul.f32 -1.442695, %v2312_v46 }
 0x49a   :  { %v9202_v40 = vmul.f32 -1.442695, %v2310_v23  ;;  %v9203_v20 = vmul.f32 -1.442695, %v2311_v10  ;;  %v9205_v37 = vmul.f32 -1.442695, %v2313_v33 }
 0x49b   :  { %10591 = vpow2.f32 %v9200_v49  ;;  %v9206_v56 = vmul.f32 -1.442695, %v2314_v35  ;;  %v9207_v62 = vmul.f32 -1.442695, %v2315_v61  ;;  %v2372_v29 = vrot.slane %v2308_v21, 3 }
 0x49c   :  { %10593 = vpow2.f32 %v9201_v42  ;;  %v2373_v16 = vrot.slane %v2309_v22, 3  ;;  %v2374_v1 = vrot.slane %v2310_v23, 3  ;;  %v2375_v5 = vrot.slane %v2311_v10, 3 }
 0x49d   :  { %10595 = vpow2.f32 %v9202_v40  ;;  %v2376_v45 = vrot.slane %v2312_v46, 3  ;;  %v2377_v22 = vrot.slane %v2313_v33, 3  ;;  %v2378_v57 = vrot.slane %v2314_v35, 3 }
 0x49e   :  { %10597 = vpow2.f32 %v9203_v20  ;;  %v2379_v10 = vrot.slane %v2315_v61, 3 }
 0x49f   :  { %10599 = vpow2.f32 %v9204_v7 }
 0x4a0   :  { %10601 = vpow2.f32 %v9205_v37 }
 0x4a1   :  { %10603 = vpow2.f32 %v9206_v56 }
 0x4a2   :  { %10605 = vpow2.f32 %v9207_v62 }
 0x4a3   :  { %10607 = vtanh.f32 %v2372_v29 }
 0x4a4   :  { %10609 = vtanh.f32 %v2373_v16 }
 0x4a5   :  { %v10592_v14 = vpop.eup %10591  ;;  %10611 = vtanh.f32 %v2374_v1 }
 0x4a6   :  { %v10594_v32 = vpop.eup %10593  ;;  %v2340_v42 = vadd.f32 1.0, %v10592_v14  ;;  %10613 = vtanh.f32 %v2375_v5 }
 0x4a7   :  { %v10596_v40 = vpop.eup %10595  ;;  %v2341_v41 = vadd.f32 1.0, %v10594_v32  ;;  %10615 = vtanh.f32 %v2376_v45 }
 0x4a8   :  { %v10598_v20 = vpop.eup %10597  ;;  %v2342_v7 = vadd.f32 1.0, %v10596_v40  ;;  %10617 = vrcp.f32 %v2340_v42 }
 0x4a9   :  { %v10600_v37 = vpop.eup %10599  ;;  %v2343_v4 = vadd.f32 1.0, %v10598_v20  ;;  %10619 = vrcp.f32 %v2341_v41 }
 0x4aa   :  { %v10602_v56 = vpop.eup %10601  ;;  %v2344_v43 = vadd.f32 1.0, %v10600_v37  ;;  %10621 = vrcp.f32 %v2342_v7 }
 0x4ab   :  { %v10604_v13 = vpop.eup %10603  ;;  %v2345_v53 = vadd.f32 1.0, %v10602_v56  ;;  %10623 = vrcp.f32 %v2343_v4 }
 0x4ac   :  { %v10606_v9 = vpop.eup %10605  ;;  %v2346_v21 = vadd.f32 1.0, %v10604_v13  ;;  %10625 = vrcp.f32 %v2344_v43 }
 0x4ad   :  { %v10608_v46 = vpop.eup %10607  ;;  %v2347_v47 = vadd.f32 1.0, %v10606_v9  ;;  %10627 = vrcp.f32 %v2345_v53 }
 0x4ae   :  { %v10610_v23 = vpop.eup %10609  ;;  %10629 = vrcp.f32 %v2346_v21 }
 0x4af   :  { %v10612_v49 = vpop.eup %10611  ;;  %10631 = vrcp.f32 %v2347_v47 }
 0x4b0   :  { %v10614_v62 = vpop.eup %10613  ;;  %10633 = vtanh.f32 %v2377_v22 }
 0x4b1   :  { %v10616_v29 = vpop.eup %10615  ;;  %10635 = vtanh.f32 %v2378_v57 }
 0x4b2   :  { %v10618_v16 = vpop.eup %10617  ;;  %10637 = vtanh.f32 %v2379_v10 }
 0x4b3   :  { %v10620_v1 = vpop.eup %10619  ;;  %v2404_v5 = vrot.slane %v10618_v16, 1  ;;  %v2428_v35 = vmul.f32 %v10618_v16, %v10608_v46 }
 0x4b4   :  { %v10622_v45 = vpop.eup %10621  ;;  %v2405_v14 = vrot.slane %v10620_v1, 1  ;;  %v2429_v20 = vmul.f32 %v10620_v1, %v10610_v23 }
 0x4b5   :  { %v10624_v33 = vpop.eup %10623  ;;  %v2406_v32 = vrot.slane %v10622_v45, 1  ;;  %v2420_v42 = vmul.f32 %v2404_v5, %v12122_v12  ;;  %v2430_v7 = vmul.f32 %v10622_v45, %v10612_v49 }
 0x4b6   :  { %v10626_v40 = vpop.eup %10625  ;;  %v2407_v41 = vrot.slane %v10624_v33, 1  ;;  %v2421_v61 = vmul.f32 %v2405_v14, %v12126_v17  ;;  %v2431_v43 = vmul.f32 %v10624_v33, %v10614_v62 }
 0x4b7   :  { %v12294_v37 = vpop.eup %10627  ;;  %v2408_v4 = vrot.slane %v10626_v40, 1  ;;  %v2422_v56 = vmul.f32 %v2406_v32, %v12129_v6  ;;  %v12297_v13 = vadd.f32 %v2428_v35, %v2420_v42  ;;  %v2432_v21 = vmul.f32 %v10626_v40, %v10616_v29 }
 0x4b8   :  { %v10630_v53 = vpop.eup %10629  ;;  %v2409_v9 = vrot.slane %v12294_v37, 1  ;;  %v2423_v12 = vmul.f32 %v2407_v41, %v12133_v18  ;;  %v12301_v22 = vadd.f32 %v2429_v20, %v2421_v61  ;;  %v2452_v41 = vrot.slane %v10618_v16, 2 }
 0x4b9   :  { %v10632_v46 = vpop.eup %10631  ;;  %v2410_v17 = vrot.slane %v10630_v53, 1  ;;  %v2424_v47 = vmul.f32 %v2408_v4, %v12138_v31  ;;  %v12304_v57 = vadd.f32 %v2430_v7, %v2422_v56  ;;  %10639 = vtanh.f32 %v12297_v13 }
 0x4ba   :  { %v10634_v6 = vpop.eup %10633  ;;  %v2411_v23 = vrot.slane %v10632_v46, 1  ;;  %v2425_v10 = vmul.f32 %v2409_v9, %v12143_v48  ;;  %v12308_v49 = vadd.f32 %v2431_v43, %v2423_v12  ;;  %10641 = vtanh.f32 %v12301_v22 }
 0x4bb   :  { %v10636_v18 = vpop.eup %10635  ;;  %v2426_v62 = vmul.f32 %v2410_v17, %v12146_v50  ;;  %v2433_v29 = vmul.f32 %v10634_v6, %v12294_v37  ;;  %v12313_v5 = vadd.f32 %v2432_v21, %v2424_v47  ;;  %10643 = vtanh.f32 %v12304_v57 }
 0x4bc   :  { %v10638_v31 = vpop.eup %10637  ;;  %v2427_v14 = vmul.f32 %v2411_v23, %v12148_v0  ;;  %v2434_v32 = vmul.f32 %v10636_v18, %v10630_v53  ;;  %10645 = vtanh.f32 %v12308_v49  ;;  %v2453_v61 = vrot.slane %v10620_v1, 2 }
 0x4bd   :  { %v2435_v48 = vmul.f32 %v10638_v31, %v10632_v46  ;;  %v12318_v42 = vadd.f32 %v2433_v29, %v2425_v10  ;;  %10647 = vtanh.f32 %v12313_v5  ;;  %v2454_v7 = vrot.slane %v10622_v45, 2 }
 0x4be   :  { %v12321_v35 = vadd.f32 %v2434_v32, %v2426_v62  ;;  %v2455_v43 = vrot.slane %v10624_v33, 2  ;;  %v2456_v21 = vrot.slane %v10626_v40, 2  ;;  %v2457_v1 = vrot.slane %v12294_v37, 2 }
 0x4bf   :  { %v12323_v50 = vadd.f32 %v2435_v48, %v2427_v14  ;;  %10649 = vtanh.f32 %v12318_v42  ;;  %v2458_v40 = vrot.slane %v10630_v53, 2  ;;  %v2459_v18 = vrot.slane %v10632_v46, 2 }
 0x4c0   :  { %10651 = vtanh.f32 %v12321_v35 }
 0x4c1   :  { %10653 = vtanh.f32 %v12323_v50 }
 0x4c3   :  { %v10640_v0 = vpop.eup %10639 }
 0x4c4   :  { %v10642_v20 = vpop.eup %10641  ;;  %v2468_v4 = vmul.f32 %v10640_v0, %v2452_v41 }
 0x4c5   :  { %v10644_v56 = vpop.eup %10643  ;;  %v2469_v9 = vmul.f32 %v10642_v20, %v2453_v61 }
 0x4c6   :  { %v10646_v12 = vpop.eup %10645  ;;  %v2470_v17 = vmul.f32 %v10644_v56, %v2454_v7  ;;  %2476 = vst [vmem:[%s13974_s7 + $0x3] sm:$0x1] %v2468_v4 }
 0x4c7   :  { %v10648_v47 = vpop.eup %10647  ;;  %v2471_v6 = vmul.f32 %v10646_v12, %v2455_v43  ;;  %2477 = vst [vmem:[%s13974_s7 + $0xb] sm:$0x1] %v2469_v9  ;;  %v2572_v16 = vcombine.low %v2468_v4, %v2469_v9 }
 0x4c8   :  { %v2472_v45 = vmul.f32 %v10648_v47, %v2456_v21  ;;  %2478 = vst [vmem:[%s13974_s7 + $0x13] sm:$0x1] %v2470_v17  ;;  %v2485_v21 = vld [vmem:[#allocation2 + $0x4] ss:$8 sm:$0xf] }
 0x4c9   :  { %v10650_v33 = vpop.eup %10649  ;;  %2479 = vst [vmem:[%s13974_s7 + $0x1b] sm:$0x1] %v2471_v6  ;;  %v2573_v23 = vcombine.low %v2470_v17, %v2471_v6  ;;  %v2582_v31 = vrot.slane %v2572_v16, %v11833_v8  ;;  %v2487_v17 = vld [vmem:[#allocation2 + $0x24] ss:$8 sm:$0xf] }
 0x4ca   :  { %v10652_v10 = vpop.eup %10651  ;;  %v2473_v62 = vmul.f32 %v10650_v33, %v2457_v1  ;;  %2480 = vst [vmem:[%s13974_s7 + $0x23] sm:$0x1] %v2472_v45  ;;  %v2489_v47 = vld [vmem:[#allocation2 + $0x44] ss:$8 sm:$0xf] }
 0x4cb   :  { %v10654_v37 = vpop.eup %10653  ;;  %v2474_v29 = vmul.f32 %v10652_v10, %v2458_v40  ;;  %v2589_v14 = vrot.slane %v2573_v23, %v11833_v8  ;;  %v2493_v6 = vld [vmem:[#allocation2 + $0x84] ss:$8 sm:$0xf] }
 0x4cc   :  { %v2475_v32 = vmul.f32 %v10654_v37, %v2459_v18  ;;  %2481 = vst [vmem:[%s13974_s7 + $0x2b] sm:$0x1] %v2473_v62  ;;  %v2574_v53 = vcombine.low %v2472_v45, %v2473_v62  ;;  %v2491_v40 = vld [vmem:[#allocation2 + $0x64] ss:$8 sm:$0xf] }
 0x4cd   :  { %2482 = vst [vmem:[%s13974_s7 + $0x33] sm:$0x1] %v2474_v29  ;;  %v2604_v46 = vcombine.low %v2582_v31, %v2589_v14  ;;  %v2495_v23 = vld [vmem:[#allocation2 + $0xa4] ss:$8 sm:$0xf] }
 0x4ce   :  { %2483 = vst [vmem:[%s13974_s7 + $0x3b] sm:$0x1] %v2475_v32  ;;  %v2575_v48 = vcombine.low %v2474_v29, %v2475_v32  ;;  %v2596_v41 = vrot.slane %v2574_v53, %v11833_v8  ;;  %v2497_v37 = vld [vmem:[#allocation2 + $0xc4] ss:$8 sm:$0xf] }
 0x4cf   :  { %v2612_v20 = vrot.slane %v2604_v46, %v11833_v8  ;;  %v2499_v29 = vld [vmem:[#allocation2 + $0xe4] ss:$8 sm:$0xf] }
 0x4d0   :  { %v2603_v0 = vrot.slane %v2575_v48, %v11833_v8 }
 0x4d2   :  { %v2605_v61 = vcombine.low %v2596_v41, %v2603_v0 }
 0x4d4   :  { %v2619_v7 = vrot.slane %v2605_v61, %v11833_v8 }
 0x4d6   :  { %v2620_v4 = vcombine.low %v2612_v20, %v2619_v7 }
 0x4d8   :  { %2687 = vmatmul.mubr.f32.vlgmr.msra.gmra.mrb[24].mxu0 %v2620_v4  ;;  %2758 = vmatmul.mubr.f32.vlgmr.msra.gmra.mrb[24].mxu1 %v2620_v4 }
 0x4d9   :  { %9627 = vmatpush1.bf16.msra.mxu0 %v12190_v36  ;;  %9659 = vmatpush1.bf16.msra.mxu1 %v12193_v30  ;;  %v14046_v36 = vld [vmem:[#allocation11_spill] sm:$0xff]  ;;  %v14047_v30 = vld [vmem:[#allocation12_spill] sm:$0xff] }
 0x4da   :  { %9629 = vmatprep.subr.bf16.mxu0 %v12197_v11  ;;  %9661 = vmatprep.subr.bf16.mxu1 %v12199_v55  ;;  %v14048_v11 = vld [vmem:[#allocation13_spill] sm:$0xff]  ;;  %v14049_v55 = vld [vmem:[#allocation14_spill] sm:$0xff] }
 0x4db   :  { %3222 = vmatprep.mubr.f32.mxu0 %v14032_v3  ;;  %3293 = vmatprep.mubr.f32.mxu1 %v14032_v3 }
 0x4dd   :  { %9631 = vmatpush1.bf16.msra.mxu0 %v12202_v63  ;;  %9663 = vmatpush1.bf16.msra.mxu1 %v12206_v26  ;;  %v14050_v63 = vld [vmem:[#allocation15_spill] sm:$0xff]  ;;  %v14051_v26 = vld [vmem:[#allocation16_spill] sm:$0xff] }
 0x4de   :  { %9633 = vmatprep.subr.bf16.mxu0 %v12208_v34  ;;  %9665 = vmatprep.subr.bf16.mxu1 %v12210_v59  ;;  %v14052_v34 = vld [vmem:[#allocation17_spill] sm:$0xff] }
 0x4e1   :  { %9635 = vmatpush1.bf16.msra.mxu0 %v12213_v58  ;;  %9667 = vmatpush1.bf16.msra.mxu1 %v12217_v27 }
 0x4e2   :  { %9637 = vmatprep.subr.bf16.mxu0 %v12219_v24  ;;  %9669 = vmatprep.subr.bf16.mxu1 %v12222_v2 }
 0x4e5   :  { %9639 = vmatpush1.bf16.msra.mxu0 %v12225_v19  ;;  %9671 = vmatpush1.bf16.msra.mxu1 %v12229_v39 }
 0x4e6   :  { %9641 = vmatprep.subr.bf16.mxu0 %v12231_v52  ;;  %9673 = vmatprep.subr.bf16.mxu1 %v12234_v15 }
 0x4e9   :  { %9643 = vmatpush1.bf16.msra.mxu0 %v12237_v25  ;;  %9675 = vmatpush1.bf16.msra.mxu1 %v12241_v28 }
 0x4ea   :  { %9645 = vmatprep.subr.bf16.mxu0 %v12243_v38  ;;  %9677 = vmatprep.subr.bf16.mxu1 %v12246_v60 }
 0x4ed   :  { %9647 = vmatpush1.bf16.msra.mxu0 %v12249_v51  ;;  %9679 = vmatpush1.bf16.msra.mxu1 %v12253_v44 }
 0x4ee   :  { %9649 = vmatprep.subr.bf16.mxu0 %v12255_v54  ;;  %9681 = vmatprep.subr.bf16.mxu1 %v14046_v36 }
 0x4f1   :  { %9651 = vmatpush1.bf16.msra.mxu0 %v14047_v30  ;;  %9683 = vmatpush1.bf16.msra.mxu1 %v14048_v11 }
 0x4f2   :  { %9653 = vmatprep.subr.bf16.mxu0 %v14049_v55  ;;  %9685 = vmatprep.subr.bf16.mxu1 %v14050_v63 }
 0x4f5   :  { %9655 = vmatpush1.bf16.msra.mxu0 %v14051_v26  ;;  %9687 = vmatpush1.bf16.msra.mxu1 %v14052_v34 }
 0x5ab   :  { %v2688_v59 = vpop.f32.mrb[24].mxu0  ;;  %v2759_v58 = vpop.f32.mrb[24].mxu1 }
 0x5ac   :  { %v2690_v27 = vpop.f32.mrb[25].mxu0  ;;  %v2761_v24 = vpop.f32.mrb[25].mxu1 }
 0x5ad   :  { %v2768_v2 = vcombine.low %v2688_v59, %v2690_v27  ;;  %v2769_v19 = vcombine.high %v2688_v59, %v2690_v27  ;;  %v2770_v39 = vcombine.low %v2759_v58, %v2761_v24  ;;  %v2771_v52 = vcombine.high %v2759_v58, %v2761_v24 }
 0x5af   :  { %v2778_v15 = vrot.slane %v2768_v2, %v11833_v8  ;;  %v2785_v25 = vrot.slane %v2769_v19, %v11833_v8  ;;  %v2792_v28 = vrot.slane %v2770_v39, %v11833_v8  ;;  %v2799_v38 = vrot.slane %v2771_v52, %v11833_v8 }
 0x5b1   :  { %v2800_v60 = vcombine.low %v2778_v15, %v2792_v28  ;;  %v2801_v51 = vcombine.high %v2778_v15, %v2792_v28  ;;  %v2802_v44 = vcombine.low %v2785_v25, %v2799_v38  ;;  %v2803_v54 = vcombine.high %v2785_v25, %v2799_v38 }
 0x5b3   :  { %v2810_v56 = vrot.slane %v2800_v60, %v11833_v8  ;;  %v2817_v43 = vrot.slane %v2802_v44, %v11833_v8  ;;  %v2824_v9 = vrot.slane %v2801_v51, %v11833_v8  ;;  %v2831_v12 = vrot.slane %v2803_v54, %v11833_v8 }
 0x5b5   :  { %v2832_v16 = vcombine.high %v2810_v56, %v2810_v56  ;;  %v2833_v1 = vcombine.high %v2817_v43, %v2817_v43  ;;  %v2834_v45 = vcombine.high %v2824_v9, %v2824_v9  ;;  %v2835_v33 = vcombine.high %v2831_v12, %v2831_v12 }
 0x5b6   :  { %v2844_v10 = vadd.f32 %v2810_v56, %v2485_v21  ;;  %v2845_v18 = vadd.f32 %v2824_v9, %v2487_v17  ;;  %v2848_v62 = vadd.f32 %v2817_v43, %v2493_v6  ;;  %v2849_v32 = vadd.f32 %v2831_v12, %v2495_v23 }
 0x5b7   :  { %v2846_v31 = vadd.f32 %v2832_v16, %v2489_v47  ;;  %v2847_v14 = vadd.f32 %v2834_v45, %v2491_v40  ;;  %v2850_v53 = vadd.f32 %v2833_v1, %v2497_v37  ;;  %v2851_v41 = vadd.f32 %v2835_v33, %v2499_v29 }
 0x5b8   :  { %v9208_v46 = vmul.f32 -1.442695, %v2844_v10  ;;  %v9209_v48 = vmul.f32 -1.442695, %v2845_v18  ;;  %v9212_v20 = vmul.f32 -1.442695, %v2848_v62 }
 0x5b9   :  { %v9210_v0 = vmul.f32 -1.442695, %v2846_v31  ;;  %v9211_v61 = vmul.f32 -1.442695, %v2847_v14  ;;  %v9213_v7 = vmul.f32 -1.442695, %v2849_v32 }
 0x5ba   :  { %10655 = vpow2.f32 %v9208_v46  ;;  %v9214_v4 = vmul.f32 -1.442695, %v2850_v53  ;;  %v9215_v36 = vmul.f32 -1.442695, %v2851_v41  ;;  %v2908_v30 = vrot.slane %v2844_v10, 3 }
 0x5bb   :  { %10657 = vpow2.f32 %v9209_v48  ;;  %v2909_v11 = vrot.slane %v2845_v18, 3  ;;  %v2910_v55 = vrot.slane %v2846_v31, 3  ;;  %v2911_v63 = vrot.slane %v2847_v14, 3 }
 0x5bc   :  { %10659 = vpow2.f32 %v9210_v0  ;;  %v2912_v26 = vrot.slane %v2848_v62, 3  ;;  %v2913_v44 = vrot.slane %v2849_v32, 3  ;;  %v2914_v43 = vrot.slane %v2850_v53, 3 }
 0x5bd   :  { %10661 = vpow2.f32 %v9211_v61  ;;  %v2915_v12 = vrot.slane %v2851_v41, 3 }
 0x5be   :  { %10663 = vpow2.f32 %v9212_v20 }
 0x5bf   :  { %10665 = vpow2.f32 %v9213_v7 }
 0x5c0   :  { %10667 = vpow2.f32 %v9214_v4 }
 0x5c1   :  { %10669 = vpow2.f32 %v9215_v36 }
 0x5c2   :  { %10671 = vtanh.f32 %v2908_v30 }
 0x5c3   :  { %10673 = vtanh.f32 %v2909_v11 }
 0x5c4   :  { %v10656_v34 = vpop.eup %10655  ;;  %10675 = vtanh.f32 %v2910_v55 }
 0x5c5   :  { %v10658_v59 = vpop.eup %10657  ;;  %v2876_v58 = vadd.f32 1.0, %v10656_v34  ;;  %10677 = vtanh.f32 %v2911_v63 }
 0x5c6   :  { %v10660_v27 = vpop.eup %10659  ;;  %v2877_v24 = vadd.f32 1.0, %v10658_v59  ;;  %10679 = vtanh.f32 %v2912_v26 }
 0x5c7   :  { %v10662_v2 = vpop.eup %10661  ;;  %v2878_v19 = vadd.f32 1.0, %v10660_v27  ;;  %10681 = vrcp.f32 %v2876_v58 }
 0x5c8   :  { %v10664_v39 = vpop.eup %10663  ;;  %v2879_v52 = vadd.f32 1.0, %v10662_v2  ;;  %10683 = vrcp.f32 %v2877_v24 }
 0x5c9   :  { %v10666_v15 = vpop.eup %10665  ;;  %v2880_v25 = vadd.f32 1.0, %v10664_v39  ;;  %10685 = vrcp.f32 %v2878_v19 }
 0x5ca   :  { %v10668_v28 = vpop.eup %10667  ;;  %v2881_v38 = vadd.f32 1.0, %v10666_v15  ;;  %10687 = vrcp.f32 %v2879_v52 }
 0x5cb   :  { %v10670_v60 = vpop.eup %10669  ;;  %v2882_v51 = vadd.f32 1.0, %v10668_v28  ;;  %10689 = vrcp.f32 %v2880_v25 }
 0x5cc   :  { %v10672_v54 = vpop.eup %10671  ;;  %v2883_v56 = vadd.f32 1.0, %v10670_v60  ;;  %10691 = vrcp.f32 %v2881_v38 }
 0x5cd   :  { %v10674_v9 = vpop.eup %10673  ;;  %10693 = vrcp.f32 %v2882_v51 }
 0x5ce   :  { %v10676_v21 = vpop.eup %10675  ;;  %10695 = vrcp.f32 %v2883_v56 }
 0x5cf   :  { %v10678_v17 = vpop.eup %10677  ;;  %10697 = vtanh.f32 %v2913_v44 }
 0x5d0   :  { %v10680_v47 = vpop.eup %10679  ;;  %10699 = vtanh.f32 %v2914_v43 }
 0x5d1   :  { %v10682_v6 = vpop.eup %10681  ;;  %10701 = vtanh.f32 %v2915_v12 }
 0x5d2   :  { %v10684_v16 = vpop.eup %10683  ;;  %v2940_v1 = vrot.slane %v10682_v6, 1  ;;  %v2964_v18 = vmul.f32 %v10682_v6, %v10672_v54  ;;  %v2988_v19 = vrot.slane %v10682_v6, 2 }
 0x5d3   :  { %v10686_v45 = vpop.eup %10685  ;;  %v2941_v33 = vrot.slane %v10684_v16, 1  ;;  %v2965_v31 = vmul.f32 %v10684_v16, %v10674_v9  ;;  %v2989_v39 = vrot.slane %v10684_v16, 2 }
 0x5d4   :  { %v10688_v40 = vpop.eup %10687  ;;  %v2942_v23 = vrot.slane %v10686_v45, 1  ;;  %v2956_v10 = vmul.f32 %v2940_v1, %v12297_v13  ;;  %v2966_v14 = vmul.f32 %v10686_v45, %v10676_v21  ;;  %v2990_v15 = vrot.slane %v10686_v45, 2 }
 0x5d5   :  { %v10690_v62 = vpop.eup %10689  ;;  %v2943_v37 = vrot.slane %v10688_v40, 1  ;;  %v2957_v29 = vmul.f32 %v2941_v33, %v12301_v22  ;;  %v2967_v48 = vmul.f32 %v10688_v40, %v10678_v17  ;;  %v2991_v38 = vrot.slane %v10688_v40, 2 }
 0x5d6   :  { %v12401_v32 = vpop.eup %10691  ;;  %v2944_v53 = vrot.slane %v10690_v62, 1  ;;  %v2958_v46 = vmul.f32 %v2942_v23, %v12304_v57  ;;  %v12404_v41 = vadd.f32 %v2964_v18, %v2956_v10  ;;  %v2968_v20 = vmul.f32 %v10690_v62, %v10680_v47 }
 0x5d7   :  { %v10694_v0 = vpop.eup %10693  ;;  %v2945_v61 = vrot.slane %v12401_v32, 1  ;;  %v2959_v13 = vmul.f32 %v2943_v37, %v12308_v49  ;;  %v12408_v7 = vadd.f32 %v2965_v31, %v2957_v29  ;;  %v2992_v44 = vrot.slane %v10690_v62, 2 }
 0x5d8   :  { %v10696_v4 = vpop.eup %10695  ;;  %v2946_v22 = vrot.slane %v10694_v0, 1  ;;  %v2960_v36 = vmul.f32 %v2944_v53, %v12313_v5  ;;  %v12411_v30 = vadd.f32 %v2966_v14, %v2958_v46  ;;  %10703 = vtanh.f32 %v12404_v41 }
 0x5d9   :  { %v10698_v57 = vpop.eup %10697  ;;  %v2947_v11 = vrot.slane %v10696_v4, 1  ;;  %v2961_v55 = vmul.f32 %v2945_v61, %v12318_v42  ;;  %v12415_v63 = vadd.f32 %v2967_v48, %v2959_v13  ;;  %10705 = vtanh.f32 %v12408_v7  ;;  %v3577_v61 = vld [vmem:[#allocation3 + $0x28] sm:$0xff]  ;;  %v3575_v13 = vld [vmem:[#allocation3 + $0x18] sm:$0xff] }
 0x5da   :  { %v10700_v49 = vpop.eup %10699  ;;  %v2962_v26 = vmul.f32 %v2946_v22, %v12321_v35  ;;  %v2969_v34 = vmul.f32 %v10698_v57, %v12401_v32  ;;  %v12420_v59 = vadd.f32 %v2968_v20, %v2960_v36  ;;  %10707 = vtanh.f32 %v12411_v30  ;;  %v3572_v22 = vld [vmem:[#allocation3] sm:$0xff] }
 0x5db   :  { %v10702_v5 = vpop.eup %10701  ;;  %v2963_v58 = vmul.f32 %v2947_v11, %v12323_v50  ;;  %v2970_v27 = vmul.f32 %v10700_v49, %v10694_v0  ;;  %10709 = vtanh.f32 %v12415_v63  ;;  %v2993_v12 = vrot.slane %v12401_v32, 2  ;;  %v3576_v36 = vld [vmem:[#allocation3 + $0x20] sm:$0xff]  ;;  %v3578_v49 = vld [vmem:[#allocation3 + $0x30] sm:$0xff] }
 0x5dc   :  { %v2971_v42 = vmul.f32 %v10702_v5, %v10696_v4  ;;  %v12425_v24 = vadd.f32 %v2969_v34, %v2961_v55  ;;  %10711 = vtanh.f32 %v12420_v59  ;;  %v2994_v47 = vrot.slane %v10694_v0, 2  ;;  %v3573_v0 = vld [vmem:[#allocation3 + $0x8] sm:$0xff]  ;;  %v3574_v55 = vld [vmem:[#allocation3 + $0x10] sm:$0xff] }
 0x5dd   :  { %v12428_v2 = vadd.f32 %v2970_v27, %v2962_v26  ;;  %v2995_v1 = vrot.slane %v10696_v4, 2  ;;  %v12468_v20 = vpack.c.bf16 %v3577_v61, %v3573_v0  ;;  %v3579_v4 = vld [vmem:[#allocation3 + $0x38] sm:$0xff]  ;;  %v12472_v11 = vpack.c.bf16 %v3576_v36, %v3572_v22  ;;  %v3581_v26 = vld [vmem:[#allocation3 + $0x48] sm:$0xff]  ;;  %v3608_v0 = vld [vmem:[#allocation3 + $0x120] sm:$0xff] }
 0x5de   :  { %v12430_v35 = vadd.f32 %v2971_v42, %v2963_v58  ;;  %10713 = vtanh.f32 %v12425_v24  ;;  %v12470_v57 = vpack.c.bf16 %v3579_v4, %v3575_v13  ;;  %v12475_v34 = vpack.c.bf16 %v3578_v49, %v3574_v55  ;;  %v3585_v5 = vld [vmem:[#allocation3 + $0x68] sm:$0xff]  ;;  %v3583_v58 = vld [vmem:[#allocation3 + $0x58] sm:$0xff]  ;;  %v3606_v61 = vld [vmem:[#allocation3 + $0x110] sm:$0xff] }
 0x5df   :  { %10715 = vtanh.f32 %v12428_v2  ;;  %9689 = vmatprep.subr.bf16.mxu0 %v12468_v20  ;;  %v3587_v27 = vld [vmem:[#allocation3 + $0x78] sm:$0xff]  ;;  %v12479_v42 = vpack.c.bf16 %v3585_v5, %v3581_v26  ;;  %v3610_v4 = vld [vmem:[#allocation3 + $0x130] sm:$0xff]  ;;  %v3613_v22 = vld [vmem:[#allocation3 + $0x148] sm:$0xff] }
 0x5e0   :  { %10717 = vtanh.f32 %v12430_v35  ;;  %9721 = vmatprep.subr.bf16.mxu1 %v12470_v57  ;;  %v3617_v36 = vld [vmem:[#allocation3 + $0x168] sm:$0xff]  ;;  %v3615_v55 = vld [vmem:[#allocation3 + $0x158] sm:$0xff]  ;;  %v12523_v5 = vpack.c.bf16 %v3610_v4, %v3606_v61  ;;  %v3630_v61 = vld [vmem:[#allocation3 + $0x1d0] sm:$0xff] }
 0x5e1   :  { %v3619_v49 = vld [vmem:[#allocation3 + $0x178] sm:$0xff]  ;;  %v3634_v4 = vld [vmem:[#allocation3 + $0x1f0] sm:$0xff] }
 0x5e2   :  { %v10704_v50 = vpop.eup %10703 }
 0x5e3   :  { %v10706_v52 = vpop.eup %10705  ;;  %v3004_v25 = vmul.f32 %v10704_v50, %v2988_v19  ;;  %v12481_v19 = vpack.c.bf16 %v3587_v27, %v3583_v58  ;;  %v3580_v50 = vld [vmem:[#allocation3 + $0x40] sm:$0xff]  ;;  %v12525_v58 = vpack.c.bf16 %v3617_v36, %v3613_v22  ;;  %v12559_v36 = vpack.c.bf16 %v3634_v4, %v3630_v61 }
 0x5e4   :  { %v10708_v28 = vpop.eup %10707  ;;  %v3005_v60 = vmul.f32 %v10706_v52, %v2989_v39  ;;  %v3584_v39 = vld [vmem:[#allocation3 + $0x60] sm:$0xff]  ;;  %v3582_v52 = vld [vmem:[#allocation3 + $0x50] sm:$0xff] }
 0x5e5   :  { %v10710_v51 = vpop.eup %10709  ;;  %v3006_v54 = vmul.f32 %v10708_v28, %v2990_v15  ;;  %3012 = vst [vmem:[%s13974_s7 + $0x4] sm:$0x1] %v3004_v25  ;;  %v12484_v15 = vpack.c.bf16 %v3584_v39, %v3580_v50  ;;  %v3589_v28 = vld [vmem:[#allocation3 + $0x88] sm:$0xff]  ;;  %v3612_v27 = vld [vmem:[#allocation3 + $0x140] sm:$0xff]  ;;  %v3614_v39 = vld [vmem:[#allocation3 + $0x150] sm:$0xff] }
 0x5e6   :  { %v10712_v56 = vpop.eup %10711  ;;  %v3007_v43 = vmul.f32 %v10710_v51, %v2991_v38  ;;  %3013 = vst [vmem:[%s13974_s7 + $0xc] sm:$0x1] %v3005_v60  ;;  %v3108_v9 = vcombine.low %v3004_v25, %v3005_v60  ;;  %v3586_v25 = vld [vmem:[#allocation3 + $0x70] sm:$0xff]  ;;  %v3593_v38 = vld [vmem:[#allocation3 + $0xa8] sm:$0xff]  ;;  %v3616_v50 = vld [vmem:[#allocation3 + $0x160] sm:$0xff] }
 0x5e7   :  { %v3008_v21 = vmul.f32 %v10712_v56, %v2992_v44  ;;  %3014 = vst [vmem:[%s13974_s7 + $0x14] sm:$0x1] %v3006_v54  ;;  %v12488_v60 = vpack.c.bf16 %v3586_v25, %v3582_v52  ;;  %v12490_v51 = vpack.c.bf16 %v3593_v38, %v3589_v28  ;;  %v3591_v44 = vld [vmem:[#allocation3 + $0x98] sm:$0xff]  ;;  %v3588_v56 = vld [vmem:[#allocation3 + $0x80] sm:$0xff]  ;;  %v12528_v52 = vpack.c.bf16 %v3619_v49, %v3615_v55  ;;  %v3618_v25 = vld [vmem:[#allocation3 + $0x170] sm:$0xff] }
 0x5e8   :  { %v10714_v17 = vpop.eup %10713  ;;  %3015 = vst [vmem:[%s13974_s7 + $0x1c] sm:$0x1] %v3007_v43  ;;  %v3109_v6 = vcombine.low %v3006_v54, %v3007_v43  ;;  %v3118_v23 = vrot.slane %v3108_v9, %v11833_v8  ;;  %v3595_v54 = vld [vmem:[#allocation3 + $0xb8] sm:$0xff]  ;;  %v3592_v9 = vld [vmem:[#allocation3 + $0xa0] sm:$0xff]  ;;  %v3621_v28 = vld [vmem:[#allocation3 + $0x188] sm:$0xff] }
 0x5e9   :  { %v10716_v16 = vpop.eup %10715  ;;  %v3009_v45 = vmul.f32 %v10714_v17, %v2993_v12  ;;  %3016 = vst [vmem:[%s13974_s7 + $0x24] sm:$0x1] %v3008_v21  ;;  %v12492_v43 = vpack.c.bf16 %v3595_v54, %v3591_v44  ;;  %v3590_v12 = vld [vmem:[#allocation3 + $0x90] sm:$0xff]  ;;  %v12495_v17 = vpack.c.bf16 %v3592_v9, %v3588_v56  ;;  %v3625_v38 = vld [vmem:[#allocation3 + $0x1a8] sm:$0xff]  ;;  %v3623_v44 = vld [vmem:[#allocation3 + $0x198] sm:$0xff]  ;;  %v12531_v56 = vpack.c.bf16 %v3616_v50, %v3612_v27 }
 0x5ea   :  { %v10718_v33 = vpop.eup %10717  ;;  %v3010_v40 = vmul.f32 %v10716_v16, %v2994_v47  ;;  %v3125_v10 = vrot.slane %v3109_v6, %v11833_v8  ;;  %v3597_v47 = vld [vmem:[#allocation3 + $0xc8] sm:$0xff]  ;;  %v3599_v16 = vld [vmem:[#allocation3 + $0xd8] sm:$0xff]  ;;  %v12535_v9 = vpack.c.bf16 %v3618_v25, %v3614_v39  ;;  %14059 = vst [vmem:[#allocation17_spill] sm:$0xff] %v12559_v36 }
 0x5eb   :  { %v3011_v18 = vmul.f32 %v10718_v33, %v2995_v1  ;;  %3017 = vst [vmem:[%s13974_s7 + $0x2c] sm:$0x1] %v3009_v45  ;;  %v3110_v62 = vcombine.low %v3008_v21, %v3009_v45  ;;  %v3594_v21 = vld [vmem:[#allocation3 + $0xb0] sm:$0xff]  ;;  %v3601_v6 = vld [vmem:[#allocation3 + $0xe8] sm:$0xff]  ;;  %v3603_v33 = vld [vmem:[#allocation3 + $0xf8] sm:$0xff] }
 0x5ec   :  { %3018 = vst [vmem:[%s13974_s7 + $0x34] sm:$0x1] %v3010_v40  ;;  %v3140_v37 = vcombine.low %v3118_v23, %v3125_v10  ;;  %v12499_v1 = vpack.c.bf16 %v3594_v21, %v3590_v12  ;;  %v12501_v45 = vpack.c.bf16 %v3601_v6, %v3597_v47  ;;  %v3600_v23 = vld [vmem:[#allocation3 + $0xe0] sm:$0xff]  ;;  %v12504_v10 = vpack.c.bf16 %v3603_v33, %v3599_v16  ;;  %v3627_v54 = vld [vmem:[#allocation3 + $0x1b8] sm:$0xff]  ;;  %v3622_v6 = vld [vmem:[#allocation3 + $0x190] sm:$0xff] }
 0x5ed   :  { %3019 = vst [vmem:[%s13974_s7 + $0x3c] sm:$0x1] %v3011_v18  ;;  %v3111_v29 = vcombine.low %v3010_v40, %v3011_v18  ;;  %v3132_v31 = vrot.slane %v3110_v62, %v11833_v8  ;;  %v3596_v40 = vld [vmem:[#allocation3 + $0xc0] sm:$0xff]  ;;  %v3598_v18 = vld [vmem:[#allocation3 + $0xd0] sm:$0xff]  ;;  %v12537_v12 = vpack.c.bf16 %v3625_v38, %v3621_v28  ;;  %v12540_v16 = vpack.c.bf16 %v3627_v54, %v3623_v44 }
 0x5ee   :  { %v3148_v53 = vrot.slane %v3140_v37, %v11833_v8  ;;  %v3602_v62 = vld [vmem:[#allocation3 + $0xf0] sm:$0xff]  ;;  %v3605_v37 = vld [vmem:[#allocation3 + $0x108] sm:$0xff]  ;;  %v3620_v21 = vld [vmem:[#allocation3 + $0x180] sm:$0xff] }
 0x5ef   :  { %v3139_v14 = vrot.slane %v3111_v29, %v11833_v8  ;;  %v3609_v29 = vld [vmem:[#allocation3 + $0x128] sm:$0xff]  ;;  %v3624_v47 = vld [vmem:[#allocation3 + $0x1a0] sm:$0xff]  ;;  %14053 = vst [vmem:[#allocation11_spill] sm:$0xff] %v12540_v16  ;;  %v3626_v33 = vld [vmem:[#allocation3 + $0x1b0] sm:$0xff] }
 0x5f0   :  { %v3025_v61 = vld [vmem:[#allocation2 + $0x45] ss:$8 sm:$0xf] }
 0x5f1   :  { %v3141_v32 = vcombine.low %v3132_v31, %v3139_v14  ;;  %v3607_v31 = vld [vmem:[#allocation3 + $0x118] sm:$0xff] }
 0x5f2   :  { %v3611_v14 = vld [vmem:[#allocation3 + $0x138] sm:$0xff] }
 0x5f3   :  { %v3155_v46 = vrot.slane %v3141_v32, %v11833_v8  ;;  %v12507_v32 = vpack.c.bf16 %v3600_v23, %v3596_v40  ;;  %v12516_v13 = vpack.c.bf16 %v3611_v14, %v3607_v31  ;;  %v3629_v40 = vld [vmem:[#allocation3 + $0x1c8] sm:$0xff]  ;;  %v3628_v14 = vld [vmem:[#allocation3 + $0x1c0] sm:$0xff] }
 0x5f4   :  { %v3633_v23 = vld [vmem:[#allocation3 + $0x1e8] sm:$0xff] }
 0x5f5   :  { %v3156_v48 = vcombine.low %v3148_v53, %v3155_v46  ;;  %v12511_v53 = vpack.c.bf16 %v3602_v62, %v3598_v18  ;;  %v12513_v46 = vpack.c.bf16 %v3609_v29, %v3605_v37  ;;  %v3631_v18 = vld [vmem:[#allocation3 + $0x1d8] sm:$0xff]  ;;  %v12543_v37 = vpack.c.bf16 %v3624_v47, %v3620_v21 }
 0x5f6   :  { %v3635_v62 = vld [vmem:[#allocation3 + $0x1f8] sm:$0xff]  ;;  %v12547_v29 = vpack.c.bf16 %v3626_v33, %v3622_v6  ;;  %v12549_v31 = vpack.c.bf16 %v3633_v23, %v3629_v40 }
 0x5f7   :  { %3223 = vmatmul.mubr.f32.vlgmr.msra.gmra.mrb[26].mxu0 %v3156_v48  ;;  %3294 = vmatmul.mubr.f32.vlgmr.msra.gmra.mrb[26].mxu1 %v3156_v48  ;;  %v3604_v48 = vld [vmem:[#allocation3 + $0x100] sm:$0xff]  ;;  %14054 = vst [vmem:[#allocation12_spill] sm:$0xff] %v12543_v37 }
 0x5f8   :  { %3758 = vmatprep.mubr.f32.mxu0 %v14032_v3  ;;  %3829 = vmatprep.mubr.f32.mxu1 %v14032_v3  ;;  %v12519_v26 = vpack.c.bf16 %v3608_v0, %v3604_v48  ;;  %14055 = vst [vmem:[#allocation13_spill] sm:$0xff] %v12547_v29  ;;  %14056 = vst [vmem:[#allocation14_spill] sm:$0xff] %v12549_v31  ;;  %v3632_v48 = vld [vmem:[#allocation3 + $0x1e0] sm:$0xff]  ;;  %v12552_v0 = vpack.c.bf16 %v3635_v62, %v3631_v18 }
 0x5f9   :  { %9691 = vmatpush1.bf16.msra.mxu0 %v12472_v11  ;;  %9723 = vmatpush1.bf16.msra.mxu1 %v12475_v34  ;;  %v12555_v22 = vpack.c.bf16 %v3632_v48, %v3628_v14  ;;  %v3021_v14 = vld [vmem:[#allocation2 + $0x5] ss:$8 sm:$0xf] }
 0x5fa   :  { %9693 = vmatprep.subr.bf16.mxu0 %v12479_v42  ;;  %9725 = vmatprep.subr.bf16.mxu1 %v12481_v19  ;;  %14057 = vst [vmem:[#allocation15_spill] sm:$0xff] %v12552_v0  ;;  %v3023_v48 = vld [vmem:[#allocation2 + $0x25] ss:$8 sm:$0xf] }
 0x5fb   :  { %14058 = vst [vmem:[#allocation16_spill] sm:$0xff] %v12555_v22  ;;  %v3029_v4 = vld [vmem:[#allocation2 + $0x85] ss:$8 sm:$0xf] }
 0x5fd   :  { %9695 = vmatpush1.bf16.msra.mxu0 %v12484_v15  ;;  %9727 = vmatpush1.bf16.msra.mxu1 %v12488_v60 }
 0x5fe   :  { %9697 = vmatprep.subr.bf16.mxu0 %v12490_v51  ;;  %9729 = vmatprep.subr.bf16.mxu1 %v12492_v43 }
 0x601   :  { %9699 = vmatpush1.bf16.msra.mxu0 %v12495_v17  ;;  %9731 = vmatpush1.bf16.msra.mxu1 %v12499_v1 }
 0x602   :  { %9701 = vmatprep.subr.bf16.mxu0 %v12501_v45  ;;  %9733 = vmatprep.subr.bf16.mxu1 %v12504_v10 }
 0x605   :  { %9703 = vmatpush1.bf16.msra.mxu0 %v12507_v32  ;;  %9735 = vmatpush1.bf16.msra.mxu1 %v12511_v53 }
 0x606   :  { %9705 = vmatprep.subr.bf16.mxu0 %v12513_v46  ;;  %9737 = vmatprep.subr.bf16.mxu1 %v12516_v13 }
 0x609   :  { %9707 = vmatpush1.bf16.msra.mxu0 %v12519_v26  ;;  %9739 = vmatpush1.bf16.msra.mxu1 %v12523_v5 }
 0x60a   :  { %9709 = vmatprep.subr.bf16.mxu0 %v12525_v58  ;;  %9741 = vmatprep.subr.bf16.mxu1 %v12528_v52 }
 0x60d   :  { %9711 = vmatpush1.bf16.msra.mxu0 %v12531_v56  ;;  %9743 = vmatpush1.bf16.msra.mxu1 %v12535_v9 }
 0x60e   :  { %9713 = vmatprep.subr.bf16.mxu0 %v12537_v12  ;;  %9745 = vmatprep.subr.bf16.mxu1 %v12540_v16 }
 0x611   :  { %9715 = vmatpush1.bf16.msra.mxu0 %v12543_v37  ;;  %9747 = vmatpush1.bf16.msra.mxu1 %v12547_v29 }
 0x612   :  { %9717 = vmatprep.subr.bf16.mxu0 %v12549_v31  ;;  %9749 = vmatprep.subr.bf16.mxu1 %v12552_v0 }
 0x615   :  { %9719 = vmatpush1.bf16.msra.mxu0 %v12555_v22  ;;  %9751 = vmatpush1.bf16.msra.mxu1 %v12559_v36 }
 0x616   :  { %9753 = vmatprep.subr.bf16.mxu0 %v12468_v20  ;;  %9785 = vmatprep.subr.bf16.mxu1 %v12470_v57 }
 0x6ca   :  { %v3224_v55 = vpop.f32.mrb[26].mxu0  ;;  %v3295_v49 = vpop.f32.mrb[26].mxu1 }
 0x6cb   :  { %v3226_v27 = vpop.f32.mrb[27].mxu0  ;;  %v3297_v50 = vpop.f32.mrb[27].mxu1 }
 0x6cc   :  { %v3304_v39 = vcombine.low %v3224_v55, %v3226_v27  ;;  %v3305_v25 = vcombine.high %v3224_v55, %v3226_v27  ;;  %v3306_v28 = vcombine.low %v3295_v49, %v3297_v50  ;;  %v3307_v38 = vcombine.high %v3295_v49, %v3297_v50 }
 0x6ce   :  { %v3314_v44 = vrot.slane %v3304_v39, %v11833_v8  ;;  %v3321_v54 = vrot.slane %v3305_v25, %v11833_v8  ;;  %v3328_v21 = vrot.slane %v3306_v28, %v11833_v8  ;;  %v3335_v47 = vrot.slane %v3307_v38, %v11833_v8  ;;  %v3027_v39 = vld [vmem:[#allocation2 + $0x65] ss:$8 sm:$0xf] }
 0x6cf   :  { %v3031_v25 = vld [vmem:[#allocation2 + $0xa5] ss:$8 sm:$0xf] }
 0x6d0   :  { %v3336_v6 = vcombine.low %v3314_v44, %v3328_v21  ;;  %v3337_v20 = vcombine.high %v3314_v44, %v3328_v21  ;;  %v3338_v33 = vcombine.low %v3321_v54, %v3335_v47  ;;  %v3339_v57 = vcombine.high %v3321_v54, %v3335_v47  ;;  %v3033_v54 = vld [vmem:[#allocation2 + $0xc5] ss:$8 sm:$0xf] }
 0x6d1   :  { %v3035_v21 = vld [vmem:[#allocation2 + $0xe5] ss:$8 sm:$0xf] }
 0x6d2   :  { %v3346_v40 = vrot.slane %v3336_v6, %v11833_v8  ;;  %v3353_v23 = vrot.slane %v3338_v33, %v11833_v8  ;;  %v3360_v18 = vrot.slane %v3337_v20, %v11833_v8  ;;  %v3367_v62 = vrot.slane %v3339_v57, %v11833_v8 }
 0x6d4   :  { %v3368_v55 = vcombine.high %v3346_v40, %v3346_v40  ;;  %v3369_v49 = vcombine.high %v3353_v23, %v3353_v23  ;;  %v3370_v27 = vcombine.high %v3360_v18, %v3360_v18  ;;  %v3371_v50 = vcombine.high %v3367_v62, %v3367_v62 }
 0x6d5   :  { %v3380_v28 = vadd.f32 %v3346_v40, %v3021_v14  ;;  %v3381_v38 = vadd.f32 %v3360_v18, %v3023_v48  ;;  %v3384_v44 = vadd.f32 %v3353_v23, %v3029_v4  ;;  %v3385_v20 = vadd.f32 %v3367_v62, %v3031_v25 }
 0x6d6   :  { %v3382_v47 = vadd.f32 %v3368_v55, %v3025_v61  ;;  %v3383_v6 = vadd.f32 %v3370_v27, %v3027_v39  ;;  %v3386_v33 = vadd.f32 %v3369_v49, %v3033_v54  ;;  %v3387_v22 = vadd.f32 %v3371_v50, %v3035_v21 }
 0x6d7   :  { %v9216_v57 = vmul.f32 -1.442695, %v3380_v28  ;;  %v9217_v36 = vmul.f32 -1.442695, %v3381_v38  ;;  %v9220_v29 = vmul.f32 -1.442695, %v3384_v44 }
 0x6d8   :  { %v9218_v0 = vmul.f32 -1.442695, %v3382_v47  ;;  %v9219_v31 = vmul.f32 -1.442695, %v3383_v6  ;;  %v9221_v37 = vmul.f32 -1.442695, %v3385_v20 }
 0x6d9   :  { %10719 = vpow2.f32 %v9216_v57  ;;  %v9222_v16 = vmul.f32 -1.442695, %v3386_v33  ;;  %v9223_v40 = vmul.f32 -1.442695, %v3387_v22  ;;  %v3444_v23 = vrot.slane %v3380_v28, 3 }
 0x6da   :  { %10721 = vpow2.f32 %v9217_v36  ;;  %v3445_v18 = vrot.slane %v3381_v38, 3  ;;  %v3446_v62 = vrot.slane %v3382_v47, 3  ;;  %v3447_v14 = vrot.slane %v3383_v6, 3 }
 0x6db   :  { %10723 = vpow2.f32 %v9218_v0  ;;  %v3448_v48 = vrot.slane %v3384_v44, 3  ;;  %v3449_v38 = vrot.slane %v3385_v20, 3  ;;  %v3450_v21 = vrot.slane %v3386_v33, 3 }
 0x6dc   :  { %10725 = vpow2.f32 %v9219_v31  ;;  %v3451_v6 = vrot.slane %v3387_v22, 3 }
 0x6dd   :  { %10727 = vpow2.f32 %v9220_v29 }
 0x6de   :  { %10729 = vpow2.f32 %v9221_v37 }
 0x6df   :  { %10731 = vpow2.f32 %v9222_v16 }
 0x6e0   :  { %10733 = vpow2.f32 %v9223_v40 }
 0x6e1   :  { %10735 = vtanh.f32 %v3444_v23 }
 0x6e2   :  { %10737 = vtanh.f32 %v3445_v18 }
 0x6e3   :  { %v10720_v61 = vpop.eup %10719  ;;  %10739 = vtanh.f32 %v3446_v62 }
 0x6e4   :  { %v10722_v4 = vpop.eup %10721  ;;  %v3412_v36 = vadd.f32 1.0, %v10720_v61  ;;  %10741 = vtanh.f32 %v3447_v14 }
 0x6e5   :  { %v10724_v0 = vpop.eup %10723  ;;  %v3413_v55 = vadd.f32 1.0, %v10722_v4  ;;  %10743 = vtanh.f32 %v3448_v48 }
 0x6e6   :  { %v10726_v31 = vpop.eup %10725  ;;  %v3414_v29 = vadd.f32 1.0, %v10724_v0  ;;  %10745 = vrcp.f32 %v3412_v36 }
 0x6e7   :  { %v10728_v37 = vpop.eup %10727  ;;  %v3415_v49 = vadd.f32 1.0, %v10726_v31  ;;  %10747 = vrcp.f32 %v3413_v55 }
 0x6e8   :  { %v10730_v16 = vpop.eup %10729  ;;  %v3416_v27 = vadd.f32 1.0, %v10728_v37  ;;  %10749 = vrcp.f32 %v3414_v29 }
 0x6e9   :  { %v10732_v50 = vpop.eup %10731  ;;  %v3417_v39 = vadd.f32 1.0, %v10730_v16  ;;  %10751 = vrcp.f32 %v3415_v49 }
 0x6ea   :  { %v10734_v25 = vpop.eup %10733  ;;  %v3418_v28 = vadd.f32 1.0, %v10732_v50  ;;  %10753 = vrcp.f32 %v3416_v27 }
 0x6eb   :  { %v10736_v44 = vpop.eup %10735  ;;  %v3419_v54 = vadd.f32 1.0, %v10734_v25  ;;  %10755 = vrcp.f32 %v3417_v39 }
 0x6ec   :  { %v10738_v47 = vpop.eup %10737  ;;  %10757 = vrcp.f32 %v3418_v28 }
 0x6ed   :  { %v10740_v57 = vpop.eup %10739  ;;  %10759 = vrcp.f32 %v3419_v54 }
 0x6ee   :  { %v10742_v40 = vpop.eup %10741  ;;  %10761 = vtanh.f32 %v3449_v38 }
 0x6ef   :  { %v10744_v23 = vpop.eup %10743  ;;  %10763 = vtanh.f32 %v3450_v21 }
 0x6f0   :  { %v10746_v18 = vpop.eup %10745  ;;  %10765 = vtanh.f32 %v3451_v6 }
 0x6f1   :  { %v10748_v62 = vpop.eup %10747  ;;  %v3476_v14 = vrot.slane %v10746_v18, 1  ;;  %v3500_v33 = vmul.f32 %v10746_v18, %v10736_v44 }
 0x6f2   :  { %v10750_v48 = vpop.eup %10749  ;;  %v3477_v61 = vrot.slane %v10748_v62, 1  ;;  %v3501_v31 = vmul.f32 %v10748_v62, %v10738_v47 }
 0x6f3   :  { %v10752_v20 = vpop.eup %10751  ;;  %v3478_v4 = vrot.slane %v10750_v48, 1  ;;  %v3492_v36 = vmul.f32 %v3476_v14, %v12404_v41  ;;  %v3502_v29 = vmul.f32 %v10750_v48, %v10740_v57 }
 0x6f4   :  { %v10754_v0 = vpop.eup %10753  ;;  %v3479_v55 = vrot.slane %v10752_v20, 1  ;;  %v3493_v22 = vmul.f32 %v3477_v61, %v12408_v7  ;;  %v3503_v27 = vmul.f32 %v10752_v20, %v10742_v40 }
 0x6f5   :  { %v12576_v37 = vpop.eup %10755  ;;  %v3480_v49 = vrot.slane %v10754_v0, 1  ;;  %v3494_v16 = vmul.f32 %v3478_v4, %v12411_v30  ;;  %v12579_v50 = vadd.f32 %v3500_v33, %v3492_v36  ;;  %v3504_v28 = vmul.f32 %v10754_v0, %v10744_v23 }
 0x6f6   :  { %v10758_v39 = vpop.eup %10757  ;;  %v3481_v25 = vrot.slane %v12576_v37, 1  ;;  %v3495_v41 = vmul.f32 %v3479_v55, %v12415_v63  ;;  %v12583_v38 = vadd.f32 %v3501_v31, %v3493_v22  ;;  %v3524_v55 = vrot.slane %v10746_v18, 2 }
 0x6f7   :  { %v10760_v44 = vpop.eup %10759  ;;  %v3482_v7 = vrot.slane %v10758_v39, 1  ;;  %v3496_v54 = vmul.f32 %v3480_v49, %v12420_v59  ;;  %v12586_v21 = vadd.f32 %v3502_v29, %v3494_v16  ;;  %10767 = vtanh.f32 %v12579_v50 }
 0x6f8   :  { %v10762_v30 = vpop.eup %10761  ;;  %v3483_v47 = vrot.slane %v10760_v44, 1  ;;  %v3497_v6 = vmul.f32 %v3481_v25, %v12425_v24  ;;  %v12590_v57 = vadd.f32 %v3503_v27, %v3495_v41  ;;  %10769 = vtanh.f32 %v12583_v38 }
 0x6f9   :  { %v10764_v63 = vpop.eup %10763  ;;  %v3498_v40 = vmul.f32 %v3482_v7, %v12428_v2  ;;  %v3505_v23 = vmul.f32 %v10762_v30, %v12576_v37  ;;  %v12595_v14 = vadd.f32 %v3504_v28, %v3496_v54  ;;  %10771 = vtanh.f32 %v12586_v21 }
 0x6fa   :  { %v10766_v59 = vpop.eup %10765  ;;  %v3499_v61 = vmul.f32 %v3483_v47, %v12430_v35  ;;  %v3506_v4 = vmul.f32 %v10764_v63, %v10758_v39  ;;  %10773 = vtanh.f32 %v12590_v57  ;;  %v3525_v22 = vrot.slane %v10748_v62, 2 }
 0x6fb   :  { %v3507_v24 = vmul.f32 %v10766_v59, %v10760_v44  ;;  %v12600_v36 = vadd.f32 %v3505_v23, %v3497_v6  ;;  %10775 = vtanh.f32 %v12595_v14  ;;  %v3526_v29 = vrot.slane %v10750_v48, 2 }
 0x6fc   :  { %v12603_v33 = vadd.f32 %v3506_v4, %v3498_v40  ;;  %v3527_v27 = vrot.slane %v10752_v20, 2  ;;  %v3528_v28 = vrot.slane %v10754_v0, 2  ;;  %v3529_v62 = vrot.slane %v12576_v37, 2 }
 0x6fd   :  { %v12605_v2 = vadd.f32 %v3507_v24, %v3499_v61  ;;  %10777 = vtanh.f32 %v12600_v36  ;;  %v3530_v0 = vrot.slane %v10758_v39, 2  ;;  %v3531_v63 = vrot.slane %v10760_v44, 2 }
 0x6fe   :  { %10779 = vtanh.f32 %v12603_v33 }
 0x6ff   :  { %10781 = vtanh.f32 %v12605_v2 }
 0x701   :  { %v10768_v35 = vpop.eup %10767 }
 0x702   :  { %v10770_v31 = vpop.eup %10769  ;;  %v3540_v49 = vmul.f32 %v10768_v35, %v3524_v55 }
 0x703   :  { %v10772_v16 = vpop.eup %10771  ;;  %v3541_v25 = vmul.f32 %v10770_v31, %v3525_v22 }
 0x704   :  { %v10774_v41 = vpop.eup %10773  ;;  %v3542_v7 = vmul.f32 %v10772_v16, %v3526_v29  ;;  %3548 = vst [vmem:[%s13974_s7 + $0x5] sm:$0x1] %v3540_v49 }
 0x705   :  { %v10776_v54 = vpop.eup %10775  ;;  %v3543_v30 = vmul.f32 %v10774_v41, %v3527_v27  ;;  %3549 = vst [vmem:[%s13974_s7 + $0xd] sm:$0x1] %v3541_v25  ;;  %v3644_v18 = vcombine.low %v3540_v49, %v3541_v25 }
 0x706   :  { %v3544_v48 = vmul.f32 %v10776_v54, %v3528_v28  ;;  %3550 = vst [vmem:[%s13974_s7 + $0x15] sm:$0x1] %v3542_v7  ;;  %v3557_v28 = vld [vmem:[#allocation2 + $0x6] ss:$8 sm:$0xf] }
 0x707   :  { %v10778_v20 = vpop.eup %10777  ;;  %3551 = vst [vmem:[%s13974_s7 + $0x1d] sm:$0x1] %v3543_v30  ;;  %v3645_v47 = vcombine.low %v3542_v7, %v3543_v30  ;;  %v3654_v59 = vrot.slane %v3644_v18, %v11833_v8  ;;  %v3559_v7 = vld [vmem:[#allocation2 + $0x26] ss:$8 sm:$0xf] }
 0x708   :  { %v10780_v6 = vpop.eup %10779  ;;  %v3545_v40 = vmul.f32 %v10778_v20, %v3529_v62  ;;  %3552 = vst [vmem:[%s13974_s7 + $0x25] sm:$0x1] %v3544_v48  ;;  %v3561_v54 = vld [vmem:[#allocation2 + $0x46] ss:$8 sm:$0xf] }
 0x709   :  { %v10782_v37 = vpop.eup %10781  ;;  %v3546_v23 = vmul.f32 %v10780_v6, %v3530_v0  ;;  %v3661_v61 = vrot.slane %v3645_v47, %v11833_v8  ;;  %v3565_v30 = vld [vmem:[#allocation2 + $0x86] ss:$8 sm:$0xf] }
 0x70a   :  { %v3547_v4 = vmul.f32 %v10782_v37, %v3531_v63  ;;  %3553 = vst [vmem:[%s13974_s7 + $0x2d] sm:$0x1] %v3545_v40  ;;  %v3646_v39 = vcombine.low %v3544_v48, %v3545_v40  ;;  %v3563_v0 = vld [vmem:[#allocation2 + $0x66] ss:$8 sm:$0xf] }
 0x70b   :  { %3554 = vst [vmem:[%s13974_s7 + $0x35] sm:$0x1] %v3546_v23  ;;  %v3676_v44 = vcombine.low %v3654_v59, %v3661_v61  ;;  %v3567_v47 = vld [vmem:[#allocation2 + $0xa6] ss:$8 sm:$0xf] }
 0x70c   :  { %3555 = vst [vmem:[%s13974_s7 + $0x3d] sm:$0x1] %v3547_v4  ;;  %v3647_v24 = vcombine.low %v3546_v23, %v3547_v4  ;;  %v3668_v55 = vrot.slane %v3646_v39, %v11833_v8  ;;  %v3569_v37 = vld [vmem:[#allocation2 + $0xc6] ss:$8 sm:$0xf] }
 0x70d   :  { %v3684_v31 = vrot.slane %v3676_v44, %v11833_v8  ;;  %v3571_v23 = vld [vmem:[#allocation2 + $0xe6] ss:$8 sm:$0xf] }
 0x70e   :  { %v3675_v35 = vrot.slane %v3647_v24, %v11833_v8 }
 0x710   :  { %v3677_v22 = vcombine.low %v3668_v55, %v3675_v35 }
 0x712   :  { %v3691_v29 = vrot.slane %v3677_v22, %v11833_v8 }
 0x714   :  { %v3692_v49 = vcombine.low %v3684_v31, %v3691_v29 }
 0x716   :  { %3759 = vmatmul.mubr.f32.vlgmr.msra.gmra.mrb[28].mxu0 %v3692_v49  ;;  %3830 = vmatmul.mubr.f32.vlgmr.msra.gmra.mrb[28].mxu1 %v3692_v49 }
 0x717   :  { %9755 = vmatpush1.bf16.msra.mxu0 %v12472_v11  ;;  %9787 = vmatpush1.bf16.msra.mxu1 %v12475_v34  ;;  %v14060_v11 = vld [vmem:[#allocation11_spill] sm:$0xff]  ;;  %v14061_v34 = vld [vmem:[#allocation12_spill] sm:$0xff] }
 0x718   :  { %9757 = vmatprep.subr.bf16.mxu0 %v12479_v42  ;;  %9789 = vmatprep.subr.bf16.mxu1 %v12481_v19  ;;  %v14062_v42 = vld [vmem:[#allocation13_spill] sm:$0xff]  ;;  %v14063_v19 = vld [vmem:[#allocation14_spill] sm:$0xff] }
 0x719   :  { %4294 = vmatprep.mubr.f32.mxu0 %v14032_v3  ;;  %4365 = vmatprep.mubr.f32.mxu1 %v14032_v3 }
 0x71b   :  { %9759 = vmatpush1.bf16.msra.mxu0 %v12484_v15  ;;  %9791 = vmatpush1.bf16.msra.mxu1 %v12488_v60  ;;  %v14064_v15 = vld [vmem:[#allocation15_spill] sm:$0xff]  ;;  %v14065_v60 = vld [vmem:[#allocation16_spill] sm:$0xff] }
 0x71c   :  { %9761 = vmatprep.subr.bf16.mxu0 %v12490_v51  ;;  %9793 = vmatprep.subr.bf16.mxu1 %v12492_v43  ;;  %v14066_v51 = vld [vmem:[#allocation17_spill] sm:$0xff] }
 0x71f   :  { %9763 = vmatpush1.bf16.msra.mxu0 %v12495_v17  ;;  %9795 = vmatpush1.bf16.msra.mxu1 %v12499_v1 }
 0x720   :  { %9765 = vmatprep.subr.bf16.mxu0 %v12501_v45  ;;  %9797 = vmatprep.subr.bf16.mxu1 %v12504_v10 }
 0x723   :  { %9767 = vmatpush1.bf16.msra.mxu0 %v12507_v32  ;;  %9799 = vmatpush1.bf16.msra.mxu1 %v12511_v53 }
 0x724   :  { %9769 = vmatprep.subr.bf16.mxu0 %v12513_v46  ;;  %9801 = vmatprep.subr.bf16.mxu1 %v12516_v13 }
 0x727   :  { %9771 = vmatpush1.bf16.msra.mxu0 %v12519_v26  ;;  %9803 = vmatpush1.bf16.msra.mxu1 %v12523_v5 }
 0x728   :  { %9773 = vmatprep.subr.bf16.mxu0 %v12525_v58  ;;  %9805 = vmatprep.subr.bf16.mxu1 %v12528_v52 }
 0x72b   :  { %9775 = vmatpush1.bf16.msra.mxu0 %v12531_v56  ;;  %9807 = vmatpush1.bf16.msra.mxu1 %v12535_v9 }
 0x72c   :  { %9777 = vmatprep.subr.bf16.mxu0 %v12537_v12  ;;  %9809 = vmatprep.subr.bf16.mxu1 %v14060_v11 }
 0x72f   :  { %9779 = vmatpush1.bf16.msra.mxu0 %v14061_v34  ;;  %9811 = vmatpush1.bf16.msra.mxu1 %v14062_v42 }
 0x730   :  { %9781 = vmatprep.subr.bf16.mxu0 %v14063_v19  ;;  %9813 = vmatprep.subr.bf16.mxu1 %v14064_v15 }
 0x733   :  { %9783 = vmatpush1.bf16.msra.mxu0 %v14065_v60  ;;  %9815 = vmatpush1.bf16.msra.mxu1 %v14066_v51 }
 0x7e9   :  { %v3760_v43 = vpop.f32.mrb[28].mxu0  ;;  %v3831_v17 = vpop.f32.mrb[28].mxu1 }
 0x7ea   :  { %v3762_v1 = vpop.f32.mrb[29].mxu0  ;;  %v3833_v45 = vpop.f32.mrb[29].mxu1 }
 0x7eb   :  { %v3840_v10 = vcombine.low %v3760_v43, %v3762_v1  ;;  %v3841_v32 = vcombine.high %v3760_v43, %v3762_v1  ;;  %v3842_v53 = vcombine.low %v3831_v17, %v3833_v45  ;;  %v3843_v46 = vcombine.high %v3831_v17, %v3833_v45 }
 0x7ed   :  { %v3850_v13 = vrot.slane %v3840_v10, %v11833_v8  ;;  %v3857_v26 = vrot.slane %v3841_v32, %v11833_v8  ;;  %v3864_v5 = vrot.slane %v3842_v53, %v11833_v8  ;;  %v3871_v58 = vrot.slane %v3843_v46, %v11833_v8 }
 0x7ef   :  { %v3872_v52 = vcombine.low %v3850_v13, %v3864_v5  ;;  %v3873_v56 = vcombine.high %v3850_v13, %v3864_v5  ;;  %v3874_v9 = vcombine.low %v3857_v26, %v3871_v58  ;;  %v3875_v12 = vcombine.high %v3857_v26, %v3871_v58 }
 0x7f1   :  { %v3882_v16 = vrot.slane %v3872_v52, %v11833_v8  ;;  %v3889_v27 = vrot.slane %v3874_v9, %v11833_v8  ;;  %v3896_v25 = vrot.slane %v3873_v56, %v11833_v8  ;;  %v3903_v41 = vrot.slane %v3875_v12, %v11833_v8 }
 0x7f3   :  { %v3904_v18 = vcombine.high %v3882_v16, %v3882_v16  ;;  %v3905_v62 = vcombine.high %v3889_v27, %v3889_v27  ;;  %v3906_v48 = vcombine.high %v3896_v25, %v3896_v25  ;;  %v3907_v20 = vcombine.high %v3903_v41, %v3903_v41 }
 0x7f4   :  { %v3916_v6 = vadd.f32 %v3882_v16, %v3557_v28  ;;  %v3917_v63 = vadd.f32 %v3896_v25, %v3559_v7  ;;  %v3920_v40 = vadd.f32 %v3889_v27, %v3565_v30  ;;  %v3921_v4 = vadd.f32 %v3903_v41, %v3567_v47 }
 0x7f5   :  { %v3918_v59 = vadd.f32 %v3904_v18, %v3561_v54  ;;  %v3919_v61 = vadd.f32 %v3906_v48, %v3563_v0  ;;  %v3922_v39 = vadd.f32 %v3905_v62, %v3569_v37  ;;  %v3923_v55 = vadd.f32 %v3907_v20, %v3571_v23 }
 0x7f6   :  { %v9224_v44 = vmul.f32 -1.442695, %v3916_v6  ;;  %v9225_v24 = vmul.f32 -1.442695, %v3917_v63  ;;  %v9228_v31 = vmul.f32 -1.442695, %v3920_v40 }
 0x7f7   :  { %v9226_v35 = vmul.f32 -1.442695, %v3918_v59  ;;  %v9227_v22 = vmul.f32 -1.442695, %v3919_v61  ;;  %v9229_v29 = vmul.f32 -1.442695, %v3921_v4 }
 0x7f8   :  { %10783 = vpow2.f32 %v9224_v44  ;;  %v9230_v49 = vmul.f32 -1.442695, %v3922_v39  ;;  %v9231_v11 = vmul.f32 -1.442695, %v3923_v55  ;;  %v3980_v34 = vrot.slane %v3916_v6, 3 }
 0x7f9   :  { %10785 = vpow2.f32 %v9225_v24  ;;  %v3981_v42 = vrot.slane %v3917_v63, 3  ;;  %v3982_v19 = vrot.slane %v3918_v59, 3  ;;  %v3983_v15 = vrot.slane %v3919_v61, 3 }
 0x7fa   :  { %10787 = vpow2.f32 %v9226_v35  ;;  %v3984_v60 = vrot.slane %v3920_v40, 3  ;;  %v3985_v9 = vrot.slane %v3921_v4, 3  ;;  %v3986_v27 = vrot.slane %v3922_v39, 3 }
 0x7fb   :  { %10789 = vpow2.f32 %v9227_v22  ;;  %v3987_v41 = vrot.slane %v3923_v55, 3 }
 0x7fc   :  { %10791 = vpow2.f32 %v9228_v31 }
 0x7fd   :  { %10793 = vpow2.f32 %v9229_v29 }
 0x7fe   :  { %10795 = vpow2.f32 %v9230_v49 }
 0x7ff   :  { %10797 = vpow2.f32 %v9231_v11 }
 0x800   :  { %10799 = vtanh.f32 %v3980_v34 }
 0x801   :  { %10801 = vtanh.f32 %v3981_v42 }
 0x802   :  { %v10784_v51 = vpop.eup %10783  ;;  %10803 = vtanh.f32 %v3982_v19 }
 0x803   :  { %v10786_v43 = vpop.eup %10785  ;;  %v3948_v17 = vadd.f32 1.0, %v10784_v51  ;;  %10805 = vtanh.f32 %v3983_v15 }
 0x804   :  { %v10788_v1 = vpop.eup %10787  ;;  %v3949_v45 = vadd.f32 1.0, %v10786_v43  ;;  %10807 = vtanh.f32 %v3984_v60 }
 0x805   :  { %v10790_v10 = vpop.eup %10789  ;;  %v3950_v32 = vadd.f32 1.0, %v10788_v1  ;;  %10809 = vrcp.f32 %v3948_v17 }
 0x806   :  { %v10792_v53 = vpop.eup %10791  ;;  %v3951_v46 = vadd.f32 1.0, %v10790_v10  ;;  %10811 = vrcp.f32 %v3949_v45 }
 0x807   :  { %v10794_v13 = vpop.eup %10793  ;;  %v3952_v26 = vadd.f32 1.0, %v10792_v53  ;;  %10813 = vrcp.f32 %v3950_v32 }
 0x808   :  { %v10796_v5 = vpop.eup %10795  ;;  %v3953_v58 = vadd.f32 1.0, %v10794_v13  ;;  %10815 = vrcp.f32 %v3951_v46 }
 0x809   :  { %v10798_v52 = vpop.eup %10797  ;;  %v3954_v56 = vadd.f32 1.0, %v10796_v5  ;;  %10817 = vrcp.f32 %v3952_v26 }
 0x80a   :  { %v10800_v12 = vpop.eup %10799  ;;  %v3955_v16 = vadd.f32 1.0, %v10798_v52  ;;  %10819 = vrcp.f32 %v3953_v58 }
 0x80b   :  { %v10802_v25 = vpop.eup %10801  ;;  %10821 = vrcp.f32 %v3954_v56 }
 0x80c   :  { %v10804_v28 = vpop.eup %10803  ;;  %10823 = vrcp.f32 %v3955_v16 }
 0x80d   :  { %v10806_v7 = vpop.eup %10805  ;;  %10825 = vtanh.f32 %v3985_v9 }
 0x80e   :  { %v10808_v54 = vpop.eup %10807  ;;  %10827 = vtanh.f32 %v3986_v27 }
 0x80f   :  { %v10810_v30 = vpop.eup %10809  ;;  %10829 = vtanh.f32 %v3987_v41 }
 0x810   :  { %v10812_v18 = vpop.eup %10811  ;;  %v4012_v62 = vrot.slane %v10810_v30, 1  ;;  %v4036_v63 = vmul.f32 %v10810_v30, %v10800_v12  ;;  %v4060_v32 = vrot.slane %v10810_v30, 2 }
 0x811   :  { %v10814_v48 = vpop.eup %10813  ;;  %v4013_v20 = vrot.slane %v10812_v18, 1  ;;  %v4037_v59 = vmul.f32 %v10812_v18, %v10802_v25  ;;  %v4061_v53 = vrot.slane %v10812_v18, 2 }
 0x812   :  { %v10816_v0 = vpop.eup %10815  ;;  %v4014_v47 = vrot.slane %v10814_v48, 1  ;;  %v4028_v6 = vmul.f32 %v4012_v62, %v12579_v50  ;;  %v4038_v61 = vmul.f32 %v10814_v48, %v10804_v28  ;;  %v4062_v13 = vrot.slane %v10814_v48, 2 }
 0x813   :  { %v10818_v40 = vpop.eup %10817  ;;  %v4015_v37 = vrot.slane %v10816_v0, 1  ;;  %v4029_v23 = vmul.f32 %v4013_v20, %v12583_v38  ;;  %v4039_v24 = vmul.f32 %v10816_v0, %v10806_v7  ;;  %v4063_v58 = vrot.slane %v10816_v0, 2 }
 0x814   :  { %v12683_v4 = vpop.eup %10819  ;;  %v4016_v39 = vrot.slane %v10818_v40, 1  ;;  %v4030_v44 = vmul.f32 %v4014_v47, %v12586_v21  ;;  %v12686_v55 = vadd.f32 %v4036_v63, %v4028_v6  ;;  %v4040_v31 = vmul.f32 %v10818_v40, %v10808_v54 }
 0x815   :  { %v10822_v35 = vpop.eup %10821  ;;  %v4017_v22 = vrot.slane %v12683_v4, 1  ;;  %v4031_v50 = vmul.f32 %v4015_v37, %v12590_v57  ;;  %v12690_v29 = vadd.f32 %v4037_v59, %v4029_v23  ;;  %v4064_v9 = vrot.slane %v10818_v40, 2 }
 0x816   :  { %v10824_v49 = vpop.eup %10823  ;;  %v4018_v38 = vrot.slane %v10822_v35, 1  ;;  %v4032_v11 = vmul.f32 %v4016_v39, %v12595_v14  ;;  %v12693_v34 = vadd.f32 %v4038_v61, %v4030_v44  ;;  %10831 = vtanh.f32 %v12686_v55 }
 0x817   :  { %v10826_v21 = vpop.eup %10825  ;;  %v4019_v42 = vrot.slane %v10824_v49, 1  ;;  %v4033_v19 = vmul.f32 %v4017_v22, %v12600_v36  ;;  %v12697_v15 = vadd.f32 %v4039_v24, %v4031_v50  ;;  %10833 = vtanh.f32 %v12690_v29  ;;  %v4641_v22 = vld [vmem:[#allocation5 + $0x28] sm:$0xff]  ;;  %v4639_v50 = vld [vmem:[#allocation5 + $0x18] sm:$0xff] }
 0x818   :  { %v10828_v57 = vpop.eup %10827  ;;  %v4034_v60 = vmul.f32 %v4018_v38, %v12603_v33  ;;  %v4041_v51 = vmul.f32 %v10826_v21, %v12683_v4  ;;  %v12702_v43 = vadd.f32 %v4040_v31, %v4032_v11  ;;  %10835 = vtanh.f32 %v12693_v34  ;;  %v4636_v38 = vld [vmem:[#allocation5] sm:$0xff] }
 0x819   :  { %v10830_v14 = vpop.eup %10829  ;;  %v4035_v17 = vmul.f32 %v4019_v42, %v12605_v2  ;;  %v4042_v1 = vmul.f32 %v10828_v57, %v10822_v35  ;;  %10837 = vtanh.f32 %v12697_v15  ;;  %v4065_v41 = vrot.slane %v12683_v4, 2  ;;  %v4640_v11 = vld [vmem:[#allocation5 + $0x20] sm:$0xff]  ;;  %v4642_v57 = vld [vmem:[#allocation5 + $0x30] sm:$0xff] }
 0x81a   :  { %v4043_v36 = vmul.f32 %v10830_v14, %v10824_v49  ;;  %v12707_v45 = vadd.f32 %v4041_v51, %v4033_v19  ;;  %10839 = vtanh.f32 %v12702_v43  ;;  %v4066_v54 = vrot.slane %v10822_v35, 2  ;;  %v4637_v35 = vld [vmem:[#allocation5 + $0x8] sm:$0xff]  ;;  %v4638_v19 = vld [vmem:[#allocation5 + $0x10] sm:$0xff] }
 0x81b   :  { %v12710_v10 = vadd.f32 %v4042_v1, %v4034_v60  ;;  %v4067_v62 = vrot.slane %v10824_v49, 2  ;;  %v9816_v31 = vpack.c.bf16 %v4641_v22, %v4637_v35  ;;  %v4643_v49 = vld [vmem:[#allocation5 + $0x38] sm:$0xff]  ;;  %v9818_v42 = vpack.c.bf16 %v4640_v11, %v4636_v38  ;;  %v4645_v51 = vld [vmem:[#allocation5 + $0x48] sm:$0xff]  ;;  %v4672_v35 = vld [vmem:[#allocation5 + $0x120] sm:$0xff] }
 0x81c   :  { %v12712_v33 = vadd.f32 %v4043_v36, %v4035_v17  ;;  %10841 = vtanh.f32 %v12707_v45  ;;  %v9848_v21 = vpack.c.bf16 %v4643_v49, %v4639_v50  ;;  %v9850_v60 = vpack.c.bf16 %v4642_v57, %v4638_v19  ;;  %v4649_v14 = vld [vmem:[#allocation5 + $0x68] sm:$0xff]  ;;  %v4647_v17 = vld [vmem:[#allocation5 + $0x58] sm:$0xff]  ;;  %v4670_v50 = vld [vmem:[#allocation5 + $0x110] sm:$0xff] }
 0x81d   :  { %10843 = vtanh.f32 %v12710_v10  ;;  %9817 = vmatprep.subr.bf16.mxu0 %v9816_v31  ;;  %v9820_v1 = vpack.c.bf16 %v4649_v14, %v4645_v51  ;;  %v4651_v36 = vld [vmem:[#allocation5 + $0x78] sm:$0xff]  ;;  %v4674_v31 = vld [vmem:[#allocation5 + $0x130] sm:$0xff]  ;;  %v4677_v49 = vld [vmem:[#allocation5 + $0x148] sm:$0xff] }
 0x81e   :  { %10845 = vtanh.f32 %v12712_v33  ;;  %9849 = vmatprep.subr.bf16.mxu1 %v9848_v21  ;;  %v4681_v38 = vld [vmem:[#allocation5 + $0x168] sm:$0xff]  ;;  %v4679_v11 = vld [vmem:[#allocation5 + $0x158] sm:$0xff]  ;;  %v9866_v19 = vpack.c.bf16 %v4674_v31, %v4670_v50  ;;  %v4680_v51 = vld [vmem:[#allocation5 + $0x160] sm:$0xff] }
 0x81f   :  { %v4683_v21 = vld [vmem:[#allocation5 + $0x178] sm:$0xff]  ;;  %v9836_v57 = vpack.c.bf16 %v4681_v38, %v4677_v49  ;;  %v4678_v14 = vld [vmem:[#allocation5 + $0x150] sm:$0xff] }
 0x820   :  { %v10832_v2 = vpop.eup %10831 }
 0x821   :  { %v10834_v46 = vpop.eup %10833  ;;  %v4076_v26 = vmul.f32 %v10832_v2, %v4060_v32  ;;  %v4644_v32 = vld [vmem:[#allocation5 + $0x40] sm:$0xff] }
 0x822   :  { %v10836_v5 = vpop.eup %10835  ;;  %v4077_v52 = vmul.f32 %v10834_v46, %v4061_v53  ;;  %v4648_v2 = vld [vmem:[#allocation5 + $0x60] sm:$0xff]  ;;  %v9852_v53 = vpack.c.bf16 %v4651_v36, %v4647_v17  ;;  %v9868_v17 = vpack.c.bf16 %v4683_v21, %v4679_v11  ;;  %v4685_v36 = vld [vmem:[#allocation5 + $0x188] sm:$0xff] }
 0x823   :  { %v10838_v56 = vpop.eup %10837  ;;  %v4078_v12 = vmul.f32 %v10836_v5, %v4062_v13  ;;  %4084 = vst [vmem:[%s13974_s7 + $0x6] sm:$0x1] %v4076_v26  ;;  %v9822_v46 = vpack.c.bf16 %v4648_v2, %v4644_v32  ;;  %v4646_v13 = vld [vmem:[#allocation5 + $0x50] sm:$0xff]  ;;  %v4653_v5 = vld [vmem:[#allocation5 + $0x88] sm:$0xff]  ;;  %v4687_v2 = vld [vmem:[#allocation5 + $0x198] sm:$0xff] }
 0x824   :  { %v10840_v16 = vpop.eup %10839  ;;  %v4079_v27 = vmul.f32 %v10838_v56, %v4063_v58  ;;  %4085 = vst [vmem:[%s13974_s7 + $0xe] sm:$0x1] %v4077_v52  ;;  %v4180_v25 = vcombine.low %v4076_v26, %v4077_v52  ;;  %v4650_v26 = vld [vmem:[#allocation5 + $0x70] sm:$0xff]  ;;  %v4657_v52 = vld [vmem:[#allocation5 + $0xa8] sm:$0xff]  ;;  %v4655_v56 = vld [vmem:[#allocation5 + $0x98] sm:$0xff] }
 0x825   :  { %v4080_v28 = vmul.f32 %v10840_v16, %v4064_v9  ;;  %4086 = vst [vmem:[%s13974_s7 + $0x16] sm:$0x1] %v4078_v12  ;;  %v9854_v58 = vpack.c.bf16 %v4650_v26, %v4646_v13  ;;  %v4659_v9 = vld [vmem:[#allocation5 + $0xb8] sm:$0xff]  ;;  %v4689_v32 = vld [vmem:[#allocation5 + $0x1a8] sm:$0xff] }
 0x826   :  { %v10842_v7 = vpop.eup %10841  ;;  %4087 = vst [vmem:[%s13974_s7 + $0x1e] sm:$0x1] %v4079_v27  ;;  %v4181_v30 = vcombine.low %v4078_v12, %v4079_v27  ;;  %v4190_v47 = vrot.slane %v4180_v25, %v11833_v8  ;;  %v9824_v12 = vpack.c.bf16 %v4657_v52, %v4653_v5  ;;  %v9856_v16 = vpack.c.bf16 %v4659_v9, %v4655_v56  ;;  %v4652_v27 = vld [vmem:[#allocation5 + $0x80] sm:$0xff]  ;;  %v4686_v52 = vld [vmem:[#allocation5 + $0x190] sm:$0xff] }
 0x827   :  { %v10844_v18 = vpop.eup %10843  ;;  %v4081_v48 = vmul.f32 %v10842_v7, %v4065_v41  ;;  %4088 = vst [vmem:[%s13974_s7 + $0x26] sm:$0x1] %v4080_v28  ;;  %v4656_v25 = vld [vmem:[#allocation5 + $0xa0] sm:$0xff]  ;;  %v4654_v41 = vld [vmem:[#allocation5 + $0x90] sm:$0xff]  ;;  %v9840_v26 = vpack.c.bf16 %v4689_v32, %v4685_v36 }
 0x828   :  { %v10846_v20 = vpop.eup %10845  ;;  %v4082_v0 = vmul.f32 %v10844_v18, %v4066_v54  ;;  %v4197_v6 = vrot.slane %v4181_v30, %v11833_v8  ;;  %v4658_v7 = vld [vmem:[#allocation5 + $0xb0] sm:$0xff]  ;;  %v4661_v54 = vld [vmem:[#allocation5 + $0xc8] sm:$0xff]  ;;  %v4684_v5 = vld [vmem:[#allocation5 + $0x180] sm:$0xff] }
 0x829   :  { %v4083_v63 = vmul.f32 %v10846_v20, %v4067_v62  ;;  %4089 = vst [vmem:[%s13974_s7 + $0x2e] sm:$0x1] %v4081_v48  ;;  %v4182_v40 = vcombine.low %v4080_v28, %v4081_v48  ;;  %v9826_v28 = vpack.c.bf16 %v4656_v25, %v4652_v27  ;;  %v4665_v30 = vld [vmem:[#allocation5 + $0xe8] sm:$0xff]  ;;  %v9858_v18 = vpack.c.bf16 %v4658_v7, %v4654_v41  ;;  %v4663_v48 = vld [vmem:[#allocation5 + $0xd8] sm:$0xff]  ;;  %v4690_v9 = vld [vmem:[#allocation5 + $0x1b0] sm:$0xff] }
 0x82a   :  { %4090 = vst [vmem:[%s13974_s7 + $0x36] sm:$0x1] %v4082_v0  ;;  %v4212_v37 = vcombine.low %v4190_v47, %v4197_v6  ;;  %v9828_v62 = vpack.c.bf16 %v4665_v30, %v4661_v54  ;;  %v4667_v20 = vld [vmem:[#allocation5 + $0xf8] sm:$0xff]  ;;  %v4664_v6 = vld [vmem:[#allocation5 + $0xe0] sm:$0xff] }
 0x82b   :  { %4091 = vst [vmem:[%s13974_s7 + $0x3e] sm:$0x1] %v4083_v63  ;;  %v4183_v23 = vcombine.low %v4082_v0, %v4083_v63  ;;  %v4204_v59 = vrot.slane %v4182_v40, %v11833_v8  ;;  %v4660_v0 = vld [vmem:[#allocation5 + $0xc0] sm:$0xff]  ;;  %v9860_v47 = vpack.c.bf16 %v4667_v20, %v4663_v48  ;;  %v4662_v63 = vld [vmem:[#allocation5 + $0xd0] sm:$0xff]  ;;  %v4695_v27 = vld [vmem:[#allocation5 + $0x1d8] sm:$0xff] }
 0x82c   :  { %v4220_v39 = vrot.slane %v4212_v37, %v11833_v8  ;;  %v4666_v40 = vld [vmem:[#allocation5 + $0xf0] sm:$0xff]  ;;  %v9830_v37 = vpack.c.bf16 %v4664_v6, %v4660_v0  ;;  %v4699_v25 = vld [vmem:[#allocation5 + $0x1f8] sm:$0xff]  ;;  %v4692_v54 = vld [vmem:[#allocation5 + $0x1c0] sm:$0xff] }
 0x82d   :  { %v4211_v61 = vrot.slane %v4183_v23, %v11833_v8  ;;  %v4669_v23 = vld [vmem:[#allocation5 + $0x108] sm:$0xff]  ;;  %v4696_v30 = vld [vmem:[#allocation5 + $0x1e0] sm:$0xff]  ;;  %v4698_v48 = vld [vmem:[#allocation5 + $0x1f0] sm:$0xff] }
 0x82e   :  { %v4989_v20 = vld [vmem:[#allocation7 + $0x8] sm:$0xff]  ;;  %v4995_v6 = vld [vmem:[#allocation7 + $0x38] sm:$0xff] }
 0x82f   :  { %v4213_v4 = vcombine.low %v4204_v59, %v4211_v61  ;;  %v4673_v59 = vld [vmem:[#allocation5 + $0x128] sm:$0xff]  ;;  %v4671_v61 = vld [vmem:[#allocation5 + $0x118] sm:$0xff] }
 0x830   :  { %v4993_v0 = vld [vmem:[#allocation7 + $0x28] sm:$0xff] }
 0x831   :  { %v4227_v44 = vrot.slane %v4213_v4, %v11833_v8  ;;  %v9862_v4 = vpack.c.bf16 %v4666_v40, %v4662_v63  ;;  %v9846_v63 = vpack.c.bf16 %v4696_v30, %v4692_v54  ;;  %v4097_v36 = vld [vmem:[#allocation2 + $0x47] ss:$8 sm:$0xf] }
 0x832   :  { %v4101_v32 = vld [vmem:[#allocation2 + $0x87] ss:$8 sm:$0xf] }
 0x833   :  { %v4228_v24 = vcombine.low %v4220_v39, %v4227_v44  ;;  %v9832_v39 = vpack.c.bf16 %v4673_v59, %v4669_v23  ;;  %v4675_v44 = vld [vmem:[#allocation5 + $0x138] sm:$0xff] }
 0x834   :  { %v9864_v22 = vpack.c.bf16 %v4675_v44, %v4671_v61 }
 0x835   :  { %4295 = vmatmul.mubr.f32.vlgmr.msra.gmra.mrb[30].mxu0 %v4228_v24  ;;  %4366 = vmatmul.mubr.f32.vlgmr.msra.gmra.mrb[30].mxu1 %v4228_v24  ;;  %v4668_v24 = vld [vmem:[#allocation5 + $0x100] sm:$0xff] }
 0x836   :  { %4786 = vmatprep.mubr.f32.mxu0 %v14032_v3  ;;  %4899 = vmatprep.mubr.f32.mxu1 %v14032_v3 }
 0x837   :  { %9819 = vmatpush1.bf16.msra.mxu0 %v9818_v42  ;;  %9851 = vmatpush1.bf16.msra.mxu1 %v9850_v60  ;;  %v9834_v42 = vpack.c.bf16 %v4672_v35, %v4668_v24  ;;  %v4676_v60 = vld [vmem:[#allocation5 + $0x140] sm:$0xff] }
 0x838   :  { %9821 = vmatprep.subr.bf16.mxu0 %v9820_v1  ;;  %9853 = vmatprep.subr.bf16.mxu1 %v9852_v53  ;;  %v4682_v1 = vld [vmem:[#allocation5 + $0x170] sm:$0xff]  ;;  %v4691_v53 = vld [vmem:[#allocation5 + $0x1b8] sm:$0xff] }
 0x839   :  { %v9870_v13 = vpack.c.bf16 %v4682_v1, %v4678_v14  ;;  %v9872_v56 = vpack.c.bf16 %v4691_v53, %v4687_v2  ;;  %v4095_v1 = vld [vmem:[#allocation2 + $0x27] ss:$8 sm:$0xf] }
 0x83b   :  { %9823 = vmatpush1.bf16.msra.mxu0 %v9822_v46  ;;  %9855 = vmatpush1.bf16.msra.mxu1 %v9854_v58  ;;  %v9838_v46 = vpack.c.bf16 %v4680_v51, %v4676_v60  ;;  %v4688_v58 = vld [vmem:[#allocation5 + $0x1a0] sm:$0xff] }
 0x83c   :  { %9825 = vmatprep.subr.bf16.mxu0 %v9824_v12  ;;  %9857 = vmatprep.subr.bf16.mxu1 %v9856_v16  ;;  %v4693_v12 = vld [vmem:[#allocation5 + $0x1c8] sm:$0xff]  ;;  %v9842_v41 = vpack.c.bf16 %v4688_v58, %v4684_v5 }
 0x83d   :  { %v4697_v16 = vld [vmem:[#allocation5 + $0x1e8] sm:$0xff] }
 0x83e   :  { %v9844_v7 = vpack.c.bf16 %v4697_v16, %v4693_v12  ;;  %v4103_v5 = vld [vmem:[#allocation2 + $0xa7] ss:$8 sm:$0xf] }
 0x83f   :  { %9827 = vmatpush1.bf16.msra.mxu0 %v9826_v28  ;;  %9859 = vmatpush1.bf16.msra.mxu1 %v9858_v18  ;;  %v9874_v28 = vpack.c.bf16 %v4690_v9, %v4686_v52  ;;  %v4694_v18 = vld [vmem:[#allocation5 + $0x1d0] sm:$0xff] }
 0x840   :  { %9829 = vmatprep.subr.bf16.mxu0 %v9828_v62  ;;  %9861 = vmatprep.subr.bf16.mxu1 %v9860_v47  ;;  %v9876_v62 = vpack.c.bf16 %v4699_v25, %v4695_v27  ;;  %v4991_v47 = vld [vmem:[#allocation7 + $0x18] sm:$0xff]  ;;  %v9878_v40 = vpack.c.bf16 %v4698_v48, %v4694_v18 }
 0x841   :  { %v12752_v23 = vpack.c.bf16 %v4995_v6, %v4991_v47  ;;  %v4105_v9 = vld [vmem:[#allocation2 + $0xc7] ss:$8 sm:$0xf] }
 0x842   :  { %v4107_v12 = vld [vmem:[#allocation2 + $0xe7] ss:$8 sm:$0xf] }
 0x843   :  { %9831 = vmatpush1.bf16.msra.mxu0 %v9830_v37  ;;  %9863 = vmatpush1.bf16.msra.mxu1 %v9862_v4  ;;  %v12750_v37 = vpack.c.bf16 %v4993_v0, %v4989_v20 }
 0x844   :  { %9833 = vmatprep.subr.bf16.mxu0 %v9832_v39  ;;  %9865 = vmatprep.subr.bf16.mxu1 %v9864_v22 }
 0x847   :  { %9835 = vmatpush1.bf16.msra.mxu0 %v9834_v42  ;;  %9867 = vmatpush1.bf16.msra.mxu1 %v9866_v19 }
 0x848   :  { %9837 = vmatprep.subr.bf16.mxu0 %v9836_v57  ;;  %9869 = vmatprep.subr.bf16.mxu1 %v9868_v17  ;;  %v4093_v17 = vld [vmem:[#allocation2 + $0x7] ss:$8 sm:$0xf] }
 0x84b   :  { %9839 = vmatpush1.bf16.msra.mxu0 %v9838_v46  ;;  %9871 = vmatpush1.bf16.msra.mxu1 %v9870_v13 }
 0x84c   :  { %9841 = vmatprep.subr.bf16.mxu0 %v9840_v26  ;;  %9873 = vmatprep.subr.bf16.mxu1 %v9872_v56  ;;  %v4099_v26 = vld [vmem:[#allocation2 + $0x67] ss:$8 sm:$0xf] }
 0x84f   :  { %9843 = vmatpush1.bf16.msra.mxu0 %v9842_v41  ;;  %9875 = vmatpush1.bf16.msra.mxu1 %v9874_v28 }
 0x850   :  { %9845 = vmatprep.subr.bf16.mxu0 %v9844_v7  ;;  %9877 = vmatprep.subr.bf16.mxu1 %v9876_v62 }
 0x853   :  { %9847 = vmatpush1.bf16.msra.mxu0 %v9846_v63  ;;  %9879 = vmatpush1.bf16.msra.mxu1 %v9878_v40 }
 0x854   :  { %9881 = vmatprep.subr.bf16.mxu0 %v12750_v37  ;;  %9913 = vmatprep.subr.bf16.mxu1 %v12752_v23 }
 0x908   :  { %v4296_v59 = vpop.f32.mrb[30].mxu0  ;;  %v4367_v61 = vpop.f32.mrb[30].mxu1 }
 0x909   :  { %v4298_v4 = vpop.f32.mrb[31].mxu0  ;;  %v4369_v39 = vpop.f32.mrb[31].mxu1 }
 0x90a   :  { %v4376_v44 = vcombine.low %v4296_v59, %v4298_v4  ;;  %v4377_v24 = vcombine.high %v4296_v59, %v4298_v4  ;;  %v4378_v35 = vcombine.low %v4367_v61, %v4369_v39  ;;  %v4379_v22 = vcombine.high %v4367_v61, %v4369_v39 }
 0x90c   :  { %v4386_v50 = vrot.slane %v4376_v44, %v11833_v8  ;;  %v4393_v31 = vrot.slane %v4377_v24, %v11833_v8  ;;  %v4400_v49 = vrot.slane %v4378_v35, %v11833_v8  ;;  %v4407_v38 = vrot.slane %v4379_v22, %v11833_v8 }
 0x90e   :  { %v4408_v11 = vcombine.low %v4386_v50, %v4400_v49  ;;  %v4409_v21 = vcombine.high %v4386_v50, %v4400_v49  ;;  %v4410_v42 = vcombine.low %v4393_v31, %v4407_v38  ;;  %v4411_v19 = vcombine.high %v4393_v31, %v4407_v38 }
 0x910   :  { %v4418_v57 = vrot.slane %v4408_v11, %v11833_v8  ;;  %v4425_v60 = vrot.slane %v4410_v42, %v11833_v8  ;;  %v4432_v51 = vrot.slane %v4409_v21, %v11833_v8  ;;  %v4439_v14 = vrot.slane %v4411_v19, %v11833_v8 }
 0x912   :  { %v4440_v2 = vcombine.high %v4418_v57, %v4418_v57  ;;  %v4441_v53 = vcombine.high %v4425_v60, %v4425_v60  ;;  %v4442_v46 = vcombine.high %v4432_v51, %v4432_v51  ;;  %v4443_v13 = vcombine.high %v4439_v14, %v4439_v14 }
 0x913   :  { %v4452_v58 = vadd.f32 %v4418_v57, %v4093_v17  ;;  %v4453_v52 = vadd.f32 %v4432_v51, %v4095_v1  ;;  %v4456_v56 = vadd.f32 %v4425_v60, %v4101_v32  ;;  %v4457_v25 = vadd.f32 %v4439_v14, %v4103_v5 }
 0x914   :  { %v4454_v16 = vadd.f32 %v4440_v2, %v4097_v36  ;;  %v4455_v27 = vadd.f32 %v4442_v46, %v4099_v26  ;;  %v4458_v41 = vadd.f32 %v4441_v53, %v4105_v9  ;;  %v4459_v54 = vadd.f32 %v4443_v13, %v4107_v12 }
 0x915   :  { %v9232_v28 = vmul.f32 -1.442695, %v4452_v58  ;;  %v9233_v7 = vmul.f32 -1.442695, %v4453_v52  ;;  %v9236_v62 = vmul.f32 -1.442695, %v4456_v56 }
 0x916   :  { %v9234_v30 = vmul.f32 -1.442695, %v4454_v16  ;;  %v9235_v18 = vmul.f32 -1.442695, %v4455_v27  ;;  %v9237_v48 = vmul.f32 -1.442695, %v4457_v25 }
 0x917   :  { %10847 = vpow2.f32 %v9232_v28  ;;  %v9238_v20 = vmul.f32 -1.442695, %v4458_v41  ;;  %v9239_v0 = vmul.f32 -1.442695, %v4459_v54  ;;  %v4516_v47 = vrot.slane %v4452_v58, 3 }
 0x918   :  { %10849 = vpow2.f32 %v9233_v7  ;;  %v4517_v6 = vrot.slane %v4453_v52, 3  ;;  %v4518_v63 = vrot.slane %v4454_v16, 3  ;;  %v4519_v40 = vrot.slane %v4455_v27, 3 }
 0x919   :  { %10851 = vpow2.f32 %v9234_v30  ;;  %v4520_v59 = vrot.slane %v4456_v56, 3  ;;  %v4521_v57 = vrot.slane %v4457_v25, 3  ;;  %v4522_v14 = vrot.slane %v4458_v41, 3 }
 0x91a   :  { %10853 = vpow2.f32 %v9235_v18  ;;  %v4523_v1 = vrot.slane %v4459_v54, 3 }
 0x91b   :  { %10855 = vpow2.f32 %v9236_v62 }
 0x91c   :  { %10857 = vpow2.f32 %v9237_v48 }
 0x91d   :  { %10859 = vpow2.f32 %v9238_v20 }
 0x91e   :  { %10861 = vpow2.f32 %v9239_v0 }
 0x91f   :  { %10863 = vtanh.f32 %v4516_v47 }
 0x920   :  { %10865 = vtanh.f32 %v4517_v6 }
 0x921   :  { %v10848_v61 = vpop.eup %10847  ;;  %10867 = vtanh.f32 %v4518_v63 }
 0x922   :  { %v10850_v4 = vpop.eup %10849  ;;  %v4484_v39 = vadd.f32 1.0, %v10848_v61  ;;  %10869 = vtanh.f32 %v4519_v40 }
 0x923   :  { %v10852_v44 = vpop.eup %10851  ;;  %v4485_v24 = vadd.f32 1.0, %v10850_v4  ;;  %10871 = vtanh.f32 %v4520_v59 }
 0x924   :  { %v10854_v35 = vpop.eup %10853  ;;  %v4486_v22 = vadd.f32 1.0, %v10852_v44  ;;  %10873 = vrcp.f32 %v4484_v39 }
 0x925   :  { %v10856_v50 = vpop.eup %10855  ;;  %v4487_v31 = vadd.f32 1.0, %v10854_v35  ;;  %10875 = vrcp.f32 %v4485_v24 }
 0x926   :  { %v10858_v49 = vpop.eup %10857  ;;  %v4488_v38 = vadd.f32 1.0, %v10856_v50  ;;  %10877 = vrcp.f32 %v4486_v22 }
 0x927   :  { %v10860_v11 = vpop.eup %10859  ;;  %v4489_v21 = vadd.f32 1.0, %v10858_v49  ;;  %10879 = vrcp.f32 %v4487_v31 }
 0x928   :  { %v10862_v42 = vpop.eup %10861  ;;  %v4490_v19 = vadd.f32 1.0, %v10860_v11  ;;  %10881 = vrcp.f32 %v4488_v38 }
 0x929   :  { %v10864_v60 = vpop.eup %10863  ;;  %v4491_v51 = vadd.f32 1.0, %v10862_v42  ;;  %10883 = vrcp.f32 %v4489_v21 }
 0x92a   :  { %v10866_v17 = vpop.eup %10865  ;;  %10885 = vrcp.f32 %v4490_v19 }
 0x92b   :  { %v10868_v36 = vpop.eup %10867  ;;  %10887 = vrcp.f32 %v4491_v51 }
 0x92c   :  { %v10870_v32 = vpop.eup %10869  ;;  %10889 = vtanh.f32 %v4521_v57 }
 0x92d   :  { %v10872_v2 = vpop.eup %10871  ;;  %10891 = vtanh.f32 %v4522_v14 }
 0x92e   :  { %v10874_v53 = vpop.eup %10873  ;;  %10893 = vtanh.f32 %v4523_v1  ;;  %v4988_v1 = vld [vmem:[#allocation7] sm:$0xff] }
 0x92f   :  { %v10876_v46 = vpop.eup %10875  ;;  %v4548_v13 = vrot.slane %v10874_v53, 1  ;;  %v4572_v9 = vmul.f32 %v10874_v53, %v10864_v60 }
 0x930   :  { %v10878_v26 = vpop.eup %10877  ;;  %v4549_v5 = vrot.slane %v10876_v46, 1  ;;  %v4573_v25 = vmul.f32 %v10876_v46, %v10866_v17  ;;  %v4597_v38 = vrot.slane %v10876_v46, 2 }
 0x931   :  { %v12764_v58 = vpop.eup %10879  ;;  %v4550_v52 = vrot.slane %v10878_v26, 1  ;;  %v4564_v56 = vmul.f32 %v4548_v13, %v12686_v55  ;;  %v4574_v41 = vmul.f32 %v10878_v26, %v10868_v36  ;;  %v4598_v42 = vrot.slane %v10878_v26, 2 }
 0x932   :  { %v12767_v12 = vpop.eup %10881  ;;  %v4551_v16 = vrot.slane %v12764_v58, 1  ;;  %v4565_v27 = vmul.f32 %v4549_v5, %v12690_v29  ;;  %v4575_v30 = vmul.f32 %v12764_v58, %v10870_v32  ;;  %v4599_v57 = vrot.slane %v12764_v58, 2  ;;  %v4992_v32 = vld [vmem:[#allocation7 + $0x20] sm:$0xff]  ;;  %v4997_v5 = vld [vmem:[#allocation7 + $0x48] sm:$0xff] }
 0x933   :  { %v12771_v28 = vpop.eup %10883  ;;  %v4552_v7 = vrot.slane %v12767_v12, 1  ;;  %v4566_v54 = vmul.f32 %v4550_v52, %v12693_v34  ;;  %v4580_v18 = vadd.f32 %v4572_v9, %v4564_v56  ;;  %v4576_v20 = vmul.f32 %v12767_v12, %v10872_v2  ;;  %v4990_v2 = vld [vmem:[#allocation7 + $0x10] sm:$0xff]  ;;  %v5001_v56 = vld [vmem:[#allocation7 + $0x68] sm:$0xff]  ;;  %v4999_v9 = vld [vmem:[#allocation7 + $0x58] sm:$0xff] }
 0x934   :  { %v12776_v62 = vpop.eup %10885  ;;  %v4553_v55 = vrot.slane %v12771_v28, 1  ;;  %v4567_v48 = vmul.f32 %v4551_v16, %v12697_v15  ;;  %v4581_v29 = vadd.f32 %v4573_v25, %v4565_v27  ;;  %v4600_v14 = vrot.slane %v12767_v12, 2  ;;  %v5003_v12 = vld [vmem:[#allocation7 + $0x78] sm:$0xff] }
 0x935   :  { %v12781_v0 = vpop.eup %10887  ;;  %v4554_v47 = vrot.slane %v12776_v62, 1  ;;  %v4568_v6 = vmul.f32 %v4552_v7, %v12702_v43  ;;  %v4582_v63 = vadd.f32 %v4574_v41, %v4566_v54  ;;  %10895 = vtanh.f32 %v4580_v18  ;;  %v4996_v7 = vld [vmem:[#allocation7 + $0x40] sm:$0xff]  ;;  %v4998_v18 = vld [vmem:[#allocation7 + $0x50] sm:$0xff] }
 0x936   :  { %v10890_v34 = vpop.eup %10889  ;;  %v4555_v40 = vrot.slane %v12781_v0, 1  ;;  %v4569_v59 = vmul.f32 %v4553_v55, %v12707_v45  ;;  %v4583_v61 = vadd.f32 %v4575_v30, %v4567_v48  ;;  %10897 = vtanh.f32 %v4581_v29  ;;  %v5000_v30 = vld [vmem:[#allocation7 + $0x60] sm:$0xff] }
 0x937   :  { %v10892_v4 = vpop.eup %10891  ;;  %v4570_v15 = vmul.f32 %v4554_v47, %v12710_v10  ;;  %v4577_v39 = vmul.f32 %v10890_v34, %v12771_v28  ;;  %v4584_v44 = vadd.f32 %v4576_v20, %v4568_v6  ;;  %10899 = vtanh.f32 %v4582_v63  ;;  %v5009_v47 = vld [vmem:[#allocation7 + $0xa8] sm:$0xff]  ;;  %v5007_v6 = vld [vmem:[#allocation7 + $0x98] sm:$0xff] }
 0x938   :  { %v10894_v24 = vpop.eup %10893  ;;  %v4571_v35 = vmul.f32 %v4555_v40, %v12712_v33  ;;  %v4578_v43 = vmul.f32 %v10892_v4, %v12776_v62  ;;  %10901 = vtanh.f32 %v4583_v61  ;;  %v4596_v10 = vrot.slane %v10874_v53, 2  ;;  %v4994_v53 = vld [vmem:[#allocation7 + $0x30] sm:$0xff]  ;;  %v5011_v63 = vld [vmem:[#allocation7 + $0xb8] sm:$0xff]  ;;  %v5008_v61 = vld [vmem:[#allocation7 + $0xa0] sm:$0xff] }
 0x939   :  { %v4579_v22 = vmul.f32 %v10894_v24, %v12781_v0  ;;  %v4585_v50 = vadd.f32 %v4577_v39, %v4569_v59  ;;  %10903 = vtanh.f32 %v4584_v44  ;;  %v4601_v13 = vrot.slane %v12771_v28, 2  ;;  %v5004_v59 = vld [vmem:[#allocation7 + $0x80] sm:$0xff]  ;;  %v5006_v4 = vld [vmem:[#allocation7 + $0x90] sm:$0xff] }
 0x93a   :  { %v4586_v45 = vadd.f32 %v4578_v43, %v4570_v15  ;;  %v4602_v58 = vrot.slane %v12776_v62, 2  ;;  %v4603_v27 = vrot.slane %v12781_v0, 2  ;;  %v12812_v41 = vpack.c.bf16 %v4992_v32, %v4988_v1  ;;  %v5002_v62 = vld [vmem:[#allocation7 + $0x70] sm:$0xff]  ;;  %v5005_v0 = vld [vmem:[#allocation7 + $0x88] sm:$0xff]  ;;  %v5020_v1 = vld [vmem:[#allocation7 + $0x100] sm:$0xff] }
 0x93b   :  { %v4587_v31 = vadd.f32 %v4579_v22, %v4571_v35  ;;  %10905 = vtanh.f32 %v4585_v50  ;;  %v12814_v28 = vpack.c.bf16 %v4994_v53, %v4990_v2  ;;  %v12822_v20 = vpack.c.bf16 %v5001_v56, %v4997_v5  ;;  %v5010_v15 = vld [vmem:[#allocation7 + $0xb0] sm:$0xff]  ;;  %v5013_v35 = vld [vmem:[#allocation7 + $0xc8] sm:$0xff]  ;;  %v5015_v22 = vld [vmem:[#allocation7 + $0xd8] sm:$0xff] }
 0x93c   :  { %10907 = vtanh.f32 %v4586_v45  ;;  %v12824_v29 = vpack.c.bf16 %v5003_v12, %v4999_v9  ;;  %v12834_v34 = vpack.c.bf16 %v5000_v30, %v4996_v7  ;;  %v12836_v40 = vpack.c.bf16 %v5002_v62, %v4998_v18  ;;  %v5017_v43 = vld [vmem:[#allocation7 + $0xe8] sm:$0xff]  ;;  %v5019_v50 = vld [vmem:[#allocation7 + $0xf8] sm:$0xff]  ;;  %v5022_v32 = vld [vmem:[#allocation7 + $0x110] sm:$0xff] }
 0x93d   :  { %10909 = vtanh.f32 %v4587_v31  ;;  %v12845_v44 = vpack.c.bf16 %v5009_v47, %v5005_v0  ;;  %v12847_v24 = vpack.c.bf16 %v5011_v63, %v5007_v6  ;;  %v12851_v45 = vpack.c.bf16 %v5008_v61, %v5004_v59  ;;  %v5026_v2 = vld [vmem:[#allocation7 + $0x130] sm:$0xff]  ;;  %v5033_v5 = vld [vmem:[#allocation7 + $0x168] sm:$0xff]  ;;  %v5028_v12 = vld [vmem:[#allocation7 + $0x140] sm:$0xff] }
 0x93e   :  { %v12853_v31 = vpack.c.bf16 %v5010_v15, %v5006_v4  ;;  %v12887_v9 = vpack.c.bf16 %v5026_v2, %v5022_v32  ;;  %v5037_v18 = vld [vmem:[#allocation7 + $0x188] sm:$0xff]  ;;  %v5036_v6 = vld [vmem:[#allocation7 + $0x180] sm:$0xff]  ;;  %v5038_v59 = vld [vmem:[#allocation7 + $0x190] sm:$0xff] }
 0x93f   :  { %v10896_v49 = vpop.eup %10895  ;;  %v5041_v62 = vld [vmem:[#allocation7 + $0x1a8] sm:$0xff]  ;;  %v5040_v63 = vld [vmem:[#allocation7 + $0x1a0] sm:$0xff]  ;;  %v5042_v61 = vld [vmem:[#allocation7 + $0x1b0] sm:$0xff] }
 0x940   :  { %v10898_v11 = vpop.eup %10897  ;;  %v4612_v21 = vmul.f32 %v10896_v49, %v4596_v10  ;;  %v5012_v10 = vld [vmem:[#allocation7 + $0xc0] sm:$0xff]  ;;  %v12913_v15 = vpack.c.bf16 %v5041_v62, %v5037_v18 }
 0x941   :  { %v10900_v19 = vpop.eup %10899  ;;  %v4613_v33 = vmul.f32 %v10898_v11, %v4597_v38  ;;  %v5016_v49 = vld [vmem:[#allocation7 + $0xe0] sm:$0xff]  ;;  %v5014_v38 = vld [vmem:[#allocation7 + $0xd0] sm:$0xff] }
 0x942   :  { %v10902_v60 = vpop.eup %10901  ;;  %4620 = vst [vmem:[%s13974_s7 + $0x7] sm:$0x1] %v4612_v21  ;;  %v4614_v51 = vmul.f32 %v10900_v19, %v4598_v42  ;;  %v5018_v11 = vld [vmem:[#allocation7 + $0xf0] sm:$0xff]  ;;  %v12862_v42 = vpack.c.bf16 %v5017_v43, %v5013_v35  ;;  %v12864_v19 = vpack.c.bf16 %v5019_v50, %v5015_v22  ;;  %v5045_v35 = vld [vmem:[#allocation7 + $0x1c8] sm:$0xff]  ;;  %v5047_v22 = vld [vmem:[#allocation7 + $0x1d8] sm:$0xff] }
 0x943   :  { %v10904_v17 = vpop.eup %10903  ;;  %4621 = vst [vmem:[%s13974_s7 + $0xf] sm:$0x1] %v4613_v33  ;;  %v4615_v36 = vmul.f32 %v10902_v60, %v4599_v57  ;;  %v5021_v33 = vld [vmem:[#allocation7 + $0x108] sm:$0xff]  ;;  %v5023_v60 = vld [vmem:[#allocation7 + $0x118] sm:$0xff] }
 0x944   :  { %4622 = vst [vmem:[%s13974_s7 + $0x17] sm:$0x1] %v4614_v51  ;;  %v4616_v46 = vmul.f32 %v10904_v17, %v4600_v14  ;;  %v5025_v57 = vld [vmem:[#allocation7 + $0x128] sm:$0xff]  ;;  %v5027_v51 = vld [vmem:[#allocation7 + $0x138] sm:$0xff]  ;;  %v12868_v14 = vpack.c.bf16 %v5016_v49, %v5012_v10  ;;  %v12870_v17 = vpack.c.bf16 %v5018_v11, %v5014_v38  ;;  %v9906_v10 = vpack.c.bf16 %v5040_v63, %v5036_v6  ;;  %v5044_v38 = vld [vmem:[#allocation7 + $0x1c0] sm:$0xff] }
 0x945   :  { %v10906_v26 = vpop.eup %10905  ;;  %4623 = vst [vmem:[%s13974_s7 + $0x1f] sm:$0x1] %v4615_v36  ;;  %v5024_v36 = vld [vmem:[#allocation7 + $0x120] sm:$0xff]  ;;  %v5049_v43 = vld [vmem:[#allocation7 + $0x1e8] sm:$0xff]  ;;  %v5051_v50 = vld [vmem:[#allocation7 + $0x1f8] sm:$0xff]  ;;  %v9938_v49 = vpack.c.bf16 %v5042_v61, %v5038_v59 }
 0x946   :  { %v10908_v52 = vpop.eup %10907  ;;  %4624 = vst [vmem:[%s13974_s7 + $0x27] sm:$0x1] %v4616_v46  ;;  %v4617_v16 = vmul.f32 %v10906_v26, %v4601_v13  ;;  %v12879_v46 = vpack.c.bf16 %v5025_v57, %v5021_v33  ;;  %v12881_v13 = vpack.c.bf16 %v5027_v51, %v5023_v60  ;;  %v5029_v26 = vld [vmem:[#allocation7 + $0x148] sm:$0xff]  ;;  %v12885_v56 = vpack.c.bf16 %v5024_v36, %v5020_v1  ;;  %v5048_v11 = vld [vmem:[#allocation7 + $0x1e0] sm:$0xff]  ;;  %v5050_v33 = vld [vmem:[#allocation7 + $0x1f0] sm:$0xff] }
 0x947   :  { %v10910_v25 = vpop.eup %10909  ;;  %v4618_v54 = vmul.f32 %v10908_v52, %v4602_v58  ;;  %v5031_v58 = vld [vmem:[#allocation7 + $0x158] sm:$0xff]  ;;  %v9908_v60 = vpack.c.bf16 %v5049_v43, %v5045_v35  ;;  %v9940_v51 = vpack.c.bf16 %v5051_v50, %v5047_v22  ;;  %v9910_v1 = vpack.c.bf16 %v5048_v11, %v5044_v38 }
 0x948   :  { %4625 = vst [vmem:[%s13974_s7 + $0x2f] sm:$0x1] %v4617_v16  ;;  %v4619_v55 = vmul.f32 %v10910_v25, %v4603_v27  ;;  %v5035_v52 = vld [vmem:[#allocation7 + $0x178] sm:$0xff]  ;;  %v5032_v16 = vld [vmem:[#allocation7 + $0x160] sm:$0xff]  ;;  %v5030_v27 = vld [vmem:[#allocation7 + $0x150] sm:$0xff] }
 0x949   :  { %v4628_v48 = vld [vmem:[%s13974_s7] sm:$0xff]  ;;  %4626 = vst [vmem:[%s13974_s7 + $0x37] sm:$0x1] %v4618_v54  ;;  %v5034_v25 = vld [vmem:[#allocation7 + $0x170] sm:$0xff]  ;;  %v12896_v54 = vpack.c.bf16 %v5033_v5, %v5029_v26  ;;  %v12898_v30 = vpack.c.bf16 %v5035_v52, %v5031_v58  ;;  %v12902_v0 = vpack.c.bf16 %v5032_v16, %v5028_v12 }
 0x94a   :  { %4787 = vmatmul.mubr.f32.vlgmr.msra.gmra.mrb[32].mxu0 %v4628_v48  ;;  %4900 = vmatmul.mubr.f32.vlgmr.msra.gmra.mrb[32].mxu1 %v4628_v48  ;;  %4627 = vst [vmem:[%s13974_s7 + $0x3f] sm:$0x1] %v4619_v55  ;;  %v4629_v39 = vld [vmem:[%s13974_s7 + $0x8] sm:$0xff]  ;;  %v5039_v55 = vld [vmem:[#allocation7 + $0x198] sm:$0xff]  ;;  %v12904_v47 = vpack.c.bf16 %v5034_v25, %v5030_v27 }
 0x94b   :  { %9883 = vmatpush1.bf16.msra.mxu0 %v12812_v41  ;;  %9915 = vmatpush1.bf16.msra.mxu1 %v12814_v28  ;;  %v4630_v21 = vld [vmem:[%s13974_s7 + $0x10] sm:$0xff]  ;;  %v5043_v48 = vld [vmem:[#allocation7 + $0x1b8] sm:$0xff] }
 0x94c   :  { %4792 = vmatprep.mubr.f32.mxu0 %v14032_v3  ;;  %4905 = vmatprep.mubr.f32.mxu1 %v14032_v3  ;;  %v4631_v53 = vld [vmem:[%s13974_s7 + $0x18] sm:$0xff] }
 0x94d   :  { %9885 = vmatprep.subr.bf16.mxu0 %v12822_v20  ;;  %9917 = vmatprep.subr.bf16.mxu1 %v12824_v29  ;;  %v4632_v7 = vld [vmem:[%s13974_s7 + $0x20] sm:$0xff] }
 0x94e   :  { %4793 = vmatmul.mubr.f32.gmra.mrb[34].mxu0 %v4629_v39  ;;  %4906 = vmatmul.mubr.f32.gmra.mrb[34].mxu1 %v4629_v39  ;;  %v12915_v39 = vpack.c.bf16 %v5043_v48, %v5039_v55 }
 0x94f   :  { %9887 = vmatpush1.bf16.msra.mxu0 %v12834_v34  ;;  %9919 = vmatpush1.bf16.msra.mxu1 %v12836_v40  ;;  %v4633_v4 = vld [vmem:[%s13974_s7 + $0x28] sm:$0xff] }
 0x950   :  { %4798 = vmatprep.mubr.f32.mxu0 %v14032_v3  ;;  %4911 = vmatprep.mubr.f32.mxu1 %v14032_v3  ;;  %v4634_v57 = vld [vmem:[%s13974_s7 + $0x30] sm:$0xff] }
 0x951   :  { %9889 = vmatprep.subr.bf16.mxu0 %v12845_v44  ;;  %9921 = vmatprep.subr.bf16.mxu1 %v12847_v24  ;;  %v4635_v32 = vld [vmem:[%s13974_s7 + $0x38] sm:$0xff] }
 0x952   :  { %4799 = vmatmul.mubr.f32.gmra.mrb[36].mxu0 %v4630_v21  ;;  %4912 = vmatmul.mubr.f32.gmra.mrb[36].mxu1 %v4630_v21  ;;  %v5046_v21 = vld [vmem:[#allocation7 + $0x1d0] sm:$0xff] }
 0x953   :  { %9891 = vmatpush1.bf16.msra.mxu0 %v12851_v45  ;;  %9923 = vmatpush1.bf16.msra.mxu1 %v12853_v31  ;;  %v9942_v36 = vpack.c.bf16 %v5050_v33, %v5046_v21 }
 0x954   :  { %4804 = vmatprep.mubr.f32.mxu0 %v14032_v3  ;;  %4917 = vmatprep.mubr.f32.mxu1 %v14032_v3 }
 0x955   :  { %9893 = vmatprep.subr.bf16.mxu0 %v12862_v42  ;;  %9925 = vmatprep.subr.bf16.mxu1 %v12864_v19 }
 0x956   :  { %4805 = vmatmul.mubr.f32.gmra.mrb[38].mxu0 %v4631_v53  ;;  %4918 = vmatmul.mubr.f32.gmra.mrb[38].mxu1 %v4631_v53 }
 0x957   :  { %9895 = vmatpush1.bf16.msra.mxu0 %v12868_v14  ;;  %9927 = vmatpush1.bf16.msra.mxu1 %v12870_v17 }
 0x958   :  { %4810 = vmatprep.mubr.f32.mxu0 %v14032_v3  ;;  %4923 = vmatprep.mubr.f32.mxu1 %v14032_v3 }
 0x959   :  { %9897 = vmatprep.subr.bf16.mxu0 %v12879_v46  ;;  %9929 = vmatprep.subr.bf16.mxu1 %v12881_v13 }
 0x95a   :  { %4811 = vmatmul.mubr.f32.gmra.mrb[40].mxu0 %v4632_v7  ;;  %4924 = vmatmul.mubr.f32.gmra.mrb[40].mxu1 %v4632_v7 }
 0x95b   :  { %9899 = vmatpush1.bf16.msra.mxu0 %v12885_v56  ;;  %9931 = vmatpush1.bf16.msra.mxu1 %v12887_v9 }
 0x95c   :  { %4816 = vmatprep.mubr.f32.mxu0 %v14032_v3  ;;  %4929 = vmatprep.mubr.f32.mxu1 %v14032_v3 }
 0x95d   :  { %9901 = vmatprep.subr.bf16.mxu0 %v12896_v54  ;;  %9933 = vmatprep.subr.bf16.mxu1 %v12898_v30 }
 0x95e   :  { %4817 = vmatmul.mubr.f32.gmra.mrb[42].mxu0 %v4633_v4  ;;  %4930 = vmatmul.mubr.f32.gmra.mrb[42].mxu1 %v4633_v4 }
 0x95f   :  { %9903 = vmatpush1.bf16.msra.mxu0 %v12902_v0  ;;  %9935 = vmatpush1.bf16.msra.mxu1 %v12904_v47 }
 0x960   :  { %4822 = vmatprep.mubr.f32.mxu0 %v14032_v3  ;;  %4935 = vmatprep.mubr.f32.mxu1 %v14032_v3 }
 0x961   :  { %9905 = vmatprep.subr.bf16.mxu0 %v12913_v15  ;;  %9937 = vmatprep.subr.bf16.mxu1 %v12915_v39 }
 0x962   :  { %4823 = vmatmul.mubr.f32.gmra.mrb[44].mxu0 %v4634_v57  ;;  %4936 = vmatmul.mubr.f32.gmra.mrb[44].mxu1 %v4634_v57 }
 0x963   :  { %9907 = vmatpush1.bf16.msra.mxu0 %v9906_v10  ;;  %9939 = vmatpush1.bf16.msra.mxu1 %v9938_v49 }
 0x964   :  { %4828 = vmatprep.mubr.f32.mxu0 %v14032_v3  ;;  %4941 = vmatprep.mubr.f32.mxu1 %v14032_v3 }
 0x965   :  { %9909 = vmatprep.subr.bf16.mxu0 %v9908_v60  ;;  %9941 = vmatprep.subr.bf16.mxu1 %v9940_v51 }
 0x966   :  { %4829 = vmatmul.mubr.f32.gmra.mrb[46].mxu0 %v4635_v32  ;;  %4942 = vmatmul.mubr.f32.gmra.mrb[46].mxu1 %v4635_v32 }
 0x967   :  { %9911 = vmatpush1.bf16.msra.mxu0 %v9910_v1  ;;  %9943 = vmatpush1.bf16.msra.mxu1 %v9942_v36 }
 0x968   :  { %5116 = vmatprep.mubr.f32.mxu0 %v14032_v3  ;;  %5187 = vmatprep.mubr.f32.mxu1 %v14032_v3 }
 0x969   :  { %9945 = vmatprep.subr.bf16.mxu0 %v12750_v37  ;;  %9977 = vmatprep.subr.bf16.mxu1 %v12752_v23  ;;  %v4700_v37 = vld [vmem:[%s13973_s6] sm:$0xf] }
 0x96a   :  { %5117 = vmatmul.mubr.f32.vlgmr.msra.gmra.mrb[48].mxu0 %v14032_v3  ;;  %5188 = vmatmul.mubr.f32.vlgmr.msra.gmra.mrb[48].mxu1 %v14032_v3  ;;  %v14067_v23 = vld [vmem:[#allocation10_spill] sm:$0xff] }
 0x96b   :  { %9947 = vmatpush1.bf16.msra.mxu0 %v12812_v41  ;;  %9979 = vmatpush1.bf16.msra.mxu1 %v12814_v28  ;;  %v14068_v41 = vsub.s32 0, %v14067_v23 }
 0x96c   :  { %9949 = vmatprep.subr.bf16.mxu0 %v12822_v20  ;;  %9981 = vmatprep.subr.bf16.mxu1 %v12824_v29  ;;  %v14069_v20 = vsub.s32 2, %v14067_v23 }
 0x96d   :  { %5644 = vmatprep.mubr.f32.mxu0 %v14032_v3  ;;  %5715 = vmatprep.mubr.f32.mxu1 %v14032_v3  ;;  %v12968_v28 = vrot.slane %v4700_v37, %v14068_v41 }
 0x96e   :  { %v12972_v29 = vrot.slane %v4700_v37, %v14069_v20 }
 0x96f   :  { %9951 = vmatpush1.bf16.msra.mxu0 %v12834_v34  ;;  %9983 = vmatpush1.bf16.msra.mxu1 %v12836_v40  ;;  %v14070_v34 = vsub.s32 1, %v14067_v23 }
 0x970   :  { %9953 = vmatprep.subr.bf16.mxu0 %v12845_v44  ;;  %9985 = vmatprep.subr.bf16.mxu1 %v12847_v24  ;;  %v14071_v44 = vsub.s32 3, %v14067_v23 }
 0x971   :  { %v12976_v40 = vrot.slane %v4700_v37, %v14070_v34 }
 0x972   :  { %v12980_v24 = vrot.slane %v4700_v37, %v14071_v44 }
 0x973   :  { %9955 = vmatpush1.bf16.msra.mxu0 %v12851_v45  ;;  %9987 = vmatpush1.bf16.msra.mxu1 %v12853_v31 }
 0x974   :  { %9957 = vmatprep.subr.bf16.mxu0 %v12862_v42  ;;  %9989 = vmatprep.subr.bf16.mxu1 %v12864_v19 }
 0x977   :  { %9959 = vmatpush1.bf16.msra.mxu0 %v12868_v14  ;;  %9991 = vmatpush1.bf16.msra.mxu1 %v12870_v17 }
 0x978   :  { %9961 = vmatprep.subr.bf16.mxu0 %v12879_v46  ;;  %9993 = vmatprep.subr.bf16.mxu1 %v12881_v13 }
 0x97b   :  { %9963 = vmatpush1.bf16.msra.mxu0 %v12885_v56  ;;  %9995 = vmatpush1.bf16.msra.mxu1 %v12887_v9 }
 0x97c   :  { %9965 = vmatprep.subr.bf16.mxu0 %v12896_v54  ;;  %9997 = vmatprep.subr.bf16.mxu1 %v12898_v30 }
 0x97f   :  { %9967 = vmatpush1.bf16.msra.mxu0 %v12902_v0  ;;  %9999 = vmatpush1.bf16.msra.mxu1 %v12904_v47 }
 0x980   :  { %9969 = vmatprep.subr.bf16.mxu0 %v12913_v15  ;;  %10001 = vmatprep.subr.bf16.mxu1 %v12915_v39 }
 0x983   :  { %9971 = vmatpush1.bf16.msra.mxu0 %v9906_v10  ;;  %10003 = vmatpush1.bf16.msra.mxu1 %v9938_v49 }
 0x984   :  { %9973 = vmatprep.subr.bf16.mxu0 %v9908_v60  ;;  %10005 = vmatprep.subr.bf16.mxu1 %v9940_v51 }
 0x987   :  { %9975 = vmatpush1.bf16.msra.mxu0 %v9910_v1  ;;  %10007 = vmatpush1.bf16.msra.mxu1 %v9942_v36 }
 0xa1d   :  { %v4788_v45 = vpop.f32.mrb[32].mxu0  ;;  %v4901_v31 = vpop.f32.mrb[32].mxu1 }
 0xa1e   :  { %v4789_v42 = vadd.f32 %v4788_v45, %v12968_v28  ;;  %v4902_v19 = vadd.f32 %v4901_v31, %v12972_v29  ;;  %v4790_v14 = vpop.f32.mrb[33].mxu0  ;;  %v4903_v17 = vpop.f32.mrb[33].mxu1 }
 0xa1f   :  { %v4791_v2 = vadd.f32 %v4790_v14, %v12976_v40  ;;  %v4904_v53 = vadd.f32 %v4903_v17, %v12980_v24 }
 0xa20   :  { %4948 = vst [vmem:[#allocation2] sm:$0xff] %v4789_v42  ;;  %4950 = vst [vmem:[#allocation2 + $0x10] sm:$0xff] %v4902_v19 }
 0xa21   :  { %4949 = vst [vmem:[#allocation2 + $0x8] sm:$0xff] %v4791_v2  ;;  %4951 = vst [vmem:[#allocation2 + $0x18] sm:$0xff] %v4904_v53  ;;  %v4794_v46 = vpop.f32.mrb[34].mxu0  ;;  %v4907_v13 = vpop.f32.mrb[34].mxu1 }
 0xa22   :  { %v4795_v26 = vadd.f32 %v4794_v46, %v12968_v28  ;;  %v4908_v5 = vadd.f32 %v4907_v13, %v12972_v29  ;;  %v4796_v58 = vpop.f32.mrb[35].mxu0  ;;  %v4909_v52 = vpop.f32.mrb[35].mxu1 }
 0xa23   :  { %v4797_v56 = vadd.f32 %v4796_v58, %v12976_v40  ;;  %v4910_v9 = vadd.f32 %v4909_v52, %v12980_v24 }
 0xa24   :  { %4952 = vst [vmem:[#allocation2 + $0x20] sm:$0xff] %v4795_v26  ;;  %4954 = vst [vmem:[#allocation2 + $0x30] sm:$0xff] %v4908_v5 }
 0xa25   :  { %4953 = vst [vmem:[#allocation2 + $0x28] sm:$0xff] %v4797_v56  ;;  %4955 = vst [vmem:[#allocation2 + $0x38] sm:$0xff] %v4910_v9  ;;  %v4800_v12 = vpop.f32.mrb[36].mxu0  ;;  %v4913_v16 = vpop.f32.mrb[36].mxu1 }
 0xa26   :  { %v4801_v27 = vadd.f32 %v4800_v12, %v12968_v28  ;;  %v4914_v25 = vadd.f32 %v4913_v16, %v12972_v29  ;;  %v4802_v7 = vpop.f32.mrb[37].mxu0  ;;  %v4915_v54 = vpop.f32.mrb[37].mxu1 }
 0xa27   :  { %v4803_v30 = vadd.f32 %v4802_v7, %v12976_v40  ;;  %v4916_v18 = vadd.f32 %v4915_v54, %v12980_v24 }
 0xa28   :  { %4956 = vst [vmem:[#allocation2 + $0x40] sm:$0xff] %v4801_v27  ;;  %4958 = vst [vmem:[#allocation2 + $0x50] sm:$0xff] %v4914_v25 }
 0xa29   :  { %4957 = vst [vmem:[#allocation2 + $0x48] sm:$0xff] %v4803_v30  ;;  %4959 = vst [vmem:[#allocation2 + $0x58] sm:$0xff] %v4916_v18  ;;  %v4806_v62 = vpop.f32.mrb[38].mxu0  ;;  %v4919_v55 = vpop.f32.mrb[38].mxu1 }
 0xa2a   :  { %v4807_v48 = vadd.f32 %v4806_v62, %v12968_v28  ;;  %v4920_v0 = vadd.f32 %v4919_v55, %v12972_v29  ;;  %v4808_v47 = vpop.f32.mrb[39].mxu0  ;;  %v4921_v6 = vpop.f32.mrb[39].mxu1  ;;  %v4980_v30 = vld [vmem:[#allocation2] ss:$8 sm:$0xf] }
 0xa2b   :  { %v4809_v63 = vadd.f32 %v4808_v47, %v12976_v40  ;;  %v4922_v59 = vadd.f32 %v4921_v6, %v12980_v24 }
 0xa2c   :  { %4960 = vst [vmem:[#allocation2 + $0x60] sm:$0xff] %v4807_v48  ;;  %4962 = vst [vmem:[#allocation2 + $0x70] sm:$0xff] %v4920_v0  ;;  %v4981_v18 = vld [vmem:[#allocation2 + $0x20] ss:$8 sm:$0xf] }
 0xa2d   :  { %4961 = vst [vmem:[#allocation2 + $0x68] sm:$0xff] %v4809_v63  ;;  %4963 = vst [vmem:[#allocation2 + $0x78] sm:$0xff] %v4922_v59  ;;  %v4812_v61 = vpop.f32.mrb[40].mxu0  ;;  %v4925_v4 = vpop.f32.mrb[40].mxu1 }
 0xa2e   :  { %v4813_v15 = vadd.f32 %v4812_v61, %v12968_v28  ;;  %v4926_v39 = vadd.f32 %v4925_v4, %v12972_v29  ;;  %v4814_v35 = vpop.f32.mrb[41].mxu0  ;;  %v4927_v43 = vpop.f32.mrb[41].mxu1 }
 0xa2f   :  { %v4815_v22 = vadd.f32 %v4814_v35, %v12976_v40  ;;  %v4928_v50 = vadd.f32 %v4927_v43, %v12980_v24 }
 0xa30   :  { %4964 = vst [vmem:[#allocation2 + $0x80] sm:$0xff] %v4813_v15  ;;  %4966 = vst [vmem:[#allocation2 + $0x90] sm:$0xff] %v4926_v39  ;;  %v4982_v62 = vld [vmem:[#allocation2 + $0x40] ss:$8 sm:$0xf] }
 0xa31   :  { %4965 = vst [vmem:[#allocation2 + $0x88] sm:$0xff] %v4815_v22  ;;  %4967 = vst [vmem:[#allocation2 + $0x98] sm:$0xff] %v4928_v50  ;;  %v4818_v10 = vpop.f32.mrb[42].mxu0  ;;  %v4931_v49 = vpop.f32.mrb[42].mxu1 }
 0xa32   :  { %v4819_v38 = vadd.f32 %v4818_v10, %v12968_v28  ;;  %v4932_v11 = vadd.f32 %v4931_v49, %v12972_v29  ;;  %v4820_v21 = vpop.f32.mrb[43].mxu0  ;;  %v4933_v33 = vpop.f32.mrb[43].mxu1 }
 0xa33   :  { %v4821_v57 = vadd.f32 %v4820_v21, %v12976_v40  ;;  %v4934_v60 = vadd.f32 %v4933_v33, %v12980_v24 }
 0xa34   :  { %4968 = vst [vmem:[#allocation2 + $0xa0] sm:$0xff] %v4819_v38  ;;  %4970 = vst [vmem:[#allocation2 + $0xb0] sm:$0xff] %v4932_v11  ;;  %v4983_v63 = vld [vmem:[#allocation2 + $0x60] ss:$8 sm:$0xf] }
 0xa35   :  { %4969 = vst [vmem:[#allocation2 + $0xa8] sm:$0xff] %v4821_v57  ;;  %4971 = vst [vmem:[#allocation2 + $0xb8] sm:$0xff] %v4934_v60  ;;  %v4824_v51 = vpop.f32.mrb[44].mxu0  ;;  %v4937_v1 = vpop.f32.mrb[44].mxu1 }
 0xa36   :  { %v4825_v36 = vadd.f32 %v4824_v51, %v12968_v28  ;;  %v4938_v32 = vadd.f32 %v4937_v1, %v12972_v29  ;;  %v4826_v37 = vpop.f32.mrb[45].mxu0  ;;  %v4939_v23 = vpop.f32.mrb[45].mxu1 }
 0xa37   :  { %v4827_v41 = vadd.f32 %v4826_v37, %v12976_v40  ;;  %v4940_v20 = vadd.f32 %v4939_v23, %v12980_v24 }
 0xa38   :  { %4972 = vst [vmem:[#allocation2 + $0xc0] sm:$0xff] %v4825_v36  ;;  %4974 = vst [vmem:[#allocation2 + $0xd0] sm:$0xff] %v4938_v32  ;;  %v4984_v55 = vld [vmem:[#allocation2 + $0x80] ss:$8 sm:$0xf] }
 0xa39   :  { %4973 = vst [vmem:[#allocation2 + $0xc8] sm:$0xff] %v4827_v41  ;;  %4975 = vst [vmem:[#allocation2 + $0xd8] sm:$0xff] %v4940_v20  ;;  %v4830_v34 = vpop.f32.mrb[46].mxu0  ;;  %v4943_v44 = vpop.f32.mrb[46].mxu1 }
 0xa3a   :  { %v4831_v45 = vadd.f32 %v4830_v34, %v12968_v28  ;;  %v4944_v31 = vadd.f32 %v4943_v44, %v12972_v29  ;;  %v4832_v42 = vpop.f32.mrb[47].mxu0  ;;  %v4945_v19 = vpop.f32.mrb[47].mxu1 }
 0xa3b   :  { %v4833_v14 = vadd.f32 %v4832_v42, %v12976_v40  ;;  %v4946_v17 = vadd.f32 %v4945_v19, %v12980_v24 }
 0xa3c   :  { %4976 = vst [vmem:[#allocation2 + $0xe0] sm:$0xff] %v4831_v45  ;;  %4978 = vst [vmem:[#allocation2 + $0xf0] sm:$0xff] %v4944_v31  ;;  %v4985_v59 = vld [vmem:[#allocation2 + $0xa0] ss:$8 sm:$0xf] }
 0xa3d   :  { %4977 = vst [vmem:[#allocation2 + $0xe8] sm:$0xff] %v4833_v14  ;;  %4979 = vst [vmem:[#allocation2 + $0xf8] sm:$0xff] %v4946_v17  ;;  %v5118_v2 = vpop.f32.mrb[48].mxu0  ;;  %v5189_v53 = vpop.f32.mrb[48].mxu1 }
 0xa3e   :  { %v5120_v46 = vpop.f32.mrb[49].mxu0  ;;  %v5191_v13 = vpop.f32.mrb[49].mxu1 }
 0xa3f   :  { %v5198_v26 = vcombine.low %v5118_v2, %v5120_v46  ;;  %v5199_v5 = vcombine.high %v5118_v2, %v5120_v46  ;;  %v5200_v58 = vcombine.low %v5189_v53, %v5191_v13  ;;  %v5201_v28 = vcombine.high %v5189_v53, %v5191_v13 }
 0xa40   :  { %v4986_v39 = vld [vmem:[#allocation2 + $0xc0] ss:$8 sm:$0xf] }
 0xa41   :  { %v5208_v29 = vrot.slane %v5198_v26, %v11833_v8  ;;  %v5215_v52 = vrot.slane %v5199_v5, %v11833_v8  ;;  %v5222_v40 = vrot.slane %v5200_v58, %v11833_v8  ;;  %v5229_v24 = vrot.slane %v5201_v28, %v11833_v8 }
 0xa43   :  { %v5230_v56 = vcombine.low %v5208_v29, %v5222_v40  ;;  %v5231_v9 = vcombine.high %v5208_v29, %v5222_v40  ;;  %v5232_v12 = vcombine.low %v5215_v52, %v5229_v24  ;;  %v5233_v16 = vcombine.high %v5215_v52, %v5229_v24 }
 0xa44   :  { %v4987_v35 = vld [vmem:[#allocation2 + $0xe0] ss:$8 sm:$0xf] }
 0xa45   :  { %v5240_v27 = vrot.slane %v5230_v56, %v11833_v8  ;;  %v5247_v25 = vrot.slane %v5232_v12, %v11833_v8  ;;  %v5254_v7 = vrot.slane %v5231_v9, %v11833_v8  ;;  %v5261_v54 = vrot.slane %v5233_v16, %v11833_v8 }
 0xa47   :  { %v5262_v48 = vcombine.high %v5240_v27, %v5240_v27  ;;  %v5263_v0 = vcombine.high %v5247_v25, %v5247_v25  ;;  %v5264_v47 = vcombine.high %v5254_v7, %v5254_v7  ;;  %v5265_v6 = vcombine.high %v5261_v54, %v5261_v54 }
 0xa48   :  { %v5274_v61 = vadd.f32 %v5240_v27, %v4980_v30  ;;  %v5275_v4 = vadd.f32 %v5254_v7, %v4981_v18  ;;  %v5278_v15 = vadd.f32 %v5247_v25, %v4984_v55  ;;  %v5279_v50 = vadd.f32 %v5261_v54, %v4985_v59 }
 0xa49   :  { %v5276_v43 = vadd.f32 %v5262_v48, %v4982_v62  ;;  %v5277_v22 = vadd.f32 %v5264_v47, %v4983_v63  ;;  %v5280_v10 = vadd.f32 %v5263_v0, %v4986_v39  ;;  %v5281_v11 = vadd.f32 %v5265_v6, %v4987_v35 }
 0xa4a   :  { %v9240_v49 = vmul.f32 -1.442695, %v5274_v61  ;;  %v9241_v38 = vmul.f32 -1.442695, %v5275_v4  ;;  %v9244_v57 = vmul.f32 -1.442695, %v5278_v15 }
 0xa4b   :  { %v9242_v21 = vmul.f32 -1.442695, %v5276_v43  ;;  %v9243_v33 = vmul.f32 -1.442695, %v5277_v22  ;;  %v9245_v60 = vmul.f32 -1.442695, %v5279_v50 }
 0xa4c   :  { %10911 = vpow2.f32 %v9240_v49  ;;  %v9246_v51 = vmul.f32 -1.442695, %v5280_v10  ;;  %v9247_v1 = vmul.f32 -1.442695, %v5281_v11  ;;  %v5338_v36 = vrot.slane %v5274_v61, 3 }
 0xa4d   :  { %10913 = vpow2.f32 %v9241_v38  ;;  %v5339_v32 = vrot.slane %v5275_v4, 3  ;;  %v5340_v37 = vrot.slane %v5276_v43, 3  ;;  %v5341_v23 = vrot.slane %v5277_v22, 3 }
 0xa4e   :  { %10915 = vpow2.f32 %v9242_v21  ;;  %v5342_v41 = vrot.slane %v5278_v15, 3  ;;  %v5343_v58 = vrot.slane %v5279_v50, 3  ;;  %v5344_v52 = vrot.slane %v5280_v10, 3 }
 0xa4f   :  { %10917 = vpow2.f32 %v9243_v33  ;;  %v5345_v24 = vrot.slane %v5281_v11, 3 }
 0xa50   :  { %10919 = vpow2.f32 %v9244_v57 }
 0xa51   :  { %10921 = vpow2.f32 %v9245_v60 }
 0xa52   :  { %10923 = vpow2.f32 %v9246_v51 }
 0xa53   :  { %10925 = vpow2.f32 %v9247_v1 }
 0xa54   :  { %10927 = vtanh.f32 %v5338_v36 }
 0xa55   :  { %10929 = vtanh.f32 %v5339_v32 }
 0xa56   :  { %v10912_v20 = vpop.eup %10911  ;;  %10931 = vtanh.f32 %v5340_v37 }
 0xa57   :  { %v10914_v34 = vpop.eup %10913  ;;  %v5306_v44 = vadd.f32 1.0, %v10912_v20  ;;  %10933 = vtanh.f32 %v5341_v23 }
 0xa58   :  { %v10916_v45 = vpop.eup %10915  ;;  %v5307_v31 = vadd.f32 1.0, %v10914_v34  ;;  %10935 = vtanh.f32 %v5342_v41 }
 0xa59   :  { %v10918_v42 = vpop.eup %10917  ;;  %v5308_v19 = vadd.f32 1.0, %v10916_v45  ;;  %10937 = vrcp.f32 %v5306_v44 }
 0xa5a   :  { %v10920_v14 = vpop.eup %10919  ;;  %v5309_v17 = vadd.f32 1.0, %v10918_v42  ;;  %10939 = vrcp.f32 %v5307_v31 }
 0xa5b   :  { %v10922_v2 = vpop.eup %10921  ;;  %v5310_v53 = vadd.f32 1.0, %v10920_v14  ;;  %10941 = vrcp.f32 %v5308_v19 }
 0xa5c   :  { %v10924_v46 = vpop.eup %10923  ;;  %v5311_v13 = vadd.f32 1.0, %v10922_v2  ;;  %10943 = vrcp.f32 %v5309_v17 }
 0xa5d   :  { %v10926_v26 = vpop.eup %10925  ;;  %v5312_v5 = vadd.f32 1.0, %v10924_v46  ;;  %10945 = vrcp.f32 %v5310_v53 }
 0xa5e   :  { %v10928_v28 = vpop.eup %10927  ;;  %v5313_v29 = vadd.f32 1.0, %v10926_v26  ;;  %10947 = vrcp.f32 %v5311_v13 }
 0xa5f   :  { %v10930_v40 = vpop.eup %10929  ;;  %10949 = vrcp.f32 %v5312_v5 }
 0xa60   :  { %v10932_v56 = vpop.eup %10931  ;;  %10951 = vrcp.f32 %v5313_v29 }
 0xa61   :  { %v10934_v9 = vpop.eup %10933  ;;  %10953 = vtanh.f32 %v5343_v58 }
 0xa62   :  { %v10936_v12 = vpop.eup %10935  ;;  %10955 = vtanh.f32 %v5344_v52 }
 0xa63   :  { %v10938_v16 = vpop.eup %10937  ;;  %10957 = vtanh.f32 %v5345_v24 }
 0xa64   :  { %v10940_v27 = vpop.eup %10939  ;;  %v5370_v25 = vrot.slane %v10938_v16, 1  ;;  %v5394_v55 = vmul.f32 %v10938_v16, %v10928_v28  ;;  %v5418_v42 = vrot.slane %v10938_v16, 2 }
 0xa65   :  { %v10942_v7 = vpop.eup %10941  ;;  %v5371_v54 = vrot.slane %v10940_v27, 1  ;;  %v5395_v6 = vmul.f32 %v10940_v27, %v10930_v40  ;;  %v5419_v14 = vrot.slane %v10940_v27, 2 }
 0xa66   :  { %v10944_v30 = vpop.eup %10943  ;;  %v5372_v18 = vrot.slane %v10942_v7, 1  ;;  %v5386_v62 = vmul.f32 0.0, %v5370_v25  ;;  %v5396_v63 = vmul.f32 %v10942_v7, %v10932_v56  ;;  %v5420_v2 = vrot.slane %v10942_v7, 2 }
 0xa67   :  { %v10946_v48 = vpop.eup %10945  ;;  %v5373_v0 = vrot.slane %v10944_v30, 1  ;;  %v5387_v47 = vmul.f32 0.0, %v5371_v54  ;;  %v5397_v15 = vmul.f32 %v10944_v30, %v10934_v9  ;;  %v5421_v13 = vrot.slane %v10944_v30, 2 }
 0xa68   :  { %v13022_v59 = vpop.eup %10947  ;;  %v5374_v61 = vrot.slane %v10946_v48, 1  ;;  %v5388_v4 = vmul.f32 0.0, %v5372_v18  ;;  %v13024_v39 = vadd.f32 %v5394_v55, %v5386_v62  ;;  %v5398_v50 = vmul.f32 %v10946_v48, %v10936_v12 }
 0xa69   :  { %v10950_v35 = vpop.eup %10949  ;;  %v5375_v43 = vrot.slane %v13022_v59, 1  ;;  %v5389_v22 = vmul.f32 0.0, %v5373_v0  ;;  %v13027_v10 = vadd.f32 %v5395_v6, %v5387_v47  ;;  %v5422_v58 = vrot.slane %v10946_v48, 2 }
 0xa6a   :  { %v10952_v49 = vpop.eup %10951  ;;  %v5376_v38 = vrot.slane %v10950_v35, 1  ;;  %v5390_v11 = vmul.f32 0.0, %v5374_v61  ;;  %v13029_v21 = vadd.f32 %v5396_v63, %v5388_v4  ;;  %10959 = vtanh.f32 %v13024_v39 }
 0xa6b   :  { %v10954_v33 = vpop.eup %10953  ;;  %v5377_v57 = vrot.slane %v10952_v49, 1  ;;  %v5391_v60 = vmul.f32 0.0, %v5375_v43  ;;  %v13032_v51 = vadd.f32 %v5397_v15, %v5389_v22  ;;  %10961 = vtanh.f32 %v13027_v10  ;;  %v5991_v43 = vld [vmem:[#allocation7 + $0x28] sm:$0xff]  ;;  %v5989_v22 = vld [vmem:[#allocation7 + $0x18] sm:$0xff] }
 0xa6c   :  { %v10956_v1 = vpop.eup %10955  ;;  %v5392_v36 = vmul.f32 0.0, %v5376_v38  ;;  %v5399_v32 = vmul.f32 %v10954_v33, %v13022_v59  ;;  %v13036_v37 = vadd.f32 %v5398_v50, %v5390_v11  ;;  %10963 = vtanh.f32 %v13029_v21  ;;  %v5986_v38 = vld [vmem:[#allocation7] sm:$0xff] }
 0xa6d   :  { %v10958_v23 = vpop.eup %10957  ;;  %v5393_v41 = vmul.f32 0.0, %v5377_v57  ;;  %v5400_v20 = vmul.f32 %v10956_v1, %v10950_v35  ;;  %10965 = vtanh.f32 %v13032_v51  ;;  %v5423_v24 = vrot.slane %v13022_v59, 2  ;;  %v5990_v11 = vld [vmem:[#allocation7 + $0x20] sm:$0xff]  ;;  %v5992_v1 = vld [vmem:[#allocation7 + $0x30] sm:$0xff] }
 0xa6e   :  { %v5401_v34 = vmul.f32 %v10958_v23, %v10952_v49  ;;  %v13040_v44 = vadd.f32 %v5399_v32, %v5391_v60  ;;  %10967 = vtanh.f32 %v13036_v37  ;;  %v5424_v12 = vrot.slane %v10950_v35, 2  ;;  %v5987_v35 = vld [vmem:[#allocation7 + $0x8] sm:$0xff]  ;;  %v5988_v60 = vld [vmem:[#allocation7 + $0x10] sm:$0xff] }
 0xa6f   :  { %v13043_v45 = vadd.f32 %v5400_v20, %v5392_v36  ;;  %v5425_v25 = vrot.slane %v10952_v49, 2  ;;  %v13083_v50 = vpack.c.bf16 %v5991_v43, %v5987_v35  ;;  %v5993_v49 = vld [vmem:[#allocation7 + $0x38] sm:$0xff]  ;;  %v13087_v57 = vpack.c.bf16 %v5990_v11, %v5986_v38  ;;  %v5995_v36 = vld [vmem:[#allocation7 + $0x48] sm:$0xff]  ;;  %v6022_v35 = vld [vmem:[#allocation7 + $0x120] sm:$0xff] }
 0xa70   :  { %v13045_v31 = vadd.f32 %v5401_v34, %v5393_v41  ;;  %10969 = vtanh.f32 %v13040_v44  ;;  %v13085_v33 = vpack.c.bf16 %v5993_v49, %v5989_v22  ;;  %v13090_v32 = vpack.c.bf16 %v5992_v1, %v5988_v60  ;;  %v5999_v23 = vld [vmem:[#allocation7 + $0x68] sm:$0xff]  ;;  %v5997_v41 = vld [vmem:[#allocation7 + $0x58] sm:$0xff]  ;;  %v6020_v43 = vld [vmem:[#allocation7 + $0x110] sm:$0xff] }
 0xa71   :  { %10971 = vtanh.f32 %v13043_v45  ;;  %10009 = vmatprep.subr.bf16.mxu0 %v13083_v50  ;;  %v6001_v20 = vld [vmem:[#allocation7 + $0x78] sm:$0xff]  ;;  %v13094_v34 = vpack.c.bf16 %v5999_v23, %v5995_v36  ;;  %v6024_v49 = vld [vmem:[#allocation7 + $0x130] sm:$0xff]  ;;  %v6027_v38 = vld [vmem:[#allocation7 + $0x148] sm:$0xff] }
 0xa72   :  { %10973 = vtanh.f32 %v13045_v31  ;;  %10041 = vmatprep.subr.bf16.mxu1 %v13085_v33  ;;  %v6031_v11 = vld [vmem:[#allocation7 + $0x168] sm:$0xff]  ;;  %v6029_v60 = vld [vmem:[#allocation7 + $0x158] sm:$0xff]  ;;  %v13138_v23 = vpack.c.bf16 %v6024_v49, %v6020_v43  ;;  %v6044_v43 = vld [vmem:[#allocation7 + $0x1d0] sm:$0xff] }
 0xa73   :  { %v6033_v1 = vld [vmem:[#allocation7 + $0x178] sm:$0xff]  ;;  %v6048_v49 = vld [vmem:[#allocation7 + $0x1f0] sm:$0xff] }
 0xa74   :  { %v10960_v19 = vpop.eup %10959 }
 0xa75   :  { %v10962_v17 = vpop.eup %10961  ;;  %v5434_v53 = vmul.f32 %v10960_v19, %v5418_v42  ;;  %v13096_v42 = vpack.c.bf16 %v6001_v20, %v5997_v41  ;;  %v5994_v19 = vld [vmem:[#allocation7 + $0x40] sm:$0xff]  ;;  %v13140_v41 = vpack.c.bf16 %v6031_v11, %v6027_v38  ;;  %v13174_v11 = vpack.c.bf16 %v6048_v49, %v6044_v43 }
 0xa76   :  { %v10964_v46 = vpop.eup %10963  ;;  %v5435_v26 = vmul.f32 %v10962_v17, %v5419_v14  ;;  %v5998_v14 = vld [vmem:[#allocation7 + $0x60] sm:$0xff]  ;;  %v5996_v17 = vld [vmem:[#allocation7 + $0x50] sm:$0xff] }
 0xa77   :  { %v10966_v5 = vpop.eup %10965  ;;  %v5436_v28 = vmul.f32 %v10964_v46, %v5420_v2  ;;  %5442 = vst [vmem:[%s13975_s8] sm:$0x1] %v5434_v53  ;;  %v13099_v2 = vpack.c.bf16 %v5998_v14, %v5994_v19  ;;  %v6003_v46 = vld [vmem:[#allocation7 + $0x88] sm:$0xff]  ;;  %v6026_v20 = vld [vmem:[#allocation7 + $0x140] sm:$0xff]  ;;  %v6028_v14 = vld [vmem:[#allocation7 + $0x150] sm:$0xff] }
 0xa78   :  { %v10968_v29 = vpop.eup %10967  ;;  %v5437_v52 = vmul.f32 %v10966_v5, %v5421_v13  ;;  %5443 = vst [vmem:[%s13975_s8 + $0x8] sm:$0x1] %v5435_v26  ;;  %v5530_v40 = vcombine.low %v5434_v53, %v5435_v26  ;;  %v6000_v53 = vld [vmem:[#allocation7 + $0x70] sm:$0xff]  ;;  %v6007_v13 = vld [vmem:[#allocation7 + $0xa8] sm:$0xff]  ;;  %v6030_v19 = vld [vmem:[#allocation7 + $0x160] sm:$0xff] }
 0xa79   :  { %v5438_v56 = vmul.f32 %v10968_v29, %v5422_v58  ;;  %5444 = vst [vmem:[%s13975_s8 + $0x10] sm:$0x1] %v5436_v28  ;;  %v13103_v26 = vpack.c.bf16 %v6000_v53, %v5996_v17  ;;  %v13105_v5 = vpack.c.bf16 %v6007_v13, %v6003_v46  ;;  %v6005_v58 = vld [vmem:[#allocation7 + $0x98] sm:$0xff]  ;;  %v6002_v29 = vld [vmem:[#allocation7 + $0x80] sm:$0xff]  ;;  %v13143_v17 = vpack.c.bf16 %v6033_v1, %v6029_v60  ;;  %v6032_v53 = vld [vmem:[#allocation7 + $0x170] sm:$0xff] }
 0xa7a   :  { %v10970_v9 = vpop.eup %10969  ;;  %5445 = vst [vmem:[%s13975_s8 + $0x18] sm:$0x1] %v5437_v52  ;;  %v5531_v16 = vcombine.low %v5436_v28, %v5437_v52  ;;  %v5540_v18 = vrot.slane %v5530_v40, %v11833_v8  ;;  %v6009_v28 = vld [vmem:[#allocation7 + $0xb8] sm:$0xff]  ;;  %v6006_v40 = vld [vmem:[#allocation7 + $0xa0] sm:$0xff]  ;;  %v6035_v46 = vld [vmem:[#allocation7 + $0x188] sm:$0xff] }
 0xa7b   :  { %v10972_v27 = vpop.eup %10971  ;;  %v5439_v7 = vmul.f32 %v10970_v9, %v5423_v24  ;;  %5446 = vst [vmem:[%s13975_s8 + $0x20] sm:$0x1] %v5438_v56  ;;  %v13107_v52 = vpack.c.bf16 %v6009_v28, %v6005_v58  ;;  %v6004_v24 = vld [vmem:[#allocation7 + $0x90] sm:$0xff]  ;;  %v13110_v9 = vpack.c.bf16 %v6006_v40, %v6002_v29  ;;  %v6039_v13 = vld [vmem:[#allocation7 + $0x1a8] sm:$0xff]  ;;  %v6037_v58 = vld [vmem:[#allocation7 + $0x198] sm:$0xff]  ;;  %v13146_v29 = vpack.c.bf16 %v6030_v19, %v6026_v20 }
 0xa7c   :  { %v10974_v54 = vpop.eup %10973  ;;  %v5440_v30 = vmul.f32 %v10972_v27, %v5424_v12  ;;  %v5547_v62 = vrot.slane %v5531_v16, %v11833_v8  ;;  %v6011_v12 = vld [vmem:[#allocation7 + $0xc8] sm:$0xff]  ;;  %v6013_v27 = vld [vmem:[#allocation7 + $0xd8] sm:$0xff]  ;;  %v13150_v40 = vpack.c.bf16 %v6032_v53, %v6028_v14  ;;  %14078 = vst [vmem:[#allocation17_spill] sm:$0xff] %v13174_v11 }
 0xa7d   :  { %v5441_v55 = vmul.f32 %v10974_v54, %v5425_v25  ;;  %5447 = vst [vmem:[%s13975_s8 + $0x28] sm:$0x1] %v5439_v7  ;;  %v5532_v48 = vcombine.low %v5438_v56, %v5439_v7  ;;  %v6008_v56 = vld [vmem:[#allocation7 + $0xb0] sm:$0xff]  ;;  %v6015_v16 = vld [vmem:[#allocation7 + $0xe8] sm:$0xff]  ;;  %v6017_v54 = vld [vmem:[#allocation7 + $0xf8] sm:$0xff] }
 0xa7e   :  { %5448 = vst [vmem:[%s13975_s8 + $0x30] sm:$0x1] %v5440_v30  ;;  %v5562_v0 = vcombine.low %v5540_v18, %v5547_v62  ;;  %v13114_v25 = vpack.c.bf16 %v6008_v56, %v6004_v24  ;;  %v13116_v7 = vpack.c.bf16 %v6015_v16, %v6011_v12  ;;  %v6014_v18 = vld [vmem:[#allocation7 + $0xe0] sm:$0xff]  ;;  %v13119_v62 = vpack.c.bf16 %v6017_v54, %v6013_v27  ;;  %v6041_v28 = vld [vmem:[#allocation7 + $0x1b8] sm:$0xff]  ;;  %v6036_v16 = vld [vmem:[#allocation7 + $0x190] sm:$0xff] }
 0xa7f   :  { %5449 = vst [vmem:[%s13975_s8 + $0x38] sm:$0x1] %v5441_v55  ;;  %v5533_v47 = vcombine.low %v5440_v30, %v5441_v55  ;;  %v5554_v6 = vrot.slane %v5532_v48, %v11833_v8  ;;  %v6010_v30 = vld [vmem:[#allocation7 + $0xc0] sm:$0xff]  ;;  %v6012_v55 = vld [vmem:[#allocation7 + $0xd0] sm:$0xff]  ;;  %v13152_v24 = vpack.c.bf16 %v6039_v13, %v6035_v46  ;;  %v13155_v27 = vpack.c.bf16 %v6041_v28, %v6037_v58 }
 0xa80   :  { %v5570_v61 = vrot.slane %v5562_v0, %v11833_v8  ;;  %v6016_v48 = vld [vmem:[#allocation7 + $0xf0] sm:$0xff]  ;;  %v6019_v0 = vld [vmem:[#allocation7 + $0x108] sm:$0xff]  ;;  %v6034_v56 = vld [vmem:[#allocation7 + $0x180] sm:$0xff] }
 0xa81   :  { %v5561_v63 = vrot.slane %v5533_v47, %v11833_v8  ;;  %v6023_v47 = vld [vmem:[#allocation7 + $0x128] sm:$0xff]  ;;  %v6038_v12 = vld [vmem:[#allocation7 + $0x1a0] sm:$0xff]  ;;  %14072 = vst [vmem:[#allocation11_spill] sm:$0xff] %v13155_v27  ;;  %v6040_v54 = vld [vmem:[#allocation7 + $0x1b0] sm:$0xff] }
 0xa82   :  { %v5452_v43 = vld [vmem:[#allocation2 + $0x41] ss:$8 sm:$0xf] }
 0xa83   :  { %v5563_v59 = vcombine.low %v5554_v6, %v5561_v63  ;;  %v6021_v6 = vld [vmem:[#allocation7 + $0x118] sm:$0xff] }
 0xa84   :  { %v6025_v63 = vld [vmem:[#allocation7 + $0x138] sm:$0xff] }
 0xa85   :  { %v5577_v4 = vrot.slane %v5563_v59, %v11833_v8  ;;  %v13122_v59 = vpack.c.bf16 %v6014_v18, %v6010_v30  ;;  %v13131_v22 = vpack.c.bf16 %v6025_v63, %v6021_v6  ;;  %v6043_v30 = vld [vmem:[#allocation7 + $0x1c8] sm:$0xff]  ;;  %v6042_v63 = vld [vmem:[#allocation7 + $0x1c0] sm:$0xff] }
 0xa86   :  { %v6047_v18 = vld [vmem:[#allocation7 + $0x1e8] sm:$0xff] }
 0xa87   :  { %v5578_v15 = vcombine.low %v5570_v61, %v5577_v4  ;;  %v13126_v61 = vpack.c.bf16 %v6016_v48, %v6012_v55  ;;  %v13128_v4 = vpack.c.bf16 %v6023_v47, %v6019_v0  ;;  %v6045_v55 = vld [vmem:[#allocation7 + $0x1d8] sm:$0xff]  ;;  %v13158_v0 = vpack.c.bf16 %v6038_v12, %v6034_v56 }
 0xa88   :  { %v6049_v48 = vld [vmem:[#allocation7 + $0x1f8] sm:$0xff]  ;;  %v13162_v47 = vpack.c.bf16 %v6040_v54, %v6036_v16  ;;  %v13164_v6 = vpack.c.bf16 %v6047_v18, %v6043_v30 }
 0xa89   :  { %5645 = vmatmul.mubr.f32.vlgmr.msra.gmra.mrb[50].mxu0 %v5578_v15  ;;  %5716 = vmatmul.mubr.f32.vlgmr.msra.gmra.mrb[50].mxu1 %v5578_v15  ;;  %v6018_v15 = vld [vmem:[#allocation7 + $0x100] sm:$0xff]  ;;  %14073 = vst [vmem:[#allocation12_spill] sm:$0xff] %v13158_v0 }
 0xa8a   :  { %6172 = vmatprep.mubr.f32.mxu0 %v14032_v3  ;;  %6243 = vmatprep.mubr.f32.mxu1 %v14032_v3  ;;  %v13134_v36 = vpack.c.bf16 %v6022_v35, %v6018_v15  ;;  %14074 = vst [vmem:[#allocation13_spill] sm:$0xff] %v13162_v47  ;;  %14075 = vst [vmem:[#allocation14_spill] sm:$0xff] %v13164_v6  ;;  %v6046_v15 = vld [vmem:[#allocation7 + $0x1e0] sm:$0xff]  ;;  %v13167_v35 = vpack.c.bf16 %v6049_v48, %v6045_v55 }
 0xa8b   :  { %10011 = vmatpush1.bf16.msra.mxu0 %v13087_v57  ;;  %10043 = vmatpush1.bf16.msra.mxu1 %v13090_v32  ;;  %v13170_v38 = vpack.c.bf16 %v6046_v15, %v6042_v63  ;;  %v5450_v63 = vld [vmem:[#allocation2 + $0x1] ss:$8 sm:$0xf] }
 0xa8c   :  { %10013 = vmatprep.subr.bf16.mxu0 %v13094_v34  ;;  %10045 = vmatprep.subr.bf16.mxu1 %v13096_v42  ;;  %14076 = vst [vmem:[#allocation15_spill] sm:$0xff] %v13167_v35  ;;  %v5451_v15 = vld [vmem:[#allocation2 + $0x21] ss:$8 sm:$0xf] }
 0xa8d   :  { %14077 = vst [vmem:[#allocation16_spill] sm:$0xff] %v13170_v38  ;;  %v5454_v49 = vld [vmem:[#allocation2 + $0x81] ss:$8 sm:$0xf] }
 0xa8f   :  { %10015 = vmatpush1.bf16.msra.mxu0 %v13099_v2  ;;  %10047 = vmatpush1.bf16.msra.mxu1 %v13103_v26 }
 0xa90   :  { %10017 = vmatprep.subr.bf16.mxu0 %v13105_v5  ;;  %10049 = vmatprep.subr.bf16.mxu1 %v13107_v52 }
 0xa93   :  { %10019 = vmatpush1.bf16.msra.mxu0 %v13110_v9  ;;  %10051 = vmatpush1.bf16.msra.mxu1 %v13114_v25 }
 0xa94   :  { %10021 = vmatprep.subr.bf16.mxu0 %v13116_v7  ;;  %10053 = vmatprep.subr.bf16.mxu1 %v13119_v62 }
 0xa97   :  { %10023 = vmatpush1.bf16.msra.mxu0 %v13122_v59  ;;  %10055 = vmatpush1.bf16.msra.mxu1 %v13126_v61 }
 0xa98   :  { %10025 = vmatprep.subr.bf16.mxu0 %v13128_v4  ;;  %10057 = vmatprep.subr.bf16.mxu1 %v13131_v22 }
 0xa9b   :  { %10027 = vmatpush1.bf16.msra.mxu0 %v13134_v36  ;;  %10059 = vmatpush1.bf16.msra.mxu1 %v13138_v23 }
 0xa9c   :  { %10029 = vmatprep.subr.bf16.mxu0 %v13140_v41  ;;  %10061 = vmatprep.subr.bf16.mxu1 %v13143_v17 }
 0xa9f   :  { %10031 = vmatpush1.bf16.msra.mxu0 %v13146_v29  ;;  %10063 = vmatpush1.bf16.msra.mxu1 %v13150_v40 }
 0xaa0   :  { %10033 = vmatprep.subr.bf16.mxu0 %v13152_v24  ;;  %10065 = vmatprep.subr.bf16.mxu1 %v13155_v27 }
 0xaa3   :  { %10035 = vmatpush1.bf16.msra.mxu0 %v13158_v0  ;;  %10067 = vmatpush1.bf16.msra.mxu1 %v13162_v47 }
 0xaa4   :  { %10037 = vmatprep.subr.bf16.mxu0 %v13164_v6  ;;  %10069 = vmatprep.subr.bf16.mxu1 %v13167_v35 }
 0xaa7   :  { %10039 = vmatpush1.bf16.msra.mxu0 %v13170_v38  ;;  %10071 = vmatpush1.bf16.msra.mxu1 %v13174_v11 }
 0xaa8   :  { %10073 = vmatprep.subr.bf16.mxu0 %v13083_v50  ;;  %10105 = vmatprep.subr.bf16.mxu1 %v13085_v33 }
 0xb5c   :  { %v5646_v60 = vpop.f32.mrb[50].mxu0  ;;  %v5717_v1 = vpop.f32.mrb[50].mxu1 }
 0xb5d   :  { %v5648_v20 = vpop.f32.mrb[51].mxu0  ;;  %v5719_v19 = vpop.f32.mrb[51].mxu1 }
 0xb5e   :  { %v5726_v14 = vcombine.low %v5646_v60, %v5648_v20  ;;  %v5727_v53 = vcombine.high %v5646_v60, %v5648_v20  ;;  %v5728_v46 = vcombine.low %v5717_v1, %v5719_v19  ;;  %v5729_v13 = vcombine.high %v5717_v1, %v5719_v19 }
 0xb60   :  { %v5736_v58 = vrot.slane %v5726_v14, %v11833_v8  ;;  %v5743_v28 = vrot.slane %v5727_v53, %v11833_v8  ;;  %v5750_v56 = vrot.slane %v5728_v46, %v11833_v8  ;;  %v5757_v12 = vrot.slane %v5729_v13, %v11833_v8  ;;  %v5453_v14 = vld [vmem:[#allocation2 + $0x61] ss:$8 sm:$0xf] }
 0xb61   :  { %v5455_v53 = vld [vmem:[#allocation2 + $0xa1] ss:$8 sm:$0xf] }
 0xb62   :  { %v5758_v16 = vcombine.low %v5736_v58, %v5750_v56  ;;  %v5759_v50 = vcombine.high %v5736_v58, %v5750_v56  ;;  %v5760_v54 = vcombine.low %v5743_v28, %v5757_v12  ;;  %v5761_v33 = vcombine.high %v5743_v28, %v5757_v12  ;;  %v5456_v28 = vld [vmem:[#allocation2 + $0xc1] ss:$8 sm:$0xf] }
 0xb63   :  { %v5457_v56 = vld [vmem:[#allocation2 + $0xe1] ss:$8 sm:$0xf] }
 0xb64   :  { %v5768_v30 = vrot.slane %v5758_v16, %v11833_v8  ;;  %v5775_v18 = vrot.slane %v5760_v54, %v11833_v8  ;;  %v5782_v55 = vrot.slane %v5759_v50, %v11833_v8  ;;  %v5789_v48 = vrot.slane %v5761_v33, %v11833_v8 }
 0xb66   :  { %v5790_v60 = vcombine.high %v5768_v30, %v5768_v30  ;;  %v5791_v1 = vcombine.high %v5775_v18, %v5775_v18  ;;  %v5792_v20 = vcombine.high %v5782_v55, %v5782_v55  ;;  %v5793_v19 = vcombine.high %v5789_v48, %v5789_v48 }
 0xb67   :  { %v5802_v46 = vadd.f32 %v5768_v30, %v5450_v63  ;;  %v5803_v13 = vadd.f32 %v5782_v55, %v5451_v15  ;;  %v5806_v58 = vadd.f32 %v5775_v18, %v5454_v49  ;;  %v5807_v50 = vadd.f32 %v5789_v48, %v5455_v53 }
 0xb68   :  { %v5804_v12 = vadd.f32 %v5790_v60, %v5452_v43  ;;  %v5805_v16 = vadd.f32 %v5792_v20, %v5453_v14  ;;  %v5808_v54 = vadd.f32 %v5791_v1, %v5456_v28  ;;  %v5809_v38 = vadd.f32 %v5793_v19, %v5457_v56 }
 0xb69   :  { %v9248_v33 = vmul.f32 -1.442695, %v5802_v46  ;;  %v9249_v11 = vmul.f32 -1.442695, %v5803_v13  ;;  %v9252_v47 = vmul.f32 -1.442695, %v5806_v58 }
 0xb6a   :  { %v9250_v35 = vmul.f32 -1.442695, %v5804_v12  ;;  %v9251_v6 = vmul.f32 -1.442695, %v5805_v16  ;;  %v9253_v0 = vmul.f32 -1.442695, %v5807_v50 }
 0xb6b   :  { %10975 = vpow2.f32 %v9248_v33  ;;  %v9254_v27 = vmul.f32 -1.442695, %v5808_v54  ;;  %v9255_v30 = vmul.f32 -1.442695, %v5809_v38  ;;  %v5866_v18 = vrot.slane %v5802_v46, 3 }
 0xb6c   :  { %10977 = vpow2.f32 %v9249_v11  ;;  %v5867_v55 = vrot.slane %v5803_v13, 3  ;;  %v5868_v48 = vrot.slane %v5804_v12, 3  ;;  %v5869_v63 = vrot.slane %v5805_v16, 3 }
 0xb6d   :  { %10979 = vpow2.f32 %v9250_v35  ;;  %v5870_v15 = vrot.slane %v5806_v58, 3  ;;  %v5871_v13 = vrot.slane %v5807_v50, 3  ;;  %v5872_v56 = vrot.slane %v5808_v54, 3 }
 0xb6e   :  { %10981 = vpow2.f32 %v9251_v6  ;;  %v5873_v16 = vrot.slane %v5809_v38, 3 }
 0xb6f   :  { %10983 = vpow2.f32 %v9252_v47 }
 0xb70   :  { %10985 = vpow2.f32 %v9253_v0 }
 0xb71   :  { %10987 = vpow2.f32 %v9254_v27 }
 0xb72   :  { %10989 = vpow2.f32 %v9255_v30 }
 0xb73   :  { %10991 = vtanh.f32 %v5866_v18 }
 0xb74   :  { %10993 = vtanh.f32 %v5867_v55 }
 0xb75   :  { %v10976_v43 = vpop.eup %10975  ;;  %10995 = vtanh.f32 %v5868_v48 }
 0xb76   :  { %v10978_v49 = vpop.eup %10977  ;;  %v5834_v11 = vadd.f32 1.0, %v10976_v43  ;;  %10997 = vtanh.f32 %v5869_v63 }
 0xb77   :  { %v10980_v35 = vpop.eup %10979  ;;  %v5835_v60 = vadd.f32 1.0, %v10978_v49  ;;  %10999 = vtanh.f32 %v5870_v15 }
 0xb78   :  { %v10982_v6 = vpop.eup %10981  ;;  %v5836_v47 = vadd.f32 1.0, %v10980_v35  ;;  %11001 = vrcp.f32 %v5834_v11 }
 0xb79   :  { %v10984_v0 = vpop.eup %10983  ;;  %v5837_v1 = vadd.f32 1.0, %v10982_v6  ;;  %11003 = vrcp.f32 %v5835_v60 }
 0xb7a   :  { %v10986_v27 = vpop.eup %10985  ;;  %v5838_v20 = vadd.f32 1.0, %v10984_v0  ;;  %11005 = vrcp.f32 %v5836_v47 }
 0xb7b   :  { %v10988_v19 = vpop.eup %10987  ;;  %v5839_v14 = vadd.f32 1.0, %v10986_v27  ;;  %11007 = vrcp.f32 %v5837_v1 }
 0xb7c   :  { %v10990_v53 = vpop.eup %10989  ;;  %v5840_v46 = vadd.f32 1.0, %v10988_v19  ;;  %11009 = vrcp.f32 %v5838_v20 }
 0xb7d   :  { %v10992_v58 = vpop.eup %10991  ;;  %v5841_v28 = vadd.f32 1.0, %v10990_v53  ;;  %11011 = vrcp.f32 %v5839_v14 }
 0xb7e   :  { %v10994_v12 = vpop.eup %10993  ;;  %11013 = vrcp.f32 %v5840_v46 }
 0xb7f   :  { %v10996_v33 = vpop.eup %10995  ;;  %11015 = vrcp.f32 %v5841_v28 }
 0xb80   :  { %v10998_v30 = vpop.eup %10997  ;;  %11017 = vtanh.f32 %v5871_v13 }
 0xb81   :  { %v11000_v18 = vpop.eup %10999  ;;  %11019 = vtanh.f32 %v5872_v56 }
 0xb82   :  { %v11002_v55 = vpop.eup %11001  ;;  %11021 = vtanh.f32 %v5873_v16 }
 0xb83   :  { %v11004_v48 = vpop.eup %11003  ;;  %v5898_v63 = vrot.slane %v11002_v55, 1  ;;  %v5922_v54 = vmul.f32 %v11002_v55, %v10992_v58 }
 0xb84   :  { %v11006_v15 = vpop.eup %11005  ;;  %v5899_v43 = vrot.slane %v11004_v48, 1  ;;  %v5923_v6 = vmul.f32 %v11004_v48, %v10994_v12 }
 0xb85   :  { %v11008_v50 = vpop.eup %11007  ;;  %v5900_v49 = vrot.slane %v11006_v15, 1  ;;  %v5914_v11 = vmul.f32 %v5898_v63, %v13024_v39  ;;  %v5924_v47 = vmul.f32 %v11006_v15, %v10996_v33 }
 0xb86   :  { %v11010_v35 = vpop.eup %11009  ;;  %v5901_v60 = vrot.slane %v11008_v50, 1  ;;  %v5915_v38 = vmul.f32 %v5899_v43, %v13027_v10  ;;  %v5925_v20 = vmul.f32 %v11008_v50, %v10998_v30 }
 0xb87   :  { %v13191_v0 = vpop.eup %11011  ;;  %v5902_v1 = vrot.slane %v11010_v35, 1  ;;  %v5916_v27 = vmul.f32 %v5900_v49, %v13029_v21  ;;  %v13194_v19 = vadd.f32 %v5922_v54, %v5914_v11  ;;  %v5926_v46 = vmul.f32 %v11010_v35, %v11000_v18 }
 0xb88   :  { %v11014_v14 = vpop.eup %11013  ;;  %v5903_v53 = vrot.slane %v13191_v0, 1  ;;  %v5917_v39 = vmul.f32 %v5901_v60, %v13032_v51  ;;  %v13198_v13 = vadd.f32 %v5923_v6, %v5915_v38  ;;  %v5946_v60 = vrot.slane %v11002_v55, 2 }
 0xb89   :  { %v11016_v58 = vpop.eup %11015  ;;  %v5904_v10 = vrot.slane %v11014_v14, 1  ;;  %v5918_v28 = vmul.f32 %v5902_v1, %v13036_v37  ;;  %v13201_v56 = vadd.f32 %v5924_v47, %v5916_v27  ;;  %11023 = vtanh.f32 %v13194_v19 }
 0xb8a   :  { %v11018_v21 = vpop.eup %11017  ;;  %v5905_v12 = vrot.slane %v11016_v58, 1  ;;  %v5919_v16 = vmul.f32 %v5903_v53, %v13040_v44  ;;  %v13205_v33 = vadd.f32 %v5925_v20, %v5917_v39  ;;  %11025 = vtanh.f32 %v13198_v13 }
 0xb8b   :  { %v11020_v51 = vpop.eup %11019  ;;  %v5920_v30 = vmul.f32 %v5904_v10, %v13043_v45  ;;  %v5927_v18 = vmul.f32 %v11018_v21, %v13191_v0  ;;  %v13210_v63 = vadd.f32 %v5926_v46, %v5918_v28  ;;  %11027 = vtanh.f32 %v13201_v56 }
 0xb8c   :  { %v11022_v37 = vpop.eup %11021  ;;  %v5921_v43 = vmul.f32 %v5905_v12, %v13045_v31  ;;  %v5928_v49 = vmul.f32 %v11020_v51, %v11014_v14  ;;  %11029 = vtanh.f32 %v13205_v33  ;;  %v5947_v38 = vrot.slane %v11004_v48, 2 }
 0xb8d   :  { %v5929_v44 = vmul.f32 %v11022_v37, %v11016_v58  ;;  %v13215_v11 = vadd.f32 %v5927_v18, %v5919_v16  ;;  %11031 = vtanh.f32 %v13210_v63  ;;  %v5948_v47 = vrot.slane %v11006_v15, 2 }
 0xb8e   :  { %v13218_v54 = vadd.f32 %v5928_v49, %v5920_v30  ;;  %v5949_v20 = vrot.slane %v11008_v50, 2  ;;  %v5950_v46 = vrot.slane %v11010_v35, 2  ;;  %v5951_v48 = vrot.slane %v13191_v0, 2 }
 0xb8f   :  { %v13220_v45 = vadd.f32 %v5929_v44, %v5921_v43  ;;  %11033 = vtanh.f32 %v13215_v11  ;;  %v5952_v35 = vrot.slane %v11014_v14, 2  ;;  %v5953_v51 = vrot.slane %v11016_v58, 2 }
 0xb90   :  { %11035 = vtanh.f32 %v13218_v54 }
 0xb91   :  { %11037 = vtanh.f32 %v13220_v45 }
 0xb93   :  { %v11024_v31 = vpop.eup %11023 }
 0xb94   :  { %v11026_v6 = vpop.eup %11025  ;;  %v5962_v1 = vmul.f32 %v11024_v31, %v5946_v60 }
 0xb95   :  { %v11028_v27 = vpop.eup %11027  ;;  %v5963_v53 = vmul.f32 %v11026_v6, %v5947_v38 }
 0xb96   :  { %v11030_v39 = vpop.eup %11029  ;;  %v5964_v10 = vmul.f32 %v11028_v27, %v5948_v47  ;;  %5970 = vst [vmem:[%s13975_s8 + $0x1] sm:$0x1] %v5962_v1 }
 0xb97   :  { %v11032_v28 = vpop.eup %11031  ;;  %v5965_v21 = vmul.f32 %v11030_v39, %v5949_v20  ;;  %5971 = vst [vmem:[%s13975_s8 + $0x9] sm:$0x1] %v5963_v53  ;;  %v6058_v55 = vcombine.low %v5962_v1, %v5963_v53 }
 0xb98   :  { %v5966_v15 = vmul.f32 %v11032_v28, %v5950_v46  ;;  %5972 = vst [vmem:[%s13975_s8 + $0x11] sm:$0x1] %v5964_v10  ;;  %v5978_v46 = vld [vmem:[#allocation2 + $0x2] ss:$8 sm:$0xf] }
 0xb99   :  { %v11034_v50 = vpop.eup %11033  ;;  %5973 = vst [vmem:[%s13975_s8 + $0x19] sm:$0x1] %v5965_v21  ;;  %v6059_v12 = vcombine.low %v5964_v10, %v5965_v21  ;;  %v6068_v37 = vrot.slane %v6058_v55, %v11833_v8  ;;  %v5979_v10 = vld [vmem:[#allocation2 + $0x22] ss:$8 sm:$0xf] }
 0xb9a   :  { %v11036_v16 = vpop.eup %11035  ;;  %v5967_v30 = vmul.f32 %v11034_v50, %v5951_v48  ;;  %5974 = vst [vmem:[%s13975_s8 + $0x21] sm:$0x1] %v5966_v15  ;;  %v5980_v28 = vld [vmem:[#allocation2 + $0x42] ss:$8 sm:$0xf] }
 0xb9b   :  { %v11038_v0 = vpop.eup %11037  ;;  %v5968_v18 = vmul.f32 %v11036_v16, %v5952_v35  ;;  %v6075_v43 = vrot.slane %v6059_v12, %v11833_v8  ;;  %v5982_v21 = vld [vmem:[#allocation2 + $0x82] ss:$8 sm:$0xf] }
 0xb9c   :  { %v5969_v49 = vmul.f32 %v11038_v0, %v5953_v51  ;;  %5975 = vst [vmem:[%s13975_s8 + $0x29] sm:$0x1] %v5967_v30  ;;  %v6060_v14 = vcombine.low %v5966_v15, %v5967_v30  ;;  %v5981_v35 = vld [vmem:[#allocation2 + $0x62] ss:$8 sm:$0xf] }
 0xb9d   :  { %5976 = vst [vmem:[%s13975_s8 + $0x31] sm:$0x1] %v5968_v18  ;;  %v6090_v58 = vcombine.low %v6068_v37, %v6075_v43  ;;  %v5983_v12 = vld [vmem:[#allocation2 + $0xa2] ss:$8 sm:$0xf] }
 0xb9e   :  { %5977 = vst [vmem:[%s13975_s8 + $0x39] sm:$0x1] %v5969_v49  ;;  %v6061_v44 = vcombine.low %v5968_v18, %v5969_v49  ;;  %v6082_v60 = vrot.slane %v6060_v14, %v11833_v8  ;;  %v5984_v0 = vld [vmem:[#allocation2 + $0xc2] ss:$8 sm:$0xf] }
 0xb9f   :  { %v6098_v6 = vrot.slane %v6090_v58, %v11833_v8  ;;  %v5985_v18 = vld [vmem:[#allocation2 + $0xe2] ss:$8 sm:$0xf] }
 0xba0   :  { %v6089_v31 = vrot.slane %v6061_v44, %v11833_v8 }
 0xba2   :  { %v6091_v38 = vcombine.low %v6082_v60, %v6089_v31 }
 0xba4   :  { %v6105_v47 = vrot.slane %v6091_v38, %v11833_v8 }
 0xba6   :  { %v6106_v1 = vcombine.low %v6098_v6, %v6105_v47 }
 0xba8   :  { %6173 = vmatmul.mubr.f32.vlgmr.msra.gmra.mrb[52].mxu0 %v6106_v1  ;;  %6244 = vmatmul.mubr.f32.vlgmr.msra.gmra.mrb[52].mxu1 %v6106_v1 }
 0xba9   :  { %10075 = vmatpush1.bf16.msra.mxu0 %v13087_v57  ;;  %10107 = vmatpush1.bf16.msra.mxu1 %v13090_v32  ;;  %v14079_v57 = vld [vmem:[#allocation11_spill] sm:$0xff]  ;;  %v14080_v32 = vld [vmem:[#allocation12_spill] sm:$0xff] }
 0xbaa   :  { %10077 = vmatprep.subr.bf16.mxu0 %v13094_v34  ;;  %10109 = vmatprep.subr.bf16.mxu1 %v13096_v42  ;;  %v14081_v34 = vld [vmem:[#allocation13_spill] sm:$0xff]  ;;  %v14082_v42 = vld [vmem:[#allocation14_spill] sm:$0xff] }
 0xbab   :  { %6700 = vmatprep.mubr.f32.mxu0 %v14032_v3  ;;  %6771 = vmatprep.mubr.f32.mxu1 %v14032_v3 }
 0xbad   :  { %10079 = vmatpush1.bf16.msra.mxu0 %v13099_v2  ;;  %10111 = vmatpush1.bf16.msra.mxu1 %v13103_v26  ;;  %v14083_v2 = vld [vmem:[#allocation15_spill] sm:$0xff]  ;;  %v14084_v26 = vld [vmem:[#allocation16_spill] sm:$0xff] }
 0xbae   :  { %10081 = vmatprep.subr.bf16.mxu0 %v13105_v5  ;;  %10113 = vmatprep.subr.bf16.mxu1 %v13107_v52  ;;  %v14085_v5 = vld [vmem:[#allocation17_spill] sm:$0xff] }
 0xbb1   :  { %10083 = vmatpush1.bf16.msra.mxu0 %v13110_v9  ;;  %10115 = vmatpush1.bf16.msra.mxu1 %v13114_v25 }
 0xbb2   :  { %10085 = vmatprep.subr.bf16.mxu0 %v13116_v7  ;;  %10117 = vmatprep.subr.bf16.mxu1 %v13119_v62 }
 0xbb5   :  { %10087 = vmatpush1.bf16.msra.mxu0 %v13122_v59  ;;  %10119 = vmatpush1.bf16.msra.mxu1 %v13126_v61 }
 0xbb6   :  { %10089 = vmatprep.subr.bf16.mxu0 %v13128_v4  ;;  %10121 = vmatprep.subr.bf16.mxu1 %v13131_v22 }
 0xbb9   :  { %10091 = vmatpush1.bf16.msra.mxu0 %v13134_v36  ;;  %10123 = vmatpush1.bf16.msra.mxu1 %v13138_v23 }
 0xbba   :  { %10093 = vmatprep.subr.bf16.mxu0 %v13140_v41  ;;  %10125 = vmatprep.subr.bf16.mxu1 %v13143_v17 }
 0xbbd   :  { %10095 = vmatpush1.bf16.msra.mxu0 %v13146_v29  ;;  %10127 = vmatpush1.bf16.msra.mxu1 %v13150_v40 }
 0xbbe   :  { %10097 = vmatprep.subr.bf16.mxu0 %v13152_v24  ;;  %10129 = vmatprep.subr.bf16.mxu1 %v14079_v57 }
 0xbc1   :  { %10099 = vmatpush1.bf16.msra.mxu0 %v14080_v32  ;;  %10131 = vmatpush1.bf16.msra.mxu1 %v14081_v34 }
 0xbc2   :  { %10101 = vmatprep.subr.bf16.mxu0 %v14082_v42  ;;  %10133 = vmatprep.subr.bf16.mxu1 %v14083_v2 }
 0xbc5   :  { %10103 = vmatpush1.bf16.msra.mxu0 %v14084_v26  ;;  %10135 = vmatpush1.bf16.msra.mxu1 %v14085_v5 }
 0xc7b   :  { %v6174_v52 = vpop.f32.mrb[52].mxu0  ;;  %v6245_v9 = vpop.f32.mrb[52].mxu1 }
 0xc7c   :  { %v6176_v25 = vpop.f32.mrb[53].mxu0  ;;  %v6247_v7 = vpop.f32.mrb[53].mxu1 }
 0xc7d   :  { %v6254_v62 = vcombine.low %v6174_v52, %v6176_v25  ;;  %v6255_v59 = vcombine.high %v6174_v52, %v6176_v25  ;;  %v6256_v61 = vcombine.low %v6245_v9, %v6247_v7  ;;  %v6257_v4 = vcombine.high %v6245_v9, %v6247_v7 }
 0xc7f   :  { %v6264_v22 = vrot.slane %v6254_v62, %v11833_v8  ;;  %v6271_v36 = vrot.slane %v6255_v59, %v11833_v8  ;;  %v6278_v23 = vrot.slane %v6256_v61, %v11833_v8  ;;  %v6285_v41 = vrot.slane %v6257_v4, %v11833_v8 }
 0xc81   :  { %v6286_v17 = vcombine.low %v6264_v22, %v6278_v23  ;;  %v6287_v29 = vcombine.high %v6264_v22, %v6278_v23  ;;  %v6288_v40 = vcombine.low %v6271_v36, %v6285_v41  ;;  %v6289_v24 = vcombine.high %v6271_v36, %v6285_v41 }
 0xc83   :  { %v6296_v27 = vrot.slane %v6286_v17, %v11833_v8  ;;  %v6303_v20 = vrot.slane %v6288_v40, %v11833_v8  ;;  %v6310_v53 = vrot.slane %v6287_v29, %v11833_v8  ;;  %v6317_v39 = vrot.slane %v6289_v24, %v11833_v8 }
 0xc85   :  { %v6318_v55 = vcombine.high %v6296_v27, %v6296_v27  ;;  %v6319_v48 = vcombine.high %v6303_v20, %v6303_v20  ;;  %v6320_v15 = vcombine.high %v6310_v53, %v6310_v53  ;;  %v6321_v50 = vcombine.high %v6317_v39, %v6317_v39 }
 0xc86   :  { %v6330_v16 = vadd.f32 %v6296_v27, %v5978_v46  ;;  %v6331_v51 = vadd.f32 %v6310_v53, %v5979_v10  ;;  %v6334_v30 = vadd.f32 %v6303_v20, %v5982_v21  ;;  %v6335_v49 = vadd.f32 %v6317_v39, %v5983_v12 }
 0xc87   :  { %v6332_v37 = vadd.f32 %v6318_v55, %v5980_v28  ;;  %v6333_v43 = vadd.f32 %v6320_v15, %v5981_v35  ;;  %v6336_v14 = vadd.f32 %v6319_v48, %v5984_v0  ;;  %v6337_v60 = vadd.f32 %v6321_v50, %v5985_v18 }
 0xc88   :  { %v9256_v58 = vmul.f32 -1.442695, %v6330_v16  ;;  %v9257_v44 = vmul.f32 -1.442695, %v6331_v51  ;;  %v9260_v6 = vmul.f32 -1.442695, %v6334_v30 }
 0xc89   :  { %v9258_v31 = vmul.f32 -1.442695, %v6332_v37  ;;  %v9259_v38 = vmul.f32 -1.442695, %v6333_v43  ;;  %v9261_v47 = vmul.f32 -1.442695, %v6335_v49 }
 0xc8a   :  { %11039 = vpow2.f32 %v9256_v58  ;;  %v9262_v1 = vmul.f32 -1.442695, %v6336_v14  ;;  %v9263_v57 = vmul.f32 -1.442695, %v6337_v60  ;;  %v6394_v32 = vrot.slane %v6330_v16, 3 }
 0xc8b   :  { %11041 = vpow2.f32 %v9257_v44  ;;  %v6395_v34 = vrot.slane %v6331_v51, 3  ;;  %v6396_v42 = vrot.slane %v6332_v37, 3  ;;  %v6397_v2 = vrot.slane %v6333_v43, 3 }
 0xc8c   :  { %11043 = vpow2.f32 %v9258_v31  ;;  %v6398_v26 = vrot.slane %v6334_v30, 3  ;;  %v6399_v40 = vrot.slane %v6335_v49, 3  ;;  %v6400_v20 = vrot.slane %v6336_v14, 3 }
 0xc8d   :  { %11045 = vpow2.f32 %v9259_v38  ;;  %v6401_v39 = vrot.slane %v6337_v60, 3 }
 0xc8e   :  { %11047 = vpow2.f32 %v9260_v6 }
 0xc8f   :  { %11049 = vpow2.f32 %v9261_v47 }
 0xc90   :  { %11051 = vpow2.f32 %v9262_v1 }
 0xc91   :  { %11053 = vpow2.f32 %v9263_v57 }
 0xc92   :  { %11055 = vtanh.f32 %v6394_v32 }
 0xc93   :  { %11057 = vtanh.f32 %v6395_v34 }
 0xc94   :  { %v11040_v5 = vpop.eup %11039  ;;  %11059 = vtanh.f32 %v6396_v42 }
 0xc95   :  { %v11042_v52 = vpop.eup %11041  ;;  %v6362_v9 = vadd.f32 1.0, %v11040_v5  ;;  %11061 = vtanh.f32 %v6397_v2 }
 0xc96   :  { %v11044_v25 = vpop.eup %11043  ;;  %v6363_v7 = vadd.f32 1.0, %v11042_v52  ;;  %11063 = vtanh.f32 %v6398_v26 }
 0xc97   :  { %v11046_v62 = vpop.eup %11045  ;;  %v6364_v59 = vadd.f32 1.0, %v11044_v25  ;;  %11065 = vrcp.f32 %v6362_v9 }
 0xc98   :  { %v11048_v61 = vpop.eup %11047  ;;  %v6365_v4 = vadd.f32 1.0, %v11046_v62  ;;  %11067 = vrcp.f32 %v6363_v7 }
 0xc99   :  { %v11050_v22 = vpop.eup %11049  ;;  %v6366_v36 = vadd.f32 1.0, %v11048_v61  ;;  %11069 = vrcp.f32 %v6364_v59 }
 0xc9a   :  { %v11052_v23 = vpop.eup %11051  ;;  %v6367_v41 = vadd.f32 1.0, %v11050_v22  ;;  %11071 = vrcp.f32 %v6365_v4 }
 0xc9b   :  { %v11054_v17 = vpop.eup %11053  ;;  %v6368_v29 = vadd.f32 1.0, %v11052_v23  ;;  %11073 = vrcp.f32 %v6366_v36 }
 0xc9c   :  { %v11056_v24 = vpop.eup %11055  ;;  %v6369_v27 = vadd.f32 1.0, %v11054_v17  ;;  %11075 = vrcp.f32 %v6367_v41 }
 0xc9d   :  { %v11058_v53 = vpop.eup %11057  ;;  %11077 = vrcp.f32 %v6368_v29 }
 0xc9e   :  { %v11060_v46 = vpop.eup %11059  ;;  %11079 = vrcp.f32 %v6369_v27 }
 0xc9f   :  { %v11062_v10 = vpop.eup %11061  ;;  %11081 = vtanh.f32 %v6399_v40 }
 0xca0   :  { %v11064_v28 = vpop.eup %11063  ;;  %11083 = vtanh.f32 %v6400_v20 }
 0xca1   :  { %v11066_v21 = vpop.eup %11065  ;;  %11085 = vtanh.f32 %v6401_v39 }
 0xca2   :  { %v11068_v55 = vpop.eup %11067  ;;  %v6426_v48 = vrot.slane %v11066_v21, 1  ;;  %v6450_v51 = vmul.f32 %v11066_v21, %v11056_v24  ;;  %v6474_v59 = vrot.slane %v11066_v21, 2 }
 0xca3   :  { %v11070_v15 = vpop.eup %11069  ;;  %v6427_v50 = vrot.slane %v11068_v55, 1  ;;  %v6451_v37 = vmul.f32 %v11068_v55, %v11058_v53  ;;  %v6475_v61 = vrot.slane %v11068_v55, 2 }
 0xca4   :  { %v11072_v35 = vpop.eup %11071  ;;  %v6428_v12 = vrot.slane %v11070_v15, 1  ;;  %v6442_v16 = vmul.f32 %v6426_v48, %v13194_v19  ;;  %v6452_v43 = vmul.f32 %v11070_v15, %v11060_v46  ;;  %v6476_v22 = vrot.slane %v11070_v15, 2 }
 0xca5   :  { %v11074_v30 = vpop.eup %11073  ;;  %v6429_v0 = vrot.slane %v11072_v35, 1  ;;  %v6443_v18 = vmul.f32 %v6427_v50, %v13198_v13  ;;  %v6453_v44 = vmul.f32 %v11072_v35, %v11062_v10  ;;  %v6477_v41 = vrot.slane %v11072_v35, 2 }
 0xca6   :  { %v13298_v49 = vpop.eup %11075  ;;  %v6430_v14 = vrot.slane %v11074_v30, 1  ;;  %v6444_v58 = vmul.f32 %v6428_v12, %v13201_v56  ;;  %v13301_v60 = vadd.f32 %v6450_v51, %v6442_v16  ;;  %v6454_v6 = vmul.f32 %v11074_v30, %v11064_v28 }
 0xca7   :  { %v11078_v31 = vpop.eup %11077  ;;  %v6431_v38 = vrot.slane %v13298_v49, 1  ;;  %v6445_v19 = vmul.f32 %v6429_v0, %v13205_v33  ;;  %v13305_v47 = vadd.f32 %v6451_v37, %v6443_v18  ;;  %v6478_v40 = vrot.slane %v11074_v30, 2 }
 0xca8   :  { %v11080_v1 = vpop.eup %11079  ;;  %v6432_v13 = vrot.slane %v11078_v31, 1  ;;  %v6446_v57 = vmul.f32 %v6430_v14, %v13210_v63  ;;  %v13308_v32 = vadd.f32 %v6452_v43, %v6444_v58  ;;  %11087 = vtanh.f32 %v13301_v60 }
 0xca9   :  { %v11082_v56 = vpop.eup %11081  ;;  %v6433_v34 = vrot.slane %v11080_v1, 1  ;;  %v6447_v42 = vmul.f32 %v6431_v38, %v13215_v11  ;;  %v13312_v2 = vadd.f32 %v6453_v44, %v6445_v19  ;;  %11089 = vtanh.f32 %v13305_v47  ;;  %v7047_v38 = vld [vmem:[#allocation7 + $0x28] sm:$0xff]  ;;  %v7045_v19 = vld [vmem:[#allocation7 + $0x18] sm:$0xff] }
 0xcaa   :  { %v11084_v33 = vpop.eup %11083  ;;  %v6448_v26 = vmul.f32 %v6432_v13, %v13218_v54  ;;  %v6455_v5 = vmul.f32 %v11082_v56, %v13298_v49  ;;  %v13317_v52 = vadd.f32 %v6454_v6, %v6446_v57  ;;  %11091 = vtanh.f32 %v13308_v32  ;;  %v7042_v13 = vld [vmem:[#allocation7] sm:$0xff] }
 0xcab   :  { %v11086_v63 = vpop.eup %11085  ;;  %v6449_v9 = vmul.f32 %v6433_v34, %v13220_v45  ;;  %v6456_v25 = vmul.f32 %v11084_v33, %v11078_v31  ;;  %11093 = vtanh.f32 %v13312_v2  ;;  %v6479_v39 = vrot.slane %v13298_v49, 2  ;;  %v7046_v57 = vld [vmem:[#allocation7 + $0x20] sm:$0xff]  ;;  %v7048_v33 = vld [vmem:[#allocation7 + $0x30] sm:$0xff] }
 0xcac   :  { %v6457_v11 = vmul.f32 %v11086_v63, %v11080_v1  ;;  %v13322_v7 = vadd.f32 %v6455_v5, %v6447_v42  ;;  %11095 = vtanh.f32 %v13317_v52  ;;  %v6480_v28 = vrot.slane %v11078_v31, 2  ;;  %v7043_v31 = vld [vmem:[#allocation7 + $0x8] sm:$0xff]  ;;  %v7044_v42 = vld [vmem:[#allocation7 + $0x10] sm:$0xff] }
 0xcad   :  { %v13325_v62 = vadd.f32 %v6456_v25, %v6448_v26  ;;  %v6481_v48 = vrot.slane %v11080_v1, 2  ;;  %v13365_v6 = vpack.c.bf16 %v7047_v38, %v7043_v31  ;;  %v7049_v1 = vld [vmem:[#allocation7 + $0x38] sm:$0xff]  ;;  %v13369_v34 = vpack.c.bf16 %v7046_v57, %v7042_v13  ;;  %v7051_v26 = vld [vmem:[#allocation7 + $0x48] sm:$0xff]  ;;  %v7078_v31 = vld [vmem:[#allocation7 + $0x120] sm:$0xff] }
 0xcae   :  { %v13327_v54 = vadd.f32 %v6457_v11, %v6449_v9  ;;  %11097 = vtanh.f32 %v13322_v7  ;;  %v13367_v56 = vpack.c.bf16 %v7049_v1, %v7045_v19  ;;  %v13372_v5 = vpack.c.bf16 %v7048_v33, %v7044_v42  ;;  %v7055_v63 = vld [vmem:[#allocation7 + $0x68] sm:$0xff]  ;;  %v7053_v9 = vld [vmem:[#allocation7 + $0x58] sm:$0xff]  ;;  %v7076_v38 = vld [vmem:[#allocation7 + $0x110] sm:$0xff] }
 0xcaf   :  { %11099 = vtanh.f32 %v13325_v62  ;;  %10137 = vmatprep.subr.bf16.mxu0 %v13365_v6  ;;  %v7057_v25 = vld [vmem:[#allocation7 + $0x78] sm:$0xff]  ;;  %v13376_v11 = vpack.c.bf16 %v7055_v63, %v7051_v26  ;;  %v7080_v1 = vld [vmem:[#allocation7 + $0x130] sm:$0xff]  ;;  %v7083_v13 = vld [vmem:[#allocation7 + $0x148] sm:$0xff] }
 0xcb0   :  { %11101 = vtanh.f32 %v13327_v54  ;;  %10169 = vmatprep.subr.bf16.mxu1 %v13367_v56  ;;  %v7087_v57 = vld [vmem:[#allocation7 + $0x168] sm:$0xff]  ;;  %v7085_v42 = vld [vmem:[#allocation7 + $0x158] sm:$0xff]  ;;  %v13420_v63 = vpack.c.bf16 %v7080_v1, %v7076_v38  ;;  %v7100_v38 = vld [vmem:[#allocation7 + $0x1d0] sm:$0xff] }
 0xcb1   :  { %v7089_v33 = vld [vmem:[#allocation7 + $0x178] sm:$0xff]  ;;  %v7104_v1 = vld [vmem:[#allocation7 + $0x1f0] sm:$0xff] }
 0xcb2   :  { %v11088_v45 = vpop.eup %11087 }
 0xcb3   :  { %v11090_v4 = vpop.eup %11089  ;;  %v6490_v36 = vmul.f32 %v11088_v45, %v6474_v59  ;;  %v13378_v59 = vpack.c.bf16 %v7057_v25, %v7053_v9  ;;  %v7050_v45 = vld [vmem:[#allocation7 + $0x40] sm:$0xff]  ;;  %v13422_v9 = vpack.c.bf16 %v7087_v57, %v7083_v13  ;;  %v13456_v57 = vpack.c.bf16 %v7104_v1, %v7100_v38 }
 0xcb4   :  { %v11092_v23 = vpop.eup %11091  ;;  %v6491_v17 = vmul.f32 %v11090_v4, %v6475_v61  ;;  %v7054_v61 = vld [vmem:[#allocation7 + $0x60] sm:$0xff]  ;;  %v7052_v4 = vld [vmem:[#allocation7 + $0x50] sm:$0xff] }
 0xcb5   :  { %v11094_v29 = vpop.eup %11093  ;;  %v6492_v24 = vmul.f32 %v11092_v23, %v6476_v22  ;;  %6498 = vst [vmem:[%s13975_s8 + $0x2] sm:$0x1] %v6490_v36  ;;  %v13381_v22 = vpack.c.bf16 %v7054_v61, %v7050_v45  ;;  %v7059_v23 = vld [vmem:[#allocation7 + $0x88] sm:$0xff]  ;;  %v7082_v25 = vld [vmem:[#allocation7 + $0x140] sm:$0xff]  ;;  %v7084_v61 = vld [vmem:[#allocation7 + $0x150] sm:$0xff] }
 0xcb6   :  { %v11096_v27 = vpop.eup %11095  ;;  %v6493_v20 = vmul.f32 %v11094_v29, %v6477_v41  ;;  %6499 = vst [vmem:[%s13975_s8 + $0xa] sm:$0x1] %v6491_v17  ;;  %v6586_v53 = vcombine.low %v6490_v36, %v6491_v17  ;;  %v7056_v36 = vld [vmem:[#allocation7 + $0x70] sm:$0xff]  ;;  %v7063_v41 = vld [vmem:[#allocation7 + $0xa8] sm:$0xff]  ;;  %v7086_v45 = vld [vmem:[#allocation7 + $0x160] sm:$0xff] }
 0xcb7   :  { %v6494_v46 = vmul.f32 %v11096_v27, %v6478_v40  ;;  %6500 = vst [vmem:[%s13975_s8 + $0x12] sm:$0x1] %v6492_v24  ;;  %v13385_v17 = vpack.c.bf16 %v7056_v36, %v7052_v4  ;;  %v13387_v29 = vpack.c.bf16 %v7063_v41, %v7059_v23  ;;  %v7061_v40 = vld [vmem:[#allocation7 + $0x98] sm:$0xff]  ;;  %v7058_v27 = vld [vmem:[#allocation7 + $0x80] sm:$0xff]  ;;  %v13425_v4 = vpack.c.bf16 %v7089_v33, %v7085_v42  ;;  %v7088_v36 = vld [vmem:[#allocation7 + $0x170] sm:$0xff] }
 0xcb8   :  { %v11098_v10 = vpop.eup %11097  ;;  %6501 = vst [vmem:[%s13975_s8 + $0x1a] sm:$0x1] %v6493_v20  ;;  %v6587_v21 = vcombine.low %v6492_v24, %v6493_v20  ;;  %v6596_v12 = vrot.slane %v6586_v53, %v11833_v8  ;;  %v7065_v24 = vld [vmem:[#allocation7 + $0xb8] sm:$0xff]  ;;  %v7062_v53 = vld [vmem:[#allocation7 + $0xa0] sm:$0xff]  ;;  %v7091_v23 = vld [vmem:[#allocation7 + $0x188] sm:$0xff] }
 0xcb9   :  { %v11100_v55 = vpop.eup %11099  ;;  %v6495_v15 = vmul.f32 %v11098_v10, %v6479_v39  ;;  %6502 = vst [vmem:[%s13975_s8 + $0x22] sm:$0x1] %v6494_v46  ;;  %v13389_v20 = vpack.c.bf16 %v7065_v24, %v7061_v40  ;;  %v7060_v39 = vld [vmem:[#allocation7 + $0x90] sm:$0xff]  ;;  %v13392_v10 = vpack.c.bf16 %v7062_v53, %v7058_v27  ;;  %v7095_v41 = vld [vmem:[#allocation7 + $0x1a8] sm:$0xff]  ;;  %v7093_v40 = vld [vmem:[#allocation7 + $0x198] sm:$0xff]  ;;  %v13428_v27 = vpack.c.bf16 %v7086_v45, %v7082_v25 }
 0xcba   :  { %v11102_v50 = vpop.eup %11101  ;;  %v6496_v35 = vmul.f32 %v11100_v55, %v6480_v28  ;;  %v6603_v16 = vrot.slane %v6587_v21, %v11833_v8  ;;  %v7067_v28 = vld [vmem:[#allocation7 + $0xc8] sm:$0xff]  ;;  %v7069_v55 = vld [vmem:[#allocation7 + $0xd8] sm:$0xff]  ;;  %v13432_v53 = vpack.c.bf16 %v7088_v36, %v7084_v61  ;;  %14092 = vst [vmem:[#allocation16_spill] sm:$0xff] %v13456_v57 }
 0xcbb   :  { %v6497_v51 = vmul.f32 %v11102_v50, %v6481_v48  ;;  %6503 = vst [vmem:[%s13975_s8 + $0x2a] sm:$0x1] %v6495_v15  ;;  %v6588_v30 = vcombine.low %v6494_v46, %v6495_v15  ;;  %v7064_v46 = vld [vmem:[#allocation7 + $0xb0] sm:$0xff]  ;;  %v7071_v21 = vld [vmem:[#allocation7 + $0xe8] sm:$0xff]  ;;  %v7073_v50 = vld [vmem:[#allocation7 + $0xf8] sm:$0xff] }
 0xcbc   :  { %6504 = vst [vmem:[%s13975_s8 + $0x32] sm:$0x1] %v6496_v35  ;;  %v6618_v0 = vcombine.low %v6596_v12, %v6603_v16  ;;  %v13396_v48 = vpack.c.bf16 %v7064_v46, %v7060_v39  ;;  %v13398_v15 = vpack.c.bf16 %v7071_v21, %v7067_v28  ;;  %v7070_v12 = vld [vmem:[#allocation7 + $0xe0] sm:$0xff]  ;;  %v13401_v16 = vpack.c.bf16 %v7073_v50, %v7069_v55  ;;  %v7097_v24 = vld [vmem:[#allocation7 + $0x1b8] sm:$0xff]  ;;  %v7092_v21 = vld [vmem:[#allocation7 + $0x190] sm:$0xff] }
 0xcbd   :  { %6505 = vst [vmem:[%s13975_s8 + $0x3a] sm:$0x1] %v6497_v51  ;;  %v6589_v18 = vcombine.low %v6496_v35, %v6497_v51  ;;  %v6610_v37 = vrot.slane %v6588_v30, %v11833_v8  ;;  %v7066_v35 = vld [vmem:[#allocation7 + $0xc0] sm:$0xff]  ;;  %v7068_v51 = vld [vmem:[#allocation7 + $0xd0] sm:$0xff]  ;;  %v13434_v39 = vpack.c.bf16 %v7095_v41, %v7091_v23  ;;  %v13437_v55 = vpack.c.bf16 %v7097_v24, %v7093_v40 }
 0xcbe   :  { %v6626_v14 = vrot.slane %v6618_v0, %v11833_v8  ;;  %v7072_v30 = vld [vmem:[#allocation7 + $0xf0] sm:$0xff]  ;;  %v7075_v0 = vld [vmem:[#allocation7 + $0x108] sm:$0xff]  ;;  %v7090_v46 = vld [vmem:[#allocation7 + $0x180] sm:$0xff] }
 0xcbf   :  { %v6617_v43 = vrot.slane %v6589_v18, %v11833_v8  ;;  %v7079_v18 = vld [vmem:[#allocation7 + $0x128] sm:$0xff]  ;;  %v7094_v28 = vld [vmem:[#allocation7 + $0x1a0] sm:$0xff]  ;;  %14086 = vst [vmem:[#allocation10_spill] sm:$0xff] %v13437_v55  ;;  %v7096_v50 = vld [vmem:[#allocation7 + $0x1b0] sm:$0xff] }
 0xcc0   :  { %v6508_v38 = vld [vmem:[#allocation2 + $0x43] ss:$8 sm:$0xf] }
 0xcc1   :  { %v6619_v49 = vcombine.low %v6610_v37, %v6617_v43  ;;  %v7077_v37 = vld [vmem:[#allocation7 + $0x118] sm:$0xff] }
 0xcc2   :  { %v7081_v43 = vld [vmem:[#allocation7 + $0x138] sm:$0xff] }
 0xcc3   :  { %v6633_v58 = vrot.slane %v6619_v49, %v11833_v8  ;;  %v13404_v49 = vpack.c.bf16 %v7070_v12, %v7066_v35  ;;  %v13413_v19 = vpack.c.bf16 %v7081_v43, %v7077_v37  ;;  %v7099_v35 = vld [vmem:[#allocation7 + $0x1c8] sm:$0xff]  ;;  %v7098_v43 = vld [vmem:[#allocation7 + $0x1c0] sm:$0xff] }
 0xcc4   :  { %v7103_v12 = vld [vmem:[#allocation7 + $0x1e8] sm:$0xff] }
 0xcc5   :  { %v6634_v44 = vcombine.low %v6626_v14, %v6633_v58  ;;  %v13408_v14 = vpack.c.bf16 %v7072_v30, %v7068_v51  ;;  %v13410_v58 = vpack.c.bf16 %v7079_v18, %v7075_v0  ;;  %v7101_v51 = vld [vmem:[#allocation7 + $0x1d8] sm:$0xff]  ;;  %v13440_v0 = vpack.c.bf16 %v7094_v28, %v7090_v46 }
 0xcc6   :  { %v7105_v30 = vld [vmem:[#allocation7 + $0x1f8] sm:$0xff]  ;;  %v13444_v18 = vpack.c.bf16 %v7096_v50, %v7092_v21  ;;  %v13446_v37 = vpack.c.bf16 %v7103_v12, %v7099_v35 }
 0xcc7   :  { %6701 = vmatmul.mubr.f32.vlgmr.msra.gmra.mrb[54].mxu0 %v6634_v44  ;;  %6772 = vmatmul.mubr.f32.vlgmr.msra.gmra.mrb[54].mxu1 %v6634_v44  ;;  %v7074_v44 = vld [vmem:[#allocation7 + $0x100] sm:$0xff]  ;;  %14087 = vst [vmem:[#allocation11_spill] sm:$0xff] %v13440_v0 }
 0xcc8   :  { %7228 = vmatprep.mubr.f32.mxu0 %v14032_v3  ;;  %7299 = vmatprep.mubr.f32.mxu1 %v14032_v3  ;;  %v13416_v26 = vpack.c.bf16 %v7078_v31, %v7074_v44  ;;  %14088 = vst [vmem:[#allocation12_spill] sm:$0xff] %v13444_v18  ;;  %14089 = vst [vmem:[#allocation13_spill] sm:$0xff] %v13446_v37  ;;  %v7102_v44 = vld [vmem:[#allocation7 + $0x1e0] sm:$0xff]  ;;  %v13449_v31 = vpack.c.bf16 %v7105_v30, %v7101_v51 }
 0xcc9   :  { %10139 = vmatpush1.bf16.msra.mxu0 %v13369_v34  ;;  %10171 = vmatpush1.bf16.msra.mxu1 %v13372_v5  ;;  %v13452_v13 = vpack.c.bf16 %v7102_v44, %v7098_v43  ;;  %v6506_v43 = vld [vmem:[#allocation2 + $0x3] ss:$8 sm:$0xf] }
 0xcca   :  { %10141 = vmatprep.subr.bf16.mxu0 %v13376_v11  ;;  %10173 = vmatprep.subr.bf16.mxu1 %v13378_v59  ;;  %14090 = vst [vmem:[#allocation14_spill] sm:$0xff] %v13449_v31  ;;  %v6507_v44 = vld [vmem:[#allocation2 + $0x23] ss:$8 sm:$0xf] }
 0xccb   :  { %14091 = vst [vmem:[#allocation15_spill] sm:$0xff] %v13452_v13  ;;  %v6510_v1 = vld [vmem:[#allocation2 + $0x83] ss:$8 sm:$0xf] }
 0xccd   :  { %10143 = vmatpush1.bf16.msra.mxu0 %v13381_v22  ;;  %10175 = vmatpush1.bf16.msra.mxu1 %v13385_v17 }
 0xcce   :  { %10145 = vmatprep.subr.bf16.mxu0 %v13387_v29  ;;  %10177 = vmatprep.subr.bf16.mxu1 %v13389_v20 }
 0xcd1   :  { %10147 = vmatpush1.bf16.msra.mxu0 %v13392_v10  ;;  %10179 = vmatpush1.bf16.msra.mxu1 %v13396_v48 }
 0xcd2   :  { %10149 = vmatprep.subr.bf16.mxu0 %v13398_v15  ;;  %10181 = vmatprep.subr.bf16.mxu1 %v13401_v16 }
 0xcd5   :  { %10151 = vmatpush1.bf16.msra.mxu0 %v13404_v49  ;;  %10183 = vmatpush1.bf16.msra.mxu1 %v13408_v14 }
 0xcd6   :  { %10153 = vmatprep.subr.bf16.mxu0 %v13410_v58  ;;  %10185 = vmatprep.subr.bf16.mxu1 %v13413_v19 }
 0xcd9   :  { %10155 = vmatpush1.bf16.msra.mxu0 %v13416_v26  ;;  %10187 = vmatpush1.bf16.msra.mxu1 %v13420_v63 }
 0xcda   :  { %10157 = vmatprep.subr.bf16.mxu0 %v13422_v9  ;;  %10189 = vmatprep.subr.bf16.mxu1 %v13425_v4 }
 0xcdd   :  { %10159 = vmatpush1.bf16.msra.mxu0 %v13428_v27  ;;  %10191 = vmatpush1.bf16.msra.mxu1 %v13432_v53 }
 0xcde   :  { %10161 = vmatprep.subr.bf16.mxu0 %v13434_v39  ;;  %10193 = vmatprep.subr.bf16.mxu1 %v13437_v55 }
 0xce1   :  { %10163 = vmatpush1.bf16.msra.mxu0 %v13440_v0  ;;  %10195 = vmatpush1.bf16.msra.mxu1 %v13444_v18 }
 0xce2   :  { %10165 = vmatprep.subr.bf16.mxu0 %v13446_v37  ;;  %10197 = vmatprep.subr.bf16.mxu1 %v13449_v31 }
 0xce5   :  { %10167 = vmatpush1.bf16.msra.mxu0 %v13452_v13  ;;  %10199 = vmatpush1.bf16.msra.mxu1 %v13456_v57 }
 0xce6   :  { %10201 = vmatprep.subr.bf16.mxu0 %v13365_v6  ;;  %10233 = vmatprep.subr.bf16.mxu1 %v13367_v56 }
 0xd9a   :  { %v6702_v42 = vpop.f32.mrb[54].mxu0  ;;  %v6773_v33 = vpop.f32.mrb[54].mxu1 }
 0xd9b   :  { %v6704_v25 = vpop.f32.mrb[55].mxu0  ;;  %v6775_v45 = vpop.f32.mrb[55].mxu1 }
 0xd9c   :  { %v6782_v61 = vcombine.low %v6702_v42, %v6704_v25  ;;  %v6783_v36 = vcombine.high %v6702_v42, %v6704_v25  ;;  %v6784_v23 = vcombine.low %v6773_v33, %v6775_v45  ;;  %v6785_v41 = vcombine.high %v6773_v33, %v6775_v45 }
 0xd9e   :  { %v6792_v40 = vrot.slane %v6782_v61, %v11833_v8  ;;  %v6799_v24 = vrot.slane %v6783_v36, %v11833_v8  ;;  %v6806_v46 = vrot.slane %v6784_v23, %v11833_v8  ;;  %v6813_v28 = vrot.slane %v6785_v41, %v11833_v8  ;;  %v6509_v61 = vld [vmem:[#allocation2 + $0x63] ss:$8 sm:$0xf] }
 0xd9f   :  { %v6511_v36 = vld [vmem:[#allocation2 + $0xa3] ss:$8 sm:$0xf] }
 0xda0   :  { %v6814_v21 = vcombine.low %v6792_v40, %v6806_v46  ;;  %v6815_v6 = vcombine.high %v6792_v40, %v6806_v46  ;;  %v6816_v50 = vcombine.low %v6799_v24, %v6813_v28  ;;  %v6817_v56 = vcombine.high %v6799_v24, %v6813_v28  ;;  %v6512_v24 = vld [vmem:[#allocation2 + $0xc3] ss:$8 sm:$0xf] }
 0xda1   :  { %v6513_v46 = vld [vmem:[#allocation2 + $0xe3] ss:$8 sm:$0xf] }
 0xda2   :  { %v6824_v35 = vrot.slane %v6814_v21, %v11833_v8  ;;  %v6831_v12 = vrot.slane %v6816_v50, %v11833_v8  ;;  %v6838_v51 = vrot.slane %v6815_v6, %v11833_v8  ;;  %v6845_v30 = vrot.slane %v6817_v56, %v11833_v8 }
 0xda4   :  { %v6846_v42 = vcombine.high %v6824_v35, %v6824_v35  ;;  %v6847_v33 = vcombine.high %v6831_v12, %v6831_v12  ;;  %v6848_v25 = vcombine.high %v6838_v51, %v6838_v51  ;;  %v6849_v45 = vcombine.high %v6845_v30, %v6845_v30 }
 0xda5   :  { %v6858_v23 = vadd.f32 %v6824_v35, %v6506_v43  ;;  %v6859_v41 = vadd.f32 %v6838_v51, %v6507_v44  ;;  %v6862_v40 = vadd.f32 %v6831_v12, %v6510_v1  ;;  %v6863_v6 = vadd.f32 %v6845_v30, %v6511_v36 }
 0xda6   :  { %v6860_v28 = vadd.f32 %v6846_v42, %v6508_v38  ;;  %v6861_v21 = vadd.f32 %v6848_v25, %v6509_v61  ;;  %v6864_v50 = vadd.f32 %v6847_v33, %v6512_v24  ;;  %v6865_v13 = vadd.f32 %v6849_v45, %v6513_v46 }
 0xda7   :  { %v9264_v56 = vmul.f32 -1.442695, %v6858_v23  ;;  %v9265_v57 = vmul.f32 -1.442695, %v6859_v41  ;;  %v9268_v18 = vmul.f32 -1.442695, %v6862_v40 }
 0xda8   :  { %v9266_v31 = vmul.f32 -1.442695, %v6860_v28  ;;  %v9267_v37 = vmul.f32 -1.442695, %v6861_v21  ;;  %v9269_v0 = vmul.f32 -1.442695, %v6863_v6 }
 0xda9   :  { %11103 = vpow2.f32 %v9264_v56  ;;  %v9270_v55 = vmul.f32 -1.442695, %v6864_v50  ;;  %v9271_v35 = vmul.f32 -1.442695, %v6865_v13  ;;  %v6922_v12 = vrot.slane %v6858_v23, 3 }
 0xdaa   :  { %11105 = vpow2.f32 %v9265_v57  ;;  %v6923_v51 = vrot.slane %v6859_v41, 3  ;;  %v6924_v30 = vrot.slane %v6860_v28, 3  ;;  %v6925_v43 = vrot.slane %v6861_v21, 3 }
 0xdab   :  { %11107 = vpow2.f32 %v9266_v31  ;;  %v6926_v44 = vrot.slane %v6862_v40, 3  ;;  %v6927_v41 = vrot.slane %v6863_v6, 3  ;;  %v6928_v46 = vrot.slane %v6864_v50, 3 }
 0xdac   :  { %11109 = vpow2.f32 %v9267_v37  ;;  %v6929_v21 = vrot.slane %v6865_v13, 3 }
 0xdad   :  { %11111 = vpow2.f32 %v9268_v18 }
 0xdae   :  { %11113 = vpow2.f32 %v9269_v0 }
 0xdaf   :  { %11115 = vpow2.f32 %v9270_v55 }
 0xdb0   :  { %11117 = vpow2.f32 %v9271_v35 }
 0xdb1   :  { %11119 = vtanh.f32 %v6922_v12 }
 0xdb2   :  { %11121 = vtanh.f32 %v6923_v51 }
 0xdb3   :  { %v11104_v38 = vpop.eup %11103  ;;  %11123 = vtanh.f32 %v6924_v30 }
 0xdb4   :  { %v11106_v1 = vpop.eup %11105  ;;  %v6890_v57 = vadd.f32 1.0, %v11104_v38  ;;  %11125 = vtanh.f32 %v6925_v43 }
 0xdb5   :  { %v11108_v31 = vpop.eup %11107  ;;  %v6891_v42 = vadd.f32 1.0, %v11106_v1  ;;  %11127 = vtanh.f32 %v6926_v44 }
 0xdb6   :  { %v11110_v37 = vpop.eup %11109  ;;  %v6892_v18 = vadd.f32 1.0, %v11108_v31  ;;  %11129 = vrcp.f32 %v6890_v57 }
 0xdb7   :  { %v11112_v0 = vpop.eup %11111  ;;  %v6893_v33 = vadd.f32 1.0, %v11110_v37  ;;  %11131 = vrcp.f32 %v6891_v42 }
 0xdb8   :  { %v11114_v55 = vpop.eup %11113  ;;  %v6894_v25 = vadd.f32 1.0, %v11112_v0  ;;  %11133 = vrcp.f32 %v6892_v18 }
 0xdb9   :  { %v11116_v45 = vpop.eup %11115  ;;  %v6895_v61 = vadd.f32 1.0, %v11114_v55  ;;  %11135 = vrcp.f32 %v6893_v33 }
 0xdba   :  { %v11118_v36 = vpop.eup %11117  ;;  %v6896_v23 = vadd.f32 1.0, %v11116_v45  ;;  %11137 = vrcp.f32 %v6894_v25 }
 0xdbb   :  { %v11120_v40 = vpop.eup %11119  ;;  %v6897_v24 = vadd.f32 1.0, %v11118_v36  ;;  %11139 = vrcp.f32 %v6895_v61 }
 0xdbc   :  { %v11122_v28 = vpop.eup %11121  ;;  %11141 = vrcp.f32 %v6896_v23 }
 0xdbd   :  { %v11124_v56 = vpop.eup %11123  ;;  %11143 = vrcp.f32 %v6897_v24 }
 0xdbe   :  { %v11126_v35 = vpop.eup %11125  ;;  %11145 = vtanh.f32 %v6927_v41 }
 0xdbf   :  { %v11128_v12 = vpop.eup %11127  ;;  %11147 = vtanh.f32 %v6928_v46 }
 0xdc0   :  { %v11130_v51 = vpop.eup %11129  ;;  %11149 = vtanh.f32 %v6929_v21 }
 0xdc1   :  { %v11132_v30 = vpop.eup %11131  ;;  %v6954_v43 = vrot.slane %v11130_v51, 1  ;;  %v6978_v50 = vmul.f32 %v11130_v51, %v11120_v40 }
 0xdc2   :  { %v11134_v44 = vpop.eup %11133  ;;  %v6955_v38 = vrot.slane %v11132_v30, 1  ;;  %v6979_v37 = vmul.f32 %v11132_v30, %v11122_v28 }
 0xdc3   :  { %v11136_v6 = vpop.eup %11135  ;;  %v6956_v1 = vrot.slane %v11134_v44, 1  ;;  %v6970_v57 = vmul.f32 %v6954_v43, %v13301_v60  ;;  %v6980_v18 = vmul.f32 %v11134_v44, %v11124_v56 }
 0xdc4   :  { %v11138_v31 = vpop.eup %11137  ;;  %v6957_v42 = vrot.slane %v11136_v6, 1  ;;  %v6971_v13 = vmul.f32 %v6955_v38, %v13305_v47  ;;  %v6981_v25 = vmul.f32 %v11136_v6, %v11126_v35 }
 0xdc5   :  { %v13473_v0 = vpop.eup %11139  ;;  %v6958_v33 = vrot.slane %v11138_v31, 1  ;;  %v6972_v55 = vmul.f32 %v6956_v1, %v13308_v32  ;;  %v13476_v45 = vadd.f32 %v6978_v50, %v6970_v57  ;;  %v6982_v23 = vmul.f32 %v11138_v31, %v11128_v12 }
 0xdc6   :  { %v11142_v61 = vpop.eup %11141  ;;  %v6959_v36 = vrot.slane %v13473_v0, 1  ;;  %v6973_v60 = vmul.f32 %v6957_v42, %v13312_v2  ;;  %v13480_v41 = vadd.f32 %v6979_v37, %v6971_v13  ;;  %v7002_v42 = vrot.slane %v11130_v51, 2 }
 0xdc7   :  { %v11144_v40 = vpop.eup %11143  ;;  %v6960_v47 = vrot.slane %v11142_v61, 1  ;;  %v6974_v24 = vmul.f32 %v6958_v33, %v13317_v52  ;;  %v13483_v46 = vadd.f32 %v6980_v18, %v6972_v55  ;;  %11151 = vtanh.f32 %v13476_v45 }
 0xdc8   :  { %v11146_v32 = vpop.eup %11145  ;;  %v6961_v28 = vrot.slane %v11144_v40, 1  ;;  %v6975_v21 = vmul.f32 %v6959_v36, %v13322_v7  ;;  %v13487_v56 = vadd.f32 %v6981_v25, %v6973_v60  ;;  %11153 = vtanh.f32 %v13480_v41 }
 0xdc9   :  { %v11148_v2 = vpop.eup %11147  ;;  %v6976_v35 = vmul.f32 %v6960_v47, %v13325_v62  ;;  %v6983_v12 = vmul.f32 %v11146_v32, %v13473_v0  ;;  %v13492_v43 = vadd.f32 %v6982_v23, %v6974_v24  ;;  %11155 = vtanh.f32 %v13483_v46 }
 0xdca   :  { %v11150_v52 = vpop.eup %11149  ;;  %v6977_v38 = vmul.f32 %v6961_v28, %v13327_v54  ;;  %v6984_v1 = vmul.f32 %v11148_v2, %v11142_v61  ;;  %11157 = vtanh.f32 %v13487_v56  ;;  %v7003_v13 = vrot.slane %v11132_v30, 2 }
 0xdcb   :  { %v6985_v7 = vmul.f32 %v11150_v52, %v11144_v40  ;;  %v13497_v57 = vadd.f32 %v6983_v12, %v6975_v21  ;;  %11159 = vtanh.f32 %v13492_v43  ;;  %v7004_v18 = vrot.slane %v11134_v44, 2 }
 0xdcc   :  { %v13500_v50 = vadd.f32 %v6984_v1, %v6976_v35  ;;  %v7005_v25 = vrot.slane %v11136_v6, 2  ;;  %v7006_v23 = vrot.slane %v11138_v31, 2  ;;  %v7007_v30 = vrot.slane %v13473_v0, 2 }
 0xdcd   :  { %v13502_v62 = vadd.f32 %v6985_v7, %v6977_v38  ;;  %11161 = vtanh.f32 %v13497_v57  ;;  %v7008_v31 = vrot.slane %v11142_v61, 2  ;;  %v7009_v2 = vrot.slane %v11144_v40, 2 }
 0xdce   :  { %11163 = vtanh.f32 %v13500_v50 }
 0xdcf   :  { %11165 = vtanh.f32 %v13502_v62 }
 0xdd1   :  { %v11152_v54 = vpop.eup %11151 }
 0xdd2   :  { %v11154_v37 = vpop.eup %11153  ;;  %v7018_v33 = vmul.f32 %v11152_v54, %v7002_v42 }
 0xdd3   :  { %v11156_v55 = vpop.eup %11155  ;;  %v7019_v36 = vmul.f32 %v11154_v37, %v7003_v13 }
 0xdd4   :  { %v11158_v60 = vpop.eup %11157  ;;  %v7020_v47 = vmul.f32 %v11156_v55, %v7004_v18  ;;  %7026 = vst [vmem:[%s13975_s8 + $0x3] sm:$0x1] %v7018_v33 }
 0xdd5   :  { %v11160_v24 = vpop.eup %11159  ;;  %v7021_v32 = vmul.f32 %v11158_v60, %v7005_v25  ;;  %7027 = vst [vmem:[%s13975_s8 + $0xb] sm:$0x1] %v7019_v36  ;;  %v7114_v51 = vcombine.low %v7018_v33, %v7019_v36 }
 0xdd6   :  { %v7022_v44 = vmul.f32 %v11160_v24, %v7006_v23  ;;  %7028 = vst [vmem:[%s13975_s8 + $0x13] sm:$0x1] %v7020_v47  ;;  %v7034_v23 = vld [vmem:[#allocation2 + $0x4] ss:$8 sm:$0xf] }
 0xdd7   :  { %v11162_v6 = vpop.eup %11161  ;;  %7029 = vst [vmem:[%s13975_s8 + $0x1b] sm:$0x1] %v7021_v32  ;;  %v7115_v28 = vcombine.low %v7020_v47, %v7021_v32  ;;  %v7124_v52 = vrot.slane %v7114_v51, %v11833_v8  ;;  %v7035_v47 = vld [vmem:[#allocation2 + $0x24] ss:$8 sm:$0xf] }
 0xdd8   :  { %v11164_v21 = vpop.eup %11163  ;;  %v7023_v35 = vmul.f32 %v11162_v6, %v7007_v30  ;;  %7030 = vst [vmem:[%s13975_s8 + $0x23] sm:$0x1] %v7022_v44  ;;  %v7036_v24 = vld [vmem:[#allocation2 + $0x44] ss:$8 sm:$0xf] }
 0xdd9   :  { %v11166_v0 = vpop.eup %11165  ;;  %v7024_v12 = vmul.f32 %v11164_v21, %v7008_v31  ;;  %v7131_v38 = vrot.slane %v7115_v28, %v11833_v8  ;;  %v7038_v32 = vld [vmem:[#allocation2 + $0x84] ss:$8 sm:$0xf] }
 0xdda   :  { %v7025_v1 = vmul.f32 %v11166_v0, %v7009_v2  ;;  %7031 = vst [vmem:[%s13975_s8 + $0x2b] sm:$0x1] %v7023_v35  ;;  %v7116_v61 = vcombine.low %v7022_v44, %v7023_v35  ;;  %v7037_v31 = vld [vmem:[#allocation2 + $0x64] ss:$8 sm:$0xf] }
 0xddb   :  { %7032 = vst [vmem:[%s13975_s8 + $0x33] sm:$0x1] %v7024_v12  ;;  %v7146_v40 = vcombine.low %v7124_v52, %v7131_v38  ;;  %v7039_v28 = vld [vmem:[#allocation2 + $0xa4] ss:$8 sm:$0xf] }
 0xddc   :  { %7033 = vst [vmem:[%s13975_s8 + $0x3b] sm:$0x1] %v7025_v1  ;;  %v7117_v7 = vcombine.low %v7024_v12, %v7025_v1  ;;  %v7138_v42 = vrot.slane %v7116_v61, %v11833_v8  ;;  %v7040_v0 = vld [vmem:[#allocation2 + $0xc4] ss:$8 sm:$0xf] }
 0xddd   :  { %v7154_v37 = vrot.slane %v7146_v40, %v11833_v8  ;;  %v7041_v12 = vld [vmem:[#allocation2 + $0xe4] ss:$8 sm:$0xf] }
 0xdde   :  { %v7145_v54 = vrot.slane %v7117_v7, %v11833_v8 }
 0xde0   :  { %v7147_v13 = vcombine.low %v7138_v42, %v7145_v54 }
 0xde2   :  { %v7161_v18 = vrot.slane %v7147_v13, %v11833_v8 }
 0xde4   :  { %v7162_v33 = vcombine.low %v7154_v37, %v7161_v18 }
 0xde6   :  { %7229 = vmatmul.mubr.f32.vlgmr.msra.gmra.mrb[56].mxu0 %v7162_v33  ;;  %7300 = vmatmul.mubr.f32.vlgmr.msra.gmra.mrb[56].mxu1 %v7162_v33 }
 0xde7   :  { %10203 = vmatpush1.bf16.msra.mxu0 %v13369_v34  ;;  %10235 = vmatpush1.bf16.msra.mxu1 %v13372_v5  ;;  %v14093_v34 = vld [vmem:[#allocation10_spill] sm:$0xff]  ;;  %v14094_v5 = vld [vmem:[#allocation11_spill] sm:$0xff] }
 0xde8   :  { %10205 = vmatprep.subr.bf16.mxu0 %v13376_v11  ;;  %10237 = vmatprep.subr.bf16.mxu1 %v13378_v59  ;;  %v14095_v11 = vld [vmem:[#allocation12_spill] sm:$0xff]  ;;  %v14096_v59 = vld [vmem:[#allocation13_spill] sm:$0xff] }
 0xde9   :  { %7756 = vmatprep.mubr.f32.mxu0 %v14032_v3  ;;  %7827 = vmatprep.mubr.f32.mxu1 %v14032_v3 }
 0xdeb   :  { %10207 = vmatpush1.bf16.msra.mxu0 %v13381_v22  ;;  %10239 = vmatpush1.bf16.msra.mxu1 %v13385_v17  ;;  %v14097_v22 = vld [vmem:[#allocation14_spill] sm:$0xff]  ;;  %v14098_v17 = vld [vmem:[#allocation15_spill] sm:$0xff] }
 0xdec   :  { %10209 = vmatprep.subr.bf16.mxu0 %v13387_v29  ;;  %10241 = vmatprep.subr.bf16.mxu1 %v13389_v20  ;;  %v14099_v29 = vld [vmem:[#allocation16_spill] sm:$0xff] }
 0xdef   :  { %10211 = vmatpush1.bf16.msra.mxu0 %v13392_v10  ;;  %10243 = vmatpush1.bf16.msra.mxu1 %v13396_v48 }
 0xdf0   :  { %10213 = vmatprep.subr.bf16.mxu0 %v13398_v15  ;;  %10245 = vmatprep.subr.bf16.mxu1 %v13401_v16 }
 0xdf3   :  { %10215 = vmatpush1.bf16.msra.mxu0 %v13404_v49  ;;  %10247 = vmatpush1.bf16.msra.mxu1 %v13408_v14 }
 0xdf4   :  { %10217 = vmatprep.subr.bf16.mxu0 %v13410_v58  ;;  %10249 = vmatprep.subr.bf16.mxu1 %v13413_v19 }
 0xdf7   :  { %10219 = vmatpush1.bf16.msra.mxu0 %v13416_v26  ;;  %10251 = vmatpush1.bf16.msra.mxu1 %v13420_v63 }
 0xdf8   :  { %10221 = vmatprep.subr.bf16.mxu0 %v13422_v9  ;;  %10253 = vmatprep.subr.bf16.mxu1 %v13425_v4 }
 0xdfb   :  { %10223 = vmatpush1.bf16.msra.mxu0 %v13428_v27  ;;  %10255 = vmatpush1.bf16.msra.mxu1 %v13432_v53 }
 0xdfc   :  { %10225 = vmatprep.subr.bf16.mxu0 %v13434_v39  ;;  %10257 = vmatprep.subr.bf16.mxu1 %v14093_v34 }
 0xdff   :  { %10227 = vmatpush1.bf16.msra.mxu0 %v14094_v5  ;;  %10259 = vmatpush1.bf16.msra.mxu1 %v14095_v11 }
 0xe00   :  { %10229 = vmatprep.subr.bf16.mxu0 %v14096_v59  ;;  %10261 = vmatprep.subr.bf16.mxu1 %v14097_v22 }
 0xe03   :  { %10231 = vmatpush1.bf16.msra.mxu0 %v14098_v17  ;;  %10263 = vmatpush1.bf16.msra.mxu1 %v14099_v29 }
 0xeb9   :  { %v7230_v20 = vpop.f32.mrb[56].mxu0  ;;  %v7301_v10 = vpop.f32.mrb[56].mxu1 }
 0xeba   :  { %v7232_v48 = vpop.f32.mrb[57].mxu0  ;;  %v7303_v15 = vpop.f32.mrb[57].mxu1 }
 0xebb   :  { %v7310_v16 = vcombine.low %v7230_v20, %v7232_v48  ;;  %v7311_v49 = vcombine.high %v7230_v20, %v7232_v48  ;;  %v7312_v14 = vcombine.low %v7301_v10, %v7303_v15  ;;  %v7313_v58 = vcombine.high %v7301_v10, %v7303_v15 }
 0xebd   :  { %v7320_v19 = vrot.slane %v7310_v16, %v11833_v8  ;;  %v7327_v26 = vrot.slane %v7311_v49, %v11833_v8  ;;  %v7334_v63 = vrot.slane %v7312_v14, %v11833_v8  ;;  %v7341_v9 = vrot.slane %v7313_v58, %v11833_v8 }
 0xebf   :  { %v7342_v4 = vcombine.low %v7320_v19, %v7334_v63  ;;  %v7343_v27 = vcombine.high %v7320_v19, %v7334_v63  ;;  %v7344_v53 = vcombine.low %v7327_v26, %v7341_v9  ;;  %v7345_v39 = vcombine.high %v7327_v26, %v7341_v9 }
 0xec1   :  { %v7352_v55 = vrot.slane %v7342_v4, %v11833_v8  ;;  %v7359_v25 = vrot.slane %v7344_v53, %v11833_v8  ;;  %v7366_v36 = vrot.slane %v7343_v27, %v11833_v8  ;;  %v7373_v60 = vrot.slane %v7345_v39, %v11833_v8 }
 0xec3   :  { %v7374_v51 = vcombine.high %v7352_v55, %v7352_v55  ;;  %v7375_v30 = vcombine.high %v7359_v25, %v7359_v25  ;;  %v7376_v44 = vcombine.high %v7366_v36, %v7366_v36  ;;  %v7377_v6 = vcombine.high %v7373_v60, %v7373_v60 }
 0xec4   :  { %v7386_v21 = vadd.f32 %v7352_v55, %v7034_v23  ;;  %v7387_v2 = vadd.f32 %v7366_v36, %v7035_v47  ;;  %v7390_v35 = vadd.f32 %v7359_v25, %v7038_v32  ;;  %v7391_v1 = vadd.f32 %v7373_v60, %v7039_v28 }
 0xec5   :  { %v7388_v52 = vadd.f32 %v7374_v51, %v7036_v24  ;;  %v7389_v38 = vadd.f32 %v7376_v44, %v7037_v31  ;;  %v7392_v61 = vadd.f32 %v7375_v30, %v7040_v0  ;;  %v7393_v42 = vadd.f32 %v7377_v6, %v7041_v12 }
 0xec6   :  { %v9272_v40 = vmul.f32 -1.442695, %v7386_v21  ;;  %v9273_v7 = vmul.f32 -1.442695, %v7387_v2  ;;  %v9276_v37 = vmul.f32 -1.442695, %v7390_v35 }
 0xec7   :  { %v9274_v54 = vmul.f32 -1.442695, %v7388_v52  ;;  %v9275_v13 = vmul.f32 -1.442695, %v7389_v38  ;;  %v9277_v18 = vmul.f32 -1.442695, %v7391_v1 }
 0xec8   :  { %11167 = vpow2.f32 %v9272_v40  ;;  %v9278_v33 = vmul.f32 -1.442695, %v7392_v61  ;;  %v9279_v34 = vmul.f32 -1.442695, %v7393_v42  ;;  %v7450_v5 = vrot.slane %v7386_v21, 3 }
 0xec9   :  { %11169 = vpow2.f32 %v9273_v7  ;;  %v7451_v11 = vrot.slane %v7387_v2, 3  ;;  %v7452_v59 = vrot.slane %v7388_v52, 3  ;;  %v7453_v22 = vrot.slane %v7389_v38, 3 }
 0xeca   :  { %11171 = vpow2.f32 %v9274_v54  ;;  %v7454_v17 = vrot.slane %v7390_v35, 3  ;;  %v7455_v53 = vrot.slane %v7391_v1, 3  ;;  %v7456_v25 = vrot.slane %v7392_v61, 3 }
 0xecb   :  { %11173 = vpow2.f32 %v9275_v13  ;;  %v7457_v60 = vrot.slane %v7393_v42, 3 }
 0xecc   :  { %11175 = vpow2.f32 %v9276_v37 }
 0xecd   :  { %11177 = vpow2.f32 %v9277_v18 }
 0xece   :  { %11179 = vpow2.f32 %v9278_v33 }
 0xecf   :  { %11181 = vpow2.f32 %v9279_v34 }
 0xed0   :  { %11183 = vtanh.f32 %v7450_v5 }
 0xed1   :  { %11185 = vtanh.f32 %v7451_v11 }
 0xed2   :  { %v11168_v29 = vpop.eup %11167  ;;  %11187 = vtanh.f32 %v7452_v59 }
 0xed3   :  { %v11170_v20 = vpop.eup %11169  ;;  %v7418_v10 = vadd.f32 1.0, %v11168_v29  ;;  %11189 = vtanh.f32 %v7453_v22 }
 0xed4   :  { %v11172_v48 = vpop.eup %11171  ;;  %v7419_v15 = vadd.f32 1.0, %v11170_v20  ;;  %11191 = vtanh.f32 %v7454_v17 }
 0xed5   :  { %v11174_v16 = vpop.eup %11173  ;;  %v7420_v49 = vadd.f32 1.0, %v11172_v48  ;;  %11193 = vrcp.f32 %v7418_v10 }
 0xed6   :  { %v11176_v14 = vpop.eup %11175  ;;  %v7421_v58 = vadd.f32 1.0, %v11174_v16  ;;  %11195 = vrcp.f32 %v7419_v15 }
 0xed7   :  { %v11178_v19 = vpop.eup %11177  ;;  %v7422_v26 = vadd.f32 1.0, %v11176_v14  ;;  %11197 = vrcp.f32 %v7420_v49 }
 0xed8   :  { %v11180_v63 = vpop.eup %11179  ;;  %v7423_v9 = vadd.f32 1.0, %v11178_v19  ;;  %11199 = vrcp.f32 %v7421_v58 }
 0xed9   :  { %v11182_v4 = vpop.eup %11181  ;;  %v7424_v27 = vadd.f32 1.0, %v11180_v63  ;;  %11201 = vrcp.f32 %v7422_v26 }
 0xeda   :  { %v11184_v39 = vpop.eup %11183  ;;  %v7425_v55 = vadd.f32 1.0, %v11182_v4  ;;  %11203 = vrcp.f32 %v7423_v9 }
 0xedb   :  { %v11186_v36 = vpop.eup %11185  ;;  %11205 = vrcp.f32 %v7424_v27 }
 0xedc   :  { %v11188_v23 = vpop.eup %11187  ;;  %11207 = vrcp.f32 %v7425_v55 }
 0xedd   :  { %v11190_v47 = vpop.eup %11189  ;;  %11209 = vtanh.f32 %v7455_v53 }
 0xede   :  { %v11192_v24 = vpop.eup %11191  ;;  %11211 = vtanh.f32 %v7456_v25 }
 0xedf   :  { %v11194_v32 = vpop.eup %11193  ;;  %11213 = vtanh.f32 %v7457_v60 }
 0xee0   :  { %v11196_v51 = vpop.eup %11195  ;;  %v7482_v30 = vrot.slane %v11194_v32, 1  ;;  %v7506_v2 = vmul.f32 %v11194_v32, %v11184_v39  ;;  %v7530_v49 = vrot.slane %v11194_v32, 2 }
 0xee1   :  { %v11198_v44 = vpop.eup %11197  ;;  %v7483_v6 = vrot.slane %v11196_v51, 1  ;;  %v7507_v52 = vmul.f32 %v11196_v51, %v11186_v36  ;;  %v7531_v14 = vrot.slane %v11196_v51, 2 }
 0xee2   :  { %v11200_v31 = vpop.eup %11199  ;;  %v7484_v28 = vrot.slane %v11198_v44, 1  ;;  %v7498_v21 = vmul.f32 %v7482_v30, %v13476_v45  ;;  %v7508_v38 = vmul.f32 %v11198_v44, %v11188_v23  ;;  %v7532_v19 = vrot.slane %v11198_v44, 2 }
 0xee3   :  { %v11202_v35 = vpop.eup %11201  ;;  %v7485_v0 = vrot.slane %v11200_v31, 1  ;;  %v7499_v12 = vmul.f32 %v7483_v6, %v13480_v41  ;;  %v7509_v7 = vmul.f32 %v11200_v31, %v11190_v47  ;;  %v7533_v9 = vrot.slane %v11200_v31, 2 }
 0xee4   :  { %v13580_v1 = vpop.eup %11203  ;;  %v7486_v61 = vrot.slane %v11202_v35, 1  ;;  %v7500_v40 = vmul.f32 %v7484_v28, %v13483_v46  ;;  %v13583_v42 = vadd.f32 %v7506_v2, %v7498_v21  ;;  %v7510_v37 = vmul.f32 %v11202_v35, %v11192_v24 }
 0xee5   :  { %v11206_v54 = vpop.eup %11205  ;;  %v7487_v13 = vrot.slane %v13580_v1, 1  ;;  %v7501_v45 = vmul.f32 %v7485_v0, %v13487_v56  ;;  %v13587_v18 = vadd.f32 %v7507_v52, %v7499_v12  ;;  %v7534_v53 = vrot.slane %v11202_v35, 2 }
 0xee6   :  { %v11208_v33 = vpop.eup %11207  ;;  %v7488_v41 = vrot.slane %v11206_v54, 1  ;;  %v7502_v34 = vmul.f32 %v7486_v61, %v13492_v43  ;;  %v13590_v5 = vadd.f32 %v7508_v38, %v7500_v40  ;;  %11215 = vtanh.f32 %v13583_v42 }
 0xee7   :  { %v11210_v46 = vpop.eup %11209  ;;  %v7489_v11 = vrot.slane %v11208_v33, 1  ;;  %v7503_v59 = vmul.f32 %v7487_v13, %v13497_v57  ;;  %v13594_v22 = vadd.f32 %v7509_v7, %v7501_v45  ;;  %11217 = vtanh.f32 %v13587_v18  ;;  %v8103_v13 = vld [vmem:[#allocation7 + $0x28] sm:$0xff]  ;;  %v8101_v45 = vld [vmem:[#allocation7 + $0x18] sm:$0xff] }
 0xee8   :  { %v11212_v56 = vpop.eup %11211  ;;  %v7504_v17 = vmul.f32 %v7488_v41, %v13500_v50  ;;  %v7511_v29 = vmul.f32 %v11210_v46, %v13580_v1  ;;  %v13599_v20 = vadd.f32 %v7510_v37, %v7502_v34  ;;  %11219 = vtanh.f32 %v13590_v5  ;;  %v8098_v41 = vld [vmem:[#allocation7] sm:$0xff] }
 0xee9   :  { %v11214_v43 = vpop.eup %11213  ;;  %v7505_v10 = vmul.f32 %v7489_v11, %v13502_v62  ;;  %v7512_v48 = vmul.f32 %v11212_v56, %v11206_v54  ;;  %11221 = vtanh.f32 %v13594_v22  ;;  %v7535_v60 = vrot.slane %v13580_v1, 2  ;;  %v8102_v34 = vld [vmem:[#allocation7 + $0x20] sm:$0xff]  ;;  %v8104_v56 = vld [vmem:[#allocation7 + $0x30] sm:$0xff] }
 0xeea   :  { %v7513_v57 = vmul.f32 %v11214_v43, %v11208_v33  ;;  %v13604_v15 = vadd.f32 %v7511_v29, %v7503_v59  ;;  %11223 = vtanh.f32 %v13599_v20  ;;  %v7536_v24 = vrot.slane %v11206_v54, 2  ;;  %v8099_v54 = vld [vmem:[#allocation7 + $0x8] sm:$0xff]  ;;  %v8100_v59 = vld [vmem:[#allocation7 + $0x10] sm:$0xff] }
 0xeeb   :  { %v13607_v16 = vadd.f32 %v7512_v48, %v7504_v17  ;;  %v7537_v30 = vrot.slane %v11208_v33, 2  ;;  %v13647_v37 = vpack.c.bf16 %v8103_v13, %v8099_v54  ;;  %v8105_v33 = vld [vmem:[#allocation7 + $0x38] sm:$0xff]  ;;  %v13651_v11 = vpack.c.bf16 %v8102_v34, %v8098_v41  ;;  %v8107_v17 = vld [vmem:[#allocation7 + $0x48] sm:$0xff]  ;;  %v8134_v54 = vld [vmem:[#allocation7 + $0x120] sm:$0xff] }
 0xeec   :  { %v13609_v50 = vadd.f32 %v7513_v57, %v7505_v10  ;;  %11225 = vtanh.f32 %v13604_v15  ;;  %v13649_v46 = vpack.c.bf16 %v8105_v33, %v8101_v45  ;;  %v13654_v29 = vpack.c.bf16 %v8104_v56, %v8100_v59  ;;  %v8111_v43 = vld [vmem:[#allocation7 + $0x68] sm:$0xff]  ;;  %v8109_v10 = vld [vmem:[#allocation7 + $0x58] sm:$0xff]  ;;  %v8132_v13 = vld [vmem:[#allocation7 + $0x110] sm:$0xff] }
 0xeed   :  { %11227 = vtanh.f32 %v13607_v16  ;;  %10265 = vmatprep.subr.bf16.mxu0 %v13647_v37  ;;  %v8113_v48 = vld [vmem:[#allocation7 + $0x78] sm:$0xff]  ;;  %v13658_v57 = vpack.c.bf16 %v8111_v43, %v8107_v17  ;;  %v8136_v33 = vld [vmem:[#allocation7 + $0x130] sm:$0xff]  ;;  %v8139_v41 = vld [vmem:[#allocation7 + $0x148] sm:$0xff] }
 0xeee   :  { %11229 = vtanh.f32 %v13609_v50  ;;  %10297 = vmatprep.subr.bf16.mxu1 %v13649_v46  ;;  %v8143_v34 = vld [vmem:[#allocation7 + $0x168] sm:$0xff]  ;;  %v8141_v59 = vld [vmem:[#allocation7 + $0x158] sm:$0xff]  ;;  %v13702_v43 = vpack.c.bf16 %v8136_v33, %v8132_v13  ;;  %v8156_v13 = vld [vmem:[#allocation7 + $0x1d0] sm:$0xff] }
 0xeef   :  { %v8145_v56 = vld [vmem:[#allocation7 + $0x178] sm:$0xff]  ;;  %v8160_v33 = vld [vmem:[#allocation7 + $0x1f0] sm:$0xff] }
 0xef0   :  { %v11216_v62 = vpop.eup %11215 }
 0xef1   :  { %v11218_v58 = vpop.eup %11217  ;;  %v7546_v26 = vmul.f32 %v11216_v62, %v7530_v49  ;;  %v13660_v49 = vpack.c.bf16 %v8113_v48, %v8109_v10  ;;  %v8106_v62 = vld [vmem:[#allocation7 + $0x40] sm:$0xff]  ;;  %v13704_v10 = vpack.c.bf16 %v8143_v34, %v8139_v41  ;;  %v13738_v34 = vpack.c.bf16 %v8160_v33, %v8156_v13 }
 0xef2   :  { %v11220_v63 = vpop.eup %11219  ;;  %v7547_v4 = vmul.f32 %v11218_v58, %v7531_v14  ;;  %v8110_v14 = vld [vmem:[#allocation7 + $0x60] sm:$0xff]  ;;  %v8108_v58 = vld [vmem:[#allocation7 + $0x50] sm:$0xff] }
 0xef3   :  { %v11222_v27 = vpop.eup %11221  ;;  %v7548_v39 = vmul.f32 %v11220_v63, %v7532_v19  ;;  %7554 = vst [vmem:[%s13975_s8 + $0x4] sm:$0x1] %v7546_v26  ;;  %v13663_v19 = vpack.c.bf16 %v8110_v14, %v8106_v62  ;;  %v8115_v63 = vld [vmem:[#allocation7 + $0x88] sm:$0xff]  ;;  %v8138_v48 = vld [vmem:[#allocation7 + $0x140] sm:$0xff]  ;;  %v8140_v14 = vld [vmem:[#allocation7 + $0x150] sm:$0xff] }
 0xef4   :  { %v11224_v55 = vpop.eup %11223  ;;  %v7549_v25 = vmul.f32 %v11222_v27, %v7533_v9  ;;  %7555 = vst [vmem:[%s13975_s8 + $0xc] sm:$0x1] %v7547_v4  ;;  %v7642_v36 = vcombine.low %v7546_v26, %v7547_v4  ;;  %v8112_v26 = vld [vmem:[#allocation7 + $0x70] sm:$0xff]  ;;  %v8119_v9 = vld [vmem:[#allocation7 + $0xa8] sm:$0xff]  ;;  %v8142_v62 = vld [vmem:[#allocation7 + $0x160] sm:$0xff] }
 0xef5   :  { %v7550_v23 = vmul.f32 %v11224_v55, %v7534_v53  ;;  %7556 = vst [vmem:[%s13975_s8 + $0x14] sm:$0x1] %v7548_v39  ;;  %v13667_v4 = vpack.c.bf16 %v8112_v26, %v8108_v58  ;;  %v13669_v27 = vpack.c.bf16 %v8119_v9, %v8115_v63  ;;  %v8117_v53 = vld [vmem:[#allocation7 + $0x98] sm:$0xff]  ;;  %v8114_v55 = vld [vmem:[#allocation7 + $0x80] sm:$0xff]  ;;  %v13707_v58 = vpack.c.bf16 %v8145_v56, %v8141_v59  ;;  %v8144_v26 = vld [vmem:[#allocation7 + $0x170] sm:$0xff] }
 0xef6   :  { %v11226_v47 = vpop.eup %11225  ;;  %7557 = vst [vmem:[%s13975_s8 + $0x1c] sm:$0x1] %v7549_v25  ;;  %v7643_v32 = vcombine.low %v7548_v39, %v7549_v25  ;;  %v7652_v28 = vrot.slane %v7642_v36, %v11833_v8  ;;  %v8121_v39 = vld [vmem:[#allocation7 + $0xb8] sm:$0xff]  ;;  %v8118_v36 = vld [vmem:[#allocation7 + $0xa0] sm:$0xff]  ;;  %v8147_v63 = vld [vmem:[#allocation7 + $0x188] sm:$0xff] }
 0xef7   :  { %v11228_v51 = vpop.eup %11227  ;;  %v7551_v44 = vmul.f32 %v11226_v47, %v7535_v60  ;;  %7558 = vst [vmem:[%s13975_s8 + $0x24] sm:$0x1] %v7550_v23  ;;  %v13671_v25 = vpack.c.bf16 %v8121_v39, %v8117_v53  ;;  %v8116_v60 = vld [vmem:[#allocation7 + $0x90] sm:$0xff]  ;;  %v13674_v47 = vpack.c.bf16 %v8118_v36, %v8114_v55  ;;  %v8151_v9 = vld [vmem:[#allocation7 + $0x1a8] sm:$0xff]  ;;  %v8149_v53 = vld [vmem:[#allocation7 + $0x198] sm:$0xff]  ;;  %v13710_v55 = vpack.c.bf16 %v8142_v62, %v8138_v48 }
 0xef8   :  { %v11230_v6 = vpop.eup %11229  ;;  %v7552_v31 = vmul.f32 %v11228_v51, %v7536_v24  ;;  %v7659_v21 = vrot.slane %v7643_v32, %v11833_v8  ;;  %v8123_v24 = vld [vmem:[#allocation7 + $0xc8] sm:$0xff]  ;;  %v8125_v51 = vld [vmem:[#allocation7 + $0xd8] sm:$0xff]  ;;  %v13714_v36 = vpack.c.bf16 %v8144_v26, %v8140_v14  ;;  %14106 = vst [vmem:[#allocation15_spill] sm:$0xff] %v13738_v34 }
 0xef9   :  { %v7553_v2 = vmul.f32 %v11230_v6, %v7537_v30  ;;  %7559 = vst [vmem:[%s13975_s8 + $0x2c] sm:$0x1] %v7551_v44  ;;  %v7644_v35 = vcombine.low %v7550_v23, %v7551_v44  ;;  %v8120_v23 = vld [vmem:[#allocation7 + $0xb0] sm:$0xff]  ;;  %v8127_v32 = vld [vmem:[#allocation7 + $0xe8] sm:$0xff]  ;;  %v8129_v6 = vld [vmem:[#allocation7 + $0xf8] sm:$0xff] }
 0xefa   :  { %7560 = vst [vmem:[%s13975_s8 + $0x34] sm:$0x1] %v7552_v31  ;;  %v7674_v0 = vcombine.low %v7652_v28, %v7659_v21  ;;  %v13678_v30 = vpack.c.bf16 %v8120_v23, %v8116_v60  ;;  %v13680_v44 = vpack.c.bf16 %v8127_v32, %v8123_v24  ;;  %v8126_v28 = vld [vmem:[#allocation7 + $0xe0] sm:$0xff]  ;;  %v13683_v21 = vpack.c.bf16 %v8129_v6, %v8125_v51  ;;  %v8153_v39 = vld [vmem:[#allocation7 + $0x1b8] sm:$0xff]  ;;  %v8148_v32 = vld [vmem:[#allocation7 + $0x190] sm:$0xff] }
 0xefb   :  { %7561 = vst [vmem:[%s13975_s8 + $0x3c] sm:$0x1] %v7553_v2  ;;  %v7645_v12 = vcombine.low %v7552_v31, %v7553_v2  ;;  %v7666_v52 = vrot.slane %v7644_v35, %v11833_v8  ;;  %v8122_v31 = vld [vmem:[#allocation7 + $0xc0] sm:$0xff]  ;;  %v8124_v2 = vld [vmem:[#allocation7 + $0xd0] sm:$0xff]  ;;  %v13716_v60 = vpack.c.bf16 %v8151_v9, %v8147_v63  ;;  %v13719_v51 = vpack.c.bf16 %v8153_v39, %v8149_v53 }
 0xefc   :  { %v7682_v61 = vrot.slane %v7674_v0, %v11833_v8  ;;  %v8128_v35 = vld [vmem:[#allocation7 + $0xf0] sm:$0xff]  ;;  %v8131_v0 = vld [vmem:[#allocation7 + $0x108] sm:$0xff]  ;;  %v8146_v23 = vld [vmem:[#allocation7 + $0x180] sm:$0xff] }
 0xefd   :  { %v7673_v38 = vrot.slane %v7645_v12, %v11833_v8  ;;  %v8135_v12 = vld [vmem:[#allocation7 + $0x128] sm:$0xff]  ;;  %v8150_v24 = vld [vmem:[#allocation7 + $0x1a0] sm:$0xff]  ;;  %14100 = vst [vmem:[#allocation17_spill] sm:$0xff] %v13719_v51  ;;  %v8152_v6 = vld [vmem:[#allocation7 + $0x1b0] sm:$0xff] }
 0xefe   :  { %v7564_v13 = vld [vmem:[#allocation2 + $0x45] ss:$8 sm:$0xf] }
 0xeff   :  { %v7675_v1 = vcombine.low %v7666_v52, %v7673_v38  ;;  %v8133_v52 = vld [vmem:[#allocation7 + $0x118] sm:$0xff] }
 0xf00   :  { %v8137_v38 = vld [vmem:[#allocation7 + $0x138] sm:$0xff] }
 0xf01   :  { %v7689_v40 = vrot.slane %v7675_v1, %v11833_v8  ;;  %v13686_v1 = vpack.c.bf16 %v8126_v28, %v8122_v31  ;;  %v13695_v45 = vpack.c.bf16 %v8137_v38, %v8133_v52  ;;  %v8155_v31 = vld [vmem:[#allocation7 + $0x1c8] sm:$0xff]  ;;  %v8154_v38 = vld [vmem:[#allocation7 + $0x1c0] sm:$0xff] }
 0xf02   :  { %v8159_v28 = vld [vmem:[#allocation7 + $0x1e8] sm:$0xff] }
 0xf03   :  { %v7690_v7 = vcombine.low %v7682_v61, %v7689_v40  ;;  %v13690_v61 = vpack.c.bf16 %v8128_v35, %v8124_v2  ;;  %v13692_v40 = vpack.c.bf16 %v8135_v12, %v8131_v0  ;;  %v8157_v2 = vld [vmem:[#allocation7 + $0x1d8] sm:$0xff]  ;;  %v13722_v0 = vpack.c.bf16 %v8150_v24, %v8146_v23 }
 0xf04   :  { %v8161_v35 = vld [vmem:[#allocation7 + $0x1f8] sm:$0xff]  ;;  %v13726_v12 = vpack.c.bf16 %v8152_v6, %v8148_v32  ;;  %v13728_v52 = vpack.c.bf16 %v8159_v28, %v8155_v31 }
 0xf05   :  { %7757 = vmatmul.mubr.f32.vlgmr.msra.gmra.mrb[58].mxu0 %v7690_v7  ;;  %7828 = vmatmul.mubr.f32.vlgmr.msra.gmra.mrb[58].mxu1 %v7690_v7  ;;  %v8130_v7 = vld [vmem:[#allocation7 + $0x100] sm:$0xff]  ;;  %14101 = vst [vmem:[#allocation10_spill] sm:$0xff] %v13722_v0 }
 0xf06   :  { %8284 = vmatprep.mubr.f32.mxu0 %v14032_v3  ;;  %8355 = vmatprep.mubr.f32.mxu1 %v14032_v3  ;;  %v13698_v17 = vpack.c.bf16 %v8134_v54, %v8130_v7  ;;  %14102 = vst [vmem:[#allocation11_spill] sm:$0xff] %v13726_v12  ;;  %14103 = vst [vmem:[#allocation12_spill] sm:$0xff] %v13728_v52  ;;  %v8158_v7 = vld [vmem:[#allocation7 + $0x1e0] sm:$0xff]  ;;  %v13731_v54 = vpack.c.bf16 %v8161_v35, %v8157_v2 }
 0xf07   :  { %10267 = vmatpush1.bf16.msra.mxu0 %v13651_v11  ;;  %10299 = vmatpush1.bf16.msra.mxu1 %v13654_v29  ;;  %v13734_v41 = vpack.c.bf16 %v8158_v7, %v8154_v38  ;;  %v7562_v38 = vld [vmem:[#allocation2 + $0x5] ss:$8 sm:$0xf] }
 0xf08   :  { %10269 = vmatprep.subr.bf16.mxu0 %v13658_v57  ;;  %10301 = vmatprep.subr.bf16.mxu1 %v13660_v49  ;;  %14104 = vst [vmem:[#allocation13_spill] sm:$0xff] %v13731_v54  ;;  %v7563_v7 = vld [vmem:[#allocation2 + $0x25] ss:$8 sm:$0xf] }
 0xf09   :  { %14105 = vst [vmem:[#allocation14_spill] sm:$0xff] %v13734_v41  ;;  %v7566_v33 = vld [vmem:[#allocation2 + $0x85] ss:$8 sm:$0xf] }
 0xf0b   :  { %10271 = vmatpush1.bf16.msra.mxu0 %v13663_v19  ;;  %10303 = vmatpush1.bf16.msra.mxu1 %v13667_v4 }
 0xf0c   :  { %10273 = vmatprep.subr.bf16.mxu0 %v13669_v27  ;;  %10305 = vmatprep.subr.bf16.mxu1 %v13671_v25 }
 0xf0f   :  { %10275 = vmatpush1.bf16.msra.mxu0 %v13674_v47  ;;  %10307 = vmatpush1.bf16.msra.mxu1 %v13678_v30 }
 0xf10   :  { %10277 = vmatprep.subr.bf16.mxu0 %v13680_v44  ;;  %10309 = vmatprep.subr.bf16.mxu1 %v13683_v21 }
 0xf13   :  { %10279 = vmatpush1.bf16.msra.mxu0 %v13686_v1  ;;  %10311 = vmatpush1.bf16.msra.mxu1 %v13690_v61 }
 0xf14   :  { %10281 = vmatprep.subr.bf16.mxu0 %v13692_v40  ;;  %10313 = vmatprep.subr.bf16.mxu1 %v13695_v45 }
 0xf17   :  { %10283 = vmatpush1.bf16.msra.mxu0 %v13698_v17  ;;  %10315 = vmatpush1.bf16.msra.mxu1 %v13702_v43 }
 0xf18   :  { %10285 = vmatprep.subr.bf16.mxu0 %v13704_v10  ;;  %10317 = vmatprep.subr.bf16.mxu1 %v13707_v58 }
 0xf1b   :  { %10287 = vmatpush1.bf16.msra.mxu0 %v13710_v55  ;;  %10319 = vmatpush1.bf16.msra.mxu1 %v13714_v36 }
 0xf1c   :  { %10289 = vmatprep.subr.bf16.mxu0 %v13716_v60  ;;  %10321 = vmatprep.subr.bf16.mxu1 %v13719_v51 }
 0xf1f   :  { %10291 = vmatpush1.bf16.msra.mxu0 %v13722_v0  ;;  %10323 = vmatpush1.bf16.msra.mxu1 %v13726_v12 }
 0xf20   :  { %10293 = vmatprep.subr.bf16.mxu0 %v13728_v52  ;;  %10325 = vmatprep.subr.bf16.mxu1 %v13731_v54 }
 0xf23   :  { %10295 = vmatpush1.bf16.msra.mxu0 %v13734_v41  ;;  %10327 = vmatpush1.bf16.msra.mxu1 %v13738_v34 }
 0xf24   :  { %10329 = vmatprep.subr.bf16.mxu0 %v13647_v37  ;;  %10361 = vmatprep.subr.bf16.mxu1 %v13649_v46 }
 0xfd8   :  { %v7758_v59 = vpop.f32.mrb[58].mxu0  ;;  %v7829_v56 = vpop.f32.mrb[58].mxu1 }
 0xfd9   :  { %v7760_v48 = vpop.f32.mrb[59].mxu0  ;;  %v7831_v62 = vpop.f32.mrb[59].mxu1 }
 0xfda   :  { %v7838_v14 = vcombine.low %v7758_v59, %v7760_v48  ;;  %v7839_v26 = vcombine.high %v7758_v59, %v7760_v48  ;;  %v7840_v63 = vcombine.low %v7829_v56, %v7831_v62  ;;  %v7841_v9 = vcombine.high %v7829_v56, %v7831_v62 }
 0xfdc   :  { %v7848_v53 = vrot.slane %v7838_v14, %v11833_v8  ;;  %v7855_v39 = vrot.slane %v7839_v26, %v11833_v8  ;;  %v7862_v23 = vrot.slane %v7840_v63, %v11833_v8  ;;  %v7869_v24 = vrot.slane %v7841_v9, %v11833_v8  ;;  %v7565_v14 = vld [vmem:[#allocation2 + $0x65] ss:$8 sm:$0xf] }
 0xfdd   :  { %v7567_v26 = vld [vmem:[#allocation2 + $0xa5] ss:$8 sm:$0xf] }
 0xfde   :  { %v7870_v32 = vcombine.low %v7848_v53, %v7862_v23  ;;  %v7871_v37 = vcombine.high %v7848_v53, %v7862_v23  ;;  %v7872_v6 = vcombine.low %v7855_v39, %v7869_v24  ;;  %v7873_v46 = vcombine.high %v7855_v39, %v7869_v24  ;;  %v7568_v39 = vld [vmem:[#allocation2 + $0xc5] ss:$8 sm:$0xf] }
 0xfdf   :  { %v7569_v23 = vld [vmem:[#allocation2 + $0xe5] ss:$8 sm:$0xf] }
 0xfe0   :  { %v7880_v31 = vrot.slane %v7870_v32, %v11833_v8  ;;  %v7887_v28 = vrot.slane %v7872_v6, %v11833_v8  ;;  %v7894_v2 = vrot.slane %v7871_v37, %v11833_v8  ;;  %v7901_v35 = vrot.slane %v7873_v46, %v11833_v8 }
 0xfe2   :  { %v7902_v59 = vcombine.high %v7880_v31, %v7880_v31  ;;  %v7903_v56 = vcombine.high %v7887_v28, %v7887_v28  ;;  %v7904_v48 = vcombine.high %v7894_v2, %v7894_v2  ;;  %v7905_v62 = vcombine.high %v7901_v35, %v7901_v35 }
 0xfe3   :  { %v7914_v63 = vadd.f32 %v7880_v31, %v7562_v38  ;;  %v7915_v9 = vadd.f32 %v7894_v2, %v7563_v7  ;;  %v7918_v53 = vadd.f32 %v7887_v28, %v7566_v33  ;;  %v7919_v37 = vadd.f32 %v7901_v35, %v7567_v26 }
 0xfe4   :  { %v7916_v24 = vadd.f32 %v7902_v59, %v7564_v13  ;;  %v7917_v32 = vadd.f32 %v7904_v48, %v7565_v14  ;;  %v7920_v6 = vadd.f32 %v7903_v56, %v7568_v39  ;;  %v7921_v41 = vadd.f32 %v7905_v62, %v7569_v23 }
 0xfe5   :  { %v9280_v46 = vmul.f32 -1.442695, %v7914_v63  ;;  %v9281_v34 = vmul.f32 -1.442695, %v7915_v9  ;;  %v9284_v12 = vmul.f32 -1.442695, %v7918_v53 }
 0xfe6   :  { %v9282_v54 = vmul.f32 -1.442695, %v7916_v24  ;;  %v9283_v52 = vmul.f32 -1.442695, %v7917_v32  ;;  %v9285_v0 = vmul.f32 -1.442695, %v7919_v37 }
 0xfe7   :  { %11231 = vpow2.f32 %v9280_v46  ;;  %v9286_v51 = vmul.f32 -1.442695, %v7920_v6  ;;  %v9287_v31 = vmul.f32 -1.442695, %v7921_v41  ;;  %v7978_v28 = vrot.slane %v7914_v63, 3 }
 0xfe8   :  { %11233 = vpow2.f32 %v9281_v34  ;;  %v7979_v2 = vrot.slane %v7915_v9, 3  ;;  %v7980_v35 = vrot.slane %v7916_v24, 3  ;;  %v7981_v38 = vrot.slane %v7917_v32, 3 }
 0xfe9   :  { %11235 = vpow2.f32 %v9282_v54  ;;  %v7982_v7 = vrot.slane %v7918_v53, 3  ;;  %v7983_v9 = vrot.slane %v7919_v37, 3  ;;  %v7984_v23 = vrot.slane %v7920_v6, 3 }
 0xfea   :  { %11237 = vpow2.f32 %v9283_v52  ;;  %v7985_v32 = vrot.slane %v7921_v41, 3 }
 0xfeb   :  { %11239 = vpow2.f32 %v9284_v12 }
 0xfec   :  { %11241 = vpow2.f32 %v9285_v0 }
 0xfed   :  { %11243 = vpow2.f32 %v9286_v51 }
 0xfee   :  { %11245 = vpow2.f32 %v9287_v31 }
 0xfef   :  { %11247 = vtanh.f32 %v7978_v28 }
 0xff0   :  { %11249 = vtanh.f32 %v7979_v2 }
 0xff1   :  { %v11232_v13 = vpop.eup %11231  ;;  %11251 = vtanh.f32 %v7980_v35 }
 0xff2   :  { %v11234_v33 = vpop.eup %11233  ;;  %v7946_v34 = vadd.f32 1.0, %v11232_v13  ;;  %11253 = vtanh.f32 %v7981_v38 }
 0xff3   :  { %v11236_v54 = vpop.eup %11235  ;;  %v7947_v59 = vadd.f32 1.0, %v11234_v33  ;;  %11255 = vtanh.f32 %v7982_v7 }
 0xff4   :  { %v11238_v52 = vpop.eup %11237  ;;  %v7948_v12 = vadd.f32 1.0, %v11236_v54  ;;  %11257 = vrcp.f32 %v7946_v34 }
 0xff5   :  { %v11240_v0 = vpop.eup %11239  ;;  %v7949_v56 = vadd.f32 1.0, %v11238_v52  ;;  %11259 = vrcp.f32 %v7947_v59 }
 0xff6   :  { %v11242_v51 = vpop.eup %11241  ;;  %v7950_v48 = vadd.f32 1.0, %v11240_v0  ;;  %11261 = vrcp.f32 %v7948_v12 }
 0xff7   :  { %v11244_v62 = vpop.eup %11243  ;;  %v7951_v14 = vadd.f32 1.0, %v11242_v51  ;;  %11263 = vrcp.f32 %v7949_v56 }
 0xff8   :  { %v11246_v26 = vpop.eup %11245  ;;  %v7952_v63 = vadd.f32 1.0, %v11244_v62  ;;  %11265 = vrcp.f32 %v7950_v48 }
 0xff9   :  { %v11248_v53 = vpop.eup %11247  ;;  %v7953_v39 = vadd.f32 1.0, %v11246_v26  ;;  %11267 = vrcp.f32 %v7951_v14 }
 0xffa   :  { %v11250_v24 = vpop.eup %11249  ;;  %11269 = vrcp.f32 %v7952_v63 }
 0xffb   :  { %v11252_v46 = vpop.eup %11251  ;;  %11271 = vrcp.f32 %v7953_v39 }
 0xffc   :  { %v11254_v31 = vpop.eup %11253  ;;  %11273 = vtanh.f32 %v7983_v9 }
 0xffd   :  { %v11256_v28 = vpop.eup %11255  ;;  %11275 = vtanh.f32 %v7984_v23 }
 0xffe   :  { %v11258_v2 = vpop.eup %11257  ;;  %11277 = vtanh.f32 %v7985_v32 }
 0xfff   :  { %v11260_v35 = vpop.eup %11259  ;;  %v8010_v38 = vrot.slane %v11258_v2, 1  ;;  %v8034_v6 = vmul.f32 %v11258_v2, %v11248_v53 }
0x1000   :  { %v11262_v7 = vpop.eup %11261  ;;  %v8011_v13 = vrot.slane %v11260_v35, 1  ;;  %v8035_v52 = vmul.f32 %v11260_v35, %v11250_v24 }
0x1001   :  { %v11264_v37 = vpop.eup %11263  ;;  %v8012_v33 = vrot.slane %v11262_v7, 1  ;;  %v8026_v34 = vmul.f32 %v8010_v38, %v13583_v42  ;;  %v8036_v12 = vmul.f32 %v11262_v7, %v11252_v46 }
0x1002   :  { %v11266_v54 = vpop.eup %11265  ;;  %v8013_v59 = vrot.slane %v11264_v37, 1  ;;  %v8027_v41 = vmul.f32 %v8011_v13, %v13587_v18  ;;  %v8037_v48 = vmul.f32 %v11264_v37, %v11254_v31 }
0x1003   :  { %v13755_v0 = vpop.eup %11267  ;;  %v8014_v56 = vrot.slane %v11266_v54, 1  ;;  %v8028_v51 = vmul.f32 %v8012_v33, %v13590_v5  ;;  %v13758_v62 = vadd.f32 %v8034_v6, %v8026_v34  ;;  %v8038_v63 = vmul.f32 %v11266_v54, %v11256_v28 }
0x1004   :  { %v11270_v14 = vpop.eup %11269  ;;  %v8015_v26 = vrot.slane %v13755_v0, 1  ;;  %v8029_v42 = vmul.f32 %v8013_v59, %v13594_v22  ;;  %v13762_v9 = vadd.f32 %v8035_v52, %v8027_v41  ;;  %v8058_v59 = vrot.slane %v11258_v2, 2 }
0x1005   :  { %v11272_v53 = vpop.eup %11271  ;;  %v8016_v18 = vrot.slane %v11270_v14, 1  ;;  %v8030_v39 = vmul.f32 %v8014_v56, %v13599_v20  ;;  %v13765_v23 = vadd.f32 %v8036_v12, %v8028_v51  ;;  %11279 = vtanh.f32 %v13758_v62 }
0x1006   :  { %v11274_v5 = vpop.eup %11273  ;;  %v8017_v24 = vrot.slane %v11272_v53, 1  ;;  %v8031_v32 = vmul.f32 %v8015_v26, %v13604_v15  ;;  %v13769_v46 = vadd.f32 %v8037_v48, %v8029_v42  ;;  %11281 = vtanh.f32 %v13762_v9 }
0x1007   :  { %v11276_v22 = vpop.eup %11275  ;;  %v8032_v31 = vmul.f32 %v8016_v18, %v13607_v16  ;;  %v8039_v28 = vmul.f32 %v11274_v5, %v13755_v0  ;;  %v13774_v38 = vadd.f32 %v8038_v63, %v8030_v39  ;;  %11283 = vtanh.f32 %v13765_v23 }
0x1008   :  { %v11278_v20 = vpop.eup %11277  ;;  %v8033_v13 = vmul.f32 %v8017_v24, %v13609_v50  ;;  %v8040_v33 = vmul.f32 %v11276_v22, %v11270_v14  ;;  %11285 = vtanh.f32 %v13769_v46  ;;  %v8059_v41 = vrot.slane %v11260_v35, 2 }
0x1009   :  { %v8041_v15 = vmul.f32 %v11278_v20, %v11272_v53  ;;  %v13779_v34 = vadd.f32 %v8039_v28, %v8031_v32  ;;  %11287 = vtanh.f32 %v13774_v38  ;;  %v8060_v12 = vrot.slane %v11262_v7, 2 }
0x100a   :  { %v13782_v6 = vadd.f32 %v8040_v33, %v8032_v31  ;;  %v8061_v48 = vrot.slane %v11264_v37, 2  ;;  %v8062_v63 = vrot.slane %v11266_v54, 2  ;;  %v8063_v35 = vrot.slane %v13755_v0, 2 }
0x100b   :  { %v13784_v16 = vadd.f32 %v8041_v15, %v8033_v13  ;;  %11289 = vtanh.f32 %v13779_v34  ;;  %v8064_v54 = vrot.slane %v11270_v14, 2  ;;  %v8065_v22 = vrot.slane %v11272_v53, 2 }
0x100c   :  { %11291 = vtanh.f32 %v13782_v6 }
0x100d   :  { %11293 = vtanh.f32 %v13784_v16 }
0x100f   :  { %v11280_v50 = vpop.eup %11279 }
0x1010   :  { %v11282_v52 = vpop.eup %11281  ;;  %v8074_v56 = vmul.f32 %v11280_v50, %v8058_v59 }
0x1011   :  { %v11284_v51 = vpop.eup %11283  ;;  %v8075_v26 = vmul.f32 %v11282_v52, %v8059_v41 }
0x1012   :  { %v11286_v42 = vpop.eup %11285  ;;  %v8076_v18 = vmul.f32 %v11284_v51, %v8060_v12  ;;  %8082 = vst [vmem:[%s13975_s8 + $0x5] sm:$0x1] %v8074_v56 }
0x1013   :  { %v11288_v39 = vpop.eup %11287  ;;  %v8077_v5 = vmul.f32 %v11286_v42, %v8061_v48  ;;  %8083 = vst [vmem:[%s13975_s8 + $0xd] sm:$0x1] %v8075_v26  ;;  %v8170_v2 = vcombine.low %v8074_v56, %v8075_v26  ;;  %v8090_v42 = vld [vmem:[#allocation2 + $0x6] ss:$8 sm:$0xf] }
0x1014   :  { %v8078_v7 = vmul.f32 %v11288_v39, %v8062_v63  ;;  %8084 = vst [vmem:[%s13975_s8 + $0x15] sm:$0x1] %v8076_v18  ;;  %v8091_v63 = vld [vmem:[#allocation2 + $0x26] ss:$8 sm:$0xf] }
0x1015   :  { %v11290_v37 = vpop.eup %11289  ;;  %8085 = vst [vmem:[%s13975_s8 + $0x1d] sm:$0x1] %v8077_v5  ;;  %v8171_v24 = vcombine.low %v8076_v18, %v8077_v5  ;;  %v8180_v20 = vrot.slane %v8170_v2, %v11833_v8  ;;  %v8092_v18 = vld [vmem:[#allocation2 + $0x46] ss:$8 sm:$0xf] }
0x1016   :  { %v11292_v32 = vpop.eup %11291  ;;  %v8079_v31 = vmul.f32 %v11290_v37, %v8063_v35  ;;  %8086 = vst [vmem:[%s13975_s8 + $0x25] sm:$0x1] %v8078_v7  ;;  %v8094_v39 = vld [vmem:[#allocation2 + $0x86] ss:$8 sm:$0xf] }
0x1017   :  { %v11294_v0 = vpop.eup %11293  ;;  %v8080_v28 = vmul.f32 %v11292_v32, %v8064_v54  ;;  %v8187_v13 = vrot.slane %v8171_v24, %v11833_v8  ;;  %v8093_v37 = vld [vmem:[#allocation2 + $0x66] ss:$8 sm:$0xf] }
0x1018   :  { %v8081_v33 = vmul.f32 %v11294_v0, %v8065_v22  ;;  %8087 = vst [vmem:[%s13975_s8 + $0x2d] sm:$0x1] %v8079_v31  ;;  %v8172_v14 = vcombine.low %v8078_v7, %v8079_v31  ;;  %v8095_v54 = vld [vmem:[#allocation2 + $0xa6] ss:$8 sm:$0xf] }
0x1019   :  { %8088 = vst [vmem:[%s13975_s8 + $0x35] sm:$0x1] %v8080_v28  ;;  %v8202_v53 = vcombine.low %v8180_v20, %v8187_v13  ;;  %v8096_v31 = vld [vmem:[#allocation2 + $0xc6] ss:$8 sm:$0xf] }
0x101a   :  { %8089 = vst [vmem:[%s13975_s8 + $0x3d] sm:$0x1] %v8081_v33  ;;  %v8173_v15 = vcombine.low %v8080_v28, %v8081_v33  ;;  %v8194_v59 = vrot.slane %v8172_v14, %v11833_v8  ;;  %v8097_v0 = vld [vmem:[#allocation2 + $0xe6] ss:$8 sm:$0xf] }
0x101b   :  { %v8210_v52 = vrot.slane %v8202_v53, %v11833_v8 }
0x101c   :  { %v8201_v50 = vrot.slane %v8173_v15, %v11833_v8 }
0x101e   :  { %v8203_v41 = vcombine.low %v8194_v59, %v8201_v50 }
0x1020   :  { %v8217_v12 = vrot.slane %v8203_v41, %v11833_v8 }
0x1022   :  { %v8218_v56 = vcombine.low %v8210_v52, %v8217_v12 }
0x1024   :  { %8285 = vmatmul.mubr.f32.vlgmr.msra.gmra.mrb[60].mxu0 %v8218_v56  ;;  %8356 = vmatmul.mubr.f32.vlgmr.msra.gmra.mrb[60].mxu1 %v8218_v56 }
0x1025   :  { %10331 = vmatpush1.bf16.msra.mxu0 %v13651_v11  ;;  %10363 = vmatpush1.bf16.msra.mxu1 %v13654_v29  ;;  %v14108_v11 = vld [vmem:[#allocation10_spill] sm:$0xff]  ;;  %v14109_v29 = vld [vmem:[#allocation11_spill] sm:$0xff] }
0x1026   :  { %10333 = vmatprep.subr.bf16.mxu0 %v13658_v57  ;;  %10365 = vmatprep.subr.bf16.mxu1 %v13660_v49  ;;  %v14110_v57 = vld [vmem:[#allocation12_spill] sm:$0xff]  ;;  %v14111_v49 = vld [vmem:[#allocation13_spill] sm:$0xff] }
0x1027   :  { %8812 = vmatprep.mubr.f32.mxu0 %v14032_v3  ;;  %8883 = vmatprep.mubr.f32.mxu1 %v14032_v3  ;;  %v14107_v3 = vld [vmem:[#allocation17_spill] sm:$0xff] }
0x1029   :  { %10335 = vmatpush1.bf16.msra.mxu0 %v13663_v19  ;;  %10367 = vmatpush1.bf16.msra.mxu1 %v13667_v4  ;;  %v14112_v19 = vld [vmem:[#allocation14_spill] sm:$0xff]  ;;  %v14113_v4 = vld [vmem:[#allocation15_spill] sm:$0xff] }
0x102a   :  { %10337 = vmatprep.subr.bf16.mxu0 %v13669_v27  ;;  %10369 = vmatprep.subr.bf16.mxu1 %v13671_v25 }
0x102d   :  { %10339 = vmatpush1.bf16.msra.mxu0 %v13674_v47  ;;  %10371 = vmatpush1.bf16.msra.mxu1 %v13678_v30 }
0x102e   :  { %10341 = vmatprep.subr.bf16.mxu0 %v13680_v44  ;;  %10373 = vmatprep.subr.bf16.mxu1 %v13683_v21 }
0x1031   :  { %10343 = vmatpush1.bf16.msra.mxu0 %v13686_v1  ;;  %10375 = vmatpush1.bf16.msra.mxu1 %v13690_v61 }
0x1032   :  { %10345 = vmatprep.subr.bf16.mxu0 %v13692_v40  ;;  %10377 = vmatprep.subr.bf16.mxu1 %v13695_v45 }
0x1035   :  { %10347 = vmatpush1.bf16.msra.mxu0 %v13698_v17  ;;  %10379 = vmatpush1.bf16.msra.mxu1 %v13702_v43 }
0x1036   :  { %10349 = vmatprep.subr.bf16.mxu0 %v13704_v10  ;;  %10381 = vmatprep.subr.bf16.mxu1 %v13707_v58 }
0x1039   :  { %10351 = vmatpush1.bf16.msra.mxu0 %v13710_v55  ;;  %10383 = vmatpush1.bf16.msra.mxu1 %v13714_v36 }
0x103a   :  { %10353 = vmatprep.subr.bf16.mxu0 %v13716_v60  ;;  %10385 = vmatprep.subr.bf16.mxu1 %v14107_v3 }
0x103d   :  { %10355 = vmatpush1.bf16.msra.mxu0 %v14108_v11  ;;  %10387 = vmatpush1.bf16.msra.mxu1 %v14109_v29 }
0x103e   :  { %10357 = vmatprep.subr.bf16.mxu0 %v14110_v57  ;;  %10389 = vmatprep.subr.bf16.mxu1 %v14111_v49 }
0x1041   :  { %10359 = vmatpush1.bf16.msra.mxu0 %v14112_v19  ;;  %10391 = vmatpush1.bf16.msra.mxu1 %v14113_v4 }
0x10f7   :  { %v8286_v27 = vpop.f32.mrb[60].mxu0  ;;  %v8357_v25 = vpop.f32.mrb[60].mxu1 }
0x10f8   :  { %v8288_v47 = vpop.f32.mrb[61].mxu0  ;;  %v8359_v30 = vpop.f32.mrb[61].mxu1 }
0x10f9   :  { %v8366_v44 = vcombine.low %v8286_v27, %v8288_v47  ;;  %v8367_v21 = vcombine.high %v8286_v27, %v8288_v47  ;;  %v8368_v1 = vcombine.low %v8357_v25, %v8359_v30  ;;  %v8369_v61 = vcombine.high %v8357_v25, %v8359_v30 }
0x10fb   :  { %v8376_v40 = vrot.slane %v8366_v44, %v11833_v8  ;;  %v8383_v45 = vrot.slane %v8367_v21, %v11833_v8  ;;  %v8390_v17 = vrot.slane %v8368_v1, %v11833_v8  ;;  %v8397_v43 = vrot.slane %v8369_v61, %v11833_v8 }
0x10fd   :  { %v8398_v10 = vcombine.low %v8376_v40, %v8390_v17  ;;  %v8399_v58 = vcombine.high %v8376_v40, %v8390_v17  ;;  %v8400_v55 = vcombine.low %v8383_v45, %v8397_v43  ;;  %v8401_v36 = vcombine.high %v8383_v45, %v8397_v43 }
0x10ff   :  { %v8408_v60 = vrot.slane %v8398_v10, %v11833_v8  ;;  %v8415_v51 = vrot.slane %v8400_v55, %v11833_v8  ;;  %v8422_v48 = vrot.slane %v8399_v58, %v11833_v8  ;;  %v8429_v26 = vrot.slane %v8401_v36, %v11833_v8 }
0x1101   :  { %v8430_v5 = vcombine.high %v8408_v60, %v8408_v60  ;;  %v8431_v2 = vcombine.high %v8415_v51, %v8415_v51  ;;  %v8432_v35 = vcombine.high %v8422_v48, %v8422_v48  ;;  %v8433_v7 = vcombine.high %v8429_v26, %v8429_v26 }
0x1102   :  { %v8442_v24 = vadd.f32 %v8408_v60, %v8090_v42  ;;  %v8443_v32 = vadd.f32 %v8422_v48, %v8091_v63  ;;  %v8446_v22 = vadd.f32 %v8415_v51, %v8094_v39  ;;  %v8447_v13 = vadd.f32 %v8429_v26, %v8095_v54 }
0x1103   :  { %v8444_v28 = vadd.f32 %v8430_v5, %v8092_v18  ;;  %v8445_v20 = vadd.f32 %v8432_v35, %v8093_v37  ;;  %v8448_v33 = vadd.f32 %v8431_v2, %v8096_v31  ;;  %v8449_v15 = vadd.f32 %v8433_v7, %v8097_v0 }
0x1104   :  { %v9288_v14 = vmul.f32 -1.442695, %v8442_v24  ;;  %v9289_v53 = vmul.f32 -1.442695, %v8443_v32  ;;  %v9292_v41 = vmul.f32 -1.442695, %v8446_v22 }
0x1105   :  { %v9290_v59 = vmul.f32 -1.442695, %v8444_v28  ;;  %v9291_v50 = vmul.f32 -1.442695, %v8445_v20  ;;  %v9293_v52 = vmul.f32 -1.442695, %v8447_v13 }
0x1106   :  { %11295 = vpow2.f32 %v9288_v14  ;;  %v9294_v12 = vmul.f32 -1.442695, %v8448_v33  ;;  %v9295_v56 = vmul.f32 -1.442695, %v8449_v15  ;;  %v8506_v3 = vrot.slane %v8442_v24, 3 }
0x1107   :  { %11297 = vpow2.f32 %v9289_v53  ;;  %v8507_v11 = vrot.slane %v8443_v32, 3  ;;  %v8508_v29 = vrot.slane %v8444_v28, 3  ;;  %v8509_v57 = vrot.slane %v8445_v20, 3 }
0x1108   :  { %11299 = vpow2.f32 %v9290_v59  ;;  %v8510_v49 = vrot.slane %v8446_v22, 3  ;;  %v8511_v58 = vrot.slane %v8447_v13, 3  ;;  %v8512_v60 = vrot.slane %v8448_v33, 3 }
0x1109   :  { %11301 = vpow2.f32 %v9291_v50  ;;  %v8513_v48 = vrot.slane %v8449_v15, 3 }
0x110a   :  { %11303 = vpow2.f32 %v9292_v41 }
0x110b   :  { %11305 = vpow2.f32 %v9293_v52 }
0x110c   :  { %11307 = vpow2.f32 %v9294_v12 }
0x110d   :  { %11309 = vpow2.f32 %v9295_v56 }
0x110e   :  { %11311 = vtanh.f32 %v8506_v3 }
0x110f   :  { %11313 = vtanh.f32 %v8507_v11 }
0x1110   :  { %v11296_v19 = vpop.eup %11295  ;;  %11315 = vtanh.f32 %v8508_v29 }
0x1111   :  { %v11298_v4 = vpop.eup %11297  ;;  %v8474_v27 = vadd.f32 1.0, %v11296_v19  ;;  %11317 = vtanh.f32 %v8509_v57 }
0x1112   :  { %v11300_v25 = vpop.eup %11299  ;;  %v8475_v47 = vadd.f32 1.0, %v11298_v4  ;;  %11319 = vtanh.f32 %v8510_v49 }
0x1113   :  { %v11302_v30 = vpop.eup %11301  ;;  %v8476_v44 = vadd.f32 1.0, %v11300_v25  ;;  %11321 = vrcp.f32 %v8474_v27 }
0x1114   :  { %v11304_v21 = vpop.eup %11303  ;;  %v8477_v1 = vadd.f32 1.0, %v11302_v30  ;;  %11323 = vrcp.f32 %v8475_v47 }
0x1115   :  { %v11306_v61 = vpop.eup %11305  ;;  %v8478_v40 = vadd.f32 1.0, %v11304_v21  ;;  %11325 = vrcp.f32 %v8476_v44 }
0x1116   :  { %v11308_v45 = vpop.eup %11307  ;;  %v8479_v17 = vadd.f32 1.0, %v11306_v61  ;;  %11327 = vrcp.f32 %v8477_v1 }
0x1117   :  { %v11310_v43 = vpop.eup %11309  ;;  %v8480_v10 = vadd.f32 1.0, %v11308_v45  ;;  %11329 = vrcp.f32 %v8478_v40 }
0x1118   :  { %v11312_v55 = vpop.eup %11311  ;;  %v8481_v36 = vadd.f32 1.0, %v11310_v43  ;;  %11331 = vrcp.f32 %v8479_v17 }
0x1119   :  { %v11314_v51 = vpop.eup %11313  ;;  %11333 = vrcp.f32 %v8480_v10 }
0x111a   :  { %v11316_v26 = vpop.eup %11315  ;;  %11335 = vrcp.f32 %v8481_v36 }
0x111b   :  { %v11318_v42 = vpop.eup %11317  ;;  %11337 = vtanh.f32 %v8511_v58 }
0x111c   :  { %v11320_v63 = vpop.eup %11319  ;;  %11339 = vtanh.f32 %v8512_v60 }
0x111d   :  { %v11322_v18 = vpop.eup %11321  ;;  %11341 = vtanh.f32 %v8513_v48 }
0x111e   :  { %v11324_v39 = vpop.eup %11323  ;;  %v8538_v5 = vrot.slane %v11322_v18, 1  ;;  %v8562_v24 = vmul.f32 %v11322_v18, %v11312_v55  ;;  %v8586_v30 = vrot.slane %v11322_v18, 2 }
0x111f   :  { %v11326_v2 = vpop.eup %11325  ;;  %v8539_v35 = vrot.slane %v11324_v39, 1  ;;  %v8563_v0 = vmul.f32 %v11324_v39, %v11314_v51  ;;  %v8587_v44 = vrot.slane %v11324_v39, 2 }
0x1120   :  { %v11328_v7 = vpop.eup %11327  ;;  %v8540_v37 = vrot.slane %v11326_v2, 1  ;;  %v8554_v54 = vmul.f32 %v8538_v5, %v13758_v62  ;;  %v8564_v28 = vmul.f32 %v11326_v2, %v11316_v26  ;;  %v8588_v1 = vrot.slane %v11326_v2, 2 }
0x1121   :  { %v11330_v32 = vpop.eup %11329  ;;  %v8541_v22 = vrot.slane %v11328_v7, 1  ;;  %v8555_v31 = vmul.f32 %v8539_v35, %v13762_v9  ;;  %v8565_v14 = vmul.f32 %v11328_v7, %v11318_v42  ;;  %v8589_v45 = vrot.slane %v11328_v7, 2 }
0x1122   :  { %v13862_v20 = vpop.eup %11331  ;;  %v8542_v13 = vrot.slane %v11330_v32, 1  ;;  %v8556_v33 = vmul.f32 %v8540_v37, %v13765_v23  ;;  %v13865_v53 = vadd.f32 %v8562_v24, %v8554_v54  ;;  %v8566_v50 = vmul.f32 %v11330_v32, %v11320_v63 }
0x1123   :  { %v11334_v15 = vpop.eup %11333  ;;  %v8543_v59 = vrot.slane %v13862_v20, 1  ;;  %v8557_v62 = vmul.f32 %v8541_v22, %v13769_v46  ;;  %v13869_v41 = vadd.f32 %v8563_v0, %v8555_v31  ;;  %v8590_v10 = vrot.slane %v11330_v32, 2 }
0x1124   :  { %v11336_v52 = vpop.eup %11335  ;;  %v8544_v9 = vrot.slane %v11334_v15, 1  ;;  %v8558_v12 = vmul.f32 %v8542_v13, %v13774_v38  ;;  %v13872_v56 = vadd.f32 %v8564_v28, %v8556_v33  ;;  %11343 = vtanh.f32 %v13865_v53 }
0x1125   :  { %v11338_v23 = vpop.eup %11337  ;;  %v8545_v3 = vrot.slane %v11336_v52, 1  ;;  %v8559_v11 = vmul.f32 %v8543_v59, %v13779_v34  ;;  %v13876_v29 = vadd.f32 %v8565_v14, %v8557_v62  ;;  %11345 = vtanh.f32 %v13869_v41 }
0x1126   :  { %v11340_v46 = vpop.eup %11339  ;;  %v8560_v57 = vmul.f32 %v8544_v9, %v13782_v6  ;;  %v8567_v49 = vmul.f32 %v11338_v23, %v13862_v20  ;;  %v13881_v19 = vadd.f32 %v8566_v50, %v8558_v12  ;;  %11347 = vtanh.f32 %v13872_v56 }
0x1127   :  { %v11342_v38 = vpop.eup %11341  ;;  %v8561_v4 = vmul.f32 %v8545_v3, %v13784_v16  ;;  %v8568_v27 = vmul.f32 %v11340_v46, %v11334_v15  ;;  %11349 = vtanh.f32 %v13876_v29  ;;  %v8591_v51 = vrot.slane %v13862_v20, 2 }
0x1128   :  { %v8569_v34 = vmul.f32 %v11342_v38, %v11336_v52  ;;  %v13886_v25 = vadd.f32 %v8567_v49, %v8559_v11  ;;  %11351 = vtanh.f32 %v13881_v19  ;;  %v8592_v42 = vrot.slane %v11334_v15, 2 }
0x1129   :  { %v13889_v47 = vadd.f32 %v8568_v27, %v8560_v57  ;;  %v8593_v39 = vrot.slane %v11336_v52, 2 }
0x112a   :  { %v13891_v6 = vadd.f32 %v8569_v34, %v8561_v4  ;;  %11353 = vtanh.f32 %v13886_v25 }
0x112b   :  { %11355 = vtanh.f32 %v13889_v47 }
0x112c   :  { %11357 = vtanh.f32 %v13891_v6 }
0x112e   :  { %v11344_v16 = vpop.eup %11343 }
0x112f   :  { %v11346_v21 = vpop.eup %11345  ;;  %v8602_v61 = vmul.f32 %v11344_v16, %v8586_v30 }
0x1130   :  { %v11348_v40 = vpop.eup %11347  ;;  %v8603_v17 = vmul.f32 %v11346_v21, %v8587_v44  ;;  %v8618_v44 = vld [vmem:[#allocation2 + $0x7] ss:$8 sm:$0xf] }
0x1131   :  { %v11350_v43 = vpop.eup %11349  ;;  %v8604_v58 = vmul.f32 %v11348_v40, %v8588_v1  ;;  %8610 = vst [vmem:[%s13975_s8 + $0x6] sm:$0x1] %v8602_v61  ;;  %v8619_v21 = vld [vmem:[#allocation2 + $0x27] ss:$8 sm:$0xf] }
0x1132   :  { %v11352_v55 = vpop.eup %11351  ;;  %v8605_v36 = vmul.f32 %v11350_v43, %v8589_v45  ;;  %8611 = vst [vmem:[%s13975_s8 + $0xe] sm:$0x1] %v8603_v17  ;;  %v8698_v60 = vcombine.low %v8602_v61, %v8603_v17  ;;  %v8620_v1 = vld [vmem:[#allocation2 + $0x47] ss:$8 sm:$0xf] }
0x1133   :  { %v8606_v48 = vmul.f32 %v11352_v55, %v8590_v10  ;;  %8612 = vst [vmem:[%s13975_s8 + $0x16] sm:$0x1] %v8604_v58  ;;  %v8622_v61 = vld [vmem:[#allocation2 + $0x87] ss:$8 sm:$0xf] }
0x1134   :  { %v11354_v26 = vpop.eup %11353  ;;  %8613 = vst [vmem:[%s13975_s8 + $0x1e] sm:$0x1] %v8605_v36  ;;  %v8699_v63 = vcombine.low %v8604_v58, %v8605_v36  ;;  %v8708_v7 = vrot.slane %v8698_v60, %v11833_v8  ;;  %v8621_v10 = vld [vmem:[#allocation2 + $0x67] ss:$8 sm:$0xf] }
0x1135   :  { %v11356_v18 = vpop.eup %11355  ;;  %v8607_v5 = vmul.f32 %v11354_v26, %v8591_v51  ;;  %8614 = vst [vmem:[%s13975_s8 + $0x26] sm:$0x1] %v8606_v48  ;;  %v8623_v58 = vld [vmem:[#allocation2 + $0xa7] ss:$8 sm:$0xf] }
0x1136   :  { %v11358_v2 = vpop.eup %11357  ;;  %v8608_v35 = vmul.f32 %v11356_v18, %v8592_v42  ;;  %v8715_v37 = vrot.slane %v8699_v63, %v11833_v8  ;;  %v8624_v51 = vld [vmem:[#allocation2 + $0xc7] ss:$8 sm:$0xf] }
0x1137   :  { %v8609_v54 = vmul.f32 %v11358_v2, %v8593_v39  ;;  %8615 = vst [vmem:[%s13975_s8 + $0x2e] sm:$0x1] %v8607_v5  ;;  %v8700_v24 = vcombine.low %v8606_v48, %v8607_v5  ;;  %v8625_v48 = vld [vmem:[#allocation2 + $0xe7] ss:$8 sm:$0xf] }
0x1138   :  { %8616 = vst [vmem:[%s13975_s8 + $0x36] sm:$0x1] %v8608_v35  ;;  %v8730_v32 = vcombine.low %v8708_v7, %v8715_v37 }
0x1139   :  { %8617 = vst [vmem:[%s13975_s8 + $0x3e] sm:$0x1] %v8609_v54  ;;  %v8701_v22 = vcombine.low %v8608_v35, %v8609_v54  ;;  %v8722_v31 = vrot.slane %v8700_v24, %v11833_v8 }
0x113a   :  { %v8738_v20 = vrot.slane %v8730_v32, %v11833_v8 }
0x113b   :  { %v8729_v0 = vrot.slane %v8701_v22, %v11833_v8 }
0x113d   :  { %v8731_v28 = vcombine.low %v8722_v31, %v8729_v0 }
0x113f   :  { %v8745_v13 = vrot.slane %v8731_v28, %v11833_v8 }
0x1141   :  { %v8746_v33 = vcombine.low %v8738_v20, %v8745_v13 }
0x1143   :  { %8813 = vmatmul.mubr.f32.vlgmr.msra.gmra.mrb[62].mxu0 %v8746_v33  ;;  %8884 = vmatmul.mubr.f32.vlgmr.msra.gmra.mrb[62].mxu1 %v8746_v33 }
0x1216   :  { %v8814_v14 = vpop.f32.mrb[62].mxu0  ;;  %v8885_v15 = vpop.f32.mrb[62].mxu1 }
0x1217   :  { %v8816_v59 = vpop.f32.mrb[63].mxu0  ;;  %v8887_v62 = vpop.f32.mrb[63].mxu1 }
0x1218   :  { %v8894_v50 = vcombine.low %v8814_v14, %v8816_v59  ;;  %v8895_v52 = vcombine.high %v8814_v14, %v8816_v59  ;;  %v8896_v9 = vcombine.low %v8885_v15, %v8887_v62  ;;  %v8897_v12 = vcombine.high %v8885_v15, %v8887_v62 }
0x121a   :  { %v8904_v23 = vrot.slane %v8894_v50, %v11833_v8  ;;  %v8911_v3 = vrot.slane %v8895_v52, %v11833_v8  ;;  %v8918_v11 = vrot.slane %v8896_v9, %v11833_v8  ;;  %v8925_v46 = vrot.slane %v8897_v12, %v11833_v8 }
0x121c   :  { %v8926_v57 = vcombine.low %v8904_v23, %v8918_v11  ;;  %v8927_v49 = vcombine.high %v8904_v23, %v8918_v11  ;;  %v8928_v38 = vcombine.low %v8911_v3, %v8925_v46  ;;  %v8929_v4 = vcombine.high %v8911_v3, %v8925_v46 }
0x121e   :  { %v8936_v27 = vrot.slane %v8926_v57, %v11833_v8  ;;  %v8943_v34 = vrot.slane %v8928_v38, %v11833_v8  ;;  %v8950_v30 = vrot.slane %v8927_v49, %v11833_v8  ;;  %v8957_v16 = vrot.slane %v8929_v4, %v11833_v8 }
0x1220   :  { %v8958_v40 = vcombine.high %v8936_v27, %v8936_v27  ;;  %v8959_v45 = vcombine.high %v8943_v34, %v8943_v34  ;;  %v8960_v17 = vcombine.high %v8950_v30, %v8950_v30  ;;  %v8961_v43 = vcombine.high %v8957_v16, %v8957_v16 }
0x1221   :  { %v8970_v55 = vadd.f32 %v8936_v27, %v8618_v44  ;;  %v8971_v36 = vadd.f32 %v8950_v30, %v8619_v21  ;;  %v8974_v60 = vadd.f32 %v8943_v34, %v8622_v61  ;;  %v8975_v63 = vadd.f32 %v8957_v16, %v8623_v58 }
0x1222   :  { %v8972_v26 = vadd.f32 %v8958_v40, %v8620_v1  ;;  %v8973_v42 = vadd.f32 %v8960_v17, %v8621_v10  ;;  %v8976_v18 = vadd.f32 %v8959_v45, %v8624_v51  ;;  %v8977_v5 = vadd.f32 %v8961_v43, %v8625_v48 }
0x1223   :  { %v9296_v8 = vmul.f32 -1.442695, %v8970_v55  ;;  %v9297_v39 = vmul.f32 -1.442695, %v8971_v36  ;;  %v9300_v7 = vmul.f32 -1.442695, %v8974_v60 }
0x1224   :  { %v9298_v2 = vmul.f32 -1.442695, %v8972_v26  ;;  %v9299_v35 = vmul.f32 -1.442695, %v8973_v42  ;;  %v9301_v37 = vmul.f32 -1.442695, %v8975_v63 }
0x1225   :  { %11359 = vpow2.f32 %v9296_v8  ;;  %v9302_v54 = vmul.f32 -1.442695, %v8976_v18  ;;  %v9303_v24 = vmul.f32 -1.442695, %v8977_v5  ;;  %v9034_v32 = vrot.slane %v8970_v55, 3 }
0x1226   :  { %11361 = vpow2.f32 %v9297_v39  ;;  %v9035_v22 = vrot.slane %v8971_v36, 3  ;;  %v9036_v31 = vrot.slane %v8972_v26, 3  ;;  %v9037_v0 = vrot.slane %v8973_v42, 3 }
0x1227   :  { %11363 = vpow2.f32 %v9298_v2  ;;  %v9038_v28 = vrot.slane %v8974_v60, 3  ;;  %v9039_v57 = vrot.slane %v8975_v63, 3  ;;  %v9040_v4 = vrot.slane %v8976_v18, 3 }
0x1228   :  { %11365 = vpow2.f32 %v9299_v35  ;;  %v9041_v34 = vrot.slane %v8977_v5, 3 }
0x1229   :  { %11367 = vpow2.f32 %v9300_v7 }
0x122a   :  { %11369 = vpow2.f32 %v9301_v37 }
0x122b   :  { %11371 = vpow2.f32 %v9302_v54 }
0x122c   :  { %11373 = vpow2.f32 %v9303_v24 }
0x122d   :  { %11375 = vtanh.f32 %v9034_v32 }
0x122e   :  { %11377 = vtanh.f32 %v9035_v22 }
0x122f   :  { %v11360_v20 = vpop.eup %11359  ;;  %11379 = vtanh.f32 %v9036_v31 }
0x1230   :  { %v11362_v13 = vpop.eup %11361  ;;  %v9002_v33 = vadd.f32 1.0, %v11360_v20  ;;  %11381 = vtanh.f32 %v9037_v0 }
0x1231   :  { %v11364_v14 = vpop.eup %11363  ;;  %v9003_v15 = vadd.f32 1.0, %v11362_v13  ;;  %11383 = vtanh.f32 %v9038_v28 }
0x1232   :  { %v11366_v59 = vpop.eup %11365  ;;  %v9004_v62 = vadd.f32 1.0, %v11364_v14  ;;  %11385 = vrcp.f32 %v9002_v33 }
0x1233   :  { %v11368_v50 = vpop.eup %11367  ;;  %v9005_v52 = vadd.f32 1.0, %v11366_v59  ;;  %11387 = vrcp.f32 %v9003_v15 }
0x1234   :  { %v11370_v9 = vpop.eup %11369  ;;  %v9006_v12 = vadd.f32 1.0, %v11368_v50  ;;  %11389 = vrcp.f32 %v9004_v62 }
0x1235   :  { %v11372_v23 = vpop.eup %11371  ;;  %v9007_v3 = vadd.f32 1.0, %v11370_v9  ;;  %11391 = vrcp.f32 %v9005_v52 }
0x1236   :  { %v11374_v11 = vpop.eup %11373  ;;  %v9008_v46 = vadd.f32 1.0, %v11372_v23  ;;  %11393 = vrcp.f32 %v9006_v12 }
0x1237   :  { %v11376_v49 = vpop.eup %11375  ;;  %v9009_v38 = vadd.f32 1.0, %v11374_v11  ;;  %11395 = vrcp.f32 %v9007_v3 }
0x1238   :  { %v11378_v27 = vpop.eup %11377  ;;  %11397 = vrcp.f32 %v9008_v46 }
0x1239   :  { %v11380_v30 = vpop.eup %11379  ;;  %11399 = vrcp.f32 %v9009_v38 }
0x123a   :  { %v11382_v16 = vpop.eup %11381  ;;  %11401 = vtanh.f32 %v9039_v57 }
0x123b   :  { %v11384_v44 = vpop.eup %11383  ;;  %11403 = vtanh.f32 %v9040_v4 }
0x123c   :  { %v11386_v21 = vpop.eup %11385  ;;  %11405 = vtanh.f32 %v9041_v34 }
0x123d   :  { %v11388_v1 = vpop.eup %11387  ;;  %v9066_v61 = vrot.slane %v11386_v21, 1  ;;  %v9090_v58 = vmul.f32 %v11386_v21, %v11376_v49 }
0x123e   :  { %v11390_v40 = vpop.eup %11389  ;;  %v9067_v45 = vrot.slane %v11388_v1, 1  ;;  %v9091_v51 = vmul.f32 %v11388_v1, %v11378_v27  ;;  %v9115_v50 = vrot.slane %v11388_v1, 2 }
0x123f   :  { %v11392_v17 = vpop.eup %11391  ;;  %v9068_v43 = vrot.slane %v11390_v40, 1  ;;  %v9082_v10 = vmul.f32 %v9066_v61, %v13865_v53  ;;  %v9092_v48 = vmul.f32 %v11390_v40, %v11380_v30  ;;  %v9116_v52 = vrot.slane %v11390_v40, 2 }
0x1240   :  { %v11394_v55 = vpop.eup %11393  ;;  %v9069_v36 = vrot.slane %v11392_v17, 1  ;;  %v9083_v60 = vmul.f32 %v9067_v45, %v13869_v41  ;;  %v9093_v18 = vmul.f32 %v11392_v17, %v11382_v16  ;;  %v9117_v23 = vrot.slane %v11392_v17, 2 }
0x1241   :  { %v11396_v26 = vpop.eup %11395  ;;  %v9070_v42 = vrot.slane %v11394_v55, 1  ;;  %v9084_v63 = vmul.f32 %v9068_v43, %v13872_v56  ;;  %v9098_v8 = vadd.f32 %v9090_v58, %v9082_v10  ;;  %v9094_v35 = vmul.f32 %v11394_v55, %v11384_v44 }
0x1242   :  { %v11398_v39 = vpop.eup %11397  ;;  %v9071_v5 = vrot.slane %v11396_v26, 1  ;;  %v9085_v2 = vmul.f32 %v9069_v36, %v13876_v29  ;;  %v9099_v7 = vadd.f32 %v9091_v51, %v9083_v60  ;;  %v9118_v11 = vrot.slane %v11394_v55, 2 }
0x1243   :  { %v11400_v53 = vpop.eup %11399  ;;  %v9072_v37 = vrot.slane %v11398_v39, 1  ;;  %v9086_v54 = vmul.f32 %v9070_v42, %v13881_v19  ;;  %v9100_v24 = vadd.f32 %v9092_v48, %v9084_v63  ;;  %11407 = vtanh.f32 %v9098_v8 }
0x1244   :  { %v11402_v41 = vpop.eup %11401  ;;  %v9073_v32 = vrot.slane %v11400_v53, 1  ;;  %v9087_v22 = vmul.f32 %v9071_v5, %v13886_v25  ;;  %v9101_v31 = vadd.f32 %v9093_v18, %v9085_v2  ;;  %11409 = vtanh.f32 %v9099_v7 }
0x1245   :  { %v11404_v56 = vpop.eup %11403  ;;  %v9088_v0 = vmul.f32 %v9072_v37, %v13889_v47  ;;  %v9095_v28 = vmul.f32 %v11402_v41, %v11396_v26  ;;  %v9102_v20 = vadd.f32 %v9094_v35, %v9086_v54  ;;  %11411 = vtanh.f32 %v9100_v24 }
0x1246   :  { %v11406_v29 = vpop.eup %11405  ;;  %v9089_v13 = vmul.f32 %v9073_v32, %v13891_v6  ;;  %v9096_v33 = vmul.f32 %v11404_v56, %v11398_v39  ;;  %11413 = vtanh.f32 %v9101_v31  ;;  %v9114_v25 = vrot.slane %v11386_v21, 2 }
0x1247   :  { %v9097_v19 = vmul.f32 %v11406_v29, %v11400_v53  ;;  %v9103_v14 = vadd.f32 %v9095_v28, %v9087_v22  ;;  %11415 = vtanh.f32 %v9102_v20  ;;  %v9119_v38 = vrot.slane %v11396_v26, 2 }
0x1248   :  { %v9104_v15 = vadd.f32 %v9096_v33, %v9088_v0  ;;  %v9120_v34 = vrot.slane %v11398_v39, 2  ;;  %v9121_v16 = vrot.slane %v11400_v53, 2 }
0x1249   :  { %v9105_v59 = vadd.f32 %v9097_v19, %v9089_v13  ;;  %11417 = vtanh.f32 %v9103_v14 }
0x124a   :  { %11419 = vtanh.f32 %v9104_v15 }
0x124b   :  { %11421 = vtanh.f32 %v9105_v59 }
0x124d   :  { %v11408_v62 = vpop.eup %11407 }
0x124e   :  { %v11410_v47 = vpop.eup %11409  ;;  %v9130_v9 = vmul.f32 %v11408_v62, %v9114_v25 }
0x124f   :  { %v11412_v12 = vpop.eup %11411  ;;  %v9131_v3 = vmul.f32 %v11410_v47, %v9115_v50 }
0x1250   :  { %v11414_v6 = vpop.eup %11413  ;;  %v9132_v46 = vmul.f32 %v11412_v12, %v9116_v52  ;;  %9138 = vst [vmem:[%s13975_s8 + $0x7] sm:$0x1] %v9130_v9 }
0x1251   :  { %v11416_v57 = vpop.eup %11415  ;;  %v9133_v49 = vmul.f32 %v11414_v6, %v9117_v23  ;;  %9139 = vst [vmem:[%s13975_s8 + $0xf] sm:$0x1] %v9131_v3 }
0x1252   :  { %v9134_v4 = vmul.f32 %v11416_v57, %v9118_v11  ;;  %9140 = vst [vmem:[%s13975_s8 + $0x17] sm:$0x1] %v9132_v46 }
0x1253   :  { %v11418_v27 = vpop.eup %11417  ;;  %9141 = vst [vmem:[%s13975_s8 + $0x1f] sm:$0x1] %v9133_v49 }
0x1254   :  { %v11420_v30 = vpop.eup %11419  ;;  %v9135_v44 = vmul.f32 %v11418_v27, %v9119_v38  ;;  %9142 = vst [vmem:[%s13975_s8 + $0x27] sm:$0x1] %v9134_v4 }
0x1255   :  { %v11422_v21 = vpop.eup %11421  ;;  %v9136_v1 = vmul.f32 %v11420_v30, %v9120_v34 }
0x1256   :  { %v9137_v61 = vmul.f32 %v11422_v21, %v9121_v16  ;;  %9143 = vst [vmem:[%s13975_s8 + $0x2f] sm:$0x1] %v9135_v44 }
0x1257   :  { %9144 = vst [vmem:[%s13975_s8 + $0x37] sm:$0x1] %v9136_v1 }
0x1258   :  { %9145 = vst [vmem:[%s13975_s8 + $0x3f] sm:$0x1] %v9137_v61 }
0x1259   :  { %9154 = vsyncpa [#allocation4], 1 }
0x125a   :  { %9155 = vsyncpa [#allocation6], 1 }

</bundles_post_ra>
